<compile_context>
chip_gen: v5e
topology: v5e:2x2
jax: 0.10.0
libtpu: 0.0.40
codegen_flags: <defaults>
</compile_context>

<pallas_src>
import functools

import jax
import jax.numpy as jnp
from jax import lax
from jax.experimental import pallas as pl
from jax.experimental.pallas import tpu as pltpu

BOTTLENECK_WIDTH = 128
EPS = 1e-5  # PyTorch InstanceNorm2d default eps


# ----------------------------------------------------------------------------
# Fused Pallas kernel: per-sample
#   conv1x1 -> IN -> ReLU -> conv3x3(pad=1) -> IN -> ReLU
# ----------------------------------------------------------------------------
def _fused_bottleneck_kernel(x_ref, w1_ref, g1_ref, b1_ref,
                             w2_ref, g2_ref, b2_ref,
                             o_ref, ybuf, *, H, W, pad):
    HW = H * W
    RP = o_ref.shape[-1]

    # Scratch persists across grid steps -> zero the vertical-halo margins once.
    @pl.when(pl.program_id(0) == 0)
    def _():
        zeros = jnp.zeros((pad, 3 * RP), ybuf.dtype)
        ybuf[pl.ds(0, pad), :] = zeros
        ybuf[pl.ds(pad + HW, pad), :] = zeros

    # ------------- stage 1: conv1x1 -> InstanceNorm -> ReLU -----------------
    x = x_ref[0].astype(jnp.float32)                                  # (HW, C)
    y = jnp.dot(x, w1_ref[...], preferred_element_type=jnp.float32)   # (HW, RP)

    mean1 = jnp.mean(y, axis=0, keepdims=True)
    var1 = jnp.maximum(jnp.mean(y * y, axis=0, keepdims=True) - mean1 * mean1, 0.0)
    scale1 = lax.rsqrt(var1 + EPS) * g1_ref[...]
    shift1 = b1_ref[...] - scale1 * mean1
    # Write ReLU(IN(y)) directly into the dx=0 lane group of the scratch (bf16).
    ybuf[pl.ds(pad, HW), pl.ds(RP, RP)] = (
        jnp.maximum(y * scale1 + shift1, 0.0).astype(ybuf.dtype))

    # --- build dx = -1 / +1 pre-shifted, column-masked copies (one pass each) ---
    # Margin rows around the center lane group are zero, so the row-boundary
    # reads below pick up zeros before being masked anyway.
    col = lax.broadcasted_iota(jnp.int32, (HW, RP), 0) % W
    left_src = ybuf[pl.ds(pad - 1, HW), pl.ds(RP, RP)]       # y1[j-1] (+ zero halo)
    right_src = ybuf[pl.ds(pad + 1, HW), pl.ds(RP, RP)]      # y1[j+1] (+ zero halo)
    ybuf[pl.ds(pad, HW), pl.ds(0, RP)] = (
        jnp.where(col != 0, left_src, 0).astype(ybuf.dtype))
    ybuf[pl.ds(pad, HW), pl.ds(2 * RP, RP)] = (
        jnp.where(col != W - 1, right_src, 0).astype(ybuf.dtype))

    # ----- stage 2: conv3x3 (pad=1) as 3 bf16 matmuls with K = 3*RP (per dy) -----
    acc = None
    for t, dy in enumerate((-1, 0, 1)):
        lhs = ybuf[pl.ds(pad + dy * W, HW), :]                # (HW, 3*RP) bf16
        p = jnp.dot(lhs, w2_ref[t], preferred_element_type=jnp.float32)
        acc = p if acc is None else acc + p                   # (HW, RP) f32

    # --------------- stage 2 epilogue: InstanceNorm -> ReLU ------------------
    mean2 = jnp.mean(acc, axis=0, keepdims=True)
    var2 = jnp.maximum(jnp.mean(acc * acc, axis=0, keepdims=True) - mean2 * mean2, 0.0)
    scale2 = lax.rsqrt(var2 + EPS) * g2_ref[...]
    shift2 = b2_ref[...] - scale2 * mean2
    o_ref[0] = jnp.maximum(acc * scale2 + shift2, 0.0).astype(o_ref.dtype)


# ----------------------------------------------------------------------------
# VMEM budget estimate (per-sample residency, clamped to device budget)
# ----------------------------------------------------------------------------
def _vmem_limit_bytes(HW, pad, C, rp):
    ybuf = (HW + 2 * pad) * 3 * rp * 2                  # bf16 shifted scratch
    io = 2 * HW * rp * 4 + 2 * HW * max(C, 1) * 4       # double-buffered out + in
    tmps = 4 * HW * rp * 4                              # live f32 temporaries
    weights = 2 * (3 * 3 * rp * rp * 2 + C * rp * 4 + 4 * rp * 4)
    est = ybuf + io + tmps + weights + (4 << 20)
    try:
        cap = getattr(pltpu.get_tpu_info(), "vmem_capacity_bytes", 128 << 20)
    except Exception:
        cap = 128 << 20
    return int(min(max(est, 32 << 20), int(cap * 0.8), 100 << 20))


# ----------------------------------------------------------------------------
# Module forward (wrapper)
# ----------------------------------------------------------------------------
def bottleneck_shared(x_nchw, params):
    N, C, H, W = x_nchw.shape
    rp = BOTTLENECK_WIDTH
    HW = H * W
    pad = -(-W // 8) * 8          # vertical halo margin >= W, sublane multiple
    # NOTE: row slices at pad + dy*W are sublane-aligned when W % 8 == 0;
    # other W values stay correct but pay a relayout on two of the slices.

    # NCHW -> NHWC -> (N, HW, C)
    x = jnp.transpose(x_nchw, (0, 2, 3, 1)).reshape(N, HW, C).astype(jnp.float32)

    # conv1x1 weight (RP, C, 1, 1) -> (C, RP), kept f32 (K = C is tiny here).
    w1_mat = jnp.transpose(params["w1"].reshape(rp, C), (1, 0))
    # conv3x3 weight (RP, RP, 3, 3) -> (kH, kW, Cin, Cout) -> per-dy K-concat
    # (3, 3*RP, RP) in bf16, K ordering [dx=-1 | dx=0 | dx=+1] x Cin to match
    # the lane-group ordering of the shifted y1 scratch.
    w2_cat = (jnp.transpose(params["w2"], (2, 3, 1, 0))
              .reshape(3, 3 * rp, rp).astype(jnp.bfloat16))

    kernel = functools.partial(_fused_bottleneck_kernel, H=H, W=W, pad=pad)

    y = pl.pallas_call(
        kernel,
        out_shape=jax.ShapeDtypeStruct((N, HW, rp), jnp.float32),
        grid=(N,),
        in_specs=[
            pl.BlockSpec((1, HW, C), lambda n: (n, 0, 0)),        # x (per sample)
            pl.BlockSpec((C, rp), lambda n: (0, 0)),              # w1 (grid-invariant)
            pl.BlockSpec((1, rp), lambda n: (0, 0)),              # gamma1
            pl.BlockSpec((1, rp), lambda n: (0, 0)),              # beta1
            pl.BlockSpec((3, 3 * rp, rp), lambda n: (0, 0, 0)),   # w2 K-concat (bf16)
            pl.BlockSpec((1, rp), lambda n: (0, 0)),              # gamma2
            pl.BlockSpec((1, rp), lambda n: (0, 0)),              # beta2
        ],
        out_specs=pl.BlockSpec((1, HW, rp), lambda n: (n, 0, 0)),
        scratch_shapes=[pltpu.VMEM((HW + 2 * pad, 3 * rp), jnp.bfloat16)],
        compiler_params=pltpu.CompilerParams(
            dimension_semantics=("parallel",),
            vmem_limit_bytes=_vmem_limit_bytes(HW, pad, C, rp),
        ),
    )(x, w1_mat,
      params["g1"].reshape(1, rp), params["b1"].reshape(1, rp),
      w2_cat,
      params["g2"].reshape(1, rp), params["b2"].reshape(1, rp))

    # (N, HW, RP) -> NCHW
    return jnp.transpose(y.reshape(N, H, W, rp), (0, 3, 1, 2))


# ----------------------------------------------------------------------------
# Pure-JAX reference for correctness checking
# ----------------------------------------------------------------------------
def _instance_norm_ref(x_nchw, g, b):
    mean = jnp.mean(x_nchw, axis=(2, 3), keepdims=True)
    var = jnp.mean(jnp.square(x_nchw - mean), axis=(2, 3), keepdims=True)
    xn = (x_nchw - mean) * lax.rsqrt(var + EPS)
    return xn * g.reshape(1, -1, 1, 1) + b.reshape(1, -1, 1, 1)


def bottleneck_shared_ref(x_nchw, params):
    dn = ("NCHW", "OIHW", "NCHW")
    y = lax.conv_general_dilated(x_nchw, params["w1"], (1, 1), "VALID",
                                 dimension_numbers=dn)
    y = jnp.maximum(_instance_norm_ref(y, params["g1"], params["b1"]), 0.0)
    y = lax.conv_general_dilated(y, params["w2"], (1, 1), ((1, 1), (1, 1)),
                                 dimension_numbers=dn)
    y = jnp.maximum(_instance_norm_ref(y, params["g2"], params["b2"]), 0.0)
    return y


# ----------------------------------------------------------------------------
if __name__ == "__main__":
    N, C, H, W = 2, 4, 16, 16
    rp = BOTTLENECK_WIDTH

    key = jax.random.PRNGKey(0)
    kx, k1, k2, kg1, kb1, kg2, kb2 = jax.random.split(key, 7)

    x = jax.random.normal(kx, (N, C, H, W), dtype=jnp.float32)

    params = {
        # conv1x1: (out=rp, in=C, 1, 1), no bias
        "w1": 0.1 * jax.random.normal(k1, (rp, C, 1, 1), dtype=jnp.float32),
        # conv3x3: (out=rp, in=rp, 3, 3), no bias
        "w2": 0.05 * jax.random.normal(k2, (rp, rp, 3, 3), dtype=jnp.float32),
        # InstanceNorm affine params
        "g1": 1.0 + 0.1 * jax.random.normal(kg1, (rp,), dtype=jnp.float32),
        "b1": 0.1 * jax.random.normal(kb1, (rp,), dtype=jnp.float32),
        "g2": 1.0 + 0.1 * jax.random.normal(kg2, (rp,), dtype=jnp.float32),
        "b2": 0.1 * jax.random.normal(kb2, (rp,), dtype=jnp.float32),
    }

    out = jax.block_until_ready(bottleneck_shared(x, params))
    ref = jax.block_until_ready(bottleneck_shared_ref(x, params))

    assert out.shape == (N, rp, H, W), out.shape
    # Tolerance relaxed vs. the f32 version: stage-2 matmuls run in bf16
    # (f32 accumulation), which the review calls out as acceptable accuracy loss.
    assert jnp.allclose(out, ref, rtol=2e-2, atol=2e-2), (
        float(jnp.max(jnp.abs(out - ref)))
    )
    print("KERNEL_OK")
</pallas_src>

<mosaic_0001>
module attributes {stable_mosaic.version = 11 : i64} {
  func.func @_fused_bottleneck_kernel(%arg0: i32, %arg1: memref<1x256x4xf32, #tpu.memory_space<vmem>>, %arg2: memref<4x128xf32, #tpu.memory_space<vmem>>, %arg3: memref<1x128xf32, #tpu.memory_space<vmem>>, %arg4: memref<1x128xf32, #tpu.memory_space<vmem>>, %arg5: memref<3x384x128xbf16, #tpu.memory_space<vmem>>, %arg6: memref<1x128xf32, #tpu.memory_space<vmem>>, %arg7: memref<1x128xf32, #tpu.memory_space<vmem>>, %arg8: memref<1x256x128xf32, #tpu.memory_space<vmem>>, %arg9: memref<288x384xbf16, #tpu.memory_space<vmem>>) attributes {dimension_semantics = [#tpu.dimension_semantics<parallel>], iteration_bounds = array<i64: 2>, scalar_prefetch = 0 : i64, scratch_operands = 1 : i64, tpu.core_type = #tpu.core_type<tc>, window_params = [{transform_indices = @transform_0, window_bounds = array<i64: 1, 256, 4>}, {pipeline_mode = #tpu.pipeline_mode<synchronous>, transform_indices = @transform_1, window_bounds = array<i64: 4, 128>}, {pipeline_mode = #tpu.pipeline_mode<synchronous>, transform_indices = @transform_2, window_bounds = array<i64: 1, 128>}, {pipeline_mode = #tpu.pipeline_mode<synchronous>, transform_indices = @transform_3, window_bounds = array<i64: 1, 128>}, {pipeline_mode = #tpu.pipeline_mode<synchronous>, transform_indices = @transform_4, window_bounds = array<i64: 3, 384, 128>}, {pipeline_mode = #tpu.pipeline_mode<synchronous>, transform_indices = @transform_5, window_bounds = array<i64: 1, 128>}, {pipeline_mode = #tpu.pipeline_mode<synchronous>, transform_indices = @transform_6, window_bounds = array<i64: 1, 128>}, {transform_indices = @transform_7, window_bounds = array<i64: 1, 256, 128>}]} {
    %c0_i32 = arith.constant 0 : i32
    %0 = arith.cmpi eq, %arg0, %c0_i32 : i32
    %1 = arith.extui %0 : i1 to i32
    %c0_i32_0 = arith.constant 0 : i32
    %2 = arith.cmpi ne, %1, %c0_i32_0 : i32
    scf.if %2 {
      %cst_57 = arith.constant 0.000000e+00 : bf16
      %111 = vector.broadcast %cst_57 : bf16 to vector<16x384xbf16>
      %c0_58 = arith.constant 0 : index
      %c0_59 = arith.constant 0 : index
      %112 = vector.load %arg9[%c0_58, %c0_59] : memref<288x384xbf16, #tpu.memory_space<vmem>>, vector<16x384xbf16>
      tpu.vector_store %arg9[%c0_58, %c0_59], %111 {strides = array<i32>} : memref<288x384xbf16, #tpu.memory_space<vmem>>, vector<16x384xbf16>,
      %c272 = arith.constant 272 : index
      %c0_60 = arith.constant 0 : index
      %113 = vector.load %arg9[%c272, %c0_60] : memref<288x384xbf16, #tpu.memory_space<vmem>>, vector<16x384xbf16>
      tpu.vector_store %arg9[%c272, %c0_60], %111 {strides = array<i32>} : memref<288x384xbf16, #tpu.memory_space<vmem>>, vector<16x384xbf16>,
    } else {
    }
    %c0 = arith.constant 0 : index
    %c0_1 = arith.constant 0 : index
    %c0_2 = arith.constant 0 : index
    %3 = vector.load %arg1[%c0, %c0_1, %c0_2] : memref<1x256x4xf32, #tpu.memory_space<vmem>>, vector<1x256x4xf32>
    %4 = vector.shape_cast %3 : vector<1x256x4xf32> to vector<256x4xf32>
    %c0_3 = arith.constant 0 : index
    %c0_4 = arith.constant 0 : index
    %5 = vector.load %arg2[%c0_3, %c0_4] : memref<4x128xf32, #tpu.memory_space<vmem>>, vector<4x128xf32>
    %cst = arith.constant dense<0.000000e+00> : vector<256x128xf32>
    %6 = tpu.matmul %4, %5, %cst {dimension_numbers = #tpu.dot_dimension_numbers<[1], [0], [0], [1], [0, 0, 1, 1], [], []>} : vector<256x4xf32>, vector<4x128xf32>, vector<256x128xf32> -> vector<256x128xf32>
    %cst_5 = arith.constant dense<0.000000e+00> : vector<128xf32>
    %7 = vector.multi_reduction <add>, %6, %cst_5 [0] : vector<256x128xf32> to vector<128xf32>
    %8 = vector.shape_cast %7 : vector<128xf32> to vector<1x128xf32>
    %cst_6 = arith.constant 2.560000e+02 : f32
    %9 = vector.broadcast %cst_6 : f32 to vector<1x128xf32>
    %10 = arith.divf %8, %9 : vector<1x128xf32>
    %11 = arith.mulf %6, %6 : vector<256x128xf32>
    %cst_7 = arith.constant dense<0.000000e+00> : vector<128xf32>
    %12 = vector.multi_reduction <add>, %11, %cst_7 [0] : vector<256x128xf32> to vector<128xf32>
    %13 = vector.shape_cast %12 : vector<128xf32> to vector<1x128xf32>
    %cst_8 = arith.constant 2.560000e+02 : f32
    %14 = vector.broadcast %cst_8 : f32 to vector<1x128xf32>
    %15 = arith.divf %13, %14 : vector<1x128xf32>
    %16 = arith.mulf %10, %10 : vector<1x128xf32>
    %17 = arith.subf %15, %16 : vector<1x128xf32>
    %cst_9 = arith.constant 0.000000e+00 : f32
    %18 = vector.broadcast %cst_9 : f32 to vector<1x128xf32>
    %19 = arith.maximumf %17, %18 : vector<1x128xf32>
    %cst_10 = arith.constant 9.99999974E-6 : f32
    %20 = vector.broadcast %cst_10 : f32 to vector<1x128xf32>
    %21 = arith.addf %19, %20 : vector<1x128xf32>
    %22 = math.rsqrt %21 : vector<1x128xf32>
    %c0_11 = arith.constant 0 : index
    %c0_12 = arith.constant 0 : index
    %23 = vector.load %arg3[%c0_11, %c0_12] : memref<1x128xf32, #tpu.memory_space<vmem>>, vector<1x128xf32>
    %24 = arith.mulf %22, %23 : vector<1x128xf32>
    %c0_13 = arith.constant 0 : index
    %c0_14 = arith.constant 0 : index
    %25 = vector.load %arg4[%c0_13, %c0_14] : memref<1x128xf32, #tpu.memory_space<vmem>>, vector<1x128xf32>
    %26 = arith.mulf %24, %10 : vector<1x128xf32>
    %27 = arith.subf %25, %26 : vector<1x128xf32>
    %28 = vector.broadcast %24 : vector<1x128xf32> to vector<256x128xf32>
    %29 = arith.mulf %6, %28 : vector<256x128xf32>
    %30 = vector.broadcast %27 : vector<1x128xf32> to vector<256x128xf32>
    %31 = arith.addf %29, %30 : vector<256x128xf32>
    %cst_15 = arith.constant 0.000000e+00 : f32
    %32 = vector.broadcast %cst_15 : f32 to vector<256x128xf32>
    %33 = arith.maximumf %31, %32 : vector<256x128xf32>
    %34 = arith.truncf %33 : vector<256x128xf32> to vector<256x128xbf16>
    %c16 = arith.constant 16 : index
    %c128 = arith.constant 128 : index
    %35 = vector.load %arg9[%c16, %c128] : memref<288x384xbf16, #tpu.memory_space<vmem>>, vector<256x128xbf16>
    tpu.vector_store %arg9[%c16, %c128], %34 {strides = array<i32>} : memref<288x384xbf16, #tpu.memory_space<vmem>>, vector<256x128xbf16>,
    %36 = tpu.iota {dimensions = array<i32: 0>} : vector<256x128xi32>
    %c16_i32 = arith.constant 16 : i32
    %c0_i32_16 = arith.constant 0 : i32
    %37 = arith.cmpi eq, %c16_i32, %c0_i32_16 : i32
    %c1_i32 = arith.constant 1 : i32
    %38 = arith.select %37, %c1_i32, %c16_i32 : i32
    %39 = vector.broadcast %38 : i32 to vector<256x128xi32>
    %40 = arith.remsi %36, %39 : vector<256x128xi32>
    %c0_i32_17 = arith.constant 0 : i32
    %41 = vector.broadcast %c0_i32_17 : i32 to vector<256x128xi32>
    %42 = arith.cmpi ne, %40, %41 : vector<256x128xi32>
    %c0_i32_18 = arith.constant 0 : i32
    %43 = vector.broadcast %c0_i32_18 : i32 to vector<256x128xi32>
    %44 = arith.cmpi slt, %40, %43 : vector<256x128xi32>
    %c0_i32_19 = arith.constant 0 : i32
    %45 = arith.cmpi slt, %38, %c0_i32_19 : i32
    %46 = vector.broadcast %45 : i1 to vector<256x128xi1>
    %47 = vector.broadcast %46 : vector<256x128xi1> to vector<256x128xi1>
    %48 = arith.xori %44, %47 : vector<256x128xi1>
    %49 = arith.andi %48, %42 : vector<256x128xi1>
    %50 = vector.broadcast %38 : i32 to vector<256x128xi32>
    %51 = arith.addi %40, %50 : vector<256x128xi32>
    %52 = arith.select %49, %51, %40 : vector<256x128xi1>, vector<256x128xi32>
    %c15 = arith.constant 15 : index
    %c128_20 = arith.constant 128 : index
    %53 = vector.load %arg9[%c15, %c128_20] : memref<288x384xbf16, #tpu.memory_space<vmem>>, vector<256x128xbf16>
    %c17 = arith.constant 17 : index
    %c128_21 = arith.constant 128 : index
    %54 = vector.load %arg9[%c17, %c128_21] : memref<288x384xbf16, #tpu.memory_space<vmem>>, vector<256x128xbf16>
    %c0_i32_22 = arith.constant 0 : i32
    %55 = vector.broadcast %c0_i32_22 : i32 to vector<256x128xi32>
    %56 = arith.cmpi ne, %52, %55 : vector<256x128xi32>
    %c0_i32_23 = arith.constant 0 : i32
    %57 = arith.sitofp %c0_i32_23 : i32 to bf16
    %58 = vector.broadcast %57 : bf16 to vector<256x128xbf16>
    %59 = arith.select %56, %53, %58 : vector<256x128xi1>, vector<256x128xbf16>
    %c16_24 = arith.constant 16 : index
    %c0_25 = arith.constant 0 : index
    %60 = vector.load %arg9[%c16_24, %c0_25] : memref<288x384xbf16, #tpu.memory_space<vmem>>, vector<256x128xbf16>
    tpu.vector_store %arg9[%c16_24, %c0_25], %59 {strides = array<i32>} : memref<288x384xbf16, #tpu.memory_space<vmem>>, vector<256x128xbf16>,
    %c15_i32 = arith.constant 15 : i32
    %61 = vector.broadcast %c15_i32 : i32 to vector<256x128xi32>
    %62 = arith.cmpi ne, %52, %61 : vector<256x128xi32>
    %c0_i32_26 = arith.constant 0 : i32
    %63 = arith.sitofp %c0_i32_26 : i32 to bf16
    %64 = vector.broadcast %63 : bf16 to vector<256x128xbf16>
    %65 = arith.select %62, %54, %64 : vector<256x128xi1>, vector<256x128xbf16>
    %c16_27 = arith.constant 16 : index
    %c256 = arith.constant 256 : index
    %66 = vector.load %arg9[%c16_27, %c256] : memref<288x384xbf16, #tpu.memory_space<vmem>>, vector<256x128xbf16>
    tpu.vector_store %arg9[%c16_27, %c256], %65 {strides = array<i32>} : memref<288x384xbf16, #tpu.memory_space<vmem>>, vector<256x128xbf16>,
    %c0_28 = arith.constant 0 : index
    %c0_29 = arith.constant 0 : index
    %67 = vector.load %arg9[%c0_28, %c0_29] : memref<288x384xbf16, #tpu.memory_space<vmem>>, vector<256x384xbf16>
    %c0_30 = arith.constant 0 : index
    %c0_31 = arith.constant 0 : index
    %c0_32 = arith.constant 0 : index
    %68 = vector.load %arg5[%c0_30, %c0_31, %c0_32] : memref<3x384x128xbf16, #tpu.memory_space<vmem>>, vector<1x384x128xbf16>
    %69 = vector.shape_cast %68 : vector<1x384x128xbf16> to vector<384x128xbf16>
    %cst_33 = arith.constant dense<0.000000e+00> : vector<256x128xf32>
    %70 = tpu.matmul %67, %69, %cst_33 {dimension_numbers = #tpu.dot_dimension_numbers<[1], [0], [0], [1], [0, 0, 1, 1], [], []>} : vector<256x384xbf16>, vector<384x128xbf16>, vector<256x128xf32> -> vector<256x128xf32>
    %c16_34 = arith.constant 16 : index
    %c0_35 = arith.constant 0 : index
    %71 = vector.load %arg9[%c16_34, %c0_35] : memref<288x384xbf16, #tpu.memory_space<vmem>>, vector<256x384xbf16>
    %c1 = arith.constant 1 : index
    %c0_36 = arith.constant 0 : index
    %c0_37 = arith.constant 0 : index
    %72 = vector.load %arg5[%c1, %c0_36, %c0_37] : memref<3x384x128xbf16, #tpu.memory_space<vmem>>, vector<1x384x128xbf16>
    %73 = vector.shape_cast %72 : vector<1x384x128xbf16> to vector<384x128xbf16>
    %cst_38 = arith.constant dense<0.000000e+00> : vector<256x128xf32>
    %74 = tpu.matmul %71, %73, %cst_38 {dimension_numbers = #tpu.dot_dimension_numbers<[1], [0], [0], [1], [0, 0, 1, 1], [], []>} : vector<256x384xbf16>, vector<384x128xbf16>, vector<256x128xf32> -> vector<256x128xf32>
    %75 = arith.addf %70, %74 : vector<256x128xf32>
    %c32 = arith.constant 32 : index
    %c0_39 = arith.constant 0 : index
    %76 = vector.load %arg9[%c32, %c0_39] : memref<288x384xbf16, #tpu.memory_space<vmem>>, vector<256x384xbf16>
    %c2 = arith.constant 2 : index
    %c0_40 = arith.constant 0 : index
    %c0_41 = arith.constant 0 : index
    %77 = vector.load %arg5[%c2, %c0_40, %c0_41] : memref<3x384x128xbf16, #tpu.memory_space<vmem>>, vector<1x384x128xbf16>
    %78 = vector.shape_cast %77 : vector<1x384x128xbf16> to vector<384x128xbf16>
    %cst_42 = arith.constant dense<0.000000e+00> : vector<256x128xf32>
    %79 = tpu.matmul %76, %78, %cst_42 {dimension_numbers = #tpu.dot_dimension_numbers<[1], [0], [0], [1], [0, 0, 1, 1], [], []>} : vector<256x384xbf16>, vector<384x128xbf16>, vector<256x128xf32> -> vector<256x128xf32>
    %80 = arith.addf %75, %79 : vector<256x128xf32>
    %cst_43 = arith.constant dense<0.000000e+00> : vector<128xf32>
    %81 = vector.multi_reduction <add>, %80, %cst_43 [0] : vector<256x128xf32> to vector<128xf32>
    %82 = vector.shape_cast %81 : vector<128xf32> to vector<1x128xf32>
    %cst_44 = arith.constant 2.560000e+02 : f32
    %83 = vector.broadcast %cst_44 : f32 to vector<1x128xf32>
    %84 = arith.divf %82, %83 : vector<1x128xf32>
    %85 = arith.mulf %80, %80 : vector<256x128xf32>
    %cst_45 = arith.constant dense<0.000000e+00> : vector<128xf32>
    %86 = vector.multi_reduction <add>, %85, %cst_45 [0] : vector<256x128xf32> to vector<128xf32>
    %87 = vector.shape_cast %86 : vector<128xf32> to vector<1x128xf32>
    %cst_46 = arith.constant 2.560000e+02 : f32
    %88 = vector.broadcast %cst_46 : f32 to vector<1x128xf32>
    %89 = arith.divf %87, %88 : vector<1x128xf32>
    %90 = arith.mulf %84, %84 : vector<1x128xf32>
    %91 = arith.subf %89, %90 : vector<1x128xf32>
    %cst_47 = arith.constant 0.000000e+00 : f32
    %92 = vector.broadcast %cst_47 : f32 to vector<1x128xf32>
    %93 = arith.maximumf %91, %92 : vector<1x128xf32>
    %cst_48 = arith.constant 9.99999974E-6 : f32
    %94 = vector.broadcast %cst_48 : f32 to vector<1x128xf32>
    %95 = arith.addf %93, %94 : vector<1x128xf32>
    %96 = math.rsqrt %95 : vector<1x128xf32>
    %c0_49 = arith.constant 0 : index
    %c0_50 = arith.constant 0 : index
    %97 = vector.load %arg6[%c0_49, %c0_50] : memref<1x128xf32, #tpu.memory_space<vmem>>, vector<1x128xf32>
    %98 = arith.mulf %96, %97 : vector<1x128xf32>
    %c0_51 = arith.constant 0 : index
    %c0_52 = arith.constant 0 : index
    %99 = vector.load %arg7[%c0_51, %c0_52] : memref<1x128xf32, #tpu.memory_space<vmem>>, vector<1x128xf32>
    %100 = arith.mulf %98, %84 : vector<1x128xf32>
    %101 = arith.subf %99, %100 : vector<1x128xf32>
    %102 = vector.broadcast %98 : vector<1x128xf32> to vector<256x128xf32>
    %103 = arith.mulf %80, %102 : vector<256x128xf32>
    %104 = vector.broadcast %101 : vector<1x128xf32> to vector<256x128xf32>
    %105 = arith.addf %103, %104 : vector<256x128xf32>
    %cst_53 = arith.constant 0.000000e+00 : f32
    %106 = vector.broadcast %cst_53 : f32 to vector<256x128xf32>
    %107 = arith.maximumf %105, %106 : vector<256x128xf32>
    %c0_54 = arith.constant 0 : index
    %c0_55 = arith.constant 0 : index
    %c0_56 = arith.constant 0 : index
    %108 = vector.load %arg8[%c0_54, %c0_55, %c0_56] : memref<1x256x128xf32, #tpu.memory_space<vmem>>, vector<1x256x128xf32>
    %109 = vector.shape_cast %108 : vector<1x256x128xf32> to vector<256x128xf32>
    %110 = vector.shape_cast %107 : vector<256x128xf32> to vector<1x256x128xf32>
    tpu.vector_store %arg8[%c0_54, %c0_55, %c0_56], %110 {strides = array<i32>} : memref<1x256x128xf32, #tpu.memory_space<vmem>>, vector<1x256x128xf32>,
    return
  }
  func.func @transform_0(%arg0: i32) -> (i32, i32, i32) {
    %c0_i32 = arith.constant 0 : i32
    %c0_i32_0 = arith.constant 0 : i32
    %c0_i32_1 = arith.constant 0 : i32
    return %arg0, %c0_i32, %c0_i32_0 : i32, i32, i32
  }
  func.func @transform_1(%arg0: i32) -> (i32, i32) {
    %c0_i32 = arith.constant 0 : i32
    %c0_i32_0 = arith.constant 0 : i32
    %c0_i32_1 = arith.constant 0 : i32
    return %c0_i32, %c0_i32_0 : i32, i32
  }
  func.func @transform_2(%arg0: i32) -> (i32, i32) {
    %c0_i32 = arith.constant 0 : i32
    %c0_i32_0 = arith.constant 0 : i32
    %c0_i32_1 = arith.constant 0 : i32
    return %c0_i32, %c0_i32_0 : i32, i32
  }
  func.func @transform_3(%arg0: i32) -> (i32, i32) {
    %c0_i32 = arith.constant 0 : i32
    %c0_i32_0 = arith.constant 0 : i32
    %c0_i32_1 = arith.constant 0 : i32
    return %c0_i32, %c0_i32_0 : i32, i32
  }
  func.func @transform_4(%arg0: i32) -> (i32, i32, i32) {
    %c0_i32 = arith.constant 0 : i32
    %c0_i32_0 = arith.constant 0 : i32
    %c0_i32_1 = arith.constant 0 : i32
    %c0_i32_2 = arith.constant 0 : i32
    return %c0_i32, %c0_i32_0, %c0_i32_1 : i32, i32, i32
  }
  func.func @transform_5(%arg0: i32) -> (i32, i32) {
    %c0_i32 = arith.constant 0 : i32
    %c0_i32_0 = arith.constant 0 : i32
    %c0_i32_1 = arith.constant 0 : i32
    return %c0_i32, %c0_i32_0 : i32, i32
  }
  func.func @transform_6(%arg0: i32) -> (i32, i32) {
    %c0_i32 = arith.constant 0 : i32
    %c0_i32_0 = arith.constant 0 : i32
    %c0_i32_1 = arith.constant 0 : i32
    return %c0_i32, %c0_i32_0 : i32, i32
  }
  func.func @transform_7(%arg0: i32) -> (i32, i32, i32) {
    %c0_i32 = arith.constant 0 : i32
    %c0_i32_0 = arith.constant 0 : i32
    %c0_i32_1 = arith.constant 0 : i32
    return %arg0, %c0_i32, %c0_i32_0 : i32, i32, i32
  }
}

</mosaic_0001>

<bundles_post_ra>
// kernel: tpu_custom_call.1
= control target key start
LH: loop header
LB: loop body
LE: loop exit
PB: predicated region body
PF: predicated region fallthrough
CT: control target
= control target key end

     0   :  { %12 = vsyncpa [#allocation4], 0  ;;  %s11203_s0 = inlined_call_operand.vmem [shape: f32[2,256,4], index: 0, kind: input, shape index: {}]   ;;  %s11204_s1 = inlined_call_operand.vmem [shape: f32[4,128], index: 1, kind: input, shape index: {}]   ;;  %s11205_s2 = inlined_call_operand.vmem [shape: f32[1,128], index: 2, kind: input, shape index: {}]   ;;  %s11206_s3 = inlined_call_operand.vmem [shape: f32[1,128], index: 3, kind: input, shape index: {}]   ;;  %s11207_s4 = inlined_call_operand.hbm [shape: bf16[3,384,128], index: 4, kind: input, shape index: {}]   ;;  %s11208_s5 = inlined_call_operand.vmem [shape: f32[1,128], index: 5, kind: input, shape index: {}]   ;;  %s11209_s6 = inlined_call_operand.vmem [shape: f32[1,128], index: 6, kind: input, shape index: {}]   ;;  %s11210_s7 = inlined_call_operand.hbm [shape: f32[2,256,128], index: 7, kind: output, shape index: {}]  }
   0x1   :  { %13 = vsyncpa [#allocation5], 0 }
   0x2   :  { %15 = vsyncpa [#allocation5 + $0x1], 0  ;;  %s6932_s24 = smov 0   ;;  %s6934_s25 = smov 0  }
   0x3   :  { %s6936_s26 = smov 0   ;;  %s6938_s27 = smov 0  }
   0x4 LB: > { %s6953_s28 = sadd.s32 4294967295, %s6881_s27   ;;  %s5801_s29 = sadd.s32 4294967294, %s6881_s27   ;;  %s6881_s27 = sphi %s6938_s27, %s12805_s27   ;;  %s6877_s26 = sphi %s6936_s26, %s12804_s26   ;;  %s6873_s25 = sphi %s6934_s25, %s12803_s25   ;;  %s6869_s24 = sphi %s6932_s24, %s12802_s24  }
   0x5   : > { %s6957_s30 = sadd.s32 1, %s6881_s27   ;;  %s180_s8 = sadd.s32 1, %s6877_s26 }
   0x6   : > { %s177_s9 = ssub.s32 %s6881_s27, %s6957_s30  ;;  %p190_p0 = scmp.ne.s32.totalorder %s6877_s26, %s6873_s25 }
   0x7   : > { %p178_p1 = scmp.eq.s32.totalorder %s177_s9, 0  ;;  %p191_p2 = scmp.eq.s32.totalorder %s6953_s28, 1 }
   0x8   : > { %p196_p3 = scmp.ne.s32.totalorder %s6873_s25, %s6869_s24  ;;  %p197_p4 = scmp.eq.s32.totalorder %s5801_s29, 1 }
   0x9   : > { %s6968_s10 = scalar_select %p178_p1, %s6877_s26, %s180_s8  }
   0xa   : > { %p6970_p5 = por %p191_p2, %p190_p0  ;;  %p6974_p6 = por %p197_p4, %p196_p3 }
   0xb   : > { %p5802_p7 = scmp.ge.s32.totalorder %s6881_s27, 1  ;;  %p204_p8 = scmp.lt.s32.totalorder %s6881_s27, 3 }
   0xc   : > { %p5803_p9 = scmp.ne.s32.totalorder %s6953_s28, 0  ;;  %p6730_p10 = scmp.eq.s32.totalorder %s6953_s28, 0 }
   0xd   : > { %p205_p11 = pnand %p5802_p7, %p204_p8  ;;  %s224_s15 = sshll.u32 %s11207_s4, 4  ;;  %s225_s15 = int_to_ptr.hbm [resolvable:$true] %s224_s15 }
   0xe   : > { %s6883_s16 = smov [#allocation3]   ;;  %s6884_s18 = smov 64  }
   0xf   : > { %p6722_p12 = pneg %p205_p11  ;;  %s226_s17 = sshll.u32 %s6883_s16, 4  ;;  %s227_s17 = int_to_ptr.vmem [resolvable:$true] %s226_s17 }
  0x10   : > { %s6885_s19 = smov 4   ;;  %256 = sbr.rel (%p205_p11) target bundleno = 1446 (0x5a6), region = 48 }
  0x11   : > { %p6723_p13 = pnand %p6730_p10, %p6722_p12 }
  0x13   : > { %6725 = dma.hbm_to_vmem [thread:$0]  (!%p6723_p13), %s225_s15, 9216, %s227_s17, [#allocation4], %s6884_s18, %s6884_s18, %s6885_s19  }
  0x15   : > { %6860 = dma.done.wait (%p6730_p10), [#allocation4], 9216  }
  0x16   : > { %6862 = vsyncadd (%p6730_p10), [#allocation4], 4294958080  ;;  %s286_s20 = sand.u32 1, %s6873_s25   ;;  %p289_p0 = scmp.lt.s32.totalorder %s6953_s28, 1 }
  0x17   : > { %s5807_s21 = sshll.u32 %s286_s20, 8  ;;  %300 = sbr.rel (%p5803_p9) target bundleno = 37 (0x25), region = 56 }
  0x18   : > { %s290_s22 = scalar_select %p289_p0, %s6953_s28, 1 }
  0x19   : > { %s7001_s13 = scalar_lea.vmem [#allocation6], %s5807_s21 }
  0x1a   : > { %s6534_s23 = sshll.u32 %s290_s22, 8 }
  0x1b   : > { %s6999_s9 = scalar_lea.vmem %s11203_s0, %s6534_s23 }
  0x1c   : > { %v6886_v0 = vmov 0  }
  0x1d   : > { %301 = vst [vmem:[#allocation2] sm:$0xff] %v6886_v0 }
  0x1e   : > { %302 = vst [vmem:[#allocation2 + $0x8] sm:$0xf] %v6886_v0 }
  0x1f   : > { %303 = vst [vmem:[#allocation2 + $0xc] sm:$0xff] %v6886_v0 }
  0x20   : > { %304 = vst [vmem:[#allocation2 + $0x14] sm:$0xf] %v6886_v0 }
  0x21   : > { %305 = vst [vmem:[#allocation2 + $0x198] sm:$0xff] %v6886_v0 }
  0x22   : > { %306 = vst [vmem:[#allocation2 + $0x1a0] sm:$0xf] %v6886_v0 }
  0x23   : > { %307 = vst [vmem:[#allocation2 + $0x1a4] sm:$0xff] %v6886_v0 }
  0x24   : > { %308 = vst [vmem:[#allocation2 + $0x1ac] sm:$0xf] %v6886_v0 }
  0x25 PF: > { %v341_v1 = vld [vmem:[%s11204_s1] sm:$0xf]  ;;  %vm439_vm0 = vcmask 1043456   ;;  %vm342_vm1 = vcmask 31744   ;;  %v310_v3 = vld [vmem:[%s6999_s9 + $0x8] sm:$0xff]  ;;  %v311_v4 = vld [vmem:[%s6999_s9 + $0x10] sm:$0xff]  ;;  %v854_v45 = vlaneseq }
  0x26   : > { %v309_v2 = vld [vmem:[%s6999_s9] sm:$0xff]  ;;  %5811 = vmatpush.msk.msra.mxu0 %vm439_vm0, %v341_v1  ;;  %6707 = vmatpush.msk.msra.mxu3 %vm439_vm0, %v341_v1  ;;  %v327_v5 = vld [vmem:[%s6999_s9 + $0x90] sm:$0xff]  ;;  %v312_v6 = vld [vmem:[%s6999_s9 + $0x18] sm:$0xff]  ;;  %vm6887_vm5 = vmmov 1   ;;  %v11211_v60 = vmov 0   ;;  %v11585_v57 = vmov 0 }
  0x27   : > { %5812 = vmatmul.msk.f32.vlgmr.msra.gmra.mxu0 %vm342_vm1, %v309_v2  ;;  %5830 = vmatmul.msk.f32.vlgmr.msra.gmra.mxu3 %vm342_vm1, %v327_v5  ;;  %v328_v7 = vld [vmem:[%s6999_s9 + $0x98] sm:$0xff]  ;;  %v313_v8 = vld [vmem:[%s6999_s9 + $0x20] sm:$0xff]  ;;  %v314_v10 = vld [vmem:[%s6999_s9 + $0x28] sm:$0xff]  ;;  %v7096_v47 = vshrl.u32 %v854_v45, 7  ;;  %vm1401_vm13 = vsmask.f32 3328 }
  0x28   : > { %v329_v9 = vld [vmem:[%s6999_s9 + $0xa0] sm:$0xff]  ;;  %v330_v11 = vld [vmem:[%s6999_s9 + $0xa8] sm:$0xff]  ;;  %v315_v12 = vld [vmem:[%s6999_s9 + $0x30] sm:$0xff]  ;;  %vm1402_vm14 = vsmask.f32 7440  ;;  %s6706_s8 = sshll.u32 %s6953_s28, 8 }
  0x29   : > { %v331_v13 = vld [vmem:[%s6999_s9 + $0xb0] sm:$0xff]  ;;  %v316_v14 = vld [vmem:[%s6999_s9 + $0x38] sm:$0xff]  ;;  %v317_v16 = vld [vmem:[%s6999_s9 + $0x40] sm:$0xff]  ;;  %v891_v49 = vand.u32 15, %v7096_v47  ;;  %v856_v50 = vadd.s32 8, %v7096_v47  ;;  %v857_v51 = vadd.s32 16, %v7096_v47  ;;  %s5723_s15 = scalar_lea.hbm %s11210_s7, %s6706_s8 }
  0x2a   : > { %v332_v15 = vld [vmem:[%s6999_s9 + $0xb8] sm:$0xff]  ;;  %v333_v17 = vld [vmem:[%s6999_s9 + $0xc0] sm:$0xff]  ;;  %v318_v18 = vld [vmem:[%s6999_s9 + $0x48] sm:$0xff]  ;;  %v859_v56 = vadd.s32 32, %v7096_v47  ;;  %v858_v59 = vadd.s32 24, %v7096_v47  ;;  %v872_v45 = vadd.s32 136, %v7096_v47 }
  0x2b   : > { %v334_v19 = vld [vmem:[%s6999_s9 + $0xc8] sm:$0xff]  ;;  %v319_v20 = vld [vmem:[%s6999_s9 + $0x50] sm:$0xff]  ;;  %v320_v22 = vld [vmem:[%s6999_s9 + $0x58] sm:$0xff]  ;;  %vm1305_vm2 = vcmp.ne.s32.totalorder %v891_v49, 0  ;;  %v898_v53 = vand.u32 15, %v856_v50  ;;  %v905_v54 = vand.u32 15, %v857_v51 }
  0x2c   : > { %v335_v21 = vld [vmem:[%s6999_s9 + $0xd0] sm:$0xff]  ;;  %v321_v23 = vld [vmem:[%s6999_s9 + $0x60] sm:$0xff]  ;;  %v336_v24 = vld [vmem:[%s6999_s9 + $0xd8] sm:$0xff]  ;;  %v919_v62 = vand.u32 15, %v859_v56  ;;  %v912_v2 = vand.u32 15, %v858_v59  ;;  %v873_v51 = vadd.s32 144, %v7096_v47 }
  0x2d   : > { %v322_v25 = vld [vmem:[%s6999_s9 + $0x68] sm:$0xff]  ;;  %v337_v26 = vld [vmem:[%s6999_s9 + $0xe0] sm:$0xff]  ;;  %v323_v27 = vld [vmem:[%s6999_s9 + $0x70] sm:$0xff]  ;;  %vm7108_vm4 = vcmp.ne.s32.totalorder %v898_v53, 15  ;;  %vm7112_vm7 = vcmp.ne.s32.totalorder %v905_v54, 0  ;;  %s5724_s28 = sshll.u32 %s7001_s13, 4  ;;  %s5725_s28 = int_to_ptr.vmem [resolvable:$true] %s5724_s28 }
  0x2e   : > { %v338_v28 = vld [vmem:[%s6999_s9 + $0xe8] sm:$0xff]  ;;  %v324_v29 = vld [vmem:[%s6999_s9 + $0x78] sm:$0xff]  ;;  %v339_v30 = vld [vmem:[%s6999_s9 + $0xf0] sm:$0xff]  ;;  %vm7130_vm10 = vcmp.ne.s32.totalorder %v919_v62, 0  ;;  %vm7142_vm12 = vcmp.ne.s32.totalorder %v912_v2, 15  ;;  %s5726_s16 = sshll.u32 %s5723_s15, 4  ;;  %s5727_s16 = int_to_ptr.hbm [resolvable:$true] %s5726_s16 }
  0x2f   : > { %5813 = vmatmul.msk.f32.gmra.mxu0 %vm342_vm1, %v310_v3  ;;  %5831 = vmatmul.msk.f32.gmra.mxu3 %vm342_vm1, %v328_v7  ;;  %v325_v32 = vld [vmem:[%s6999_s9 + $0x80] sm:$0xff]  ;;  %v340_v33 = vld [vmem:[%s6999_s9 + $0xf8] sm:$0xff]  ;;  %v326_v35 = vld [vmem:[%s6999_s9 + $0x88] sm:$0xff]  ;;  %v860_v3 = vadd.s32 40, %v7096_v47  ;;  %v861_v7 = vadd.s32 48, %v7096_v47  ;;  %s5712_s17 = scalar_lea.sflag [#allocation5], %s286_s20 }
  0x30   : > { %vm1337_vm3 = vmpackc.low %vm1305_vm2, %vm1305_vm2  ;;  %vm1987_vm2 = vsmask.f32 256  ;;  %s6829_s18 = sshra.s32 %s5727_s16, 4  ;;  %s6835_s23 = scalar_lea.hbm %s11210_s7, 512  ;;  %s6830_s18 = int_to_ptr.hbm [resolvable:$true] %s6829_s18 }
  0x31   : > { %vm1338_vm6 = vmpackc.low %vm6887_vm5, %vm6887_vm5  ;;  %v1369_v61 = vsel %vm1337_vm3, 65537, %v11211_v60  ;;  %vm1988_vm3 = vsmask.f32 4368  ;;  %s6831_s19 = scalar_lea.hbm %s6830_s18, 256  ;;  %p6836_p4 = scmp.lt.s32.totalorder %s6830_s18, %s11210_s7 }
  0x32   : > { %vm2379_vm8 = vmpackc.low %vm7108_vm4, %vm7108_vm4  ;;  %v1370_v63 = vsel %vm1338_vm6, 65537, %v11211_v60  ;;  %v1405_v0 = vshll.u32 %v1369_v61, 16  ;;  %v1408_v1 = vshrl.u32 %v1369_v61, 16  ;;  %p6832_p1 = scmp.ne.s32.totalorder %s6830_s18, %s6831_s19  ;;  %p6837_p7 = scmp.lt.s32.totalorder %s6835_s23, %s6831_s19 }
  0x33   : > { %vm1339_vm9 = vmpackc.low %vm7112_vm7, %vm7112_vm7 }
  0x34   : > { %vm1341_vm11 = vmpackc.low %vm7130_vm10, %vm7130_vm10  ;;  %p6833_p2 = pnand %p6832_p1, %p6970_p5  ;;  %p6838_p8 = por %p6837_p7, %p6836_p4 }
  0x35   : > { %vm2381_vm15 = vmpackc.low %vm7142_vm12, %vm7142_vm12 }
  0x36   : > { %vm7184_vm6 = vmor %vm1401_vm13, %vm1402_vm14  ;;  %p6834_p3 = pneg %p6833_p2 }
  0x37   : > { %5814 = vmatmul.msk.f32.gmra.mxu0 %vm342_vm1, %v311_v4  ;;  %5832 = vmatmul.msk.f32.gmra.mxu3 %vm342_vm1, %v329_v9  ;;  %v1371_v9 = vsel %vm1339_vm9, 65537, %v11211_v60  ;;  %v11586_v57 = vsel %vm7184_vm6, 4294967295, %v11585_v57  ;;  %vm7196_vm7 = vmor %vm1987_vm2, %vm1988_vm3 }
  0x38   : > { %11587 = vst [vmem:[#allocation14_spill] sm:$0xff] %v11586_v57  ;;  %p6839_p9 = pnand %p6838_p8, %p6834_p3 }
  0x3f   : > { %5815 = vmatmul.msk.f32.gmra.mxu0 %vm342_vm1, %v312_v6  ;;  %5833 = vmatmul.msk.f32.gmra.mxu3 %vm342_vm1, %v330_v11  ;;  %v7137_v11 = vrot.slane %v1405_v0, 5 }
  0x41   : > { %11574 = vst [vmem:[#allocation9_spill] sm:$0xff] %v7137_v11 }
  0x47   : > { %5816 = vmatmul.msk.f32.gmra.mxu0 %vm342_vm1, %v313_v8  ;;  %5834 = vmatmul.msk.f32.gmra.mxu3 %vm342_vm1, %v331_v13  ;;  %v2411_v8 = vsel %vm2379_vm8, 65537, %v11211_v60 }
  0x4f   : > { %5817 = vmatmul.msk.f32.gmra.mxu0 %vm342_vm1, %v314_v10  ;;  %5835 = vmatmul.msk.f32.gmra.mxu3 %vm342_vm1, %v332_v15  ;;  %v1414_v10 = vshll.u32 %v1370_v63, 16  ;;  %v2451_v15 = vshrl.u32 %v2411_v8, 16 }
  0x57   : > { %5818 = vmatmul.msk.f32.gmra.mxu0 %vm342_vm1, %v315_v12  ;;  %5836 = vmatmul.msk.f32.gmra.mxu3 %vm342_vm1, %v333_v17  ;;  %v1410_v12 = vrot.slane %v1408_v1, 4  ;;  %v1428_v17 = vshrl.u32 %v1371_v9, 16  ;;  %v11589_v1 = vmov 0 }
  0x58   : > { %v11590_v1 = vsel %vm7196_vm7, 4294967295, %v11589_v1 }
  0x59   : > { %11591 = vst [vmem:[#allocation16_spill] sm:$0xff] %v11590_v1 }
  0x5f   : > { %5819 = vmatmul.msk.f32.gmra.mxu0 %vm342_vm1, %v316_v14  ;;  %5837 = vmatmul.msk.f32.gmra.mxu3 %vm342_vm1, %v334_v19  ;;  %v926_v14 = vand.u32 15, %v860_v3  ;;  %v1418_v19 = vshrl.u32 %v1370_v63, 16  ;;  %v7191_v63 = vunpack.c.l.b16 %v11211_v60  ;;  %v1010_v3 = vand.u32 15, %v872_v45 }
  0x61   : > { %vm7153_vm0 = vcmp.ne.s32.totalorder %v926_v14, 15  ;;  %11588 = vst [vmem:[#allocation15_spill] sm:$0xff] %v7191_v63  ;;  %vm7236_vm8 = vcmp.ne.s32.totalorder %v1010_v3, 15 }
  0x62   : > { %vm2383_vm4 = vmpackc.low %vm7153_vm0, %vm7153_vm0 }
  0x63   : > { %vm2395_vm10 = vmpackc.low %vm7236_vm8, %vm7236_vm8 }
  0x67   : > { %5820 = vmatmul.msk.f32.gmra.mxu0 %vm342_vm1, %v317_v16  ;;  %5838 = vmatmul.msk.f32.gmra.mxu3 %vm342_vm1, %v335_v21  ;;  %v1424_v16 = vshll.u32 %v1371_v9, 16  ;;  %v1373_v21 = vsel %vm1341_vm11, 65537, %v11211_v60  ;;  %v1017_v9 = vand.u32 15, %v873_v51 }
  0x68   : > { %v1448_v50 = vshrl.u32 %v1373_v21, 16 }
  0x69   : > { %vm7244_vm9 = vcmp.ne.s32.totalorder %v1017_v9, 0 }
  0x6a   : > { %v1450_v6 = vrot.slane %v1448_v50, 4  ;;  %vm1355_vm11 = vmpackc.low %vm7244_vm9, %vm7244_vm9 }
  0x6f   : > { %5821 = vmatmul.msk.f32.gmra.mxu0 %vm342_vm1, %v318_v18  ;;  %5839 = vmatmul.msk.f32.gmra.mxu3 %vm342_vm1, %v336_v24  ;;  %v933_v18 = vand.u32 15, %v861_v7  ;;  %v2454_v24 = vshll.u32 %v2411_v8, 16  ;;  %v7209_v8 = vsel %vm2383_vm4, 65537, %v11211_v60 }
  0x70   : > { %11593 = vst [vmem:[#allocation18_spill] sm:$0xff] %v7209_v8 }
  0x77   : > { %5822 = vmatmul.msk.f32.gmra.mxu0 %vm342_vm1, %v319_v20  ;;  %5840 = vmatmul.msk.f32.gmra.mxu3 %vm342_vm1, %v337_v26  ;;  %v7146_v20 = vrot.slane %v1414_v10, 5 }
  0x79   : > { %11577 = vst [vmem:[#allocation10_spill] sm:$0xff] %v7146_v20 }
  0x7f   : > { %5823 = vmatmul.msk.f32.gmra.mxu0 %vm342_vm1, %v320_v22  ;;  %5841 = vmatmul.msk.f32.gmra.mxu3 %vm342_vm1, %v338_v28  ;;  %v1411_v22 = vor.u32 %v1410_v12, %v7137_v11  ;;  %v7159_v28 = vrot.slane %v1424_v16, 5  ;;  %v7217_v12 = vunpack.c.h.b16 %v11211_v60 }
  0x81   : > { %11580 = vst [vmem:[#allocation11_spill] sm:$0xff] %v7159_v28  ;;  %v1412_v53 = vrot.slane %v1411_v22, 4 }
  0x82   : > { %11595 = vst [vmem:[#allocation20_spill] sm:$0xff] %v7217_v12  ;;  %v866_v12 = vadd.s32 88, %v7096_v47 }
  0x84   : > { %v968_v63 = vand.u32 15, %v866_v12 }
  0x87   : > { %5824 = vmatmul.msk.f32.gmra.mxu0 %vm342_vm1, %v321_v23  ;;  %5842 = vmatmul.msk.f32.gmra.mxu3 %vm342_vm1, %v339_v30  ;;  %v2445_v23 = vrot.slane %v1418_v19, 7 }
  0x89   : > { %v7175_v54 = vor.u32 %v2445_v23, %v1414_v10  ;;  %v7177_v56 = vrot.slane %v2445_v23, 4  ;;  %v7214_v10 = vsel %vm7184_vm6, %v1412_v53, %v7146_v20  ;;  %v2487_v23 = vshrl.u32 %v7209_v8, 16 }
  0x8a   : > { %11594 = vst [vmem:[#allocation19_spill] sm:$0xff] %v7214_v10  ;;  %v875_v8 = vadd.s32 160, %v7096_v47 }
  0x8b   : > { %11584 = vst [vmem:[#allocation13_spill] sm:$0xff] %v7177_v56  ;;  %v7269_v3 = vrot.slane %v2487_v23, 7 }
  0x8d   : > { %11607 = vst [vmem:[#allocation28_spill] sm:$0xff] %v7269_v3  ;;  %v2494_v23 = vrot.slane %v7269_v3, 4 }
  0x8f   : > { %5825 = vmatmul.msk.f32.gmra.mxu0 %vm342_vm1, %v322_v25  ;;  %5843 = vmatmul.msk.f32.gmra.mxu3 %vm342_vm1, %v340_v33  ;;  %v1444_v33 = vshll.u32 %v1373_v21, 16 }
  0x91   : > { %v7200_v2 = vrot.slane %v1444_v33, 5 }
  0x93   : > { %11592 = vst [vmem:[#allocation17_spill] sm:$0xff] %v7200_v2 }
  0x97   : > { %5826 = vmatmul.msk.f32.gmra.mxu0 %vm342_vm1, %v323_v27  ;;  %v2453_v27 = vrot.slane %v2451_v15, 7 }
  0x99   : > { %v2456_v58 = vor.u32 %v2454_v24, %v2453_v27  ;;  %v2458_v61 = vrot.slane %v2453_v27, 4  ;;  %v874_v24 = vadd.s32 152, %v7096_v47 }
  0x9b   : > { %v7226_v16 = vsel %vm7196_vm7, %v7177_v56, %v2456_v58 }
  0x9c   : > { %11597 = vst [vmem:[#allocation22_spill] sm:$0xff] %v7226_v16 }
  0x9f   : > { %5827 = vmatmul.msk.f32.gmra.mxu0 %vm342_vm1, %v324_v29  ;;  %v1430_v29 = vrot.slane %v1428_v17, 4 }
  0xa1   : > { %v1431_v59 = vor.u32 %v1430_v29, %v7159_v28  ;;  %v1451_v29 = vor.u32 %v1450_v6, %v7200_v2  ;;  %v862_v6 = vadd.s32 56, %v7096_v47 }
  0xa3   : > { %v1432_v17 = vrot.slane %v1431_v59, 4  ;;  %v863_v59 = vadd.s32 64, %v7096_v47 }
  0xa4   : > { %v7066_v31 = vpop.f32.mrf.mxu0 }
  0xa5   : > { %v601_v53 = vmul.f32 %v7066_v31, %v7066_v31  ;;  %v7260_v58 = vsel %vm7184_vm6, %v1432_v17, %v7146_v20  ;;  %v1452_v17 = vrot.slane %v1451_v29, 4  ;;  %v1387_v29 = vsel %vm1355_vm11, 65537, %v11211_v60 }
  0xa6   : > { %11605 = vst [vmem:[#allocation26_spill] sm:$0xff] %v7260_v58  ;;  %v947_v25 = vand.u32 15, %v863_v59  ;;  %v1584_v14 = vshll.u32 %v1387_v29, 16  ;;  %v1588_v13 = vshrl.u32 %v1387_v29, 16  ;;  %v7320_v59 = vsel %vm7196_vm7, %v2494_v23, %v7175_v54 }
  0xa7   : > { %5828 = vmatmul.msk.f32.gmra.mxu0 %vm342_vm1, %v325_v32  ;;  %v1420_v32 = vrot.slane %v1418_v19, 4  ;;  %v7307_v30 = vsel %vm7184_vm6, %v1452_v17, %v7146_v20  ;;  %11611 = vst [vmem:[#allocation32_spill] sm:$0xff] %v7320_v59 }
  0xa8   : > { %11610 = vst [vmem:[#allocation31_spill] sm:$0xff] %v7307_v30  ;;  %vm7331_vm13 = vcmp.ne.s32.totalorder %v947_v25, 0  ;;  %v1590_v23 = vrot.slane %v1588_v13, 4 }
  0xa9   : > { %v1421_v0 = vor.u32 %v1420_v32, %v7146_v20 }
  0xaa   : > { %v7080_v38 = vpop.f32.mrf.mxu3 }
  0xab   : > { %v7241_v27 = vrot.slane %v1421_v0, 4  ;;  %v7357_v13 = vmul.f32 %v7080_v38, %v7080_v38 }
  0xac   : > { %v7072_v34 = vpop.f32.mrf.mxu0 }
  0xad   : > { %11602 = vst [vmem:[#allocation25_spill] sm:$0xff] %v7241_v27  ;;  %v602_v33 = vmul.f32 %v7072_v34, %v7072_v34 }
  0xaf   : > { %5829 = vmatmul.msk.f32.gmra.mxu0 %vm342_vm1, %v326_v35  ;;  %vm7161_vm1 = vcmp.ne.s32.totalorder %v933_v18, 0  ;;  %v7166_v35 = vsel %vm2381_vm15, 65537, %v11211_v60  ;;  %v7231_v18 = vsel %vm7196_vm7, %v2458_v61, %v7175_v54  ;;  %vm1345_vm15 = vmpackc.low %vm7331_vm13, %vm7331_vm13 }
  0xb0   : > { %11583 = vst [vmem:[#allocation12_spill] sm:$0xff] %v7166_v35  ;;  %vm1343_vm5 = vmpackc.low %vm7161_vm1, %vm7161_vm1  ;;  %v2469_v62 = vshrl.u32 %v7166_v35, 16 }
  0xb1   : > { %v1375_v7 = vsel %vm1343_vm5, 65537, %v11211_v60  ;;  %11598 = vst [vmem:[#allocation23_spill] sm:$0xff] %v7231_v18 }
  0xb2   : > { %v7086_v41 = vpop.f32.mrf.mxu3  ;;  %v7233_v19 = vrot.slane %v2469_v62, 7  ;;  %v1464_v21 = vshll.u32 %v1375_v7, 16  ;;  %v1468_v22 = vshrl.u32 %v1375_v7, 16  ;;  %v556_v7 = vadd.f32 %v7072_v34, %v7066_v31 }
  0xb4   : > { %v7076_v36 = vpop.f32.mrf.mxu0  ;;  %11599 = vst [vmem:[#allocation24_spill] sm:$0xff] %v7233_v19  ;;  %v2476_v61 = vrot.slane %v7233_v19, 4  ;;  %v7267_v62 = vrot.slane %v1464_v21, 5  ;;  %v1470_v0 = vrot.slane %v1468_v22, 4  ;;  %v633_v21 = vadd.f32 %v602_v33, %v601_v53 }
  0xb5   : > { %v603_v9 = vmul.f32 %v7076_v36, %v7076_v36  ;;  %v557_v45 = vadd.f32 %v556_v7, %v7076_v36  ;;  %v7298_v33 = vsel %vm2395_vm10, 65537, %v11211_v60  ;;  %v940_v22 = vand.u32 15, %v862_v6 }
  0xb6   : > { %11606 = vst [vmem:[#allocation27_spill] sm:$0xff] %v7267_v62  ;;  %v7289_v32 = vsel %vm7196_vm7, %v2476_v61, %v7175_v54  ;;  %v1471_v7 = vor.u32 %v1470_v0, %v7267_v62  ;;  %v2595_v60 = vshrl.u32 %v7298_v33, 16 }
  0xb7   : > { %11609 = vst [vmem:[#allocation30_spill] sm:$0xff] %v7289_v32  ;;  %v634_v61 = vadd.f32 %v633_v21, %v603_v9  ;;  %vm7322_vm12 = vcmp.ne.s32.totalorder %v940_v22, 15  ;;  %v1031_v22 = vand.u32 15, %v875_v8  ;;  %v11621_v8 = vmov 0  }
  0xb8   : > { %v1472_v3 = vrot.slane %v1471_v7, 4  ;;  %v7335_v7 = vrot.slane %v1584_v14, 5  ;;  %vm2385_vm14 = vmpackc.low %vm7322_vm12, %vm7322_vm12  ;;  %vm7522_vm12 = vcmp.ne.s32.totalorder %v968_v63, 15 }
  0xb9   : > { %v7372_v14 = vsel %vm2385_vm14, 65537, %v11621_v8  ;;  %vm7374_vm1 = vcmp.ne.s32.totalorder %v1031_v22, 0  ;;  %v864_v22 = vadd.s32 72, %v7096_v47  ;;  %vm2389_vm14 = vmpackc.low %vm7522_vm12, %vm7522_vm12 }
  0xba   : > { %v7090_v43 = vpop.f32.mrf.mxu3  ;;  %11616 = vst [vmem:[#allocation33_spill] sm:$0xff] %v7335_v7  ;;  %vm1357_vm3 = vmpackc.low %vm7374_vm1, %vm7374_vm1  ;;  %v2505_v28 = vshrl.u32 %v7372_v14, 16 }
  0xbb   : > { %11622 = vst [vmem:[#allocation36_spill] sm:$0xff] %v7372_v14  ;;  %v1389_v14 = vsel %vm1357_vm3, 65537, %v11621_v8  ;;  %v621_v12 = vmul.f32 %v7090_v43, %v7090_v43 }
  0xbc   : > { %v7078_v37 = vpop.f32.mrf.mxu0  ;;  %v7431_v18 = vrot.slane %v2505_v28, 7  ;;  %v1608_v10 = vshrl.u32 %v1389_v14, 16 }
  0xbd   : > { %v604_v53 = vmul.f32 %v7078_v37, %v7078_v37  ;;  %v558_v0 = vadd.f32 %v557_v45, %v7078_v37 }
  0xbe   : > { %11629 = vst [vmem:[#allocation41_spill] sm:$0xff] %v7431_v18 }
  0xbf   : > { %v635_v17 = vadd.f32 %v634_v61, %v604_v53  ;;  %v1024_v53 = vand.u32 15, %v874_v24  ;;  %v7337_v61 = vrot.slane %v2595_v60, 7  ;;  %v7352_v60 = vsel %vm7184_vm6, %v1472_v3, %v7146_v20 }
  0xc0   : > { %11618 = vst [vmem:[#allocation35_spill] sm:$0xff] %v7352_v60  ;;  %v1591_v3 = vor.u32 %v1590_v23, %v7335_v7  ;;  %v865_v23 = vadd.s32 80, %v7096_v47 }
  0xc1   : > { %vm7365_vm0 = vcmp.ne.s32.totalorder %v1024_v53, 15  ;;  %v1377_v53 = vsel %vm1345_vm15, 65537, %v11621_v8 }
  0xc2   : > { %v7094_v46 = vpop.f32.mrf.mxu3  ;;  %vm2397_vm2 = vmpackc.low %vm7365_vm0, %vm7365_vm0  ;;  %v1592_v2 = vrot.slane %v1591_v3, 4  ;;  %v1484_v7 = vshll.u32 %v1377_v53, 16  ;;  %v1488_v60 = vshrl.u32 %v1377_v53, 16  ;;  %v7411_v3 = vmul.f32 %v7086_v41, %v7086_v41 }
  0xc4   : > { %v7082_v39 = vpop.f32.mrf.mxu0  ;;  %v7426_v32 = vsel %vm7184_vm6, %v1592_v2, %v7146_v20  ;;  %v7429_v29 = vrot.slane %v1484_v7, 5  ;;  %v1490_v16 = vrot.slane %v1488_v60, 4 }
  0xc5   : > { %v605_v6 = vmul.f32 %v7082_v39, %v7082_v39  ;;  %v559_v45 = vadd.f32 %v558_v0, %v7082_v39  ;;  %11627 = vst [vmem:[#allocation39_spill] sm:$0xff] %v7426_v32 }
  0xc6   : > { %11628 = vst [vmem:[#allocation40_spill] sm:$0xff] %v7429_v29  ;;  %v1491_v58 = vor.u32 %v1490_v16, %v7429_v29 }
  0xc7   : > { %v636_v35 = vadd.f32 %v635_v17, %v605_v6 }
  0xca   : > { %v7103_v52 = vpop.f32.mrf.mxu3 }
  0xcc   : > { %v7084_v40 = vpop.f32.mrf.mxu0 }
  0xcd   : > { %v606_v9 = vmul.f32 %v7084_v40, %v7084_v40  ;;  %v560_v0 = vadd.f32 %v559_v45, %v7084_v40  ;;  %v2602_v45 = vrot.slane %v7337_v61, 4 }
  0xcf   : > { %v637_v6 = vadd.f32 %v636_v35, %v606_v9  ;;  %v7399_v11 = vsel %vm7196_vm7, %v2602_v45, %v7175_v54  ;;  %v2429_v45 = vsel %vm2397_vm2, 65537, %v11621_v8 }
  0xd0   : > { %11625 = vst [vmem:[#allocation37_spill] sm:$0xff] %v7399_v11 }
  0xd2   : > { %v7128_v5 = vpop.f32.mrf.mxu3 }
  0xd4   : > { %v7088_v42 = vpop.f32.mrf.mxu0 }
  0xd5   : > { %v607_v25 = vmul.f32 %v7088_v42, %v7088_v42  ;;  %v561_v24 = vadd.f32 %v560_v0, %v7088_v42 }
  0xd7   : > { %v638_v0 = vadd.f32 %v637_v6, %v607_v25 }
  0xda   : > { %v7169_v49 = vpop.f32.mrf.mxu3 }
  0xdc   : > { %v7092_v44 = vpop.f32.mrf.mxu0 }
  0xdd   : > { %v608_v17 = vmul.f32 %v7092_v44, %v7092_v44  ;;  %v562_v35 = vadd.f32 %v561_v24, %v7092_v44 }
  0xdf   : > { %v639_v24 = vadd.f32 %v638_v0, %v608_v17 }
  0xe2   : > { %v7253_v51 = vpop.f32.mrf.mxu3 }
  0xe4   : > { %v7098_v48 = vpop.f32.mrf.mxu0 }
  0xe5   : > { %v609_v9 = vmul.f32 %v7098_v48, %v7098_v48  ;;  %v563_v25 = vadd.f32 %v562_v35, %v7098_v48 }
  0xe7   : > { %v640_v0 = vadd.f32 %v639_v24, %v609_v9  ;;  %v954_v9 = vand.u32 15, %v864_v22  ;;  %v961_v24 = vand.u32 15, %v865_v23 }
  0xe9   : > { %vm7436_vm4 = vcmp.ne.s32.totalorder %v954_v9, 15  ;;  %vm7440_vm5 = vcmp.ne.s32.totalorder %v961_v24, 0  ;;  %v876_v9 = vadd.s32 168, %v7096_v47  ;;  %v2616_v24 = vshll.u32 %v2429_v45, 16 }
  0xea   : > { %v7326_v62 = vpop.f32.mrf.mxu3  ;;  %vm2387_vm8 = vmpackc.low %vm7436_vm4, %vm7436_vm4 }
  0xeb   : > { %vm1347_vm9 = vmpackc.low %vm7440_vm5, %vm7440_vm5 }
  0xec   : > { %v7105_v55 = vpop.f32.mrf.mxu0  ;;  %v1379_v2 = vsel %vm1347_vm9, 65537, %v11621_v8 }
  0xed   : > { %v610_v6 = vmul.f32 %v7105_v55, %v7105_v55  ;;  %v564_v21 = vadd.f32 %v563_v25, %v7105_v55 }
  0xef   : > { %v641_v25 = vadd.f32 %v640_v0, %v610_v6  ;;  %v2613_v6 = vshrl.u32 %v2429_v45, 16  ;;  %v1604_v0 = vshll.u32 %v1389_v14, 16  ;;  %v2512_v14 = vrot.slane %v7431_v18, 4 }
  0xf0   : > { %v1610_v18 = vrot.slane %v1608_v10, 4  ;;  %v1038_v10 = vand.u32 15, %v876_v9 }
  0xf1   : > { %v7460_v60 = vrot.slane %v1604_v0, 5  ;;  %v877_v0 = vadd.s32 176, %v7096_v47 }
  0xf2   : > { %v7404_v17 = vpop.f32.mrf.mxu3  ;;  %vm7490_vm10 = vcmp.ne.s32.totalorder %v1038_v10, 15 }
  0xf3   : > { %11634 = vst [vmem:[#allocation42_spill] sm:$0xff] %v7460_v60  ;;  %v1611_v9 = vor.u32 %v1610_v18, %v7460_v60  ;;  %vm2399_vm11 = vmpackc.low %vm7490_vm10, %vm7490_vm10  ;;  %v868_v60 = vadd.s32 104, %v7096_v47 }
  0xf4   : > { %v7126_v4 = vpop.f32.mrf.mxu0 }
  0xf5   : > { %v611_v59 = vmul.f32 %v7126_v4, %v7126_v4  ;;  %v565_v53 = vadd.f32 %v564_v21, %v7126_v4 }
  0xf7   : > { %v642_v22 = vadd.f32 %v641_v25, %v611_v59 }
  0xfa   : > { %v7465_v45 = vpop.f32.mrf.mxu3 }
  0xfc   : > { %v7157_v26 = vpop.f32.mrf.mxu0 }
  0xfd   : > { %v612_v30 = vmul.f32 %v7157_v26, %v7157_v26  ;;  %v566_v21 = vadd.f32 %v565_v53, %v7157_v26  ;;  %v2615_v53 = vrot.slane %v2613_v6, 7  ;;  %v7473_v6 = vsel %vm2387_vm8, 65537, %v11621_v8 }
  0xfe   : > { %11635 = vst [vmem:[#allocation43_spill] sm:$0xff] %v7473_v6 }
  0xff   : > { %v643_v7 = vadd.f32 %v642_v22, %v612_v30  ;;  %v2618_v16 = vor.u32 %v2616_v24, %v2615_v53  ;;  %v2620_v32 = vrot.slane %v2615_v53, 4  ;;  %v622_v24 = vmul.f32 %v7094_v46, %v7094_v46 }
 0x104   : > { %v7221_v15 = vpop.f32.mrf.mxu0 }
 0x105   : > { %11596 = vst [vmem:[#allocation21_spill] sm:$0xff] %v7221_v15  ;;  %v613_v23 = vmul.f32 %v7221_v15, %v7221_v15  ;;  %v567_v28 = vadd.f32 %v566_v21, %v7221_v15 }
 0x107   : > { %v644_v21 = vadd.f32 %v643_v7, %v613_v23 }
 0x10c   : > { %v7283_v50 = vpop.f32.mrf.mxu0 }
 0x10d   : > { %11608 = vst [vmem:[#allocation29_spill] sm:$0xff] %v7283_v50  ;;  %v614_v59 = vmul.f32 %v7283_v50, %v7283_v50  ;;  %v568_v30 = vadd.f32 %v567_v28, %v7283_v50 }
 0x10f   : > { %v645_v28 = vadd.f32 %v644_v21, %v614_v59  ;;  %v1492_v59 = vrot.slane %v1491_v58, 4  ;;  %v7483_v21 = vsel %vm7196_vm7, %v2512_v14, %v7175_v54 }
 0x110   : > { %11636 = vst [vmem:[#allocation44_spill] sm:$0xff] %v7483_v21 }
 0x114   : > { %v7339_v19 = vpop.f32.mrf.mxu0 }
 0x115   : > { %11617 = vst [vmem:[#allocation34_spill] sm:$0xff] %v7339_v19  ;;  %v615_v22 = vmul.f32 %v7339_v19, %v7339_v19  ;;  %v569_v23 = vadd.f32 %v568_v30, %v7339_v19 }
 0x117   : > { %v646_v29 = vadd.f32 %v645_v28, %v615_v22  ;;  %v1504_v22 = vshll.u32 %v1379_v2, 16  ;;  %v1508_v28 = vshrl.u32 %v1379_v2, 16 }
 0x119   : > { %v7517_v2 = vrot.slane %v1504_v22, 5 }
 0x11b   : > { %11642 = vst [vmem:[#allocation48_spill] sm:$0xff] %v7517_v2 }
 0x11c   : > { %v7402_v35 = vpop.f32.mrf.mxu0 }
 0x11d   : > { %11626 = vst [vmem:[#allocation38_spill] sm:$0xff] %v7402_v35  ;;  %v616_v7 = vmul.f32 %v7402_v35, %v7402_v35  ;;  %v570_v11 = vadd.f32 %v569_v23, %v7402_v35  ;;  %v2523_v23 = vshrl.u32 %v7473_v6, 16  ;;  %v1045_v35 = vand.u32 15, %v877_v0 }
 0x11e   : > { %v7515_v0 = vsel %vm7196_vm7, %v2620_v32, %v7175_v54 }
 0x11f   : > { %v647_v50 = vadd.f32 %v646_v29, %v616_v7  ;;  %11641 = vst [vmem:[#allocation47_spill] sm:$0xff] %v7515_v0  ;;  %vm7530_vm13 = vcmp.ne.s32.totalorder %v1045_v35, 0  ;;  %v2431_v35 = vsel %vm2399_vm11, 65537, %v11621_v8 }
 0x120   : > { %vm1359_vm15 = vmpackc.low %vm7530_vm13, %vm7530_vm13 }
 0x121   : > { %v1391_v29 = vsel %vm1359_vm15, 65537, %v11621_v8 }
 0x124   : > { %v7451_v25 = vpop.f32.mrf.mxu0 }
 0x125   : > { %v617_v30 = vmul.f32 %v7451_v25, %v7451_v25  ;;  %v571_v19 = vadd.f32 %v570_v11, %v7451_v25  ;;  %v7500_v11 = vsel %vm7184_vm6, %v1492_v59, %v7146_v20 }
 0x126   : > { %11639 = vst [vmem:[#allocation45_spill] sm:$0xff] %v7500_v11 }
 0x127   : > { %v648_v14 = vadd.f32 %v647_v50, %v617_v30  ;;  %v7509_v50 = vsel %vm7196_vm7, %v7177_v56, %v2618_v16  ;;  %v1510_v30 = vrot.slane %v1508_v28, 4  ;;  %v7526_v16 = vpop.f32.mrf.mxu3  ;;  %v624_v28 = vmul.f32 %v7128_v5, %v7128_v5 }
 0x128   : > { %11640 = vst [vmem:[#allocation46_spill] sm:$0xff] %v7509_v50 }
 0x129   : > { %11645 = vst [vmem:[#allocation49_spill] sm:$0xff] %v7526_v16 }
 0x12c   : > { %v7488_v15 = vpop.f32.mrf.mxu0 }
 0x12d   : > { %v572_v53 = vadd.f32 %v571_v19, %v7488_v15  ;;  %v618_v18 = vmul.f32 %v7488_v15, %v7488_v15  ;;  %v1612_v19 = vrot.slane %v1611_v9, 4  ;;  %v7528_v9 = vrot.slane %v2523_v23, 7 }
 0x12f   : > { %v573_v7 = vadd.f32 %v572_v53, %v7080_v38  ;;  %v649_v10 = vadd.f32 %v648_v14, %v618_v18  ;;  %11646 = vst [vmem:[#allocation50_spill] sm:$0xff] %v7528_v9  ;;  %v7543_v23 = vsel %vm7184_vm6, %v1612_v19, %v7146_v20  ;;  %v1511_v53 = vor.u32 %v1510_v30, %v7517_v2 }
 0x130   : > { %11649 = vst [vmem:[#allocation51_spill] sm:$0xff] %v7543_v23  ;;  %v867_v19 = vadd.s32 96, %v7096_v47  ;;  %v2530_v63 = vrot.slane %v7528_v9, 4  ;;  %v623_v30 = vmul.f32 %v7103_v52, %v7103_v52  ;;  %v2421_v14 = vsel %vm2389_vm14, 65537, %v11621_v8 }
 0x131   : > { %v574_v32 = vadd.f32 %v573_v7, %v7086_v41  ;;  %v650_v22 = vadd.f32 %v649_v10, %v7357_v13  ;;  %v2631_v7 = vshrl.u32 %v2431_v35, 16  ;;  %v2541_v2 = vshrl.u32 %v2421_v14, 16 }
 0x132   : > { %v7577_v10 = vsel %vm7196_vm7, %v2530_v63, %v7175_v54 }
 0x133   : > { %v575_v13 = vadd.f32 %v574_v32, %v7090_v43  ;;  %v651_v18 = vadd.f32 %v650_v22, %v7411_v3  ;;  %v975_v22 = vand.u32 15, %v867_v19  ;;  %11650 = vst [vmem:[#allocation52_spill] sm:$0xff] %v7577_v10  ;;  %v7582_v6 = vrot.slane %v2631_v7, 7 }
 0x134   : > { %v6889_v19 = vmov 256.0   ;;  %v1628_v7 = vshrl.u32 %v1391_v29, 16 }
 0x135   : > { %v576_v32 = vadd.f32 %v575_v13, %v7094_v46  ;;  %v652_v3 = vadd.f32 %v651_v18, %v621_v12  ;;  %v1512_v13 = vrot.slane %v1511_v53, 4  ;;  %v2634_v18 = vshll.u32 %v2431_v35, 16 }
 0x136   : > { %v625_v53 = vmul.f32 %v7169_v49, %v7169_v49  ;;  %6774 = vrcp.f32 %v6889_v19  ;;  %vm7595_vm0 = vcmp.ne.s32.totalorder %v975_v22, 0  ;;  %v7607_v22 = vrot.slane %v2541_v2, 7 }
 0x137   : > { %v653_v58 = vadd.f32 %v652_v3, %v622_v24  ;;  %v577_v12 = vadd.f32 %v576_v32, %v7103_v52  ;;  %v2544_v24 = vshll.u32 %v2421_v14, 16  ;;  %v1624_v3 = vshll.u32 %v1391_v29, 16  ;;  %v7584_v32 = vpop.f32.mrf.mxu3  ;;  %vm1349_vm1 = vmpackc.low %vm7595_vm0, %vm7595_vm0 }
 0x138   : > { %11651 = vst [vmem:[#allocation53_spill] sm:$0xff] %v7584_v32  ;;  %v878_v14 = vadd.s32 184, %v7096_v47  ;;  %v879_v29 = vadd.s32 192, %v7096_v47  ;;  %v628_v19 = vmul.f32 %v7404_v17, %v7404_v17  ;;  %v2548_v21 = vrot.slane %v7607_v22, 4 }
 0x139   : > { %v578_v59 = vadd.f32 %v577_v12, %v7128_v5  ;;  %v654_v9 = vadd.f32 %v653_v58, %v623_v30  ;;  %v7592_v12 = vsel %vm7184_vm6, %v1512_v13, %v7146_v20  ;;  %v2636_v13 = vor.u32 %v2634_v18, %v7582_v6 }
 0x13a   : > { %11652 = vst [vmem:[#allocation54_spill] sm:$0xff] %v7592_v12  ;;  %v627_v58 = vmul.f32 %v7326_v62, %v7326_v62  ;;  %v1052_v2 = vand.u32 15, %v878_v14  ;;  %v1381_v30 = vsel %vm1349_vm1, 65537, %v11621_v8  ;;  %v629_v14 = vmul.f32 %v7465_v45, %v7465_v45 }
 0x13b   : > { %v579_v35 = vadd.f32 %v578_v59, %v7169_v49  ;;  %v655_v63 = vadd.f32 %v654_v9, %v624_v28  ;;  %v626_v59 = vmul.f32 %v7253_v51, %v7253_v51 }
 0x13c   : > { %v7619_v18 = vpop.eup %6774  ;;  %vm7640_vm2 = vcmp.ne.s32.totalorder %v1052_v2, 15 }
 0x13d   : > { %v580_v9 = vadd.f32 %v579_v35, %v7253_v51  ;;  %v656_v28 = vadd.f32 %v655_v63, %v625_v53  ;;  %v7613_v35 = vrot.slane %v1624_v3, 5  ;;  %v1630_v53 = vrot.slane %v1628_v7, 4  ;;  %vm2401_vm5 = vmpackc.low %vm7640_vm2, %vm7640_vm2 }
 0x13e   : > { %v2638_v63 = vrot.slane %v7582_v6, 4  ;;  %v7628_v3 = vsel %vm7196_vm7, %v7177_v56, %v2636_v13  ;;  %v982_v6 = vand.u32 15, %v868_v60  ;;  %v1059_v7 = vand.u32 15, %v879_v29 }
 0x13f   : > { %v581_v0 = vadd.f32 %v580_v9, %v7326_v62  ;;  %v657_v50 = vadd.f32 %v656_v28, %v626_v59  ;;  %11655 = vst [vmem:[#allocation55_spill] sm:$0xff] %v7613_v35  ;;  %v7637_v28 = vpop.f32.mrf.mxu3  ;;  %v594_v13 = vmul.f32 256.0, %v7619_v18  ;;  %vm598_vm12 = vweird.f32 %v7619_v18 }
 0x140   : > { %11656 = vst [vmem:[#allocation56_spill] sm:$0xff] %v7628_v3  ;;  %vm7647_vm3 = vcmp.ne.s32.totalorder %v982_v6, 15  ;;  %vm7651_vm4 = vcmp.ne.s32.totalorder %v1059_v7, 0  ;;  %v632_v12 = vmul.f32 %v7637_v28, %v7637_v28 }
 0x141   : > { %v582_v9 = vadd.f32 %v581_v0, %v7404_v17  ;;  %v658_v59 = vadd.f32 %v657_v50, %v627_v58  ;;  %v2546_v0 = vor.u32 %v2544_v24, %v7607_v22  ;;  %v1631_v50 = vor.u32 %v1630_v53, %v7613_v35  ;;  %vm2391_vm8 = vmpackc.low %vm7647_vm3, %vm7647_vm3 }
 0x142   : > { %v869_v58 = vadd.s32 112, %v7096_v47  ;;  %v1528_v24 = vshrl.u32 %v1381_v30, 16  ;;  %vm1361_vm9 = vmpackc.low %vm7651_vm4, %vm7651_vm4 }
 0x143   : > { %v583_v23 = vadd.f32 %v582_v9, %v7465_v45  ;;  %v659_v10 = vadd.f32 %v658_v59, %v628_v19  ;;  %v630_v9 = vmul.f32 %v7526_v16, %v7526_v16  ;;  %v1524_v59 = vshll.u32 %v1381_v30, 16 }
 0x144   : > { %v7664_v6 = vsel %vm7196_vm7, %v7177_v56, %v2546_v0  ;;  %v1632_v7 = vrot.slane %v1631_v50, 4  ;;  %v595_v30 = vsub.f32 1.0, %v594_v13  ;;  %v7677_v0 = vsel %vm7196_vm7, %v2638_v63, %v7175_v54 }
 0x145   : > { %v660_v29 = vadd.f32 %v659_v10, %v629_v14  ;;  %v584_v19 = vadd.f32 %v583_v23, %v7526_v16  ;;  %v631_v10 = vmul.f32 %v7584_v32, %v7584_v32  ;;  %11663 = vst [vmem:[#allocation57_spill] sm:$0xff] %v7664_v6  ;;  %v7679_v50 = vrot.slane %v1524_v59, 5 }
 0x146   : > { %11664 = vst [vmem:[#allocation58_spill] sm:$0xff] %v7677_v0  ;;  %v1530_v60 = vrot.slane %v1528_v24, 4  ;;  %v880_v13 = vadd.s32 200, %v7096_v47  ;;  %v7691_v63 = vsel %vm7184_vm6, %v1632_v7, %v7146_v20  ;;  %v2423_v59 = vsel %vm2391_vm8, 65537, %v11621_v8  ;;  %v6590_v0 = vld [vmem:[#allocation3 + $0x38] sm:$0xff] }
 0x147   : > { %v585_v2 = vadd.f32 %v584_v19, %v7584_v32  ;;  %v661_v14 = vadd.f32 %v660_v29, %v630_v9  ;;  %v989_v29 = vand.u32 15, %v869_v58  ;;  %11665 = vst [vmem:[#allocation59_spill] sm:$0xff] %v7679_v50  ;;  %v2433_v58 = vsel %vm2401_vm5, 65537, %v11621_v8  ;;  %4373 = vmatpush.bf16.msrb.mxu0 %v6590_v0 }
 0x148   : > { %v596_v35 = vmul.f32 %v7619_v18, %v595_v30  ;;  %v1393_v24 = vsel %vm1361_vm9, 65537, %v11621_v8  ;;  %v1066_v6 = vand.u32 15, %v880_v13  ;;  %v2652_v22 = vshll.u32 %v2433_v58, 16 }
 0x149   : > { %v662_v9 = vadd.f32 %v661_v14, %v631_v10  ;;  %v586_v23 = vadd.f32 %v585_v2, %v7637_v28  ;;  %vm7696_vm10 = vcmp.ne.s32.totalorder %v989_v29, 0  ;;  %v2649_v14 = vshrl.u32 %v2433_v58, 16 }
 0x14a   : > { %v2559_v29 = vshrl.u32 %v2423_v59, 16  ;;  %v1644_v16 = vshll.u32 %v1393_v24, 16  ;;  %vm1351_vm11 = vmpackc.low %vm7696_vm10, %vm7696_vm10  ;;  %vm7710_vm13 = vcmp.ne.s32.totalorder %v1066_v6, 15  ;;  %v871_v19 = vadd.s32 128, %v7096_v47 }
 0x14b   : > { %v587_v10 = vrot.slane %v586_v23, 4  ;;  %v663_v2 = vadd.f32 %v662_v9, %v632_v12  ;;  %v1531_v9 = vor.u32 %v1530_v60, %v7679_v50  ;;  %v2651_v12 = vrot.slane %v2649_v14, 7  ;;  %vm2403_vm14 = vmpackc.low %vm7710_vm13, %vm7710_vm13 }
 0x14c   : > { %v7722_v58 = vrot.slane %v1644_v16, 5  ;;  %v1003_v16 = vand.u32 15, %v871_v19 }
 0x14d   : > { %v588_v53 = vadd.f32 %v587_v10, %v586_v23  ;;  %v664_v3 = vrot.slane %v663_v2, 4  ;;  %v597_v23 = vadd.f32 %v7619_v18, %v596_v35  ;;  %v1648_v10 = vshrl.u32 %v1393_v24, 16 }
 0x14e   : > { %v1532_v7 = vrot.slane %v1531_v9, 4  ;;  %v7716_v35 = vrot.slane %v2559_v29, 7  ;;  %11671 = vst [vmem:[#allocation61_spill] sm:$0xff] %v7722_v58  ;;  %v2654_v29 = vor.u32 %v2652_v22, %v2651_v12  ;;  %v2656_v0 = vrot.slane %v2651_v12, 4 }
 0x14f   : > { %v589_v11 = vrot.slane %v588_v53, 2  ;;  %v665_v30 = vadd.f32 %v664_v3, %v663_v2  ;;  %v1383_v2 = vsel %vm1351_vm11, 65537, %v11621_v8  ;;  %v7720_v24 = vsel %vm598_vm12, %v7619_v18, %v597_v23 }
 0x150   : > { %11670 = vst [vmem:[#allocation60_spill] sm:$0xff] %v7720_v24  ;;  %v1650_v6 = vrot.slane %v1648_v10, 4  ;;  %v7731_v18 = vsel %vm7196_vm7, %v2548_v21, %v7175_v54  ;;  %vm7756_vm15 = vcmp.ne.s32.totalorder %v1003_v16, 0  ;;  %v7771_v16 = vsel %vm7196_vm7, %v2656_v0, %v7175_v54 }
 0x151   : > { %v590_v60 = vadd.f32 %v589_v11, %v588_v53  ;;  %v666_v13 = vrot.slane %v665_v30, 2  ;;  %v2562_v11 = vshll.u32 %v2423_v59, 16  ;;  %v870_v53 = vadd.s32 120, %v7096_v47  ;;  %11672 = vst [vmem:[#allocation62_spill] sm:$0xff] %v7731_v18  ;;  %vm1353_vm1 = vmpackc.low %vm7756_vm15, %vm7756_vm15  ;;  %v6588_v18 = vld [vmem:[#allocation3 + $0x28] sm:$0xff] }
 0x152   : > { %v1548_v59 = vshrl.u32 %v1383_v2, 16  ;;  %11679 = vst [vmem:[#allocation65_spill] sm:$0xff] %v7771_v16  ;;  %v882_v0 = vadd.s32 216, %v7096_v47 }
 0x153   : > { %v591_v32 = vrot.slane %v590_v60, 1  ;;  %v667_v50 = vadd.f32 %v666_v13, %v665_v30  ;;  %v1544_v13 = vshll.u32 %v1383_v2, 16  ;;  %v996_v22 = vand.u32 15, %v870_v53  ;;  %v6589_v53 = vld [vmem:[#allocation3 + $0x30] sm:$0xff] }
 0x154   : > { %v2564_v3 = vor.u32 %v2562_v11, %v7716_v35  ;;  %v1651_v2 = vor.u32 %v1650_v6, %v7722_v58  ;;  %v1550_v12 = vrot.slane %v1548_v59, 4  ;;  %4374 = vmatpush.bf16.msrb.mxu0 %v6589_v53  ;;  %v886_v6 = vadd.s32 248, %v7096_v47 }
 0x155   : > { %v592_v14 = vadd.f32 %v591_v32, %v590_v60  ;;  %v668_v9 = vrot.slane %v667_v50, 1  ;;  %v7739_v32 = vsel %vm7184_vm6, %v1532_v7, %v7146_v20  ;;  %v2435_v60 = vsel %vm2403_vm14, 65537, %v11621_v8 }
 0x156   : > { %v7752_v7 = vrot.slane %v1544_v13, 5  ;;  %vm7763_vm0 = vcmp.ne.s32.totalorder %v996_v22, 15  ;;  %v1652_v11 = vrot.slane %v1651_v2, 4  ;;  %v2670_v59 = vshll.u32 %v2435_v60, 16 }
 0x157   : > { %v7734_v23 = vmul.f32 %v7720_v24, %v592_v14  ;;  %v669_v10 = vadd.f32 %v668_v9, %v667_v50  ;;  %v7750_v50 = vsel %vm7196_vm7, %v7177_v56, %v2654_v29  ;;  %v881_v14 = vadd.s32 208, %v7096_v47  ;;  %vm2393_vm2 = vmpackc.low %vm7763_vm0, %vm7763_vm0 }
 0x158   : > { %11673 = vst [vmem:[#allocation63_spill] sm:$0xff] %v7750_v50  ;;  %v2667_v9 = vshrl.u32 %v2435_v60, 16  ;;  %v1551_v22 = vor.u32 %v1550_v12, %v7752_v7  ;;  %v2566_v29 = vrot.slane %v7716_v35, 4  ;;  %v7798_v60 = vsel %vm7184_vm6, %v1652_v11, %v7146_v20  ;;  %4375 = vmatpush.bf16.msrb.mxu0 %v6588_v18 }
 0x159   : > { %v670_v21 = vmul.f32 %v669_v10, %v7720_v24  ;;  %v671_v19 = vmul.f32 %v7734_v23, %v7734_v23  ;;  %11674 = vst [vmem:[#allocation64_spill] sm:$0xff] %v7752_v7  ;;  %v1073_v2 = vand.u32 15, %v881_v14  ;;  %v1385_v14 = vsel %vm1353_vm1, 65537, %v11621_v8 }
 0x15a   : > { %v7783_v53 = vrot.slane %v2667_v9, 7  ;;  %11681 = vst [vmem:[#allocation67_spill] sm:$0xff] %v7798_v60  ;;  %v884_v9 = vadd.s32 232, %v7096_v47  ;;  %v1552_v12 = vrot.slane %v1551_v22, 4  ;;  %v7813_v11 = vsel %vm7196_vm7, %v2566_v29, %v7175_v54 }
 0x15b   : > { %v672_v10 = vsub.f32 %v670_v21, %v671_v19  ;;  %v7776_v19 = vsel %vm7196_vm7, %v7177_v56, %v2564_v3  ;;  %vm7805_vm3 = vcmp.ne.s32.totalorder %v1073_v2, 0  ;;  %11684 = vst [vmem:[#allocation68_spill] sm:$0xff] %v7813_v11  ;;  %v1080_v30 = vand.u32 15, %v882_v0 }
 0x15c   : > { %11680 = vst [vmem:[#allocation66_spill] sm:$0xff] %v7776_v19  ;;  %v2672_v24 = vor.u32 %v2670_v59, %v7783_v53  ;;  %v1564_v58 = vshll.u32 %v1385_v14, 16  ;;  %vm1363_vm4 = vmpackc.low %vm7805_vm3, %vm7805_vm3  ;;  %v1094_v22 = vand.u32 15, %v884_v9  ;;  %v885_v29 = vadd.s32 240, %v7096_v47 }
 0x15d   : > { %v673_v21 = vmax.f32 %v672_v10, 0.0  ;;  %v883_v10 = vadd.s32 224, %v7096_v47  ;;  %v1568_v7 = vshrl.u32 %v1385_v14, 16  ;;  %v1108_v19 = vand.u32 15, %v886_v6 }
 0x15e   : > { %v7833_v35 = vsel %vm7196_vm7, %v7177_v56, %v2672_v24  ;;  %v2674_v47 = vrot.slane %v7783_v53, 4  ;;  %vm7836_vm5 = vcmp.ne.s32.totalorder %v1080_v30, 15  ;;  %v1566_v14 = vrot.slane %v1564_v58, 5 }
 0x15f   : > { %v7789_v3 = vadd.f32 1e-05, %v673_v21  ;;  %v2425_v21 = vsel %vm2393_vm2, 65537, %v11621_v8  ;;  %v1087_v2 = vand.u32 15, %v883_v10  ;;  %v7828_v10 = vsel %vm7184_vm6, %v1552_v12, %v7146_v20  ;;  %11686 = vst [vmem:[#allocation70_spill] sm:$0xff] %v7833_v35  ;;  %vm2405_vm10 = vmpackc.low %vm7836_vm5, %vm7836_vm5 }
 0x160   : > { %v2577_v50 = vshrl.u32 %v2425_v21, 16  ;;  %11685 = vst [vmem:[#allocation69_spill] sm:$0xff] %v7828_v10  ;;  %v1395_v6 = vsel %vm1363_vm4, 65537, %v11621_v8  ;;  %v2580_v24 = vshll.u32 %v2425_v21, 16  ;;  %vm7848_vm9 = vcmp.ne.s32.totalorder %v1094_v22, 15 }
 0x161   : > { %6776 = vrsqrt.f32 %v7789_v3  ;;  %vm7841_vm8 = vcmp.ne.s32.totalorder %v1087_v2, 0  ;;  %v1101_v30 = vand.u32 15, %v885_v29  ;;  %v7855_v58 = vsel %vm7184_vm6, %v7241_v27, %v1566_v14  ;;  %vm2407_vm13 = vmpackc.low %vm7848_vm9, %vm7848_vm9 }
 0x162   : > { %v7846_v59 = vrot.slane %v2577_v50, 7  ;;  %11693 = vst [vmem:[#allocation71_spill] sm:$0xff] %v7855_v58  ;;  %v1570_v18 = vrot.slane %v1568_v7, 4  ;;  %vm7860_vm11 = vcmp.ne.s32.totalorder %v1108_v19, 15  ;;  %v1664_v22 = vshll.u32 %v1395_v6, 16  ;;  %vm1365_vm12 = vmpackc.low %vm7841_vm8, %vm7841_vm8 }
 0x163   : > { %v1668_v29 = vshrl.u32 %v1395_v6, 16  ;;  %v7874_v19 = vsel %vm7196_vm7, %v2674_v47, %v7175_v54  ;;  %v2437_v2 = vsel %vm2405_vm10, 65537, %v11621_v8  ;;  %vm7882_vm14 = vcmp.ne.s32.totalorder %v1101_v30, 0  ;;  %vm2409_vm15 = vmpackc.low %vm7860_vm11, %vm7860_vm11  ;;  %v6587_v30 = vld [vmem:[#allocation3 + $0x20] sm:$0xff] }
 0x164   : > { %11696 = vst [vmem:[#allocation72_spill] sm:$0xff] %v7874_v19  ;;  %v2582_v0 = vor.u32 %v2580_v24, %v7846_v59  ;;  %v1571_v47 = vor.u32 %v1570_v18, %v1566_v14  ;;  %v1397_v16 = vsel %vm1365_vm12, 65537, %v11621_v8  ;;  %v7891_v6 = vrot.slane %v1664_v22, 5  ;;  %vm1367_vm1 = vmpackc.low %vm7882_vm14, %vm7882_vm14  ;;  %v685_v14 = vld [vmem:[%s11205_s2] sm:$0x1]  ;;  %4376 = vmatpush.bf16.msrb.mxu0 %v6587_v30 }
 0x165   : > { %v1670_v24 = vrot.slane %v1668_v29, 4  ;;  %v2439_v21 = vsel %vm2407_vm13, 65537, %v11621_v8  ;;  %v2685_v27 = vshrl.u32 %v2437_v2, 16  ;;  %vm681_vm2 = vweird.f32 %v7789_v3 }
 0x166   : > { %11699 = vst [vmem:[#allocation73_spill] sm:$0xff] %v7891_v6  ;;  %v2441_v18 = vsel %vm2409_vm15, 65537, %v11621_v8  ;;  %v2703_v35 = vshrl.u32 %v2439_v21, 16  ;;  %v2584_v60 = vrot.slane %v7846_v59, 4  ;;  %v2688_v58 = vshll.u32 %v2437_v2, 16 }
 0x167   : > { %v6777_v13 = vpop.eup %6776  ;;  %v2721_v22 = vshrl.u32 %v2441_v18, 16  ;;  %v1671_v30 = vor.u32 %v1670_v24, %v7891_v6  ;;  %v2687_v19 = vrot.slane %v2685_v27, 7  ;;  %v11855_v27 = vunpack.c.h.b16 %v7691_v63 }
 0x168   : > { %v676_v12 = vmul.f32 %v6777_v13, %v7789_v3  ;;  %vm682_vm0 = vweird.f32 %v6777_v13  ;;  %v1572_v3 = vrot.slane %v1571_v47, 4 }
 0x169   : > { %vm683_vm3 = vmor %vm681_vm2, %vm682_vm0  ;;  %v7928_v24 = vrot.slane %v2721_v22, 7  ;;  %v1672_v6 = vrot.slane %v1671_v30, 4 }
 0x16a   : > { %v677_v53 = vmul.f32 %v6777_v13, %v676_v12 }
 0x16b   : > { %11702 = vst [vmem:[#allocation76_spill] sm:$0xff] %v7928_v24 }
 0x16c   : > { %v678_v12 = vmul.f32 0.5, %v677_v53  ;;  %v1688_v53 = vshrl.u32 %v1397_v16, 16 }
 0x16e   : > { %v679_v9 = vsub.f32 1.5, %v678_v12  ;;  %v1684_v12 = vshll.u32 %v1397_v16, 16  ;;  %v1399_v16 = vsel %vm1367_vm1, 65537, %v11621_v8  ;;  %v1690_v47 = vrot.slane %v1688_v53, 4 }
 0x16f   : > { %v2705_v8 = vrot.slane %v2703_v35, 7  ;;  %v1708_v10 = vshrl.u32 %v1399_v16, 16 }
 0x170   : > { %v680_v50 = vmul.f32 %v6777_v13, %v679_v9  ;;  %v7908_v9 = vsel %vm7196_vm7, %v7177_v56, %v2582_v0  ;;  %v2598_v0 = vshll.u32 %v7298_v33, 16  ;;  %v7922_v59 = vrot.slane %v1684_v12, 5 }
 0x171   : > { %11700 = vst [vmem:[#allocation74_spill] sm:$0xff] %v7908_v9  ;;  %v2724_v33 = vshll.u32 %v2441_v18, 16  ;;  %v7933_v12 = vsel %vm7184_vm6, %v1572_v3, %v7146_v20  ;;  %v1710_v3 = vrot.slane %v1708_v10, 4  ;;  %v11768_v9 = vld [vmem:[#allocation31_spill] sm:$0xff] }
 0x172   : > { %v684_v11 = vsel %vm683_vm3, %v6777_v13, %v680_v50  ;;  %v687_v13 = vld [vmem:[%s11206_s3] sm:$0x1]  ;;  %11701 = vst [vmem:[#allocation75_spill] sm:$0xff] %v7922_v59  ;;  %v2600_v35 = vor.u32 %v2598_v0, %v7337_v61  ;;  %v1691_v53 = vor.u32 %v1690_v47, %v7922_v59  ;;  %v11769_v57 = vunpack.c.l.b16 %v11768_v9 }
 0x173   : > { %v686_v29 = vmul.f32 %v685_v14, %v684_v11  ;;  %v2706_v11 = vshll.u32 %v2439_v21, 16  ;;  %v1704_v14 = vshll.u32 %v1399_v16, 16  ;;  %v2690_v21 = vor.u32 %v2688_v58, %v2687_v19 }
 0x174   : > { %v2726_v61 = vor.u32 %v2724_v33, %v7928_v24  ;;  %v7955_v58 = vsel %vm7184_vm6, %v1672_v6, %v7146_v20  ;;  %v7968_v47 = vsel %vm7196_vm7, %v7177_v56, %v2600_v35  ;;  %v11713_v35 = vld [vmem:[#allocation21_spill] sm:$0xff]  ;;  %v11961_v59 = vmov 0 }
 0x175   : > { %v688_v50 = vmul.f32 %v686_v29, %v7734_v23  ;;  %v7925_v7 = vperm.slane %v686_v29, 0  ;;  %v7938_v23 = vsel %vm7196_vm7, %v2584_v60, %v7175_v54  ;;  %v2692_v29 = vrot.slane %v2687_v19, 4  ;;  %11705 = vst [vmem:[#allocation79_spill] sm:$0xff] %v7955_v58  ;;  %v11761_v58 = vld [vmem:[#allocation30_spill] sm:$0xff] }
 0x176   : > { %11703 = vst [vmem:[#allocation77_spill] sm:$0xff] %v7938_v23  ;;  %v2708_v16 = vor.u32 %v2706_v11, %v2705_v8  ;;  %v7946_v30 = vrot.slane %v1704_v14, 5  ;;  %v7963_v10 = vsel %vm7196_vm7, %v7177_v56, %v2690_v21  ;;  %v1692_v11 = vrot.slane %v1691_v53, 4 }
 0x177   : > { %v689_v2 = vsub.f32 %v687_v13, %v688_v50  ;;  %v722_v22 = vmul.f32 %v7925_v7, %v7637_v28  ;;  %11706 = vst [vmem:[#allocation80_spill] sm:$0xff] %v7963_v10  ;;  %v7973_v6 = vsel %vm7196_vm7, %v2692_v29, %v7175_v54  ;;  %v2710_v21 = vrot.slane %v2705_v8, 4  ;;  %v11716_v13 = vld [vmem:[#allocation38_spill] sm:$0xff] }
 0x178   : > { %11704 = vst [vmem:[#allocation78_spill] sm:$0xff] %v7946_v30  ;;  %v1711_v33 = vor.u32 %v1710_v3, %v7946_v30  ;;  %v2727_v53 = vsel %vm7196_vm7, %v7177_v56, %v2726_v61  ;;  %v7993_v8 = vsel %vm7184_vm6, %v1692_v11, %v7146_v20  ;;  %v691_v11 = vmul.f32 %v7925_v7, %v7066_v31  ;;  %v11714_v3 = vld [vmem:[#allocation29_spill] sm:$0xff] }
 0x179   : > { %v7944_v18 = vperm.slane %v689_v2, 0  ;;  %11707 = vst [vmem:[#allocation81_spill] sm:$0xff] %v7968_v47  ;;  %v7978_v2 = vsel %vm7196_vm7, %v7177_v56, %v2708_v16  ;;  %v2946_v16 = vunpack.c.l.b16 %v2727_v53  ;;  %v2947_v19 = vunpack.c.h.b16 %v2727_v53 }
 0x17a   : > { %11708 = vst [vmem:[#allocation82_spill] sm:$0xff] %v7973_v6  ;;  %v7999_v29 = vrot.slane %v1711_v33, 4  ;;  %v694_v33 = vmul.f32 %v7925_v7, %v7078_v37  ;;  %v695_v61 = vmul.f32 %v7925_v7, %v7082_v39  ;;  %v697_v53 = vmul.f32 %v7925_v7, %v7088_v42 }
 0x17b   : > { %v757_v50 = vadd.f32 %v7944_v18, %v722_v22  ;;  %11709 = vst [vmem:[#allocation83_spill] sm:$0xff] %v7978_v2  ;;  %v698_v31 = vmul.f32 %v7925_v7, %v7092_v44  ;;  %v701_v37 = vmul.f32 %v7925_v7, %v7126_v4  ;;  %v702_v39 = vmul.f32 %v7925_v7, %v7157_v26  ;;  %v11715_v22 = vld [vmem:[#allocation34_spill] sm:$0xff] }
 0x17c   : > { %11710 = vst [vmem:[#allocation84_spill] sm:$0xff] %v7993_v8  ;;  %v704_v42 = vmul.f32 %v7925_v7, %v11714_v3  ;;  %v705_v44 = vmul.f32 %v7925_v7, %v11715_v22  ;;  %v708_v4 = vmul.f32 %v7925_v7, %v7488_v15  ;;  %v8044_v26 = vmul.f32 %v7925_v7, %v7080_v38 }
 0x17d   : > { %v789_v14 = vmax.f32 %v757_v50, 0.0  ;;  %11711 = vst [vmem:[#allocation85_spill] sm:$0xff] %v7999_v29  ;;  %v8004_v50 = vsel %vm7196_vm7, %v2710_v21, %v7175_v54  ;;  %v696_v21 = vmul.f32 %v7925_v7, %v7084_v40  ;;  %v703_v40 = vmul.f32 %v7925_v7, %v11713_v35 }
 0x17e   : > { %11712 = vst [vmem:[#allocation86_spill] sm:$0xff] %v8004_v50  ;;  %v8048_v35 = vmul.f32 %v7925_v7, %v7086_v41  ;;  %v8052_v22 = vmul.f32 %v7925_v7, %v7090_v43  ;;  %v8062_v38 = vmul.f32 %v7925_v7, %v7103_v52  ;;  %v729_v41 = vadd.f32 %v7944_v18, %v694_v33  ;;  %v11717_v52 = vld [vmem:[#allocation15_spill] sm:$0xff] }
 0x17f   : > { %v821_v0 = vpack.c.bf16 %v789_v14, %v789_v14  ;;  %v692_v14 = vmul.f32 %v7925_v7, %v7072_v34  ;;  %v699_v34 = vmul.f32 %v7925_v7, %v7098_v48  ;;  %v706_v48 = vmul.f32 %v7925_v7, %v11716_v13 }
 0x180   : > { %v726_v13 = vadd.f32 %v7944_v18, %v691_v11  ;;  %v8068_v43 = vmul.f32 %v7925_v7, %v7128_v5  ;;  %v8072_v11 = vmul.f32 %v7925_v7, %v7169_v49  ;;  %vm8080_vm4 = vcmp.ne.s32.totalorder %v2946_v16, %v11717_v52 }
 0x181   : > { %853 = vst [vmem:[#allocation2 + $0x190] sm:$0xf] %v821_v0  ;;  %v693_v0 = vmul.f32 %v7925_v7, %v7076_v36  ;;  %v700_v36 = vmul.f32 %v7925_v7, %v7105_v55  ;;  %v707_v55 = vmul.f32 %v7925_v7, %v7451_v25  ;;  %v727_v3 = vadd.f32 %v7944_v18, %v692_v14 }
 0x182   : > { %v8058_v25 = vmul.f32 %v7925_v7, %v7094_v46  ;;  %v8076_v46 = vmul.f32 %v7925_v7, %v7253_v51  ;;  %v730_v14 = vadd.f32 %v7944_v18, %v695_v61  ;;  %v8091_v5 = vmul.f32 %v7925_v7, %v7326_v62 }
 0x183   : > { %v728_v15 = vadd.f32 %v7944_v18, %v693_v0  ;;  %v11720_v0 = vld [vmem:[#allocation20_spill] sm:$0xff]  ;;  %v8095_v49 = vmul.f32 %v7925_v7, %v7404_v17  ;;  %v8099_v51 = vmul.f32 %v7925_v7, %v7465_v45  ;;  %v731_v16 = vadd.f32 %v7944_v18, %v696_v21  ;;  %v11731_v17 = vld [vmem:[#allocation49_spill] sm:$0xff] }
 0x184   : > { %vm8085_vm5 = vcmp.ne.s32.totalorder %v2947_v19, %v11720_v0  ;;  %v11723_v19 = vunpack.c.l.b16 %v7175_v54  ;;  %v11724_v61 = vmov 0  ;;  %v11727_v62 = vunpack.c.h.b16 %v7175_v54 }
 0x185   : > { %v11728_v28 = vmov 0  ;;  %v8118_v45 = vmul.f32 %v7925_v7, %v11731_v17  ;;  %v732_v21 = vadd.f32 %v7944_v18, %v697_v53  ;;  %v758_v60 = vmax.f32 %v726_v13, 0.0  ;;  %v11739_v17 = vld [vmem:[#allocation53_spill] sm:$0xff] }
 0x186   : > { %vm8105_vm8 = vcmp.ne.s32.totalorder %v11723_v19, %v11717_v52  ;;  %vm8112_vm9 = vcmp.ne.s32.totalorder %v11727_v62, %v11720_v0  ;;  %v759_v24 = vmax.f32 %v727_v3, 0.0  ;;  %v11732_v19 = vld [vmem:[#allocation19_spill] sm:$0xff]  ;;  %v8137_v56 = vmul.f32 %v7925_v7, %v11739_v17 }
 0x187   : > { %v11725_v61 = vsel %vm8105_vm8, 4294967295, %v11724_v61  ;;  %v11729_v28 = vsel %vm8112_vm9, 4294967295, %v11728_v28  ;;  %v11733_v30 = vunpack.c.l.b16 %v11732_v19  ;;  %v11736_v54 = vunpack.c.h.b16 %v11732_v19 }
 0x188   : > { %11726 = vst [vmem:[#allocation21_spill] sm:$0xff] %v11725_v61  ;;  %v733_v53 = vadd.f32 %v7944_v18, %v698_v31  ;;  %v760_v13 = vmax.f32 %v728_v15, 0.0  ;;  %v761_v3 = vmax.f32 %v729_v41, 0.0  ;;  %v734_v7 = vadd.f32 %v7944_v18, %v699_v34 }
 0x189   : > { %11730 = vst [vmem:[#allocation29_spill] sm:$0xff] %v11729_v28  ;;  %vm8124_vm10 = vcmp.ne.s32.totalorder %v11733_v30, %v11717_v52  ;;  %vm8131_vm11 = vcmp.ne.s32.totalorder %v11736_v54, %v11720_v0  ;;  %v11740_v30 = vld [vmem:[#allocation22_spill] sm:$0xff]  ;;  %v8156_v31 = vadd.f32 %v7944_v18, %v700_v36  ;;  %v8159_v15 = vadd.f32 %v7944_v18, %v701_v37 }
 0x18a   : > { %v11741_v1 = vunpack.c.l.b16 %v11740_v30  ;;  %v11744_v19 = vunpack.c.h.b16 %v11740_v30  ;;  %v762_v41 = vmax.f32 %v730_v14, 0.0  ;;  %v11749_v6 = vmov 0 }
 0x18b   : > { %v8176_v34 = vadd.f32 %v7944_v18, %v702_v39  ;;  %v8179_v36 = vadd.f32 %v7944_v18, %v703_v40  ;;  %v8182_v37 = vadd.f32 %v7944_v18, %v704_v42  ;;  %v763_v14 = vmax.f32 %v731_v16, 0.0 }
 0x18c   : > { %vm8143_vm12 = vcmp.ne.s32.totalorder %v11741_v1, %v11717_v52  ;;  %vm8150_vm13 = vcmp.ne.s32.totalorder %v11744_v19, %v11720_v0  ;;  %v11747_v1 = vld [vmem:[#allocation23_spill] sm:$0xff]  ;;  %v11752_v19 = vmov 0  ;;  %v8199_v40 = vadd.f32 %v7944_v18, %v705_v44 }
 0x18d   : > { %v11748_v17 = vunpack.c.l.b16 %v11747_v1  ;;  %v11751_v30 = vunpack.c.h.b16 %v11747_v1  ;;  %v764_v42 = vmax.f32 %v732_v21, 0.0  ;;  %v791_v16 = vpack.c.bf16 %v759_v24, %v759_v24 }
 0x18e   : > { %v11762_v23 = vunpack.c.l.b16 %v11761_v58  ;;  %v8216_v44 = vadd.f32 %v7944_v18, %v706_v48  ;;  %v765_v21 = vmax.f32 %v733_v53, 0.0  ;;  %v793_v24 = vpack.c.bf16 %v761_v3, %v761_v3 }
 0x18f   : > { %vm8164_vm14 = vcmp.ne.s32.totalorder %v11748_v17, %v11717_v52  ;;  %vm8171_vm15 = vcmp.ne.s32.totalorder %v11751_v30, %v11720_v0  ;;  %v11754_v17 = vld [vmem:[#allocation26_spill] sm:$0xff]  ;;  %v790_v30 = vpack.c.bf16 %v758_v60, %v758_v60  ;;  %v792_v60 = vpack.c.bf16 %v760_v13, %v760_v13  ;;  %823 = vst [vmem:[#allocation2 + $0x28] sm:$0xf] %v791_v16 }
 0x190   : > { %v11750_v6 = vsel %vm8164_vm14, 4294967295, %v11749_v6  ;;  %v11753_v19 = vsel %vm8171_vm15, 4294967295, %v11752_v19  ;;  %v11755_v10 = vunpack.c.l.b16 %v11754_v17  ;;  %v11758_v1 = vunpack.c.h.b16 %v11754_v17  ;;  %825 = vst [vmem:[#allocation2 + $0x40] sm:$0xf] %v793_v24 }
 0x191   : > { %vm8204_vm2 = vcmp.ne.s32.totalorder %v11762_v23, %v11717_v52  ;;  %v11765_v17 = vunpack.c.h.b16 %v11761_v58  ;;  %vm8221_vm7 = vcmp.ne.s32.totalorder %v11769_v57, %v11717_v52  ;;  %v11770_v23 = vmov 0  ;;  %822 = vst [vmem:[#allocation2 + $0x1c] sm:$0xf] %v790_v30  ;;  %v11775_v57 = vld [vmem:[#allocation32_spill] sm:$0xff] }
 0x192   : > { %vm8187_vm0 = vcmp.ne.s32.totalorder %v11755_v10, %v11717_v52  ;;  %vm8194_vm1 = vcmp.ne.s32.totalorder %v11758_v1, %v11720_v0  ;;  %v11763_v10 = vmov 0  ;;  %v11766_v1 = vmov 0  ;;  %824 = vst [vmem:[#allocation2 + $0x34] sm:$0xf] %v792_v60  ;;  %v11797_v60 = vld [vmem:[#allocation44_spill] sm:$0xff] }
 0x193   : > { %v11764_v10 = vsel %vm8204_vm2, 4294967295, %v11763_v10  ;;  %vm8211_vm3 = vcmp.ne.s32.totalorder %v11765_v17, %v11720_v0  ;;  %v11771_v23 = vsel %vm8221_vm7, 4294967295, %v11770_v23  ;;  %v11772_v58 = vunpack.c.h.b16 %v11768_v9 }
 0x194   : > { %v11767_v1 = vsel %vm8211_vm3, 4294967295, %v11766_v1  ;;  %v11773_v17 = vmov 0  ;;  %v8233_v48 = vadd.f32 %v7944_v18, %v707_v55  ;;  %v8236_v53 = vadd.f32 %v7944_v18, %v708_v4 }
 0x195   : > { %vm8228_vm6 = vcmp.ne.s32.totalorder %v11772_v58, %v11720_v0  ;;  %v766_v13 = vmax.f32 %v734_v7, 0.0  ;;  %v794_v3 = vpack.c.bf16 %v762_v41, %v762_v41  ;;  %v11776_v29 = vunpack.c.l.b16 %v11775_v57  ;;  %v11782_v41 = vld [vmem:[#allocation35_spill] sm:$0xff] }
 0x196   : > { %v11774_v17 = vsel %vm8228_vm6, 4294967295, %v11773_v17  ;;  %v11777_v20 = vmov 0  ;;  %v11779_v9 = vunpack.c.h.b16 %v11775_v57  ;;  %v11780_v58 = vmov 0 }
 0x197   : > { %vm8241_vm7 = vcmp.ne.s32.totalorder %v11776_v29, %v11717_v52  ;;  %v8254_v55 = vadd.f32 %v7944_v18, %v8044_v26  ;;  %v8258_v4 = vadd.f32 %v7944_v18, %v8048_v35  ;;  %v767_v29 = vmax.f32 %v8156_v31, 0.0  ;;  %826 = vst [vmem:[#allocation2 + $0x4c] sm:$0xf] %v794_v3 }
 0x198   : > { %v11778_v20 = vsel %vm8241_vm7, 4294967295, %v11777_v20  ;;  %vm8248_vm6 = vcmp.ne.s32.totalorder %v11779_v9, %v11720_v0  ;;  %v795_v7 = vpack.c.bf16 %v763_v14, %v763_v14  ;;  %v11783_v30 = vunpack.c.l.b16 %v11782_v41 }
 0x199   : > { %v11781_v58 = vsel %vm8248_vm6, 4294967295, %v11780_v58  ;;  %v11784_v57 = vmov 0  ;;  %v11786_v9 = vunpack.c.h.b16 %v11782_v41  ;;  %v11787_v26 = vmov 0 }
 0x19a   : > { %vm8264_vm7 = vcmp.ne.s32.totalorder %v11783_v30, %v11717_v52  ;;  %v8277_v35 = vadd.f32 %v7944_v18, %v8052_v22  ;;  %v8281_v31 = vadd.f32 %v7944_v18, %v8058_v25  ;;  %v768_v14 = vmax.f32 %v8159_v15, 0.0  ;;  %v11789_v30 = vld [vmem:[#allocation45_spill] sm:$0xff]  ;;  %827 = vst [vmem:[#allocation2 + $0x58] sm:$0xf] %v795_v7 }
 0x19b   : > { %v11785_v57 = vsel %vm8264_vm7, 4294967295, %v11784_v57  ;;  %vm8271_vm6 = vcmp.ne.s32.totalorder %v11786_v9, %v11720_v0  ;;  %v796_v16 = vpack.c.bf16 %v764_v42, %v764_v42  ;;  %v11790_v50 = vunpack.c.l.b16 %v11789_v30 }
 0x19c   : > { %v11788_v26 = vsel %vm8271_vm6, 4294967295, %v11787_v26  ;;  %v11791_v41 = vmov 0  ;;  %v11794_v9 = vunpack.c.h.b16 %v11789_v30  ;;  %v11795_v22 = vmov 0 }
 0x19d   : > { %vm8287_vm7 = vcmp.ne.s32.totalorder %v11790_v50, %v11717_v52  ;;  %v8300_v25 = vadd.f32 %v7944_v18, %v8062_v38  ;;  %v8304_v15 = vadd.f32 %v7944_v18, %v8068_v43  ;;  %v769_v50 = vmax.f32 %v8176_v34, 0.0  ;;  %v1303_v43 = vld [vmem:[#allocation2 + $0x190] sm:$0xf]  ;;  %828 = vst [vmem:[#allocation2 + $0x64] sm:$0xf] %v796_v16 }
 0x19e   : > { %v11792_v41 = vsel %vm8287_vm7, 4294967295, %v11791_v41  ;;  %vm8294_vm6 = vcmp.ne.s32.totalorder %v11794_v9, %v11720_v0  ;;  %v797_v42 = vpack.c.bf16 %v765_v21, %v765_v21  ;;  %v11799_v30 = vmov 0 }
 0x19f   : > { %11793 = vst [vmem:[#allocation34_spill] sm:$0xff] %v11792_v41  ;;  %v11796_v22 = vsel %vm8294_vm6, 4294967295, %v11795_v22  ;;  %v11798_v41 = vunpack.c.l.b16 %v11797_v60  ;;  %v11801_v9 = vunpack.c.h.b16 %v11797_v60  ;;  %v11802_v38 = vmov 0  ;;  %v11805_v60 = vld [vmem:[#allocation39_spill] sm:$0xff] }
 0x1a0   : > { %v8327_v34 = vadd.f32 %v7944_v18, %v8072_v11  ;;  %v8331_v21 = vadd.f32 %v7944_v18, %v8076_v46  ;;  %v770_v24 = vmax.f32 %v8179_v36, 0.0  ;;  %v11810_v11 = vunpack.c.h.b16 %v11805_v60  ;;  %v11814_v36 = vld [vmem:[#allocation52_spill] sm:$0xff]  ;;  %829 = vst [vmem:[#allocation2 + $0x70] sm:$0xf] %v797_v42 }
 0x1a1   : > { %vm8310_vm7 = vcmp.ne.s32.totalorder %v11798_v41, %v11717_v52  ;;  %vm8317_vm6 = vcmp.ne.s32.totalorder %v11801_v9, %v11720_v0  ;;  %v798_v41 = vpack.c.bf16 %v766_v13, %v766_v13  ;;  %v11806_v9 = vunpack.c.l.b16 %v11805_v60 }
 0x1a2   : > { %v11800_v30 = vsel %vm8310_vm7, 4294967295, %v11799_v30  ;;  %v11803_v38 = vsel %vm8317_vm6, 4294967295, %v11802_v38  ;;  %vm8348_vm7 = vcmp.ne.s32.totalorder %v11810_v11, %v11720_v0  ;;  %v11811_v46 = vmov 0 }
 0x1a3   : > { %11804 = vst [vmem:[#allocation38_spill] sm:$0xff] %v11803_v38  ;;  %vm8341_vm3 = vcmp.ne.s32.totalorder %v11806_v9, %v11717_v52  ;;  %v11807_v38 = vmov 0  ;;  %v11812_v46 = vsel %vm8348_vm7, 4294967295, %v11811_v46  ;;  %v11815_v13 = vunpack.c.l.b16 %v11814_v36  ;;  %vm12039_vm7 = vmpackc.low %vm8150_vm13, %vm8143_vm12 }
 0x1a4   : > { %v11808_v38 = vsel %vm8341_vm3, 4294967295, %v11807_v38  ;;  %11813 = vst [vmem:[#allocation20_spill] sm:$0xff] %v11812_v46  ;;  %v11816_v3 = vmov 0  ;;  %v11819_v9 = vunpack.c.h.b16 %v11814_v36  ;;  %v11820_v61 = vmov 0  ;;  %v11825_v36 = vld [vmem:[#allocation51_spill] sm:$0xff]  ;;  %v12033_v46 = vld [vmem:[#allocation29_spill] sm:$0xff] }
 0x1a5   : > { %11809 = vst [vmem:[#allocation15_spill] sm:$0xff] %v11808_v38  ;;  %vm8355_vm2 = vcmp.ne.s32.totalorder %v11815_v13, %v11717_v52  ;;  %v8368_v60 = vadd.f32 %v7944_v18, %v8091_v5  ;;  %v8372_v11 = vadd.f32 %v7944_v18, %v8095_v49  ;;  %v771_v13 = vmax.f32 %v8182_v37, 0.0  ;;  %v11833_v37 = vld [vmem:[#allocation54_spill] sm:$0xff] }
 0x1a6   : > { %v11817_v3 = vsel %vm8355_vm2, 4294967295, %v11816_v3  ;;  %vm8362_vm6 = vcmp.ne.s32.totalorder %v11819_v9, %v11720_v0  ;;  %v799_v28 = vpack.c.bf16 %v767_v29, %v767_v29  ;;  %v11826_v9 = vunpack.c.l.b16 %v11825_v36  ;;  %830 = vst [vmem:[#allocation2 + $0x7c] sm:$0xf] %v798_v41 }
 0x1a7   : > { %11818 = vst [vmem:[#allocation49_spill] sm:$0xff] %v11817_v3  ;;  %v11821_v61 = vsel %vm8362_vm6, 4294967295, %v11820_v61  ;;  %v11829_v5 = vunpack.c.h.b16 %v11825_v36  ;;  %v11830_v49 = vmov 0  ;;  %v11834_v29 = vunpack.c.l.b16 %v11833_v37 }
 0x1a8   : > { %11822 = vst [vmem:[#allocation19_spill] sm:$0xff] %v11821_v61  ;;  %vm8382_vm9 = vcmp.ne.s32.totalorder %v11826_v9, %v11717_v52  ;;  %v11827_v61 = vmov 0  ;;  %v11835_v7 = vmov 0  ;;  %v11837_v9 = vunpack.c.h.b16 %v11833_v37  ;;  %v11843_v37 = vld [vmem:[#allocation57_spill] sm:$0xff] }
 0x1a9   : > { %11823 = vst [vmem:[#allocation53_spill] sm:$0xff] %v8368_v60  ;;  %v11828_v61 = vsel %vm8382_vm9, 4294967295, %v11827_v61  ;;  %vm8389_vm6 = vcmp.ne.s32.totalorder %v11829_v5, %v11720_v0  ;;  %vm8396_vm2 = vcmp.ne.s32.totalorder %v11834_v29, %v11717_v52  ;;  %v11838_v3 = vmov 0  ;;  %vm11850_vm9 = vmpackc.low %vm8085_vm5, %vm8080_vm4 }
 0x1aa   : > { %11824 = vst [vmem:[#allocation22_spill] sm:$0xff] %v8372_v11  ;;  %v11831_v49 = vsel %vm8389_vm6, 4294967295, %v11830_v49  ;;  %v11836_v7 = vsel %vm8396_vm2, 4294967295, %v11835_v7  ;;  %vm8403_vm8 = vcmp.ne.s32.totalorder %v11837_v9, %v11720_v0  ;;  %v8409_v36 = vadd.f32 %v7944_v18, %v8099_v51 }
 0x1ab   : > { %11832 = vst [vmem:[#allocation23_spill] sm:$0xff] %v11831_v49  ;;  %v11839_v3 = vsel %vm8403_vm8, 4294967295, %v11838_v3  ;;  %v8413_v5 = vadd.f32 %v7944_v18, %v8118_v45  ;;  %v772_v29 = vmax.f32 %v8199_v40, 0.0  ;;  %v800_v49 = vpack.c.bf16 %v768_v14, %v768_v14 }
 0x1ac   : > { %11840 = vst [vmem:[#allocation26_spill] sm:$0xff] %v11839_v3  ;;  %v11844_v9 = vunpack.c.l.b16 %v11843_v37  ;;  %v11845_v3 = vmov 0  ;;  %v11847_v51 = vunpack.c.h.b16 %v11843_v37  ;;  %v11848_v45 = vmov 0 }
 0x1ad   : > { %11841 = vst [vmem:[#allocation30_spill] sm:$0xff] %v8409_v36  ;;  %v8439_v40 = vsel %vm11850_vm9, %v1303_v43, 0  ;;  %v773_v14 = vmax.f32 %v8216_v44, 0.0  ;;  %v774_v16 = vmax.f32 %v8233_v48, 0.0  ;;  %v11852_v37 = vunpack.c.l.b16 %v7691_v63 }
 0x1ae   : > { %11842 = vst [vmem:[#allocation31_spill] sm:$0xff] %v8413_v5  ;;  %vm8423_vm8 = vcmp.ne.s32.totalorder %v11844_v9, %v11717_v52  ;;  %vm8430_vm6 = vcmp.ne.s32.totalorder %v11847_v51, %v11720_v0  ;;  %v801_v9 = vpack.c.bf16 %v769_v50, %v769_v50  ;;  %v11853_v33 = vmov 0 }
 0x1af   : > { %v11846_v3 = vsel %vm8423_vm8, 4294967295, %v11845_v3  ;;  %v11849_v45 = vsel %vm8430_vm6, 4294967295, %v11848_v45  ;;  %11851 = vst [vmem:[#allocation32_spill] sm:$0xff] %v8439_v40  ;;  %vm8450_vm6 = vcmp.ne.s32.totalorder %v11852_v37, %v11717_v52  ;;  %vm8457_vm4 = vcmp.ne.s32.totalorder %v11855_v27, %v11720_v0 }
 0x1b0   : > { %v11854_v33 = vsel %vm8450_vm6, 4294967295, %v11853_v33  ;;  %v11856_v44 = vmov 0  ;;  %v11858_v48 = vunpack.c.l.b16 %v7739_v32  ;;  %v11859_v50 = vmov 0  ;;  %831 = vst [vmem:[#allocation2 + $0x88] sm:$0xf] %v799_v28 }
 0x1b1   : > { %v11857_v44 = vsel %vm8457_vm4, 4294967295, %v11856_v44  ;;  %v11861_v42 = vunpack.c.h.b16 %v7739_v32  ;;  %v11862_v43 = vmov 0  ;;  %v775_v63 = vmax.f32 %v8236_v53, 0.0  ;;  %832 = vst [vmem:[#allocation2 + $0x94] sm:$0xf] %v800_v49 }
 0x1b2   : > { %vm8464_vm5 = vcmp.ne.s32.totalorder %v11858_v48, %v11717_v52  ;;  %v802_v27 = vpack.c.bf16 %v770_v24, %v770_v24  ;;  %v11864_v48 = vld [vmem:[#allocation62_spill] sm:$0xff]  ;;  %v11869_v51 = vmov 0  ;;  %v803_v40 = vpack.c.bf16 %v771_v13, %v771_v13  ;;  %833 = vst [vmem:[#allocation2 + $0xa0] sm:$0xf] %v801_v9 }
 0x1b3   : > { %v11860_v50 = vsel %vm8464_vm5, 4294967295, %v11859_v50  ;;  %vm8471_vm9 = vcmp.ne.s32.totalorder %v11861_v42, %v11720_v0  ;;  %v11865_v32 = vunpack.c.l.b16 %v11864_v48  ;;  %v11866_v42 = vmov 0  ;;  %v11903_v9 = vld [vmem:[#allocation46_spill] sm:$0xff] }
 0x1b4   : > { %v11863_v43 = vsel %vm8471_vm9, 4294967295, %v11862_v43  ;;  %v11868_v53 = vunpack.c.h.b16 %v11864_v48  ;;  %v11879_v41 = vmov 0  ;;  %v8519_v28 = vadd.f32 %v7944_v18, %v8137_v56  ;;  %834 = vst [vmem:[#allocation2 + $0xac] sm:$0xf] %v802_v27  ;;  %v11930_v27 = vld [vmem:[#allocation56_spill] sm:$0xff] }
 0x1b5   : > { %vm8485_vm5 = vcmp.ne.s32.totalorder %v11865_v32, %v11717_v52  ;;  %v11874_v32 = vld [vmem:[#allocation69_spill] sm:$0xff]  ;;  %v11888_v56 = vunpack.c.h.b16 %v7933_v12  ;;  %v11889_v18 = vmov 0  ;;  %v805_v13 = vpack.c.bf16 %v773_v14, %v773_v14  ;;  %835 = vst [vmem:[#allocation2 + $0xb8] sm:$0xf] %v803_v40 }
 0x1b6   : > { %v11867_v42 = vsel %vm8485_vm5, 4294967295, %v11866_v42  ;;  %vm8492_vm9 = vcmp.ne.s32.totalorder %v11868_v53, %v11720_v0  ;;  %v11875_v48 = vunpack.c.l.b16 %v11874_v32  ;;  %v11876_v53 = vmov 0  ;;  %11882 = vst [vmem:[#allocation44_spill] sm:$0xff] %v8519_v28 }
 0x1b7   : > { %v11870_v51 = vsel %vm8492_vm9, 4294967295, %v11869_v51  ;;  %v11878_v24 = vunpack.c.h.b16 %v11874_v32  ;;  %vm11883_vm5 = vnez %v11771_v23  ;;  %v11886_v32 = vmov 0  ;;  %837 = vst [vmem:[#allocation2 + $0xd0] sm:$0xf] %v805_v13  ;;  %v12018_v13 = vld [vmem:[#allocation70_spill] sm:$0xff] }
 0x1b8   : > { %11871 = vst [vmem:[#allocation35_spill] sm:$0xff] %v11870_v51  ;;  %vm8506_vm6 = vcmp.ne.s32.totalorder %v11875_v48, %v11717_v52  ;;  %v804_v51 = vpack.c.bf16 %v772_v29, %v772_v29  ;;  %v8523_v48 = vld [vmem:[#allocation2 + $0x1c] sm:$0xf]  ;;  %vm8539_vm4 = vcmp.ne.s32.totalorder %v11888_v56, %v11720_v0  ;;  %v11896_v56 = vmov 0 }
 0x1b9   : > { %v11877_v53 = vsel %vm8506_vm6, 4294967295, %v11876_v53  ;;  %vm8513_vm9 = vcmp.ne.s32.totalorder %v11878_v24, %v11720_v0  ;;  %vm11884_vm6 = vnez %v11774_v17  ;;  %v11885_v24 = vunpack.c.l.b16 %v7933_v12  ;;  %v11894_v12 = vld [vmem:[#allocation37_spill] sm:$0xff] }
 0x1ba   : > { %v11880_v41 = vsel %vm8513_vm9, 4294967295, %v11879_v41  ;;  %v11890_v18 = vsel %vm8539_vm4, 4294967295, %v11889_v18  ;;  %v11899_v49 = vunpack.c.h.b16 %v11894_v12  ;;  %v11900_v14 = vmov 0  ;;  %836 = vst [vmem:[#allocation2 + $0xc4] sm:$0xf] %v804_v51  ;;  %v12001_v51 = vld [vmem:[#allocation68_spill] sm:$0xff] }
 0x1bb   : > { %11881 = vst [vmem:[#allocation45_spill] sm:$0xff] %v11880_v41  ;;  %vm8532_vm9 = vcmp.ne.s32.totalorder %v11885_v24, %v11717_v52  ;;  %v8546_v41 = vld [vmem:[#allocation2 + $0x34] sm:$0xf]  ;;  %v11895_v24 = vunpack.c.l.b16 %v11894_v12  ;;  %v11904_v37 = vunpack.c.l.b16 %v11903_v9  ;;  %v11905_v29 = vmov 0  ;;  %v11912_v12 = vld [vmem:[#allocation71_spill] sm:$0xff] }
 0x1bc   : > { %v11887_v32 = vsel %vm8532_vm9, 4294967295, %v11886_v32  ;;  %11891 = vst [vmem:[#allocation39_spill] sm:$0xff] %v11890_v18  ;;  %vm8562_vm4 = vcmp.ne.s32.totalorder %v11899_v49, %v11720_v0  ;;  %v11909_v60 = vmov 0  ;;  %v11913_v49 = vunpack.c.l.b16 %v11912_v12  ;;  %v8597_v18 = vld [vmem:[#allocation2 + $0x4c] sm:$0xf] }
 0x1bd   : > { %vm8555_vm15 = vcmp.ne.s32.totalorder %v11895_v24, %v11717_v52  ;;  %v11901_v14 = vsel %vm8562_vm4, 4294967295, %v11900_v14  ;;  %vm8569_vm8 = vcmp.ne.s32.totalorder %v11904_v37, %v11717_v52  ;;  %v11908_v24 = vunpack.c.h.b16 %v11903_v9 }
 0x1be   : > { %v11897_v56 = vsel %vm8555_vm15, 4294967295, %v11896_v56  ;;  %11902 = vst [vmem:[#allocation51_spill] sm:$0xff] %v11901_v14  ;;  %v11906_v29 = vsel %vm8569_vm8, 4294967295, %v11905_v29  ;;  %vm8583_vm15 = vcmp.ne.s32.totalorder %v11913_v49, %v11717_v52  ;;  %v11916_v37 = vunpack.c.h.b16 %v11912_v12  ;;  %v11921_v12 = vld [vmem:[#allocation47_spill] sm:$0xff] }
 0x1bf   : > { %11898 = vst [vmem:[#allocation52_spill] sm:$0xff] %v11897_v56  ;;  %vm8576_vm14 = vcmp.ne.s32.totalorder %v11908_v24, %v11720_v0  ;;  %v11914_v56 = vmov 0  ;;  %v11917_v14 = vmov 0  ;;  %v11922_v49 = vunpack.c.l.b16 %v11921_v12 }
 0x1c0   : > { %11907 = vst [vmem:[#allocation54_spill] sm:$0xff] %v11906_v29  ;;  %v11910_v60 = vsel %vm8576_vm14, 4294967295, %v11909_v60  ;;  %v11915_v56 = vsel %vm8583_vm15, 4294967295, %v11914_v56  ;;  %vm8590_vm4 = vcmp.ne.s32.totalorder %v11916_v37, %v11720_v0  ;;  %v806_v29 = vpack.c.bf16 %v774_v16, %v774_v16 }
 0x1c1   : > { %11911 = vst [vmem:[#allocation57_spill] sm:$0xff] %v11910_v60  ;;  %v11918_v14 = vsel %vm8590_vm4, 4294967295, %v11917_v14  ;;  %vm8606_vm2 = vcmp.ne.s32.totalorder %v11922_v49, %v11717_v52  ;;  %v11923_v37 = vmov 0  ;;  %v11926_v24 = vunpack.c.h.b16 %v11921_v12  ;;  %v11939_v12 = vld [vmem:[#allocation66_spill] sm:$0xff] }
 0x1c2   : > { %v11924_v37 = vsel %vm8606_vm2, 4294967295, %v11923_v37  ;;  %v11927_v16 = vmov 0  ;;  %v11931_v60 = vunpack.c.l.b16 %v11930_v27  ;;  %v11932_v9 = vmov 0  ;;  %838 = vst [vmem:[#allocation2 + $0xdc] sm:$0xf] %v806_v29  ;;  %v12042_v29 = vld [vmem:[#allocation23_spill] sm:$0xff] }
 0x1c3   : > { %11925 = vst [vmem:[#allocation62_spill] sm:$0xff] %v11924_v37  ;;  %vm8613_vm4 = vcmp.ne.s32.totalorder %v11926_v24, %v11720_v0  ;;  %v11935_v49 = vunpack.c.h.b16 %v11930_v27  ;;  %v11936_v36 = vmov 0  ;;  %v11940_v24 = vunpack.c.l.b16 %v11939_v12 }
 0x1c4   : > { %v11928_v16 = vsel %vm8613_vm4, 4294967295, %v11927_v16  ;;  %vm8620_vm9 = vcmp.ne.s32.totalorder %v11931_v60, %v11717_v52  ;;  %v11941_v37 = vmov 0  ;;  %v11944_v60 = vunpack.c.h.b16 %v11939_v12  ;;  %v11952_v12 = vld [vmem:[#allocation34_spill] sm:$0xff] }
 0x1c5   : > { %11929 = vst [vmem:[#allocation69_spill] sm:$0xff] %v11928_v16  ;;  %v11933_v9 = vsel %vm8620_vm9, 4294967295, %v11932_v9  ;;  %vm8627_vm8 = vcmp.ne.s32.totalorder %v11935_v49, %v11720_v0  ;;  %vm8634_vm2 = vcmp.ne.s32.totalorder %v11940_v24, %v11717_v52  ;;  %v11945_v16 = vmov 0 }
 0x1c6   : > { %11934 = vst [vmem:[#allocation37_spill] sm:$0xff] %v11933_v9  ;;  %v11937_v36 = vsel %vm8627_vm8, 4294967295, %v11936_v36  ;;  %v11942_v37 = vsel %vm8634_vm2, 4294967295, %v11941_v37  ;;  %vm8641_vm4 = vcmp.ne.s32.totalorder %v11944_v60, %v11720_v0  ;;  %v11948_v9 = vld [vmem:[#allocation86_spill] sm:$0xff]  ;;  %v807_v11 = vpack.c.bf16 %v775_v63, %v775_v63  ;;  %vm11950_vm2 = vmpackc.low %vm8131_vm11, %vm8124_vm10  ;;  %v11964_v63 = vld [vmem:[#allocation63_spill] sm:$0xff] }
 0x1c7   : > { %11938 = vst [vmem:[#allocation46_spill] sm:$0xff] %v11937_v36  ;;  %v11946_v16 = vsel %vm8641_vm4, 4294967295, %v11945_v16  ;;  %v8647_v36 = vld [vmem:[#allocation2 + $0x28] sm:$0xf]  ;;  %v8655_v24 = vsel %vm11950_vm2, %v8523_v48, 0  ;;  %vm11953_vm8 = vnez %v11952_v12  ;;  %vm11954_vm4 = vnez %v11796_v22  ;;  %v11955_v60 = vld [vmem:[#allocation58_spill] sm:$0xff] }
 0x1c8   : > { %11943 = vst [vmem:[#allocation71_spill] sm:$0xff] %v11942_v37  ;;  %v11956_v27 = vunpack.c.l.b16 %v11955_v60  ;;  %v11957_v40 = vmov 0  ;;  %v11960_v62 = vunpack.c.h.b16 %v11955_v60  ;;  %v11965_v49 = vunpack.c.l.b16 %v11964_v63  ;;  %v11973_v60 = vld [vmem:[#allocation67_spill] sm:$0xff] }
 0x1c9   : > { %11947 = vst [vmem:[#allocation47_spill] sm:$0xff] %v11946_v16  ;;  %v11966_v5 = vmov 0  ;;  %v11970_v16 = vmov 0  ;;  %v11998_v47 = vmov 0  ;;  %v12007_v28 = vmov 0 }
 0x1ca   : > { %11949 = vst [vmem:[#allocation56_spill] sm:$0xff] %v8647_v36  ;;  %vm8664_vm14 = vcmp.ne.s32.totalorder %v11956_v27, %v11717_v52  ;;  %vm8671_vm15 = vcmp.ne.s32.totalorder %v11960_v62, %v11720_v0  ;;  %vm8678_vm10 = vcmp.ne.s32.totalorder %v11965_v49, %v11717_v52  ;;  %v11969_v27 = vunpack.c.h.b16 %v11964_v63  ;;  %v11983_v63 = vld [vmem:[#allocation85_spill] sm:$0xff] }
 0x1cb   : > { %11951 = vst [vmem:[#allocation66_spill] sm:$0xff] %v8655_v24  ;;  %v11958_v40 = vsel %vm8664_vm14, 4294967295, %v11957_v40  ;;  %v11962_v59 = vsel %vm8671_vm15, 4294967295, %v11961_v59  ;;  %v11967_v5 = vsel %vm8678_vm10, 4294967295, %v11966_v5  ;;  %v11974_v62 = vunpack.c.l.b16 %v11973_v60  ;;  %v8987_v24 = vld [vmem:[#allocation2 + $0xc4] sm:$0xf] }
 0x1cc   : > { %11959 = vst [vmem:[#allocation86_spill] sm:$0xff] %v11958_v40  ;;  %vm8685_vm11 = vcmp.ne.s32.totalorder %v11969_v27, %v11720_v0  ;;  %v11975_v40 = vmov 0  ;;  %v11978_v49 = vunpack.c.h.b16 %v11973_v60  ;;  %v11984_v27 = vld [vmem:[#allocation14_spill] sm:$0xff]  ;;  %v12020_v17 = vmov 0 }
 0x1cd   : > { %11963 = vst [vmem:[#allocation34_spill] sm:$0xff] %v11962_v59  ;;  %v11971_v16 = vsel %vm8685_vm11, 4294967295, %v11970_v16  ;;  %vm8692_vm2 = vcmp.ne.s32.totalorder %v11974_v62, %v11717_v52  ;;  %v11979_v59 = vmov 0  ;;  %vm11985_vm10 = vnez %v11984_v27 }
 0x1ce   : > { %11968 = vst [vmem:[#allocation58_spill] sm:$0xff] %v11967_v5  ;;  %v11976_v40 = vsel %vm8692_vm2, 4294967295, %v11975_v40  ;;  %vm8699_vm9 = vcmp.ne.s32.totalorder %v11978_v49, %v11720_v0  ;;  %v11982_v5 = vld [vmem:[#allocation10_spill] sm:$0xff]  ;;  %v11986_v62 = vmax.f32 %v8254_v55, 0.0  ;;  %vm11989_vm2 = vnez %v11800_v30  ;;  %v11992_v49 = vld [vmem:[#allocation65_spill] sm:$0xff]  ;;  %v12137_v30 = vld [vmem:[#allocation84_spill] sm:$0xff] }
 0x1cf   : > { %11972 = vst [vmem:[#allocation63_spill] sm:$0xff] %v11971_v16  ;;  %v11980_v59 = vsel %vm8699_vm9, 4294967295, %v11979_v59  ;;  %v8707_v37 = vsel %vm11985_vm10, %v11983_v63, %v11982_v5  ;;  %vm11987_vm9 = vmpackc.low %vm8194_vm1, %vm8187_vm0  ;;  %v11990_v5 = vld [vmem:[#allocation38_spill] sm:$0xff]  ;;  %v11993_v55 = vunpack.c.l.b16 %v11992_v49  ;;  %v11994_v63 = vmov 0 }
 0x1d0   : > { %11977 = vst [vmem:[#allocation67_spill] sm:$0xff] %v11976_v40  ;;  %v808_v8 = vpack.c.bf16 %v11986_v62, %v11986_v62  ;;  %v1278_v40 = vld [vmem:[#allocation2 + $0x64] sm:$0xf]  ;;  %v8719_v60 = vsel %vm11987_vm9, %v8546_v41, 0  ;;  %vm11991_vm11 = vnez %v11990_v5  ;;  %v11997_v39 = vunpack.c.h.b16 %v11992_v49  ;;  %vm12012_vm9 = vmpackc.low %vm11884_vm6, %vm11883_vm5 }
 0x1d1   : > { %11981 = vst [vmem:[#allocation87_spill] sm:$0xff] %v11980_v59  ;;  %vm8728_vm14 = vcmp.ne.s32.totalorder %v11993_v55, %v11717_v52  ;;  %v12002_v62 = vunpack.c.l.b16 %v12001_v51  ;;  %v12003_v16 = vmov 0  ;;  %v12006_v55 = vunpack.c.h.b16 %v12001_v51 }
 0x1d2   : > { %11988 = vst [vmem:[#allocation10_spill] sm:$0xff] %v8719_v60  ;;  %v11995_v63 = vsel %vm8728_vm14, 4294967295, %v11994_v63  ;;  %vm8735_vm10 = vcmp.ne.s32.totalorder %v11997_v39, %v11720_v0  ;;  %v12009_v49 = vmax.f32 %v8258_v4, 0.0  ;;  %v8770_v4 = vsel %vm12012_vm9, %v8597_v18, 0  ;;  %v8887_v60 = vld [vmem:[#allocation2 + $0x94] sm:$0xf] }
 0x1d3   : > { %11996 = vst [vmem:[#allocation85_spill] sm:$0xff] %v11995_v63  ;;  %v11999_v47 = vsel %vm8735_vm10, 4294967295, %v11998_v47  ;;  %vm8742_vm0 = vcmp.ne.s32.totalorder %v12002_v62, %v11717_v52  ;;  %vm8749_vm1 = vcmp.ne.s32.totalorder %v12006_v55, %v11720_v0  ;;  %v12011_v62 = vmax.f32 %v8281_v31, 0.0  ;;  %v12016_v31 = vld [vmem:[#allocation19_spill] sm:$0xff]  ;;  %v12026_v55 = vld [vmem:[#allocation72_spill] sm:$0xff] }
 0x1d4   : > { %12000 = vst [vmem:[#allocation14_spill] sm:$0xff] %v11999_v47  ;;  %v12004_v16 = vsel %vm8742_vm0, 4294967295, %v12003_v16  ;;  %v12008_v28 = vsel %vm8749_vm1, 4294967295, %v12007_v28  ;;  %v809_v39 = vpack.c.bf16 %v12009_v49, %v12009_v49  ;;  %v12010_v47 = vmax.f32 %v8277_v35, 0.0  ;;  %v12014_v35 = vld [vmem:[#allocation49_spill] sm:$0xff] }
 0x1d5   : > { %12005 = vst [vmem:[#allocation38_spill] sm:$0xff] %v12004_v16  ;;  %v811_v59 = vpack.c.bf16 %v12011_v62, %v12011_v62  ;;  %v8762_v16 = vld [vmem:[#allocation2 + $0x7c] sm:$0xf]  ;;  %v12022_v23 = vunpack.c.h.b16 %v12018_v13  ;;  %v12023_v51 = vmov 0  ;;  %v12027_v49 = vunpack.c.l.b16 %v12026_v55 }
 0x1d6   : > { %v810_v63 = vpack.c.bf16 %v12010_v47, %v12010_v47  ;;  %12013 = vst [vmem:[#allocation65_spill] sm:$0xff] %v8770_v4  ;;  %v12019_v47 = vunpack.c.l.b16 %v12018_v13  ;;  %v12028_v62 = vmov 0  ;;  %v12031_v38 = vmov 0  ;;  %v12145_v4 = vld [vmem:[#allocation82_spill] sm:$0xff] }
 0x1d7   : > { %vm8790_vm6 = vcmp.ne.s32.totalorder %v12022_v23, %v11720_v0  ;;  %vm8797_vm5 = vcmp.ne.s32.totalorder %v12027_v49, %v11717_v52  ;;  %vm12034_vm15 = vnez %v12033_v46  ;;  %v12045_v46 = vld [vmem:[#allocation26_spill] sm:$0xff]  ;;  %v12049_v54 = vmov 0  ;;  %839 = vst [vmem:[#allocation2 + $0xe8] sm:$0xf] %v807_v11 }
 0x1d8   : > { %vm8783_vm14 = vcmp.ne.s32.totalorder %v12019_v47, %v11717_v52  ;;  %v12024_v51 = vsel %vm8790_vm6, 4294967295, %v12023_v51  ;;  %v12029_v62 = vsel %vm8797_vm5, 4294967295, %v12028_v62  ;;  %v12030_v47 = vunpack.c.h.b16 %v12026_v55  ;;  %vm12058_vm6 = vmpackc.low %vm11954_vm4, %vm11953_vm8  ;;  %840 = vst [vmem:[#allocation2 + $0xf4] sm:$0xf] %v808_v8  ;;  %v12078_v8 = vld [vmem:[#allocation79_spill] sm:$0xff] }
 0x1d9   : > { %v12021_v17 = vsel %vm8783_vm14, 4294967295, %v12020_v17  ;;  %12025 = vst [vmem:[#allocation68_spill] sm:$0xff] %v12024_v51  ;;  %v12035_v51 = vld [vmem:[#allocation21_spill] sm:$0xff]  ;;  %v8824_v55 = vsel %vm12039_vm7, %v8647_v36, 0  ;;  %vm12044_vm14 = vnez %v11836_v7  ;;  %vm12046_vm1 = vnez %v12045_v46  ;;  %v1283_v46 = vld [vmem:[#allocation2 + $0xa0] sm:$0xf] }
 0x1da   : > { %vm8804_vm9 = vcmp.ne.s32.totalorder %v12030_v47, %v11720_v0  ;;  %vm12036_vm10 = vnez %v12035_v51  ;;  %12040 = vst [vmem:[#allocation19_spill] sm:$0xff] %v8824_v55  ;;  %v12052_v47 = vmov 0  ;;  %vm12054_vm12 = vnez %v11788_v26 }
 0x1db   : > { %v12032_v38 = vsel %vm8804_vm9, 4294967295, %v12031_v38  ;;  %vm12037_vm3 = vmpackc.low %vm12034_vm15, %vm12036_vm10  ;;  %vm12055_vm13 = vnez %v11785_v57  ;;  %v12062_v57 = vld [vmem:[#allocation77_spill] sm:$0xff]  ;;  %v12064_v11 = vmov 0  ;;  %v12067_v12 = vmov 0  ;;  %841 = vst [vmem:[#allocation2 + $0x100] sm:$0xf] %v809_v39 }
 0x1dc   : > { %v8816_v49 = vsel %vm12037_vm3, %v8523_v48, 0  ;;  %v12047_v48 = vld [vmem:[#allocation74_spill] sm:$0xff]  ;;  %vm12056_vm10 = vmpackc.low %vm12054_vm12, %vm12055_vm13  ;;  %v12063_v26 = vunpack.c.l.b16 %v12062_v57  ;;  %v12066_v22 = vunpack.c.h.b16 %v12062_v57  ;;  %vm12070_vm4 = vnez %v11753_v19  ;;  %842 = vst [vmem:[#allocation2 + $0x10c] sm:$0xf] %v810_v63  ;;  %v12108_v63 = vld [vmem:[#allocation80_spill] sm:$0xff] }
 0x1dd   : > { %12038 = vst [vmem:[#allocation49_spill] sm:$0xff] %v8816_v49  ;;  %v12048_v51 = vunpack.c.l.b16 %v12047_v48  ;;  %v12051_v2 = vunpack.c.h.b16 %v12047_v48  ;;  %v8853_v23 = vsel %vm12056_vm10, %v1278_v40, 0  ;;  %v12069_v48 = vmax.f32 %v8300_v25, 0.0 }
 0x1de   : > { %12057 = vst [vmem:[#allocation70_spill] sm:$0xff] %v8853_v23  ;;  %vm8872_vm12 = vcmp.ne.s32.totalorder %v12063_v26, %v11717_v52  ;;  %vm8879_vm8 = vcmp.ne.s32.totalorder %v12066_v22, %v11720_v0  ;;  %v12079_v25 = vunpack.c.l.b16 %v12078_v8  ;;  %v12080_v19 = vmov 0 }
 0x1df   : > { %vm8837_vm3 = vcmp.ne.s32.totalorder %v12048_v51, %v11717_v52  ;;  %vm8844_vm7 = vcmp.ne.s32.totalorder %v12051_v2, %v11720_v0  ;;  %v8861_v51 = vsel %vm12058_vm6, %v8762_v16, 0  ;;  %v12065_v11 = vsel %vm8872_vm12, 4294967295, %v12064_v11  ;;  %843 = vst [vmem:[#allocation2 + $0x118] sm:$0xf] %v811_v59  ;;  %v12121_v59 = vld [vmem:[#allocation53_spill] sm:$0xff] }
 0x1e0   : > { %v12050_v54 = vsel %vm8837_vm3, 4294967295, %v12049_v54  ;;  %v12053_v47 = vsel %vm8844_vm7, 4294967295, %v12052_v47  ;;  %12059 = vst [vmem:[#allocation72_spill] sm:$0xff] %v8861_v51  ;;  %v12068_v12 = vsel %vm8879_vm8, 4294967295, %v12067_v12  ;;  %v812_v13 = vpack.c.bf16 %v12069_v48, %v12069_v48 }
 0x1e1   : > { %vm12071_vm6 = vnez %v11750_v6  ;;  %vm12076_vm12 = vnez %v11860_v50  ;;  %vm12077_vm7 = vnez %v11863_v43  ;;  %vm8909_vm15 = vcmp.ne.s32.totalorder %v12079_v25, %v11717_v52  ;;  %v8926_v25 = vld [vmem:[#allocation2 + $0xac] sm:$0xf] }
 0x1e2   : > { %vm12072_vm13 = vmpackc.low %vm12070_vm4, %vm12071_vm6  ;;  %v12081_v19 = vsel %vm8909_vm15, 4294967295, %v12080_v19  ;;  %v12082_v6 = vunpack.c.h.b16 %v12078_v8  ;;  %v12085_v48 = vmax.f32 %v8304_v15, 0.0  ;;  %v12086_v26 = vmax.f32 %v8327_v34, 0.0  ;;  %v12092_v15 = vld [vmem:[#allocation35_spill] sm:$0xff]  ;;  %v12094_v34 = vld [vmem:[#allocation81_spill] sm:$0xff] }
 0x1e3   : > { %v8896_v57 = vsel %vm12072_vm13, %v8546_v41, 0  ;;  %v12083_v41 = vmov 0  ;;  %vm12087_vm6 = vnez %v11767_v1  ;;  %vm12088_vm13 = vnez %v11764_v10  ;;  %844 = vst [vmem:[#allocation2 + $0x124] sm:$0xf] %v812_v13  ;;  %v12182_v13 = vld [vmem:[#allocation25_spill] sm:$0xff] }
 0x1e4   : > { %12073 = vst [vmem:[#allocation29_spill] sm:$0xff] %v8896_v57  ;;  %vm8916_vm4 = vcmp.ne.s32.totalorder %v12082_v6, %v11720_v0  ;;  %v813_v22 = vpack.c.bf16 %v12085_v48, %v12085_v48  ;;  %v814_v2 = vpack.c.bf16 %v12086_v26, %v12086_v26  ;;  %vm12089_vm8 = vmpackc.low %vm12087_vm6, %vm12088_vm13  ;;  %v12095_v39 = vunpack.c.l.b16 %v12094_v34  ;;  %v12156_v57 = vld [vmem:[#allocation30_spill] sm:$0xff] }
 0x1e5   : > { %v12084_v41 = vsel %vm8916_vm4, 4294967295, %v12083_v41  ;;  %v8935_v8 = vsel %vm12089_vm8, %v8597_v18, 0  ;;  %v12096_v26 = vmov 0  ;;  %v12098_v1 = vunpack.c.h.b16 %v12094_v34  ;;  %v12106_v34 = vld [vmem:[#allocation45_spill] sm:$0xff] }
 0x1e6   : > { %12090 = vst [vmem:[#allocation21_spill] sm:$0xff] %v8935_v8  ;;  %vm8944_vm4 = vcmp.ne.s32.totalorder %v12095_v39, %v11717_v52  ;;  %v12099_v10 = vmov 0  ;;  %vm12101_vm8 = vnez %v11781_v58  ;;  %vm12102_vm6 = vnez %v11778_v20  ;;  %v12154_v8 = vld [vmem:[#allocation22_spill] sm:$0xff] }
 0x1e7   : > { %v12097_v26 = vsel %vm8944_vm4, 4294967295, %v12096_v26  ;;  %vm8951_vm15 = vcmp.ne.s32.totalorder %v12098_v1, %v11720_v0  ;;  %vm12103_vm13 = vmpackc.low %vm12101_vm8, %vm12102_vm6  ;;  %vm12105_vm5 = vnez %v11877_v53  ;;  %vm12107_vm4 = vnez %v12106_v34  ;;  %845 = vst [vmem:[#allocation2 + $0x130] sm:$0xf] %v813_v22  ;;  %v12201_v34 = vld [vmem:[#allocation31_spill] sm:$0xff] }
 0x1e8   : > { %v12100_v10 = vsel %vm8951_vm15, 4294967295, %v12099_v10  ;;  %v8963_v39 = vsel %vm12103_vm13, %v1278_v40, 0  ;;  %v12109_v1 = vunpack.c.l.b16 %v12108_v63  ;;  %v12110_v18 = vmov 0  ;;  %vm12116_vm8 = vmpackc.low %vm12046_vm1, %vm12044_vm14  ;;  %846 = vst [vmem:[#allocation2 + $0x13c] sm:$0xf] %v814_v2  ;;  %v12203_v2 = vld [vmem:[#allocation44_spill] sm:$0xff] }
 0x1e9   : > { %12104 = vst [vmem:[#allocation23_spill] sm:$0xff] %v8963_v39  ;;  %v12112_v58 = vunpack.c.h.b16 %v12108_v63  ;;  %v12113_v20 = vmov 0  ;;  %v1941_v40 = vunpack.c.h.b16 %v8707_v37  ;;  %v12115_v48 = vmax.f32 %v8331_v21, 0.0  ;;  %vm12123_vm14 = vmpackc.low %vm12077_vm7, %vm12076_vm12 }
 0x1ea   : > { %vm8972_vm15 = vcmp.ne.s32.totalorder %v12109_v1, %v11717_v52  ;;  %v8995_v63 = vsel %vm12116_vm8, %v8887_v60, 0  ;;  %vm12118_vm6 = vnez %v11887_v32  ;;  %v2940_v21 = vunpack.c.h.b16 %v11948_v9  ;;  %vm12125_vm1 = vmpackc.low %vm11991_vm11, %vm11989_vm2 }
 0x1eb   : > { %v12111_v18 = vsel %vm8972_vm15, 4294967295, %v12110_v18  ;;  %vm8979_vm10 = vcmp.ne.s32.totalorder %v12112_v58, %v11720_v0  ;;  %v815_v6 = vpack.c.bf16 %v12115_v48, %v12115_v48  ;;  %12117 = vst [vmem:[#allocation26_spill] sm:$0xff] %v8995_v63  ;;  %v12119_v58 = vld [vmem:[#allocation39_spill] sm:$0xff]  ;;  %v12122_v48 = vmax.f32 %v12121_v59, 0.0  ;;  %vm12179_vm3 = vmpackc.low %vm12107_vm4, %vm12105_vm5 }
 0x1ec   : > { %v12114_v20 = vsel %vm8979_vm10, 4294967295, %v12113_v20  ;;  %vm12120_vm13 = vnez %v12119_v58  ;;  %v9012_v7 = vsel %vm12123_vm14, %v8926_v25, 0  ;;  %v9020_v1 = vsel %vm12125_vm1, %v8762_v16, 0 }
 0x1ed   : > { %v816_v23 = vpack.c.bf16 %v12122_v48, %v12122_v48  ;;  %12124 = vst [vmem:[#allocation74_spill] sm:$0xff] %v9012_v7  ;;  %vm12135_vm12 = vnez %v11915_v56  ;;  %vm12136_vm14 = vnez %v11918_v14  ;;  %v12138_v50 = vunpack.c.l.b16 %v12137_v30  ;;  %v9070_v48 = vld [vmem:[#allocation2 + $0xdc] sm:$0xf]  ;;  %v1292_v56 = vld [vmem:[#allocation2 + $0x10c] sm:$0xf] }
 0x1ee   : > { %12126 = vst [vmem:[#allocation77_spill] sm:$0xff] %v9020_v1  ;;  %v12139_v16 = vmov 0  ;;  %v12141_v5 = vunpack.c.h.b16 %v12137_v30  ;;  %v12142_v51 = vmov 0  ;;  %v12146_v36 = vunpack.c.l.b16 %v12145_v4  ;;  %v12232_v14 = vld [vmem:[#allocation20_spill] sm:$0xff] }
 0x1ef   : > { %vm9037_vm11 = vcmp.ne.s32.totalorder %v12138_v50, %v11717_v52  ;;  %v12147_v1 = vmov 0  ;;  %v12150_v50 = vunpack.c.h.b16 %v12145_v4  ;;  %v12151_v39 = vmov 0  ;;  %847 = vst [vmem:[#allocation2 + $0x148] sm:$0xf] %v815_v6  ;;  %v12212_v6 = vld [vmem:[#allocation14_spill] sm:$0xff] }
 0x1f0   : > { %v12140_v16 = vsel %vm9037_vm11, 4294967295, %v12139_v16  ;;  %vm9044_vm2 = vcmp.ne.s32.totalorder %v12141_v5, %v11720_v0  ;;  %vm9051_vm1 = vcmp.ne.s32.totalorder %v12146_v36, %v11717_v52  ;;  %v12155_v30 = vmax.f32 %v12154_v8, 0.0  ;;  %v9068_v36 = vld [vmem:[#allocation2 + $0xd0] sm:$0xf]  ;;  %v12166_v8 = vld [vmem:[#allocation71_spill] sm:$0xff] }
 0x1f1   : > { %v12143_v51 = vsel %vm9044_vm2, 4294967295, %v12142_v51  ;;  %v12148_v1 = vsel %vm9051_vm1, 4294967295, %v12147_v1  ;;  %vm9058_vm7 = vcmp.ne.s32.totalorder %v12150_v50, %v11720_v0  ;;  %v12157_v55 = vmax.f32 %v12156_v57, 0.0  ;;  %v12168_v57 = vld [vmem:[#allocation47_spill] sm:$0xff]  ;;  %848 = vst [vmem:[#allocation2 + $0x154] sm:$0xf] %v816_v23 }
 0x1f2   : > { %12144 = vst [vmem:[#allocation79_spill] sm:$0xff] %v12143_v51  ;;  %v12152_v39 = vsel %vm9058_vm7, 4294967295, %v12151_v39  ;;  %v817_v5 = vpack.c.bf16 %v12155_v30, %v12155_v30  ;;  %v12172_v30 = vmov 0  ;;  %v12176_v50 = vmov 0  ;;  %v9144_v51 = vld [vmem:[#allocation2 + $0xf4] sm:$0xf] }
 0x1f3   : > { %12149 = vst [vmem:[#allocation35_spill] sm:$0xff] %v12148_v1  ;;  %v818_v49 = vpack.c.bf16 %v12157_v55, %v12157_v55  ;;  %v12170_v55 = vld [vmem:[#allocation83_spill] sm:$0xff]  ;;  %v9104_v59 = vsel %vm12179_vm3, %v8987_v24, 0  ;;  %vm12183_vm2 = vnez %v11984_v27  ;;  %v12196_v4 = vunpack.c.l.b16 %v8707_v37  ;;  %vm12205_vm3 = vmpackc.low %vm12120_vm13, %vm12118_vm6  ;;  %v12228_v23 = vld [vmem:[#allocation68_spill] sm:$0xff] }
 0x1f4   : > { %12153 = vst [vmem:[#allocation81_spill] sm:$0xff] %v12152_v39  ;;  %v12171_v22 = vunpack.c.l.b16 %v12170_v55  ;;  %v12175_v43 = vunpack.c.h.b16 %v12170_v55  ;;  %vm9134_vm1 = vcmp.ne.s32.totalorder %v1941_v40, %v11720_v0  ;;  %v12199_v63 = vmov 0 }
 0x1f5   : > { %12180 = vst [vmem:[#allocation39_spill] sm:$0xff] %v9104_v59  ;;  %vm9129_vm7 = vcmp.ne.s32.totalorder %v12196_v4, %v11717_v52  ;;  %v12200_v63 = vsel %vm9134_vm1, 4294967295, %v12199_v63  ;;  %v12202_v53 = vmax.f32 %v12201_v34, 0.0  ;;  %v12204_v39 = vmax.f32 %v12203_v2, 0.0  ;;  %v12214_v4 = vld [vmem:[#allocation38_spill] sm:$0xff] }
 0x1f6   : > { %vm9087_vm11 = vcmp.ne.s32.totalorder %v12171_v22, %v11717_v52  ;;  %vm9094_vm15 = vcmp.ne.s32.totalorder %v12175_v43, %v11720_v0  ;;  %v12194_v22 = vld [vmem:[#allocation87_spill] sm:$0xff]  ;;  %v9152_v37 = vsel %vm12205_vm3, %v9070_v48, 0  ;;  %vm12206_vm10 = vnez %v12016_v31  ;;  %849 = vst [vmem:[#allocation2 + $0x160] sm:$0xf] %v817_v5  ;;  %v9295_v2 = vld [vmem:[#allocation2 + $0x130] sm:$0xf] }
 0x1f7   : > { %v12173_v30 = vsel %vm9087_vm11, 4294967295, %v12172_v30  ;;  %v12177_v50 = vsel %vm9094_vm15, 4294967295, %v12176_v50  ;;  %vm12195_vm15 = vnez %v12194_v22  ;;  %v819_v55 = vpack.c.bf16 %v12202_v53, %v12202_v53  ;;  %v12237_v53 = vld [vmem:[#allocation33_spill] sm:$0xff]  ;;  %850 = vst [vmem:[#allocation2 + $0x16c] sm:$0xf] %v818_v49  ;;  %v12333_v59 = vld [vmem:[#allocation42_spill] sm:$0xff] }
 0x1f8   : > { %12174 = vst [vmem:[#allocation45_spill] sm:$0xff] %v12173_v30  ;;  %v12181_v30 = vld [vmem:[#allocation11_spill] sm:$0xff]  ;;  %v820_v1 = vpack.c.bf16 %v12204_v39, %v12204_v39  ;;  %vm12207_vm11 = vnez %v12014_v35  ;;  %v12210_v39 = vld [vmem:[#allocation85_spill] sm:$0xff]  ;;  %vm12215_vm1 = vnez %v12214_v4  ;;  %v12217_v32 = vunpack.c.l.b16 %v11948_v9  ;;  %v1285_v35 = vld [vmem:[#allocation2 + $0xb8] sm:$0xf] }
 0x1f9   : > { %12178 = vst [vmem:[#allocation80_spill] sm:$0xff] %v12177_v50  ;;  %v9112_v43 = vsel %vm12183_vm2, %v12182_v13, %v12181_v30  ;;  %v12192_v50 = vld [vmem:[#allocation67_spill] sm:$0xff]  ;;  %v12197_v30 = vmov 0  ;;  %vm12208_vm0 = vmpackc.low %vm12206_vm10, %vm12207_vm11  ;;  %v12218_v31 = vmov 0  ;;  %vm12223_vm11 = vnez %v11849_v45  ;;  %v9241_v49 = vld [vmem:[#allocation2 + $0xe8] sm:$0xf] }
 0x1fa   : > { %vm12193_vm4 = vnez %v12192_v50  ;;  %v12198_v30 = vsel %vm9129_vm7, 4294967295, %v12197_v30  ;;  %v9160_v40 = vsel %vm12208_vm0, %v8887_v60, 0  ;;  %vm12216_vm7 = vnez %v12008_v28  ;;  %vm12222_vm10 = vmpackc.low %vm12136_vm14, %vm12135_vm12  ;;  %v12234_v45 = vld [vmem:[#allocation15_spill] sm:$0xff]  ;;  %851 = vst [vmem:[#allocation2 + $0x178] sm:$0xf] %v819_v55 }
 0x1fb   : > { %12209 = vst [vmem:[#allocation53_spill] sm:$0xff] %v9160_v40  ;;  %vm9173_vm13 = vcmp.ne.s32.totalorder %v12217_v32, %v11717_v52  ;;  %vm9178_vm0 = vcmp.ne.s32.totalorder %v2940_v21, %v11720_v0  ;;  %v12220_v60 = vmov 0  ;;  %v9188_v58 = vsel %vm12222_vm10, %v9068_v36, 0  ;;  %v12269_v22 = vld [vmem:[#allocation79_spill] sm:$0xff]  ;;  %v1298_v50 = vld [vmem:[#allocation2 + $0x154] sm:$0xf] }
 0x1fc   : > { %v12219_v31 = vsel %vm9173_vm13, 4294967295, %v12218_v31  ;;  %v12221_v60 = vsel %vm9178_vm0, 4294967295, %v12220_v60  ;;  %vm12224_vm3 = vnez %v11846_v3  ;;  %vm12233_vm0 = vnez %v12232_v14  ;;  %852 = vst [vmem:[#allocation2 + $0x184] sm:$0xf] %v820_v1  ;;  %v12275_v4 = vld [vmem:[#allocation35_spill] sm:$0xff]  ;;  %v12277_v9 = vld [vmem:[#allocation81_spill] sm:$0xff] }
 0x1fd   : > { %vm12225_vm8 = vmpackc.low %vm12223_vm11, %vm12224_vm3  ;;  %vm12235_vm13 = vnez %v12234_v45  ;;  %v9221_v32 = vsel %vm12183_vm2, %v12182_v13, %v12237_v53  ;;  %vm12239_vm3 = vnez %v12053_v47  ;;  %vm12244_vm12 = vnez %v12068_v12  ;;  %v12246_v45 = vld [vmem:[#allocation17_spill] sm:$0xff]  ;;  %12264 = vst [vmem:[#allocation30_spill] sm:$0xff] %v9295_v2  ;;  %v12288_v12 = vld [vmem:[#allocation52_spill] sm:$0xff] }
 0x1fe   : > { %v9197_v21 = vsel %vm12225_vm8, %v1283_v46, 0  ;;  %vm12236_vm11 = vmpackc.low %vm12233_vm0, %vm12235_vm13  ;;  %vm12238_vm8 = vnez %v12050_v54  ;;  %vm12240_vm13 = vnez %v12042_v29  ;;  %vm12241_vm0 = vnez %v11828_v61  ;;  %v9243_v29 = vld [vmem:[#allocation2 + $0x100] sm:$0xf]  ;;  %v1294_v61 = vld [vmem:[#allocation2 + $0x124] sm:$0xf] }
 0x1ff   : > { %12226 = vst [vmem:[#allocation84_spill] sm:$0xff] %v9197_v21  ;;  %v9213_v3 = vsel %vm12236_vm11, %v9144_v51, 0  ;;  %vm12242_vm11 = vmpackc.low %vm12240_vm13, %vm12241_vm0  ;;  %v12245_v46 = vld [vmem:[#allocation9_spill] sm:$0xff]  ;;  %v9252_v53 = vsel %vm12183_vm2, %v12182_v13, %v12246_v45  ;;  %vm12249_vm14 = vnez %v11857_v44  ;;  %vm12250_vm10 = vnez %v11854_v33  ;;  %v9279_v33 = vld [vmem:[#allocation2 + $0x118] sm:$0xf] }
 0x200   : > { %v9232_v5 = vsel %vm12242_vm11, %v1292_v56, 0  ;;  %vm12251_vm6 = vmpackc.low %vm12249_vm14, %vm12250_vm10  ;;  %vm12253_vm5 = vnez %v12092_v15  ;;  %vm12254_vm2 = vnez %v11867_v42  ;;  %vm12256_vm11 = vnez %v12097_v26  ;;  %v1296_v44 = vld [vmem:[#allocation2 + $0x13c] sm:$0xf]  ;;  %v12297_v26 = vld [vmem:[#allocation45_spill] sm:$0xff] }
 0x201   : > { %v9263_v55 = vsel %vm12251_vm6, %v1294_v61, 0  ;;  %vm12255_vm9 = vmpackc.low %vm12253_vm5, %vm12254_vm2  ;;  %vm12257_vm13 = vnez %v12100_v10  ;;  %vm12258_vm6 = vnez %v12168_v57  ;;  %vm12259_vm14 = vnez %v12166_v8  ;;  %v9340_v57 = vld [vmem:[#allocation2 + $0x148] sm:$0xf]  ;;  %v1300_v1 = vld [vmem:[#allocation2 + $0x16c] sm:$0xf] }
 0x202   : > { %12252 = vst [vmem:[#allocation82_spill] sm:$0xff] %v9263_v55  ;;  %v9273_v45 = vsel %vm12255_vm9, %v8926_v25, 0  ;;  %vm12260_vm10 = vmpackc.low %vm12258_vm6, %vm12259_vm14  ;;  %vm12262_vm9 = vnez %v12111_v18  ;;  %vm12263_vm2 = vnez %v12114_v20  ;;  %vm12268_vm14 = vnez %v12140_v16  ;;  %v12303_v25 = vld [vmem:[#allocation62_spill] sm:$0xff]  ;;  %v12308_v42 = vld [vmem:[#allocation37_spill] sm:$0xff] }
 0x203   : > { %v9287_v15 = vsel %vm12260_vm10, %v1285_v35, 0  ;;  %vm12265_vm0 = vmpackc.low %vm12195_vm15, %vm12193_vm4  ;;  %vm12270_vm10 = vnez %v12269_v22  ;;  %vm12276_vm4 = vnez %v12275_v4  ;;  %12279 = vst [vmem:[#allocation83_spill] sm:$0xff] %v9340_v57  ;;  %vm12280_vm5 = vnez %v12084_v41  ;;  %v12327_v22 = vld [vmem:[#allocation49_spill] sm:$0xff] }
 0x204   : > { %12261 = vst [vmem:[#allocation22_spill] sm:$0xff] %v9287_v15  ;;  %v9302_v8 = vsel %vm12265_vm0, %v1296_v44, 0  ;;  %vm12267_vm6 = vmpackc.low %vm12216_vm7, %vm12215_vm1  ;;  %vm12273_vm7 = vnez %v12065_v11  ;;  %vm12278_vm0 = vnez %v12277_v9  ;;  %v12286_v11 = vld [vmem:[#allocation51_spill] sm:$0xff]  ;;  %v2994_v16 = vshrl.u32 %v12327_v22, 16 }
 0x205   : > { %12266 = vst [vmem:[#allocation71_spill] sm:$0xff] %v9302_v8  ;;  %v9311_v35 = vsel %vm12267_vm6, %v8987_v24, 0  ;;  %vm12271_vm15 = vmpackc.low %vm12239_vm3, %vm12238_vm8  ;;  %vm12281_vm8 = vnez %v12081_v19  ;;  %v12291_v19 = vld [vmem:[#allocation57_spill] sm:$0xff]  ;;  %vm12313_vm6 = vnez %v12200_v63  ;;  %v6633_v63 = vld [vmem:[#allocation3 + $0x178] sm:$0xff]  ;;  %v12356_v8 = vunpack.c.l.b16 %v9112_v43 }
 0x206   : > { %v9326_v28 = vsel %vm12271_vm15, %v9068_v36, 0  ;;  %vm12274_vm1 = vmpackc.low %vm12244_vm12, %vm12273_vm7  ;;  %vm12287_vm15 = vnez %v12286_v11  ;;  %vm12289_vm7 = vnez %v12288_v12  ;;  %v12299_v36 = vld [vmem:[#allocation80_spill] sm:$0xff]  ;;  %v1299_v12 = vld [vmem:[#allocation2 + $0x160] sm:$0xf]  ;;  %v9494_v9 = vrot.slane %v2994_v16, 4  ;;  %4124 = vmatpush.bf16.msrb.mxu3 %v6633_v63 }
 0x207   : > { %12272 = vst [vmem:[#allocation47_spill] sm:$0xff] %v9326_v28  ;;  %v9334_v24 = vsel %vm12274_vm1, %v9070_v48, 0  ;;  %vm12282_vm3 = vmpackc.low %vm12280_vm5, %vm12281_vm8  ;;  %vm12292_vm5 = vnez %v12291_v19  ;;  %v12293_v48 = vld [vmem:[#allocation54_spill] sm:$0xff] }
 0x208   : > { %v9347_v54 = vsel %vm12282_vm3, %v1298_v50, 0  ;;  %vm12284_vm12 = vmpackc.low %vm12257_vm13, %vm12256_vm11  ;;  %vm12294_vm8 = vnez %v12293_v48  ;;  %vm12300_vm11 = vnez %v12299_v36  ;;  %v12306_v48 = vld [vmem:[#allocation46_spill] sm:$0xff]  ;;  %v12353_v36 = vld [vmem:[#allocation29_spill] sm:$0xff] }
 0x209   : > { %12283 = vst [vmem:[#allocation11_spill] sm:$0xff] %v9347_v54  ;;  %v9355_v47 = vsel %vm12284_vm12, %v9241_v49, 0  ;;  %vm12290_vm1 = vmpackc.low %vm12287_vm15, %vm12289_vm7  ;;  %vm12304_vm7 = vnez %v12303_v25  ;;  %vm12312_vm12 = vnez %v12198_v30  ;;  %v12316_v25 = vld [vmem:[#allocation34_spill] sm:$0xff]  ;;  %v3137_v54 = vshrl.u32 %v9311_v35, 16 }
 0x20a   : > { %12285 = vst [vmem:[#allocation25_spill] sm:$0xff] %v9355_v47  ;;  %v9363_v41 = vsel %vm12290_vm1, %v9144_v51, 0  ;;  %vm12295_vm3 = vmpackc.low %vm12292_vm5, %vm12294_vm8  ;;  %v12301_v51 = vld [vmem:[#allocation69_spill] sm:$0xff]  ;;  %vm12307_vm5 = vnez %v12306_v48  ;;  %vm12309_vm8 = vnez %v12308_v42  ;;  %v12321_v48 = vld [vmem:[#allocation63_spill] sm:$0xff] }
 0x20b   : > { %v9371_v10 = vsel %vm12295_vm3, %v9243_v29, 0  ;;  %vm12302_vm15 = vnez %v12301_v51  ;;  %vm12310_vm3 = vmpackc.low %vm12307_vm5, %vm12309_vm8  ;;  %v12318_v51 = vld [vmem:[#allocation86_spill] sm:$0xff]  ;;  %vm12322_vm8 = vnez %v12321_v48 }
 0x20c   : > { %12296 = vst [vmem:[#allocation67_spill] sm:$0xff] %v9371_v10  ;;  %vm12305_vm1 = vmpackc.low %vm12302_vm15, %vm12304_vm7  ;;  %v9392_v14 = vsel %vm12310_vm3, %v9279_v33, 0  ;;  %vm12317_vm7 = vnez %v12316_v25  ;;  %v12323_v11 = vld [vmem:[#allocation58_spill] sm:$0xff] }
 0x20d   : > { %v9384_v19 = vsel %vm12305_vm1, %v1292_v56, 0  ;;  %12311 = vst [vmem:[#allocation87_spill] sm:$0xff] %v9392_v14  ;;  %vm12314_vm15 = vmpackc.low %vm12270_vm10, %vm12268_vm14  ;;  %vm12319_vm1 = vnez %v12318_v51  ;;  %vm12324_vm3 = vnez %v12323_v11  ;;  %vm12328_vm14 = vnez %v12219_v31  ;;  %v1301_v25 = vld [vmem:[#allocation2 + $0x178] sm:$0xf]  ;;  %v1302_v51 = vld [vmem:[#allocation2 + $0x184] sm:$0xf] }
 0x20e   : > { %v9403_v56 = vsel %vm12314_vm15, %v1300_v1, 0  ;;  %vm12320_vm5 = vmpackc.low %vm12317_vm7, %vm12319_vm1  ;;  %vm12329_vm10 = vnez %v12221_v60  ;;  %vm12330_vm7 = vnez %v12212_v6  ;;  %vm12331_vm1 = vnez %v12210_v39  ;;  %v6585_v60 = vld [vmem:[#allocation3 + $0x10] sm:$0xff]  ;;  %v6611_v48 = vld [vmem:[#allocation3 + $0xc8] sm:$0xff] }
 0x20f   : > { %12315 = vst [vmem:[#allocation31_spill] sm:$0xff] %v9403_v56  ;;  %v9410_v42 = vsel %vm12320_vm5, %v1294_v61, 0  ;;  %vm12325_vm13 = vmpackc.low %vm12322_vm8, %vm12324_vm3  ;;  %vm12335_vm8 = vnez %v12228_v23  ;;  %vm12336_vm3 = vnez %v12021_v17  ;;  %v6586_v61 = vld [vmem:[#allocation3 + $0x18] sm:$0xff]  ;;  %v6632_v31 = vld [vmem:[#allocation3 + $0x170] sm:$0xff]  ;;  %v3127_v56 = vshrl.u32 %v9287_v15, 16 }
 0x210   : > { %v9418_v34 = vsel %vm12325_vm13, %v9295_v2, 0  ;;  %vm12332_vm5 = vmpackc.low %vm12330_vm7, %vm12331_vm1  ;;  %vm12334_vm13 = vnez %v11984_v27  ;;  %vm12339_vm7 = vnez %v12032_v38  ;;  %vm12340_vm1 = vnez %v12029_v62  ;;  %4377 = vmatpush.bf16.msrb.mxu0 %v6586_v61  ;;  %4125 = vmatpush.bf16.msrb.mxu3 %v6632_v31 }
 0x211   : > { %12326 = vst [vmem:[#allocation44_spill] sm:$0xff] %v9418_v34  ;;  %v9431_v11 = vsel %vm12332_vm5, %v1296_v44, 0  ;;  %v9438_v7 = vsel %vm12334_vm13, %v12182_v13, %v12333_v59  ;;  %vm12337_vm15 = vmpackc.low %vm12335_vm8, %vm12336_vm3  ;;  %v2997_v59 = vshll.u32 %v12327_v22, 16  ;;  %v6617_v44 = vld [vmem:[#allocation3 + $0xf8] sm:$0xff]  ;;  %v12354_v22 = vld [vmem:[#allocation21_spill] sm:$0xff]  ;;  %v12359_v61 = vunpack.c.h.b16 %v9112_v43 }
 0x212   : > { %v9447_v39 = vsel %vm12337_vm15, %v9340_v57, 0  ;;  %vm12341_vm5 = vmpackc.low %vm12339_vm7, %vm12340_vm1  ;;  %3946 = vmatpush.bf16.msra.mxu1 %v6617_v44  ;;  %6708 = vmatpush.bf16.msra.mxu2 %v6617_v44  ;;  %v12355_v44 = vld [vmem:[#allocation23_spill] sm:$0xff]  ;;  %v12366_v43 = vunpack.c.h.b16 %v12245_v46  ;;  %v12369_v15 = vunpack.c.l.b16 %v9221_v32 }
 0x213   : > { %12338 = vst [vmem:[#allocation85_spill] sm:$0xff] %v9447_v39  ;;  %v9454_v6 = vsel %vm12341_vm5, %v1298_v50, 0  ;;  %vm12342_vm13 = vmpackc.low %vm12313_vm6, %vm12312_vm12  ;;  %vm12347_vm6 = vnez %v12297_v26  ;;  %v12352_v50 = vld [vmem:[#allocation19_spill] sm:$0xff]  ;;  %v3017_v26 = vshrl.u32 %v12353_v36, 16  ;;  %v9502_v30 = vrot.slane %v2997_v59, 5 }
 0x214   : > { %v9462_v17 = vsel %vm12342_vm13, %v1302_v51, 0  ;;  %vm12344_vm15 = vmpackc.low %vm12263_vm2, %vm12262_vm9  ;;  %v3007_v4 = vshrl.u32 %v12352_v50, 16  ;;  %v3057_v23 = vshrl.u32 %v12355_v44, 16  ;;  %vm9508_vm2 = vcmp.ne.s32.totalorder %v12356_v8, %v11717_v52  ;;  %4378 = vmatpush.bf16.msrb.mxu0 %v6585_v60 }
 0x215   : > { %12343 = vst [vmem:[#allocation14_spill] sm:$0xff] %v9462_v17  ;;  %v9470_v38 = vsel %vm12344_vm15, %v1299_v12, 0  ;;  %vm12346_vm8 = vmpackc.low %vm12278_vm0, %vm12276_vm4  ;;  %v3013_v12 = vshll.u32 %v12353_v36, 16  ;;  %vm9515_vm4 = vcmp.ne.s32.totalorder %v12359_v61, %v11720_v0  ;;  %v12362_v36 = vld [vmem:[#allocation77_spill] sm:$0xff]  ;;  %v3097_v59 = vshrl.u32 %v9160_v40, 16  ;;  %v12387_v61 = vld [vmem:[#allocation66_spill] sm:$0xff] }
 0x216   : > { %12345 = vst [vmem:[#allocation38_spill] sm:$0xff] %v9470_v38  ;;  %v9477_v62 = vsel %vm12346_vm8, %v1300_v1, 0  ;;  %vm12348_vm12 = vmpackc.low %vm12300_vm11, %vm12347_vm6  ;;  %v6616_v1 = vld [vmem:[#allocation3 + $0xf0] sm:$0xff]  ;;  %v3077_v16 = vshrl.u32 %v12362_v36, 16  ;;  %v12363_v8 = vunpack.c.l.b16 %v12245_v46  ;;  %vm9533_vm11 = vcmp.ne.s32.totalorder %v12366_v43, %v11720_v0  ;;  %v6631_v36 = vld [vmem:[#allocation3 + $0x168] sm:$0xff] }
 0x217   : > { %v9485_v20 = vsel %vm12348_vm12, %v1301_v25, 0  ;;  %vm12350_vm9 = vmpackc.low %vm12329_vm10, %vm12328_vm14  ;;  %v3037_v25 = vshrl.u32 %v12354_v22, 16  ;;  %3947 = vmatpush.bf16.msra.mxu1 %v6616_v1  ;;  %6709 = vmatpush.bf16.msra.mxu2 %v6616_v1  ;;  %v9541_v40 = vrot.slane %v3007_v4, 4  ;;  %v9543_v57 = vrot.slane %v3013_v12, 5 }
 0x218   : > { %12349 = vst [vmem:[#allocation68_spill] sm:$0xff] %v9485_v20  ;;  %v9492_v18 = vsel %vm12350_vm9, %v1302_v51, 0  ;;  %v3107_v51 = vshrl.u32 %v9197_v21, 16  ;;  %vm9526_vm0 = vcmp.ne.s32.totalorder %v12363_v8, %v11717_v52  ;;  %v3117_v20 = vshrl.u32 %v9273_v45, 16  ;;  %v6615_v8 = vld [vmem:[#allocation3 + $0xe8] sm:$0xff]  ;;  %4126 = vmatpush.bf16.msrb.mxu3 %v6631_v36  ;;  %vm1743_vm13 = vmpackc.low %vm9515_vm4, %vm9508_vm2 }
 0x219   : > { %12351 = vst [vmem:[#allocation20_spill] sm:$0xff] %v9492_v18  ;;  %v3113_v18 = vshll.u32 %v9273_v45, 16  ;;  %v3133_v21 = vshll.u32 %v9311_v35, 16  ;;  %v9545_v46 = vrot.slane %v3017_v26, 4  ;;  %v9547_v43 = vrot.slane %v3037_v25, 4  ;;  %v6584_v45 = vld [vmem:[#allocation3 + $0x8] sm:$0xff]  ;;  %vm1729_vm3 = vmpackc.low %vm9533_vm11, %vm9526_vm0 }
 0x21a   : > { %vm9552_vm14 = vcmp.ne.s32.totalorder %v12369_v15, %v11717_v52  ;;  %v12372_v1 = vunpack.c.h.b16 %v9221_v32  ;;  %v9563_v12 = vrot.slane %v3057_v23, 4  ;;  %v3147_v26 = vshrl.u32 %v9326_v28, 16  ;;  %v6614_v28 = vld [vmem:[#allocation3 + $0xe0] sm:$0xff]  ;;  %4379 = vmatpush.bf16.msrb.mxu0 %v6584_v45 }
 0x21b   : > { %v3153_v25 = vshll.u32 %v9334_v24, 16  ;;  %v3157_v60 = vshrl.u32 %v9334_v24, 16  ;;  %v9568_v31 = vrot.slane %v3077_v16, 4  ;;  %v9570_v15 = vrot.slane %v3097_v59, 4  ;;  %3948 = vmatpush.bf16.msra.mxu1 %v6615_v8  ;;  %6710 = vmatpush.bf16.msra.mxu2 %v6615_v8 }
 0x21c   : > { %vm9559_vm10 = vcmp.ne.s32.totalorder %v12372_v1, %v11720_v0  ;;  %12375 = vst [vmem:[#allocation15_spill] sm:$0xff] %v9563_v12  ;;  %v9572_v2 = vrot.slane %v3107_v51, 4  ;;  %v9574_v55 = vrot.slane %v3113_v18, 5  ;;  %v9576_v32 = vrot.slane %v3117_v20, 4  ;;  %v6583_v20 = vld [vmem:[#allocation3] sm:$0xff] }
 0x21d   : > { %v9578_v1 = vrot.slane %v3127_v56, 4  ;;  %v9580_v23 = vrot.slane %v3133_v21, 5  ;;  %v9582_v12 = vrot.slane %v3137_v54, 4  ;;  %v3167_v24 = vshrl.u32 %v9355_v47, 16  ;;  %v6630_v56 = vld [vmem:[#allocation3 + $0x160] sm:$0xff]  ;;  %vm1855_vm7 = vmpackc.low %vm9559_vm10, %vm9552_vm14 }
 0x21e   : > { %v3173_v16 = vshll.u32 %v9363_v41, 16  ;;  %v3177_v51 = vshrl.u32 %v9363_v41, 16  ;;  %v3187_v18 = vshrl.u32 %v9371_v10, 16  ;;  %v9588_v59 = vrot.slane %v3147_v26, 4  ;;  %4380 = vmatpush.bf16.msrb.mxu0 %v6583_v20  ;;  %4127 = vmatpush.bf16.msrb.mxu3 %v6630_v56 }
 0x21f   : > { %12376 = vst [vmem:[#allocation33_spill] sm:$0xff] %v9582_v12  ;;  %v9590_v21 = vrot.slane %v3153_v25, 5  ;;  %v9592_v54 = vrot.slane %v3157_v60, 4  ;;  %v3193_v8 = vshll.u32 %v9384_v19, 16  ;;  %v3197_v47 = vshrl.u32 %v9384_v19, 16  ;;  %3949 = vmatpush.bf16.msra.mxu1 %v6614_v28  ;;  %6711 = vmatpush.bf16.msra.mxu2 %v6614_v28 }
 0x220   : > { %12377 = vst [vmem:[#allocation9_spill] sm:$0xff] %v9588_v59  ;;  %v3207_v12 = vshrl.u32 %v9392_v14, 16  ;;  %v3213_v41 = vshll.u32 %v9410_v42, 16  ;;  %v3217_v10 = vshrl.u32 %v9410_v42, 16  ;;  %v3227_v36 = vshrl.u32 %v9418_v34, 16  ;;  %v6629_v34 = vld [vmem:[#allocation3 + $0x158] sm:$0xff] }
 0x221   : > { %12378 = vst [vmem:[#allocation17_spill] sm:$0xff] %v9590_v21  ;;  %v3233_v45 = vshll.u32 %v9431_v11, 16  ;;  %v3237_v26 = vshrl.u32 %v9431_v11, 16  ;;  %v3247_v25 = vshrl.u32 %v9447_v39, 16  ;;  %v6135_v60 = vld [vmem:[#allocation2] sm:$0xf]  ;;  %vm12400_vm6 = vnez %v11984_v27 }
 0x222   : > { %12379 = vst [vmem:[#allocation79_spill] sm:$0xff] %v9592_v54  ;;  %v6536_v59 = vld [vmem:[#allocation2 + $0x8] sm:$0xf0]  ;;  %v9603_v19 = vrot.slane %v3167_v24, 4  ;;  %v9605_v14 = vrot.slane %v3173_v16, 5  ;;  %v9607_v21 = vrot.slane %v3177_v51, 4  ;;  %4128 = vmatpush.bf16.msrb.mxu3 %v6629_v34 }
 0x223   : > { %v6613_v54 = vld [vmem:[#allocation3 + $0xd8] sm:$0xff]  ;;  %v9609_v42 = vrot.slane %v3187_v18, 4  ;;  %v9615_v28 = vrot.slane %v3193_v8, 5  ;;  %v3253_v11 = vshll.u32 %v9454_v6, 16  ;;  %v3257_v24 = vshrl.u32 %v9454_v6, 16 }
 0x224   : > { %12380 = vst [vmem:[#allocation35_spill] sm:$0xff] %v9603_v19  ;;  %v3267_v16 = vshrl.u32 %v9470_v38, 16  ;;  %v1271_v51 = vld [vmem:[#allocation2 + $0x10] sm:$0x8]  ;;  %v9624_v18 = vrot.slane %v3197_v47, 4  ;;  %v9626_v20 = vrot.slane %v3207_v12, 4  ;;  %3950 = vmatpush.bf16.msra.mxu1 %v6613_v54  ;;  %6712 = vmatpush.bf16.msra.mxu2 %v6613_v54 }
 0x225   : > { %12381 = vst [vmem:[#allocation81_spill] sm:$0xff] %v9609_v42  ;;  %v9628_v56 = vrot.slane %v3213_v41, 5  ;;  %v9630_v8 = vrot.slane %v3217_v10, 4  ;;  %v9632_v39 = vrot.slane %v3227_v36, 4  ;;  %v9634_v42 = vrot.slane %v3233_v45, 5  ;;  %v6612_v19 = vld [vmem:[#allocation3 + $0xd0] sm:$0xff] }
 0x226   : > { %v9636_v6 = vrot.slane %v3237_v26, 4  ;;  %v9638_v38 = vrot.slane %v3247_v25, 4  ;;  %v6136_v10 = vor.u32 %v6536_v59, %v6135_v60  ;;  %v6628_v12 = vld [vmem:[#allocation3 + $0x150] sm:$0xff]  ;;  %v1954_v41 = vsel %vm1729_vm3, %v1271_v51, 0  ;;  %v12384_v36 = vld [vmem:[#allocation56_spill] sm:$0xff] }
 0x227   : > { %12382 = vst [vmem:[#allocation51_spill] sm:$0xff] %v9632_v39  ;;  %v1956_v35 = vsel %vm1743_vm13, %v12384_v36, 0  ;;  %v9656_v4 = vrot.slane %v3253_v11, 5  ;;  %v9658_v54 = vrot.slane %v3257_v24, 4  ;;  %v9660_v59 = vrot.slane %v3267_v16, 4  ;;  %4129 = vmatpush.bf16.msrb.mxu3 %v6628_v12 }
 0x228   : > { %12383 = vst [vmem:[#allocation52_spill] sm:$0xff] %v9638_v38  ;;  %v1991_v34 = vshrl.u32 %v1954_v41, 16  ;;  %4381 = vmatmul.bf16.vlgmr.msrb.gmra.mxu0 %v6136_v10  ;;  %v12388_v45 = vshrl.u32 %v12387_v61, 16  ;;  %v2005_v26 = vshrl.u32 %v1956_v35, 16  ;;  %v2008_v25 = vshll.u32 %v1956_v35, 16  ;;  %3951 = vmatpush.bf16.msra.mxu1 %v6612_v19  ;;  %v6627_v41 = vld [vmem:[#allocation3 + $0x148] sm:$0xff] }
 0x229   : > { %12385 = vst [vmem:[#allocation57_spill] sm:$0xff] %v9658_v54  ;;  %v1972_v60 = vsel %vm1855_vm7, %v9241_v49, 0  ;;  %6713 = vmatpush.bf16.msra.mxu2 %v6612_v19  ;;  %v2131_v11 = vshrl.u32 %v9188_v58, 16  ;;  %v12389_v24 = vshrl.u32 %v9152_v37, 16  ;;  %v12390_v10 = vshll.u32 %v12387_v61, 16 }
 0x22a   : > { %12386 = vst [vmem:[#allocation54_spill] sm:$0xff] %v9660_v59  ;;  %v1998_v17 = vrot.slane %v12388_v45, 7  ;;  %v5844_v63 = vrot.slane %v1991_v34, 11  ;;  %v2149_v16 = vshrl.u32 %v1972_v60, 16  ;;  %v2007_v47 = vrot.slane %v2005_v26, 7  ;;  %v6610_v26 = vld [vmem:[#allocation3 + $0xc0] sm:$0xff] }
 0x22b   : > { %v2142_v51 = vrot.slane %v12389_v24, 7  ;;  %v2152_v35 = vshll.u32 %v1972_v60, 16  ;;  %v9670_v59 = vrot.slane %v2131_v11, 7  ;;  %v12391_v49 = vshll.u32 %v9152_v37, 16  ;;  %v9676_v39 = vld [vmem:[#allocation2 + $0x40] sm:$0xf]  ;;  %4130 = vmatpush.bf16.msrb.mxu3 %v6627_v41 }
 0x22c   : > { %v2001_v36 = vor.u32 %v12390_v10, %v1998_v17  ;;  %v2003_v45 = vrot.slane %v1998_v17, 4  ;;  %v9674_v38 = vrot.slane %v2149_v16, 7  ;;  %v12392_v24 = vld [vmem:[#allocation16_spill] sm:$0xff]  ;;  %v2010_v54 = vor.u32 %v2008_v25, %v2007_v47  ;;  %3952 = vmatpush.bf16.msra.mxu1 %v6611_v48  ;;  %v12398_v41 = vld [vmem:[#allocation10_spill] sm:$0xff] }
 0x22d   : > { %v2145_v19 = vor.u32 %v12391_v49, %v2142_v51  ;;  %v2147_v34 = vrot.slane %v2142_v51, 4  ;;  %vm12393_vm1 = vnez %v12392_v24  ;;  %v3000_v61 = vor.u32 %v9502_v30, %v9494_v9  ;;  %6714 = vmatpush.bf16.msra.mxu2 %v6611_v48  ;;  %v6626_v30 = vld [vmem:[#allocation3 + $0x140] sm:$0xff] }
 0x22e   : > { %v2002_v12 = vsel %vm12393_vm1, %v5844_v63, %v2001_v36  ;;  %v3003_v17 = vshll.u32 %v12352_v50, 16  ;;  %v2138_v37 = vrot.slane %v9670_v59, 4  ;;  %v2154_v60 = vor.u32 %v2152_v35, %v9674_v38  ;;  %v6625_v50 = vld [vmem:[#allocation3 + $0x138] sm:$0xff] }
 0x22f   : > { %2314 = vst [vmem:[#allocation2 + $0x18] sm:$0xf] %v2002_v12  ;;  %v12394_v11 = vunpack.c.l.b16 %v9252_v53  ;;  %v2012_v25 = vrot.slane %v2007_v47, 4  ;;  %v2011_v9 = vsel %vm12393_vm1, %v2003_v45, %v2010_v54  ;;  %v3001_v48 = vrot.slane %v3000_v61, 4  ;;  %v6598_v47 = vld [vmem:[#allocation3 + $0x78] sm:$0xff]  ;;  %4131 = vmatpush.bf16.msrb.mxu3 %v6626_v30 }
 0x230   : > { %v3005_v63 = vrot.slane %v3003_v17, 5  ;;  %v12397_v16 = vunpack.c.h.b16 %v9252_v53  ;;  %2315 = vst [vmem:[#allocation2 + $0x24] sm:$0xf] %v2011_v9  ;;  %v2146_v10 = vsel %vm12393_vm1, %v2138_v37, %v2145_v19  ;;  %v2155_v36 = vsel %vm12393_vm1, %v2147_v34, %v2154_v60  ;;  %3953 = vmatpush.bf16.msra.mxu1 %v6610_v26  ;;  %v12403_v30 = vld [vmem:[#allocation12_spill] sm:$0xff] }
 0x231   : > { %vm9688_vm5 = vcmp.ne.s32.totalorder %v12394_v11, %v11717_v52  ;;  %v12399_v54 = vshrl.u32 %v12398_v41, 16  ;;  %v1863_v35 = vunpack.c.l.b16 %v9438_v7  ;;  %2330 = vst [vmem:[#allocation2 + $0xd8] sm:$0xf] %v2146_v10  ;;  %v1864_v12 = vunpack.c.h.b16 %v9438_v7  ;;  %6715 = vmatpush.bf16.msra.mxu2 %v6610_v26  ;;  %v6624_v7 = vld [vmem:[#allocation3 + $0x130] sm:$0xff] }
 0x232   : > { %vm1756_vm15 = vcmp.ne.s32.totalorder %v12397_v16, %v11720_v0  ;;  %v3006_v53 = vsel %vm12400_vm6, %v3001_v48, %v3005_v63  ;;  %v3010_v49 = vor.u32 %v9541_v40, %v3005_v63  ;;  %2331 = vst [vmem:[#allocation2 + $0xe4] sm:$0xf] %v2155_v36  ;;  %v12401_v34 = vshll.u32 %v12398_v41, 16  ;;  %v6597_v63 = vld [vmem:[#allocation3 + $0x70] sm:$0xff] }
 0x233   : > { %vm1757_vm8 = vmpackc.low %vm1756_vm15, %vm9688_vm5  ;;  %v2016_v45 = vrot.slane %v12399_v54, 7  ;;  %3349 = vst [vmem:[#allocation2 + $0x20] sm:$0xf] %v3006_v53  ;;  %vm1867_vm12 = vcmp.ne.s32.totalorder %v1863_v35, %v11717_v52  ;;  %vm1868_vm9 = vcmp.ne.s32.totalorder %v1864_v12, %v11720_v0  ;;  %v2156_v40 = vrot.slane %v9674_v38, 4 }
 0x234   : > { %v1958_v19 = vsel %vm1757_vm8, %v9676_v39, 0  ;;  %v3011_v11 = vrot.slane %v3010_v49, 4  ;;  %4462 = vmatpush.bf16.msrb.mxu1 %v6598_v47  ;;  %vm1869_vm2 = vmpackc.low %vm1868_vm9, %vm1867_vm12  ;;  %v12402_v9 = vshrl.u32 %v9213_v3, 16  ;;  %v3020_v36 = vor.u32 %v9545_v46, %v9543_v57 }
 0x235   : > { %v2019_v61 = vor.u32 %v12401_v34, %v2016_v45  ;;  %v2021_v17 = vrot.slane %v2016_v45, 4  ;;  %v2023_v37 = vshrl.u32 %v1958_v19, 16  ;;  %v2026_v60 = vshll.u32 %v1958_v19, 16  ;;  %4035 = vmatpush.bf16.msrb.mxu2 %v6625_v50  ;;  %v12405_v19 = vld [vmem:[#allocation24_spill] sm:$0xff] }
 0x236   : > { %v2160_v48 = vrot.slane %v12402_v9, 7  ;;  %v2472_v50 = vshll.u32 %v12403_v30, 16  ;;  %v5847_v16 = vld [vmem:[#allocation2 + $0x18] sm:$0xf]  ;;  %v3016_v10 = vsel %vm12400_vm6, %v3011_v11, %v9543_v57  ;;  %v1974_v38 = vsel %vm1869_vm2, %v9243_v29, 0 }
 0x237   : > { %v2020_v26 = vsel %vm12393_vm1, %v2012_v25, %v2019_v61  ;;  %v2025_v51 = vrot.slane %v2023_v37, 7  ;;  %v3033_v25 = vshll.u32 %v12354_v22, 16  ;;  %3350 = vst [vmem:[#allocation2 + $0x2c] sm:$0xf] %v3016_v10  ;;  %v12404_v41 = vshll.u32 %v9213_v3, 16 }
 0x238   : > { %2316 = vst [vmem:[#allocation2 + $0x30] sm:$0xf] %v2020_v26  ;;  %v2165_v45 = vrot.slane %v2160_v48, 4  ;;  %v2167_v35 = vshrl.u32 %v1974_v38, 16  ;;  %v6539_v53 = vld [vmem:[#allocation2 + $0x20] sm:$0xf0]  ;;  %v2474_v12 = vor.u32 %v2472_v50, %v12405_v19  ;;  %4463 = vmatpush.bf16.msrb.mxu1 %v6597_v63 }
 0x239   : > { %v2028_v47 = vor.u32 %v2026_v60, %v2025_v51  ;;  %v2163_v54 = vor.u32 %v12404_v41, %v2160_v48  ;;  %v2170_v49 = vshll.u32 %v1974_v38, 16  ;;  %4036 = vmatpush.bf16.msrb.mxu2 %v6624_v7  ;;  %v9731_v34 = vrot.slane %v3020_v36, 4  ;;  %v5943_v57 = vld [vmem:[#allocation2 + $0xd8] sm:$0xf]  ;;  %v6563_v37 = vld [vmem:[#allocation2 + $0xe0] sm:$0xf0] }
 0x23a   : > { %v9733_v29 = vrot.slane %v3033_v25, 5  ;;  %v5848_v61 = vor.u32 %v6539_v53, %v5847_v16  ;;  %v9739_v46 = vrot.slane %v2167_v35, 7  ;;  %v12406_v60 = vld [vmem:[#allocation13_spill] sm:$0xff]  ;;  %v12407_v7 = vld [vmem:[#allocation27_spill] sm:$0xff]  ;;  %v2030_v9 = vrot.slane %v2025_v51, 4 }
 0x23b   : > { %v2029_v22 = vsel %vm12393_vm1, %v2021_v17, %v2028_v47  ;;  %v2164_v3 = vsel %vm12393_vm1, %v2156_v40, %v2163_v54  ;;  %v2475_v11 = vsel %vm12393_vm1, %v12406_v60, %v2474_v12  ;;  %v1467_v26 = vsel %vm12400_vm6, %v12182_v13, %v12407_v7  ;;  %v12408_v48 = vld [vmem:[#allocation65_spill] sm:$0xff]  ;;  %v5855_v10 = vld [vmem:[#allocation2 + $0x20] sm:$0xf]  ;;  %v9759_v41 = vld [vmem:[#allocation2 + $0x58] sm:$0xf] }
 0x23c   : > { %2317 = vst [vmem:[#allocation2 + $0x3c] sm:$0xf] %v2029_v22  ;;  %v12409_v17 = vshrl.u32 %v12408_v48, 16  ;;  %3954 = vmatmul.bf16.vlgmr.msra.gmra.mxu1 %v5848_v61  ;;  %v9752_v40 = vor.u32 %v6563_v37, %v5943_v57  ;;  %4386 = vmatmul.bf16.gmra.mxu0 %v5848_v61  ;;  %v2172_v50 = vor.u32 %v2170_v49, %v9739_v46  ;;  %v2750_v63 = vunpack.c.l.b16 %v2475_v11  ;;  %v12411_v35 = vld [vmem:[#allocation55_spill] sm:$0xff]  ;;  %v6623_v49 = vld [vmem:[#allocation3 + $0x128] sm:$0xff] }
 0x23d   : > { %2332 = vst [vmem:[#allocation2 + $0xf0] sm:$0xf] %v2164_v3  ;;  %v2751_v16 = vunpack.c.h.b16 %v2475_v11  ;;  %v1765_v38 = vunpack.c.l.b16 %v1467_v26  ;;  %v1766_v36 = vunpack.c.h.b16 %v1467_v26  ;;  %v12410_v25 = vshll.u32 %v12408_v48, 16  ;;  %4037 = vmatpush.bf16.msrb.mxu2 %v6623_v49 }
 0x23e   : > { %v9750_v30 = vrot.slane %v12409_v17, 7  ;;  %3994 = vmatmul.bf16.vlgmr.msra.gmra.mxu2 %v9752_v40  ;;  %v2173_v54 = vsel %vm12393_vm1, %v2165_v45, %v2172_v50  ;;  %vm2754_vm4 = vcmp.ne.s32.totalorder %v2750_v63, %v11717_v52  ;;  %v1627_v53 = vsel %vm12400_vm6, %v12182_v13, %v12411_v35  ;;  %v6540_v19 = vld [vmem:[#allocation2 + $0x28] sm:$0xf0] }
 0x23f   : > { %vm2755_vm0 = vcmp.ne.s32.totalorder %v2751_v16, %v11720_v0  ;;  %2333 = vst [vmem:[#allocation2 + $0xfc] sm:$0xf] %v2173_v54  ;;  %vm1769_vm14 = vcmp.ne.s32.totalorder %v1765_v38, %v11717_v52  ;;  %vm1770_vm10 = vcmp.ne.s32.totalorder %v1766_v36, %v11720_v0  ;;  %v1877_v12 = vunpack.c.l.b16 %v1627_v53  ;;  %v5859_v57 = vld [vmem:[#allocation2 + $0x30] sm:$0xf]  ;;  %v12413_v16 = vld [vmem:[#allocation18_spill] sm:$0xff] }
 0x240   : > { %v2037_v51 = vor.u32 %v12410_v25, %v9750_v30  ;;  %v2039_v47 = vrot.slane %v9750_v30, 4  ;;  %vm2756_vm11 = vmpackc.low %vm2755_vm0, %vm2754_vm4  ;;  %v9774_v61 = vor.u32 %v6540_v19, %v5855_v10  ;;  %v1878_v3 = vunpack.c.h.b16 %v1627_v53  ;;  %v6596_v53 = vld [vmem:[#allocation3 + $0x68] sm:$0xff] }
 0x241   : > { %v2963_v22 = vsel %vm2756_vm11, %v9676_v39, 0  ;;  %vm1771_vm13 = vmpackc.low %vm1770_vm10, %vm1769_vm14  ;;  %v2174_v37 = vrot.slane %v9739_v46, 4  ;;  %vm1881_vm3 = vcmp.ne.s32.totalorder %v1877_v12, %v11717_v52  ;;  %v12412_v39 = vshrl.u32 %v9232_v5, 16  ;;  %4464 = vmatpush.bf16.msrb.mxu1 %v6596_v53 }
 0x242   : > { %v2038_v45 = vsel %vm12393_vm1, %v2030_v9, %v2037_v51  ;;  %v3023_v11 = vshll.u32 %v2963_v22, 16  ;;  %v3027_v7 = vshrl.u32 %v2963_v22, 16  ;;  %v1960_v26 = vsel %vm1771_vm13, %v9759_v41, 0  ;;  %4132 = vmatmul.bf16.vlgmr.msrb.gmra.mxu3 %v9774_v61 }
 0x243   : > { %2318 = vst [vmem:[#allocation2 + $0x48] sm:$0xf] %v2038_v45  ;;  %v6542_v9 = vld [vmem:[#allocation2 + $0x38] sm:$0xf0]  ;;  %v2041_v48 = vshrl.u32 %v1960_v26, 16  ;;  %v2044_v17 = vshll.u32 %v1960_v26, 16  ;;  %vm1882_vm7 = vcmp.ne.s32.totalorder %v1878_v3, %v11720_v0 }
 0x244   : > { %v2178_v30 = vrot.slane %v12412_v39, 7  ;;  %v5860_v50 = vor.u32 %v6542_v9, %v5859_v57  ;;  %v3025_v63 = vrot.slane %v3023_v11, 5  ;;  %v3029_v46 = vrot.slane %v3027_v7, 4  ;;  %vm1883_vm5 = vmpackc.low %vm1882_vm7, %vm1881_vm3  ;;  %v5955_v38 = vld [vmem:[#allocation2 + $0xf0] sm:$0xf] }
 0x245   : > { %v2490_v10 = vshll.u32 %v12413_v16, 16  ;;  %v9785_v36 = vrot.slane %v2041_v48, 7  ;;  %v1976_v25 = vsel %vm1883_vm5, %v9279_v33, 0  ;;  %v12414_v51 = vshll.u32 %v9232_v5, 16  ;;  %v12415_v33 = vld [vmem:[#allocation28_spill] sm:$0xff] }
 0x246   : > { %v2183_v35 = vrot.slane %v2178_v30, 4  ;;  %v3026_v49 = vsel %vm12400_vm6, %v9731_v34, %v3025_v63  ;;  %v3030_v19 = vor.u32 %v3029_v46, %v3025_v63  ;;  %v2185_v45 = vshrl.u32 %v1976_v25, 16  ;;  %v6566_v57 = vld [vmem:[#allocation2 + $0xf8] sm:$0xf0]  ;;  %v12416_v34 = vld [vmem:[#allocation40_spill] sm:$0xff] }
 0x247   : > { %v2181_v54 = vor.u32 %v12414_v51, %v2178_v30  ;;  %v2188_v12 = vshll.u32 %v1976_v25, 16  ;;  %3351 = vst [vmem:[#allocation2 + $0x38] sm:$0xf] %v3026_v49  ;;  %v2046_v22 = vor.u32 %v2044_v17, %v9785_v36  ;;  %v2492_v11 = vor.u32 %v2490_v10, %v12415_v33  ;;  %v9820_v51 = vld [vmem:[#allocation2 + $0x70] sm:$0xf] }
 0x248   : > { %v3040_v5 = vor.u32 %v9547_v43, %v9733_v29  ;;  %v9799_v7 = vor.u32 %v6566_v57, %v5955_v38  ;;  %v3031_v26 = vrot.slane %v3030_v19, 4  ;;  %v9801_v9 = vrot.slane %v2185_v45, 7 }
 0x249   : > { %v2182_v3 = vsel %vm12393_vm1, %v2174_v37, %v2181_v54  ;;  %v1487_v48 = vsel %vm12400_vm6, %v12182_v13, %v12416_v34  ;;  %v2047_v37 = vsel %vm12393_vm1, %v2039_v47, %v2046_v22  ;;  %v2493_v17 = vsel %vm12393_vm1, %v12406_v60, %v2492_v11 }
 0x24a   : > { %2334 = vst [vmem:[#allocation2 + $0x108] sm:$0xf] %v2182_v3  ;;  %v3041_v43 = vrot.slane %v3040_v5, 4  ;;  %v3053_v39 = vshll.u32 %v12355_v44, 16  ;;  %v3036_v30 = vsel %vm12400_vm6, %v3031_v26, %v9733_v29  ;;  %v2190_v63 = vor.u32 %v2188_v12, %v9801_v9  ;;  %v12417_v29 = vld [vmem:[#allocation70_spill] sm:$0xff]  ;;  %v6622_v5 = vld [vmem:[#allocation3 + $0x120] sm:$0xff] }
 0x24b   : > { %2319 = vst [vmem:[#allocation2 + $0x54] sm:$0xf] %v2047_v37  ;;  %v2764_v46 = vunpack.c.l.b16 %v2493_v17  ;;  %v2765_v16 = vunpack.c.h.b16 %v2493_v17  ;;  %v1779_v47 = vunpack.c.l.b16 %v1487_v48  ;;  %v1780_v38 = vunpack.c.h.b16 %v1487_v48  ;;  %4038 = vmatpush.bf16.msrb.mxu2 %v6622_v5 }
 0x24c   : > { %3352 = vst [vmem:[#allocation2 + $0x44] sm:$0xf] %v3036_v30  ;;  %v9817_v10 = vrot.slane %v3053_v39, 5  ;;  %v2048_v25 = vrot.slane %v9785_v36, 4  ;;  %v2191_v44 = vsel %vm12393_vm1, %v2183_v35, %v2190_v63  ;;  %v12418_v54 = vshrl.u32 %v12417_v29, 16  ;;  %3959 = vmatmul.bf16.gmra.mxu1 %v5860_v50  ;;  %4391 = vmatmul.bf16.gmra.mxu0 %v5860_v50  ;;  %v12419_v36 = vld [vmem:[#allocation61_spill] sm:$0xff] }
 0x24d   : > { %vm2768_vm15 = vcmp.ne.s32.totalorder %v2764_v46, %v11717_v52  ;;  %vm2769_vm8 = vcmp.ne.s32.totalorder %v2765_v16, %v11720_v0  ;;  %2335 = vst [vmem:[#allocation2 + $0x114] sm:$0xf] %v2191_v44  ;;  %vm1783_vm9 = vcmp.ne.s32.totalorder %v1779_v47, %v11717_v52  ;;  %vm1784_vm2 = vcmp.ne.s32.totalorder %v1780_v38, %v11720_v0  ;;  %v5871_v50 = vld [vmem:[#allocation2 + $0x48] sm:$0xf]  ;;  %v12423_v46 = vld [vmem:[#allocation15_spill] sm:$0xff] }
 0x24e   : > { %v2052_v53 = vrot.slane %v12418_v54, 7  ;;  %vm2770_vm12 = vmpackc.low %vm2769_vm8, %vm2768_vm15  ;;  %v1647_v35 = vsel %vm12400_vm6, %v12182_v13, %v12419_v36  ;;  %v12420_v19 = vshll.u32 %v12417_v29, 16  ;;  %3999 = vmatmul.bf16.gmra.mxu2 %v9799_v7  ;;  %v5867_v26 = vld [vmem:[#allocation2 + $0x38] sm:$0xf]  ;;  %v3060_v16 = vor.u32 %v12423_v46, %v9817_v10 }
 0x24f   : > { %v2965_v49 = vsel %vm2770_vm12, %v9759_v41, 0  ;;  %vm1785_vm4 = vmpackc.low %vm1784_vm2, %vm1783_vm9  ;;  %v1891_v57 = vunpack.c.l.b16 %v1647_v35  ;;  %v1892_v11 = vunpack.c.h.b16 %v1647_v35  ;;  %v2192_v44 = vrot.slane %v9801_v9, 4  ;;  %v12424_v29 = vld [vmem:[#allocation82_spill] sm:$0xff] }
 0x250   : > { %v2055_v45 = vor.u32 %v12420_v19, %v2052_v53  ;;  %v2057_v12 = vrot.slane %v2052_v53, 4  ;;  %v3043_v22 = vshll.u32 %v2965_v49, 16  ;;  %v3047_v3 = vshrl.u32 %v2965_v49, 16  ;;  %v12426_v19 = vld [vmem:[#allocation30_spill] sm:$0xff] }
 0x251   : > { %v1962_v33 = vsel %vm1785_vm4, %v9820_v51, 0  ;;  %v5967_v34 = vld [vmem:[#allocation2 + $0x108] sm:$0xf]  ;;  %vm9842_vm0 = vcmp.ne.s32.totalorder %v1891_v57, %v11717_v52  ;;  %vm1896_vm11 = vcmp.ne.s32.totalorder %v1892_v11, %v11720_v0  ;;  %v12425_v54 = vshrl.u32 %v12424_v29, 16 }
 0x252   : > { %v2056_v41 = vsel %vm12393_vm1, %v2048_v25, %v2055_v45  ;;  %v2059_v48 = vshrl.u32 %v1962_v33, 16  ;;  %v2062_v37 = vshll.u32 %v1962_v33, 16  ;;  %v6545_v39 = vld [vmem:[#allocation2 + $0x50] sm:$0xf0]  ;;  %v3045_v30 = vrot.slane %v3043_v22, 5  ;;  %vm1897_vm14 = vmpackc.low %vm1896_vm11, %vm9842_vm0 }
 0x253   : > { %v3049_v63 = vrot.slane %v3047_v3, 4  ;;  %2320 = vst [vmem:[#allocation2 + $0x60] sm:$0xf] %v2056_v41  ;;  %v6543_v47 = vld [vmem:[#allocation2 + $0x40] sm:$0xf0]  ;;  %v5872_v38 = vor.u32 %v6545_v39, %v5871_v50  ;;  %v2196_v53 = vrot.slane %v12425_v54, 7 }
 0x254   : > { %v9849_v25 = vrot.slane %v2059_v48, 7  ;;  %v9856_v36 = vor.u32 %v6543_v47, %v5867_v26  ;;  %v3046_v35 = vsel %vm12400_vm6, %v3041_v43, %v3045_v30  ;;  %v1978_v45 = vsel %vm1897_vm14, %v12426_v19, 0  ;;  %v6569_v57 = vld [vmem:[#allocation2 + $0x110] sm:$0xf0]  ;;  %v12428_v41 = vld [vmem:[#allocation36_spill] sm:$0xff] }
 0x255   : > { %v3050_v49 = vor.u32 %v3049_v63, %v3045_v30  ;;  %3353 = vst [vmem:[#allocation2 + $0x50] sm:$0xf] %v3046_v35  ;;  %v12427_v22 = vshll.u32 %v12424_v29, 16  ;;  %v2201_v33 = vrot.slane %v2196_v53, 4  ;;  %v2203_v9 = vshrl.u32 %v1978_v45, 16  ;;  %v6595_v48 = vld [vmem:[#allocation3 + $0x60] sm:$0xff] }
 0x256   : > { %v2064_v50 = vor.u32 %v2062_v37, %v9849_v25  ;;  %4137 = vmatmul.bf16.gmra.mxu3 %v9856_v36  ;;  %v9865_v11 = vor.u32 %v6569_v57, %v5967_v34  ;;  %v2206_v26 = vshll.u32 %v1978_v45, 16  ;;  %v2508_v43 = vshll.u32 %v12428_v41, 16  ;;  %v12429_v63 = vld [vmem:[#allocation41_spill] sm:$0xff]  ;;  %4465 = vmatpush.bf16.msrb.mxu1 %v6595_v48  ;;  %v12431_v54 = vld [vmem:[#allocation48_spill] sm:$0xff] }
 0x257   : > { %v2199_v3 = vor.u32 %v12427_v22, %v2196_v53  ;;  %v3051_v5 = vrot.slane %v3050_v49, 4  ;;  %v9872_v39 = vrot.slane %v2203_v9, 7  ;;  %v9874_v30 = vrot.slane %v3060_v16, 4  ;;  %v12430_v47 = vld [vmem:[#allocation77_spill] sm:$0xff]  ;;  %v12432_v19 = vld [vmem:[#allocation72_spill] sm:$0xff] }
 0x258   : > { %v2065_v17 = vsel %vm12393_vm1, %v2057_v12, %v2064_v50  ;;  %v2510_v46 = vor.u32 %v2508_v43, %v12429_v63  ;;  %v3073_v29 = vshll.u32 %v12430_v47, 16  ;;  %v1507_v12 = vsel %vm12400_vm6, %v12182_v13, %v12431_v54  ;;  %v12434_v50 = vld [vmem:[#allocation73_spill] sm:$0xff] }
 0x259   : > { %v2200_v37 = vsel %vm12393_vm1, %v2192_v44, %v2199_v3  ;;  %v3056_v34 = vsel %vm12400_vm6, %v3051_v5, %v9817_v10  ;;  %2321 = vst [vmem:[#allocation2 + $0x6c] sm:$0xf] %v2065_v17  ;;  %v2208_v44 = vor.u32 %v2206_v26, %v9872_v39  ;;  %v1793_v16 = vunpack.c.l.b16 %v1507_v12  ;;  %v9900_v3 = vld [vmem:[#allocation2 + $0x88] sm:$0xf] }
 0x25a   : > { %3354 = vst [vmem:[#allocation2 + $0x5c] sm:$0xf] %v3056_v34  ;;  %v1794_v53 = vunpack.c.h.b16 %v1507_v12  ;;  %v2066_v35 = vrot.slane %v9849_v25, 4  ;;  %v2511_v10 = vsel %vm12393_vm1, %v12406_v60, %v2510_v46  ;;  %v9890_v49 = vrot.slane %v3073_v29, 5  ;;  %v5883_v46 = vld [vmem:[#allocation2 + $0x60] sm:$0xf] }
 0x25b   : > { %2336 = vst [vmem:[#allocation2 + $0x120] sm:$0xf] %v2200_v37  ;;  %v12433_v45 = vshrl.u32 %v12432_v19, 16  ;;  %v1667_v22 = vsel %vm12400_vm6, %v12182_v13, %v12434_v50  ;;  %v2209_v25 = vsel %vm12393_vm1, %v2201_v33, %v2208_v44  ;;  %v2778_v9 = vunpack.c.l.b16 %v2511_v10  ;;  %v12442_v12 = vld [vmem:[#allocation71_spill] sm:$0xff]  ;;  %v6621_v26 = vld [vmem:[#allocation3 + $0x118] sm:$0xff] }
 0x25c   : > { %v2779_v5 = vunpack.c.h.b16 %v2511_v10  ;;  %vm9905_vm10 = vcmp.ne.s32.totalorder %v1793_v16, %v11717_v52  ;;  %2337 = vst [vmem:[#allocation2 + $0x12c] sm:$0xf] %v2209_v25  ;;  %vm1798_vm13 = vcmp.ne.s32.totalorder %v1794_v53, %v11720_v0  ;;  %v12437_v41 = vshll.u32 %v12432_v19, 16  ;;  %3964 = vmatmul.bf16.gmra.mxu1 %v5872_v38  ;;  %4396 = vmatmul.bf16.gmra.mxu0 %v5872_v38  ;;  %v5879_v63 = vld [vmem:[#allocation2 + $0x50] sm:$0xf] }
 0x25d   : > { %v9894_v57 = vrot.slane %v12433_v45, 7  ;;  %v1905_v17 = vunpack.c.l.b16 %v1667_v22  ;;  %vm9915_vm3 = vcmp.ne.s32.totalorder %v2778_v9, %v11717_v52  ;;  %vm1799_vm5 = vmpackc.low %vm1798_vm13, %vm9905_vm10  ;;  %v1906_v37 = vunpack.c.h.b16 %v1667_v22  ;;  %v12445_v9 = vld [vmem:[#allocation83_spill] sm:$0xff]  ;;  %4039 = vmatpush.bf16.msrb.mxu2 %v6621_v26 }
 0x25e   : > { %vm2783_vm7 = vcmp.ne.s32.totalorder %v2779_v5, %v11720_v0  ;;  %v2210_v34 = vrot.slane %v9872_v39, 4  ;;  %v1964_v47 = vsel %vm1799_vm5, %v9900_v3, 0  ;;  %v12443_v44 = vshrl.u32 %v12442_v12, 16  ;;  %4004 = vmatmul.bf16.gmra.mxu2 %v9865_v11 }
 0x25f   : > { %v2073_v43 = vor.u32 %v12437_v41, %v9894_v57  ;;  %v2075_v48 = vrot.slane %v9894_v57, 4  ;;  %vm2784_vm15 = vmpackc.low %vm2783_vm7, %vm9915_vm3  ;;  %vm9929_vm8 = vcmp.ne.s32.totalorder %v1905_v17, %v11717_v52  ;;  %v2077_v53 = vshrl.u32 %v1964_v47, 16 }
 0x260   : > { %v2214_v39 = vrot.slane %v12443_v44, 7  ;;  %v6548_v16 = vld [vmem:[#allocation2 + $0x68] sm:$0xf0]  ;;  %v2967_v38 = vsel %vm2784_vm15, %v9820_v51, 0  ;;  %v2080_v10 = vshll.u32 %v1964_v47, 16  ;;  %vm1910_vm12 = vcmp.ne.s32.totalorder %v1906_v37, %v11720_v0 }
 0x261   : > { %v2074_v29 = vsel %vm12393_vm1, %v2066_v35, %v2073_v43  ;;  %v6546_v19 = vld [vmem:[#allocation2 + $0x58] sm:$0xf0]  ;;  %v3063_v45 = vshll.u32 %v2967_v38, 16  ;;  %v3067_v35 = vshrl.u32 %v2967_v38, 16  ;;  %vm1911_vm9 = vmpackc.low %vm1910_vm12, %vm9929_vm8  ;;  %v12444_v57 = vshll.u32 %v12442_v12, 16 }
 0x262   : > { %2322 = vst [vmem:[#allocation2 + $0x78] sm:$0xf] %v2074_v29  ;;  %v9942_v22 = vor.u32 %v6546_v19, %v5879_v63  ;;  %v9944_v25 = vor.u32 %v6548_v16, %v5883_v46  ;;  %v9946_v51 = vrot.slane %v2077_v53, 7  ;;  %v1980_v5 = vsel %vm1911_vm9, %v12445_v9, 0  ;;  %v5979_v41 = vld [vmem:[#allocation2 + $0x120] sm:$0xf] }
 0x263   : > { %v2217_v50 = vor.u32 %v12444_v57, %v2214_v39  ;;  %v3065_v43 = vrot.slane %v3063_v45, 5  ;;  %v3069_v17 = vrot.slane %v3067_v35, 4  ;;  %v2221_v37 = vshrl.u32 %v1980_v5, 16  ;;  %v6572_v47 = vld [vmem:[#allocation2 + $0x128] sm:$0xf0]  ;;  %v12446_v63 = vld [vmem:[#allocation43_spill] sm:$0xff] }
 0x264   : > { %v2082_v29 = vor.u32 %v2080_v10, %v9946_v51  ;;  %v2219_v54 = vrot.slane %v2214_v39, 4  ;;  %v2526_v46 = vshll.u32 %v12446_v63, 16  ;;  %v3080_v12 = vor.u32 %v9568_v31, %v9890_v49  ;;  %v12447_v10 = vld [vmem:[#allocation50_spill] sm:$0xff]  ;;  %v12448_v45 = vld [vmem:[#allocation53_spill] sm:$0xff]  ;;  %v12449_v9 = vld [vmem:[#allocation59_spill] sm:$0xff] }
 0x265   : > { %v2218_v33 = vsel %vm12393_vm1, %v2210_v34, %v2217_v50  ;;  %v3066_v44 = vsel %vm12400_vm6, %v9874_v30, %v3065_v43  ;;  %v3070_v16 = vor.u32 %v3069_v17, %v3065_v43  ;;  %v9958_v38 = vrot.slane %v2221_v37, 7  ;;  %v6594_v50 = vld [vmem:[#allocation3 + $0x58] sm:$0xff] }
 0x266   : > { %2338 = vst [vmem:[#allocation2 + $0x138] sm:$0xf] %v2218_v33  ;;  %v2224_v34 = vshll.u32 %v1980_v5, 16  ;;  %v9960_v53 = vor.u32 %v6572_v47, %v5979_v41  ;;  %v2083_v39 = vsel %vm12393_vm1, %v2075_v48, %v2082_v29  ;;  %v2528_v19 = vor.u32 %v2526_v46, %v12447_v10  ;;  %4142 = vmatmul.bf16.gmra.mxu3 %v9942_v22  ;;  %v12450_v29 = vld [vmem:[#allocation26_spill] sm:$0xff] }
 0x267   : > { %3355 = vst [vmem:[#allocation2 + $0x68] sm:$0xf] %v3066_v44  ;;  %v3093_v35 = vshll.u32 %v12448_v45, 16  ;;  %v3071_v31 = vrot.slane %v3070_v16, 4  ;;  %v9968_v57 = vrot.slane %v3080_v12, 4  ;;  %v1527_v5 = vsel %vm12400_vm6, %v12182_v13, %v12449_v9  ;;  %4466 = vmatpush.bf16.msrb.mxu1 %v6594_v50 }
 0x268   : > { %2323 = vst [vmem:[#allocation2 + $0x84] sm:$0xf] %v2083_v39  ;;  %v2226_v30 = vor.u32 %v2224_v34, %v9958_v38  ;;  %v2529_v48 = vsel %vm12393_vm1, %v12406_v60, %v2528_v19  ;;  %v1807_v41 = vunpack.c.l.b16 %v1527_v5  ;;  %v1808_v43 = vunpack.c.h.b16 %v1527_v5  ;;  %v6780_v44 = vld [vmem:[#allocation2 + $0xa0] sm:$0xf] }
 0x269   : > { %v9977_v26 = vrot.slane %v3093_v35, 5  ;;  %v3076_v17 = vsel %vm12400_vm6, %v3071_v31, %v9890_v49  ;;  %v2792_v37 = vunpack.c.l.b16 %v2529_v48  ;;  %v2793_v47 = vunpack.c.h.b16 %v2529_v48  ;;  %v12456_v5 = vld [vmem:[#allocation11_spill] sm:$0xff] }
 0x26a   : > { %v2227_v33 = vsel %vm12393_vm1, %v2219_v54, %v2226_v30  ;;  %3356 = vst [vmem:[#allocation2 + $0x74] sm:$0xf] %v3076_v17  ;;  %vm1811_vm2 = vcmp.ne.s32.totalorder %v1807_v41, %v11717_v52  ;;  %vm1812_vm4 = vcmp.ne.s32.totalorder %v1808_v43, %v11720_v0  ;;  %v2084_v60 = vrot.slane %v9946_v51, 4  ;;  %v12452_v54 = vld [vmem:[#allocation75_spill] sm:$0xff] }
 0x26b   : > { %v12451_v63 = vshrl.u32 %v12450_v29, 16  ;;  %2339 = vst [vmem:[#allocation2 + $0x144] sm:$0xf] %v2227_v33  ;;  %vm2796_vm0 = vcmp.ne.s32.totalorder %v2792_v37, %v11717_v52  ;;  %vm2797_vm11 = vcmp.ne.s32.totalorder %v2793_v47, %v11720_v0  ;;  %v3100_v49 = vor.u32 %v9570_v15, %v9977_v26  ;;  %vm1813_vm14 = vmpackc.low %vm1812_vm4, %vm1811_vm2  ;;  %v12458_v47 = vld [vmem:[#allocation84_spill] sm:$0xff] }
 0x26c   : > { %v1687_v12 = vsel %vm12400_vm6, %v12182_v13, %v12452_v54  ;;  %vm2798_vm10 = vmpackc.low %vm2797_vm11, %vm2796_vm0  ;;  %v1966_v51 = vsel %vm1813_vm14, %v6780_v44, 0  ;;  %v12453_v16 = vshll.u32 %v12450_v29, 16  ;;  %v2228_v10 = vrot.slane %v9958_v38, 4  ;;  %3969 = vmatmul.bf16.gmra.mxu1 %v9944_v25  ;;  %4401 = vmatmul.bf16.gmra.mxu0 %v9944_v25  ;;  %v6620_v44 = vld [vmem:[#allocation3 + $0x110] sm:$0xff] }
 0x26d   : > { %v2088_v46 = vrot.slane %v12451_v63, 7  ;;  %v1919_v39 = vunpack.c.l.b16 %v1687_v12  ;;  %v2969_v19 = vsel %vm2798_vm10, %v9900_v3, 0  ;;  %v2095_v35 = vshrl.u32 %v1966_v51, 16  ;;  %v6781_v63 = vld [vmem:[#allocation2 + $0x160] sm:$0xf]  ;;  %4040 = vmatpush.bf16.msrb.mxu2 %v6620_v44  ;;  %v12465_v44 = vld [vmem:[#allocation78_spill] sm:$0xff] }
 0x26e   : > { %v1920_v15 = vunpack.c.h.b16 %v1687_v12  ;;  %v3083_v31 = vshll.u32 %v2969_v19, 16  ;;  %v3087_v30 = vshrl.u32 %v2969_v19, 16  ;;  %v2098_v3 = vshll.u32 %v1966_v51, 16  ;;  %v5891_v17 = vld [vmem:[#allocation2 + $0x68] sm:$0xf]  ;;  %4009 = vmatmul.bf16.gmra.mxu2 %v9960_v53 }
 0x26f   : > { %v2091_v34 = vor.u32 %v12453_v16, %v2088_v46  ;;  %v2093_v45 = vrot.slane %v2088_v46, 4  ;;  %vm10004_vm13 = vcmp.ne.s32.totalorder %v1919_v39, %v11717_v52  ;;  %v10010_v38 = vrot.slane %v2095_v35, 7 }
 0x270   : > { %vm1924_vm3 = vcmp.ne.s32.totalorder %v1920_v15, %v11720_v0  ;;  %v12457_v48 = vshrl.u32 %v12456_v5, 16  ;;  %v3277_v43 = vshrl.u32 %v9477_v62, 16  ;;  %v3085_v33 = vrot.slane %v3083_v31, 5 }
 0x271   : > { %v2092_v50 = vsel %vm12393_vm1, %v2084_v60, %v2091_v34  ;;  %v3089_v37 = vrot.slane %v3087_v30, 4  ;;  %vm1925_vm7 = vmpackc.low %vm1924_vm3, %vm10004_vm13  ;;  %v3103_v60 = vshll.u32 %v12458_v47, 16  ;;  %v6549_v25 = vld [vmem:[#allocation2 + $0x70] sm:$0xf0]  ;;  %v2100_v29 = vor.u32 %v2098_v3, %v10010_v38 }
 0x272   : > { %2324 = vst [vmem:[#allocation2 + $0x90] sm:$0xf] %v2092_v50  ;;  %v2232_v41 = vrot.slane %v12457_v48, 7  ;;  %v1982_v46 = vsel %vm1925_vm7, %v6781_v63, 0  ;;  %v12459_v54 = vshll.u32 %v12456_v5, 16  ;;  %v3101_v51 = vrot.slane %v3100_v49, 4 }
 0x273   : > { %v3086_v16 = vsel %vm12400_vm6, %v9968_v57, %v3085_v33  ;;  %v3090_v34 = vor.u32 %v3089_v37, %v3085_v33  ;;  %v2239_v19 = vshrl.u32 %v1982_v46, 16  ;;  %v10026_v35 = vor.u32 %v6549_v25, %v5891_v17  ;;  %v12460_v57 = vld [vmem:[#allocation64_spill] sm:$0xff] }
 0x274   : > { %v2235_v12 = vor.u32 %v12459_v54, %v2232_v41  ;;  %v2237_v39 = vrot.slane %v2232_v41, 4  ;;  %3357 = vst [vmem:[#allocation2 + $0x80] sm:$0xf] %v3086_v16  ;;  %v2101_v15 = vsel %vm12393_vm1, %v2093_v45, %v2100_v29  ;;  %v2242_v30 = vshll.u32 %v1982_v46, 16  ;;  %v12461_v41 = vld [vmem:[#allocation74_spill] sm:$0xff] }
 0x275   : > { %v3091_v50 = vrot.slane %v3090_v34, 4  ;;  %2325 = vst [vmem:[#allocation2 + $0x9c] sm:$0xf] %v2101_v15  ;;  %v10032_v49 = vrot.slane %v2239_v19, 7  ;;  %v3105_v9 = vrot.slane %v3103_v60, 5  ;;  %v1547_v3 = vsel %vm12400_vm6, %v12182_v13, %v12460_v57 }
 0x276   : > { %v2236_v31 = vsel %vm12393_vm1, %v2228_v10, %v2235_v12  ;;  %v1821_v5 = vunpack.c.l.b16 %v1547_v3  ;;  %v1822_v48 = vunpack.c.h.b16 %v1547_v3  ;;  %v2102_v45 = vrot.slane %v10010_v38, 4  ;;  %4147 = vmatmul.bf16.gmra.mxu3 %v10026_v35  ;;  %v6593_v38 = vld [vmem:[#allocation3 + $0x50] sm:$0xff]  ;;  %v5895_v46 = vld [vmem:[#allocation2 + $0x78] sm:$0xf] }
 0x277   : > { %2340 = vst [vmem:[#allocation2 + $0x150] sm:$0xf] %v2236_v31  ;;  %v12462_v17 = vshrl.u32 %v12461_v41, 16  ;;  %v3096_v33 = vsel %vm12400_vm6, %v3091_v50, %v9977_v26  ;;  %v2244_v37 = vor.u32 %v2242_v30, %v10032_v49  ;;  %v3106_v47 = vsel %vm12400_vm6, %v3101_v51, %v3105_v9  ;;  %v5991_v16 = vld [vmem:[#allocation2 + $0x138] sm:$0xf]  ;;  %4467 = vmatpush.bf16.msrb.mxu1 %v6593_v38 }
 0x278   : > { %v3110_v60 = vor.u32 %v9572_v2, %v3105_v9  ;;  %v12463_v25 = vshll.u32 %v9477_v62, 16  ;;  %3358 = vst [vmem:[#allocation2 + $0x8c] sm:$0xf] %v3096_v33  ;;  %vm1825_vm5 = vcmp.ne.s32.totalorder %v1821_v5, %v11717_v52  ;;  %vm1826_vm15 = vcmp.ne.s32.totalorder %v1822_v48, %v11720_v0  ;;  %v6782_v34 = vld [vmem:[#allocation2 + $0xb8] sm:$0xf]  ;;  %v12466_v48 = vld [vmem:[#allocation31_spill] sm:$0xff] }
 0x279   : > { %v2106_v10 = vrot.slane %v12462_v17, 7  ;;  %v12464_v26 = vshll.u32 %v12461_v41, 16  ;;  %v2245_v54 = vsel %vm12393_vm1, %v2237_v39, %v2244_v37  ;;  %3359 = vst [vmem:[#allocation2 + $0x98] sm:$0xf] %v3106_v47  ;;  %vm1827_vm8 = vmpackc.low %vm1826_vm15, %vm1825_vm5  ;;  %v1707_v51 = vsel %vm12400_vm6, %v12182_v13, %v12465_v44  ;;  %v6551_v39 = vld [vmem:[#allocation2 + $0x80] sm:$0xf0] }
 0x27a   : > { %v10050_v29 = vrot.slane %v12463_v25, 5  ;;  %v3111_v2 = vrot.slane %v3110_v60, 4  ;;  %2341 = vst [vmem:[#allocation2 + $0x15c] sm:$0xf] %v2245_v54  ;;  %v1968_v19 = vsel %vm1827_vm8, %v6782_v34, 0  ;;  %v1933_v31 = vunpack.c.l.b16 %v1707_v51  ;;  %v12468_v17 = vld [vmem:[#allocation22_spill] sm:$0xff] }
 0x27b   : > { %v2109_v63 = vor.u32 %v12464_v26, %v2106_v10  ;;  %v2111_v12 = vrot.slane %v2106_v10, 4  ;;  %v1934_v30 = vunpack.c.h.b16 %v1707_v51  ;;  %v2113_v9 = vshrl.u32 %v1968_v19, 16  ;;  %v6575_v5 = vld [vmem:[#allocation2 + $0x140] sm:$0xf0] }
 0x27c   : > { %v3116_v50 = vsel %vm12400_vm6, %v3111_v2, %v9574_v55  ;;  %v2246_v57 = vrot.slane %v10032_v49, 4  ;;  %v3120_v3 = vor.u32 %v9576_v32, %v9574_v55  ;;  %vm1937_vm12 = vcmp.ne.s32.totalorder %v1933_v31, %v11717_v52  ;;  %v12469_v60 = vld [vmem:[#allocation39_spill] sm:$0xff]  ;;  %v6783_v55 = vld [vmem:[#allocation2 + $0x178] sm:$0xf] }
 0x27d   : > { %v2110_v15 = vsel %vm12393_vm1, %v2102_v45, %v2109_v63  ;;  %3360 = vst [vmem:[#allocation2 + $0xa4] sm:$0xf] %v3116_v50  ;;  %vm1938_vm9 = vcmp.ne.s32.totalorder %v1934_v30, %v11720_v0  ;;  %v12467_v45 = vshrl.u32 %v12466_v48, 16  ;;  %v3123_v10 = vshll.u32 %v12468_v17, 16  ;;  %v5903_v30 = vld [vmem:[#allocation2 + $0x80] sm:$0xf] }
 0x27e   : > { %2326 = vst [vmem:[#allocation2 + $0xa8] sm:$0xf] %v2110_v15  ;;  %v2115_v33 = vrot.slane %v2113_v9, 7  ;;  %v2116_v37 = vshll.u32 %v1968_v19, 16  ;;  %vm1939_vm2 = vmpackc.low %vm1938_vm9, %vm1937_vm12  ;;  %v3121_v47 = vrot.slane %v3120_v3, 4  ;;  %v12470_v49 = vshrl.u32 %v12469_v60, 16 }
 0x27f   : > { %v2250_v41 = vrot.slane %v12467_v45, 7  ;;  %v5896_v38 = vor.u32 %v6551_v39, %v5895_v46  ;;  %v1984_v32 = vsel %vm1939_vm2, %v6783_v55, 0  ;;  %v12471_v26 = vshll.u32 %v12466_v48, 16  ;;  %v12473_v17 = vld [vmem:[#allocation68_spill] sm:$0xff] }
 0x280   : > { %v2124_v25 = vrot.slane %v12470_v49, 7  ;;  %v3125_v54 = vrot.slane %v3123_v10, 5  ;;  %v10080_v2 = vor.u32 %v6575_v5, %v5991_v16  ;;  %v2118_v44 = vor.u32 %v2116_v37, %v2115_v33  ;;  %v6552_v10 = vld [vmem:[#allocation2 + $0x88] sm:$0xf0] }
 0x281   : > { %v2253_v63 = vor.u32 %v12471_v26, %v2250_v41  ;;  %v2257_v51 = vshrl.u32 %v1984_v32, 16  ;;  %v2120_v34 = vrot.slane %v2115_v33, 4  ;;  %3974 = vmatmul.bf16.gmra.mxu1 %v5896_v38  ;;  %4406 = vmatmul.bf16.gmra.mxu0 %v5896_v38  ;;  %v2255_v15 = vrot.slane %v2250_v41, 4 }
 0x282   : > { %v2260_v31 = vshll.u32 %v1984_v32, 16  ;;  %v3126_v46 = vsel %vm12400_vm6, %v3121_v47, %v3125_v54  ;;  %v2119_v39 = vsel %vm12393_vm1, %v2111_v12, %v2118_v44  ;;  %v3130_v16 = vor.u32 %v9578_v1, %v3125_v54  ;;  %4014 = vmatmul.bf16.gmra.mxu2 %v10080_v2 }
 0x283   : > { %v2254_v19 = vsel %vm12393_vm1, %v2246_v57, %v2253_v63  ;;  %v2259_v50 = vrot.slane %v2257_v51, 7  ;;  %v12472_v9 = vshll.u32 %v12469_v60, 16  ;;  %2327 = vst [vmem:[#allocation2 + $0xb4] sm:$0xf] %v2119_v39  ;;  %v6619_v57 = vld [vmem:[#allocation3 + $0x108] sm:$0xff]  ;;  %v2129_v5 = vrot.slane %v2124_v25, 4 }
 0x284   : > { %2342 = vst [vmem:[#allocation2 + $0x168] sm:$0xf] %v2254_v19  ;;  %v2134_v48 = vshll.u32 %v9188_v58, 16  ;;  %v1947_v45 = vunpack.c.l.b16 %v12182_v13  ;;  %v1948_v41 = vunpack.c.h.b16 %v12182_v13  ;;  %v3287_v12 = vshrl.u32 %v12473_v17, 16  ;;  %4041 = vmatpush.bf16.msrb.mxu2 %v6619_v57  ;;  %v12476_v13 = vld [vmem:[#allocation14_spill] sm:$0xff]  ;;  %v12480_v51 = vld [vmem:[#allocation47_spill] sm:$0xff] }
 0x285   : > { %v2127_v3 = vor.u32 %v12472_v9, %v2124_v25  ;;  %v2262_v33 = vor.u32 %v2260_v31, %v2259_v50  ;;  %v3131_v37 = vrot.slane %v3130_v16, 4  ;;  %3361 = vst [vmem:[#allocation2 + $0xb0] sm:$0xf] %v3126_v46  ;;  %v2264_v60 = vrot.slane %v2259_v50, 4  ;;  %v12481_v19 = vld [vmem:[#allocation20_spill] sm:$0xff]  ;;  %v12483_v39 = vld [vmem:[#allocation79_spill] sm:$0xff] }
 0x286   : > { %v2136_v47 = vor.u32 %v2134_v48, %v9670_v59  ;;  %vm10100_vm4 = vcmp.ne.s32.totalorder %v1947_v45, %v11717_v52  ;;  %v12477_v49 = vshrl.u32 %v12476_v13, 16  ;;  %vm1952_vm0 = vcmp.ne.s32.totalorder %v1948_v41, %v11720_v0  ;;  %v12478_v59 = vld [vmem:[#allocation33_spill] sm:$0xff]  ;;  %v6592_v9 = vld [vmem:[#allocation3 + $0x48] sm:$0xff] }
 0x287   : > { %v2128_v1 = vsel %vm12393_vm1, %v2120_v34, %v2127_v3  ;;  %v2263_v38 = vsel %vm12393_vm1, %v2255_v15, %v2262_v33  ;;  %v3136_v55 = vsel %vm12400_vm6, %v3131_v37, %v9580_v23  ;;  %v3140_v32 = vor.u32 %v12478_v59, %v9580_v23  ;;  %vm1953_vm11 = vmpackc.low %vm1952_vm0, %vm10100_vm4  ;;  %v6784_v31 = vld [vmem:[#allocation2 + $0x190] sm:$0xf]  ;;  %v6554_v33 = vld [vmem:[#allocation2 + $0x98] sm:$0xf0]  ;;  %4468 = vmatpush.bf16.msrb.mxu1 %v6592_v9 }
 0x288   : > { %2328 = vst [vmem:[#allocation2 + $0xc0] sm:$0xf] %v2128_v1  ;;  %v2268_v25 = vrot.slane %v12477_v49, 7  ;;  %v10114_v26 = vor.u32 %v6552_v10, %v5903_v30  ;;  %v2137_v63 = vsel %vm12393_vm1, %v2129_v5, %v2136_v47  ;;  %v12479_v54 = vshll.u32 %v12476_v13, 16  ;;  %v12482_v30 = vld [vmem:[#allocation17_spill] sm:$0xff] }
 0x289   : > { %2343 = vst [vmem:[#allocation2 + $0x174] sm:$0xf] %v2263_v38  ;;  %v3143_v34 = vshll.u32 %v12480_v51, 16  ;;  %v3293_v15 = vshll.u32 %v12481_v19, 16  ;;  %v1986_v46 = vsel %vm1953_vm11, %v6784_v31, 0  ;;  %v3141_v23 = vrot.slane %v3140_v32, 4 }
 0x28a   : > { %v2271_v44 = vor.u32 %v12479_v54, %v2268_v25  ;;  %3362 = vst [vmem:[#allocation2 + $0xbc] sm:$0xf] %v3136_v55  ;;  %v3160_v50 = vor.u32 %v12483_v39, %v12482_v30  ;;  %4152 = vmatmul.bf16.gmra.mxu3 %v10114_v26  ;;  %v5907_v16 = vld [vmem:[#allocation2 + $0x90] sm:$0xf]  ;;  %v2275_v57 = vshrl.u32 %v1986_v46, 16  ;;  %v3180_v5 = vor.u32 %v9607_v21, %v9605_v14  ;;  %v12486_v55 = vld [vmem:[#allocation67_spill] sm:$0xff] }
 0x28b   : > { %2329 = vst [vmem:[#allocation2 + $0xcc] sm:$0xf] %v2137_v63  ;;  %v3297_v48 = vshrl.u32 %v12481_v19, 16  ;;  %v2273_v45 = vrot.slane %v2268_v25, 4  ;;  %v2278_v41 = vshll.u32 %v1986_v46, 16  ;;  %v3145_v10 = vrot.slane %v3143_v34, 5 }
 0x28c   : > { %v2272_v3 = vsel %vm12393_vm1, %v2264_v60, %v2271_v44  ;;  %v2277_v37 = vrot.slane %v2275_v57, 7  ;;  %v3161_v1 = vrot.slane %v3160_v50, 4  ;;  %v12484_v47 = vld [vmem:[#allocation25_spill] sm:$0xff]  ;;  %v3200_v13 = vor.u32 %v9624_v18, %v9615_v28  ;;  %v12487_v54 = vld [vmem:[#allocation87_spill] sm:$0xff]  ;;  %v6578_v18 = vld [vmem:[#allocation2 + $0x158] sm:$0xf0] }
 0x28d   : > { %2344 = vst [vmem:[#allocation2 + $0x180] sm:$0xf] %v2272_v3  ;;  %v3163_v58 = vshll.u32 %v12484_v47, 16  ;;  %v3146_v60 = vsel %vm12400_vm6, %v3141_v23, %v3145_v10  ;;  %v12485_v49 = vld [vmem:[#allocation9_spill] sm:$0xff]  ;;  %v3181_v38 = vrot.slane %v3180_v5, 4  ;;  %v3183_v25 = vshll.u32 %v12486_v55, 16 }
 0x28e   : > { %v3150_v21 = vor.u32 %v12485_v49, %v3145_v10  ;;  %v10141_v59 = vrot.slane %v3277_v43, 4  ;;  %v2280_v32 = vor.u32 %v2278_v41, %v2277_v37  ;;  %3363 = vst [vmem:[#allocation2 + $0xc8] sm:$0xf] %v3146_v60  ;;  %v3203_v44 = vshll.u32 %v12487_v54, 16  ;;  %v6003_v34 = vld [vmem:[#allocation2 + $0x150] sm:$0xf] }
 0x28f   : > { %v3165_v63 = vrot.slane %v3163_v58, 5  ;;  %v5908_v51 = vor.u32 %v6554_v33, %v5907_v16  ;;  %v3185_v31 = vrot.slane %v3183_v25, 5  ;;  %v3220_v46 = vor.u32 %v9630_v8, %v9628_v56  ;;  %v12488_v43 = vld [vmem:[#allocation35_spill] sm:$0xff]  ;;  %v12489_v8 = vld [vmem:[#allocation81_spill] sm:$0xff]  ;;  %v5915_v5 = vld [vmem:[#allocation2 + $0x98] sm:$0xf] }
 0x290   : > { %v3151_v19 = vrot.slane %v3150_v21, 4  ;;  %v2281_v23 = vsel %vm12393_vm1, %v2273_v45, %v2280_v32  ;;  %v3201_v50 = vrot.slane %v3200_v13, 4  ;;  %v10151_v9 = vrot.slane %v3293_v15, 5  ;;  %v12490_v33 = vld [vmem:[#allocation44_spill] sm:$0xff]  ;;  %v6618_v47 = vld [vmem:[#allocation3 + $0x100] sm:$0xff] }
 0x291   : > { %v3166_v62 = vsel %vm12400_vm6, %v3161_v1, %v3165_v63  ;;  %v3170_v39 = vor.u32 %v12488_v43, %v3165_v63  ;;  %2345 = vst [vmem:[#allocation2 + $0x18c] sm:$0xf] %v2281_v23  ;;  %v3186_v3 = vsel %vm12400_vm6, %v3181_v38, %v3185_v31  ;;  %v3190_v57 = vor.u32 %v12489_v8, %v3185_v31  ;;  %v6555_v1 = vld [vmem:[#allocation2 + $0xa0] sm:$0xf0]  ;;  %v12491_v49 = vld [vmem:[#allocation85_spill] sm:$0xff] }
 0x292   : > { %v3156_v16 = vsel %vm12400_vm6, %v3151_v19, %v12482_v30  ;;  %3979 = vmatmul.bf16.gmra.mxu1 %v5908_v51  ;;  %v10159_v24 = vor.u32 %v6578_v18, %v6003_v34  ;;  %4411 = vmatmul.bf16.gmra.mxu0 %v5908_v51  ;;  %v3205_v41 = vrot.slane %v3203_v44, 5  ;;  %3365 = vst [vmem:[#allocation2 + $0xe0] sm:$0xf] %v3166_v62  ;;  %v3221_v10 = vrot.slane %v3220_v46, 4  ;;  %v12492_v63 = vld [vmem:[#allocation57_spill] sm:$0xff]  ;;  %v12493_v44 = vld [vmem:[#allocation38_spill] sm:$0xff] }
 0x293   : > { %3364 = vst [vmem:[#allocation2 + $0xd4] sm:$0xf] %v3156_v16  ;;  %v3171_v45 = vrot.slane %v3170_v39, 4  ;;  %v3191_v15 = vrot.slane %v3190_v57, 4  ;;  %v3223_v37 = vshll.u32 %v12490_v33, 16  ;;  %v3240_v30 = vor.u32 %v9636_v6, %v9634_v42  ;;  %4042 = vmatpush.bf16.msrb.mxu2 %v6618_v47  ;;  %v12494_v34 = vld [vmem:[#allocation51_spill] sm:$0xff] }
 0x294   : > { %4019 = vmatmul.bf16.gmra.mxu2 %v10159_v24  ;;  %3367 = vst [vmem:[#allocation2 + $0xf8] sm:$0xf] %v3186_v3  ;;  %v3206_v13 = vsel %vm12400_vm6, %v3201_v50, %v3205_v41  ;;  %v3210_v60 = vor.u32 %v9626_v20, %v3205_v41  ;;  %v3243_v21 = vshll.u32 %v12491_v49, 16  ;;  %v3299_v38 = vrot.slane %v3297_v48, 4  ;;  %v12495_v46 = vld [vmem:[#allocation52_spill] sm:$0xff]  ;;  %v12497_v41 = vld [vmem:[#allocation54_spill] sm:$0xff] }
 0x295   : > { %v3176_v58 = vsel %vm12400_vm6, %v3171_v45, %v9605_v14  ;;  %v3196_v6 = vsel %vm12400_vm6, %v3191_v15, %v9615_v28  ;;  %v3225_v55 = vrot.slane %v3223_v37, 5  ;;  %v3241_v25 = vrot.slane %v3240_v30, 4  ;;  %3369 = vst [vmem:[#allocation2 + $0x110] sm:$0xf] %v3206_v13  ;;  %v12496_v50 = vld [vmem:[#allocation32_spill] sm:$0xff] }
 0x296   : > { %3366 = vst [vmem:[#allocation2 + $0xec] sm:$0xf] %v3176_v58  ;;  %v3211_v32 = vrot.slane %v3210_v60, 4  ;;  %v3245_v14 = vrot.slane %v3243_v21, 5  ;;  %v3260_v54 = vor.u32 %v12492_v63, %v9656_v4  ;;  %v3263_v51 = vshll.u32 %v12493_v44, 16  ;;  %v12498_v30 = vld [vmem:[#allocation76_spill] sm:$0xff] }
 0x297   : > { %3368 = vst [vmem:[#allocation2 + $0x104] sm:$0xf] %v3196_v6  ;;  %v10178_v20 = vor.u32 %v6555_v1, %v5915_v5  ;;  %v3226_v48 = vsel %vm12400_vm6, %v3221_v10, %v3225_v55  ;;  %v3230_v18 = vor.u32 %v12494_v34, %v3225_v55  ;;  %v3280_v28 = vor.u32 %v10141_v59, %v10050_v29  ;;  %v6591_v59 = vld [vmem:[#allocation3 + $0x40] sm:$0xff]  ;;  %v1304_v47 = vld [vmem:[#allocation2 + $0x19c] sm:$0x1]  ;;  %v6689_v55 = vld [vmem:[#allocation3 + $0x1b8] sm:$0xff] }
 0x298   : > { %v3216_v19 = vsel %vm12400_vm6, %v3211_v32, %v9628_v56  ;;  %3371 = vst [vmem:[#allocation2 + $0x128] sm:$0xf] %v3226_v48  ;;  %v3246_v31 = vsel %vm12400_vm6, %v3241_v25, %v3245_v14  ;;  %v3250_v23 = vor.u32 %v12495_v46, %v3245_v14  ;;  %v3261_v62 = vrot.slane %v3260_v54, 4  ;;  %v5919_v56 = vld [vmem:[#allocation2 + $0xa8] sm:$0xf]  ;;  %4469 = vmatpush.bf16.msrb.mxu1 %v6591_v59 }
 0x299   : > { %3370 = vst [vmem:[#allocation2 + $0x11c] sm:$0xf] %v3216_v19  ;;  %v3231_v43 = vrot.slane %v3230_v18, 4  ;;  %v3265_v39 = vrot.slane %v3263_v51, 5  ;;  %v3307_v16 = vshrl.u32 %v12496_v50, 16  ;;  %v3289_v3 = vrot.slane %v3287_v12, 4  ;;  %5153 = vmatpush.bf16.msra.mxu3 %v6689_v55 }
 0x29a   : > { %4157 = vmatmul.bf16.gmra.mxu3 %v10178_v20  ;;  %v3251_v8 = vrot.slane %v3250_v23, 4  ;;  %3373 = vst [vmem:[#allocation2 + $0x140] sm:$0xf] %v3246_v31  ;;  %v6557_v57 = vld [vmem:[#allocation2 + $0xb0] sm:$0xf0]  ;;  %v3300_v10 = vor.u32 %v3299_v38, %v10151_v9  ;;  %v3281_v33 = vrot.slane %v3280_v28, 4 }
 0x29b   : > { %v3236_v5 = vsel %vm12400_vm6, %v3231_v43, %v9634_v42  ;;  %v3266_v45 = vsel %vm12400_vm6, %v3261_v62, %v3265_v39  ;;  %v3270_v15 = vor.u32 %v12497_v41, %v3265_v39  ;;  %v3283_v37 = vshll.u32 %v12473_v17, 16  ;;  %v6015_v13 = vld [vmem:[#allocation2 + $0x168] sm:$0xf]  ;;  %v6581_v6 = vld [vmem:[#allocation2 + $0x170] sm:$0xf0] }
 0x29c   : > { %3372 = vst [vmem:[#allocation2 + $0x134] sm:$0xf] %v3236_v5  ;;  %v3256_v12 = vsel %vm12400_vm6, %v3251_v8, %v9656_v4  ;;  %v2728_v1 = vrot.slane %v12498_v30, 4  ;;  %v3309_v58 = vrot.slane %v3307_v16, 4  ;;  %v5920_v38 = vor.u32 %v6557_v57, %v5919_v56  ;;  %v5927_v18 = vld [vmem:[#allocation2 + $0xb0] sm:$0xf] }
 0x29d   : > { %3374 = vst [vmem:[#allocation2 + $0x14c] sm:$0xf] %v3256_v12  ;;  %v3271_v42 = vrot.slane %v3270_v15, 4  ;;  %v3285_v60 = vrot.slane %v3283_v37, 5  ;;  %v3301_v25 = vrot.slane %v3300_v10, 4  ;;  %v3303_v17 = vshll.u32 %v12496_v50, 16 }
 0x29e   : > { %3375 = vst [vmem:[#allocation2 + $0x158] sm:$0xf] %v3266_v45  ;;  %v2953_v49 = vunpack.c.l.b16 %v2728_v1  ;;  %v2954_v21 = vunpack.c.h.b16 %v2728_v1  ;;  %v10215_v54 = vor.u32 %v6581_v6, %v6015_v13  ;;  %v6558_v28 = vld [vmem:[#allocation2 + $0xb8] sm:$0xf0]  ;;  %v6697_v62 = vld [vmem:[#allocation3 + $0x1f8] sm:$0xff]  ;;  %v6704_v6 = vld [vmem:[#allocation3 + $0x230] sm:$0xff] }
 0x29f   : > { %v3276_v4 = vsel %vm12400_vm6, %v3271_v42, %v10050_v29  ;;  %v3286_v32 = vsel %vm12400_vm6, %v3281_v33, %v3285_v60  ;;  %v3290_v14 = vor.u32 %v3289_v3, %v3285_v60  ;;  %v3305_v63 = vrot.slane %v3303_v17, 5  ;;  %v6705_v43 = vld [vmem:[#allocation3 + $0x238] sm:$0xff]  ;;  %5242 = vmatpush.bf16.msra.mxu0 %v6697_v62  ;;  %v5931_v39 = vld [vmem:[#allocation2 + $0xc0] sm:$0xf]  ;;  %v6561_v56 = vld [vmem:[#allocation2 + $0xd0] sm:$0xf0] }
 0x2a0   : > { %3376 = vst [vmem:[#allocation2 + $0x164] sm:$0xf] %v3276_v4  ;;  %vm2957_vm1 = vcmp.ne.s32.totalorder %v2953_v49, %v11717_v52  ;;  %vm2958_vm14 = vcmp.ne.s32.totalorder %v2954_v21, %v11720_v0  ;;  %v6606_v52 = vld [vmem:[#allocation3 + $0xb8] sm:$0xff]  ;;  %v10223_v46 = vor.u32 %v6558_v28, %v5927_v18  ;;  %5331 = vmatpush.bf16.msra.mxu1 %v6705_v43  ;;  %v6027_v16 = vld [vmem:[#allocation2 + $0x180] sm:$0xf] }
 0x2a1   : > { %3377 = vst [vmem:[#allocation2 + $0x170] sm:$0xf] %v3286_v32  ;;  %vm2959_vm10 = vmpackc.low %vm2958_vm14, %vm2957_vm1  ;;  %v3291_v29 = vrot.slane %v3290_v14, 4  ;;  %v3306_v51 = vsel %vm12400_vm6, %v3301_v25, %v3305_v63  ;;  %v3310_v48 = vor.u32 %v3309_v58, %v3305_v63  ;;  %4551 = vmatpush.bf16.msra.mxu2 %v6606_v52  ;;  %v6608_v3 = vld [vmem:[#allocation2 + $0x188] sm:$0xf0]  ;;  %v6605_v58 = vld [vmem:[#allocation3 + $0xb0] sm:$0xff] }
 0x2a2   : > { %3984 = vmatmul.bf16.gmra.mxu1 %v5920_v38  ;;  %4416 = vmatmul.bf16.gmra.mxu0 %v5920_v38  ;;  %v2992_v44 = vsel %vm2959_vm10, %v1304_v47, 0  ;;  %3379 = vst [vmem:[#allocation2 + $0x188] sm:$0xf] %v3306_v51  ;;  %v6028_v8 = vor.u32 %v6608_v3, %v6027_v16  ;;  %v5939_v27 = vld [vmem:[#allocation2 + $0xc8] sm:$0xf]  ;;  %v6688_v47 = vld [vmem:[#allocation3 + $0x1b0] sm:$0xff] }
 0x2a3   : > { %v3313_v34 = vshll.u32 %v2992_v44, 16  ;;  %v3296_v0 = vsel %vm12400_vm6, %v3291_v29, %v10151_v9  ;;  %v3311_v19 = vrot.slane %v3310_v48, 4  ;;  %v6560_v9 = vld [vmem:[#allocation2 + $0xc8] sm:$0xf0]  ;;  %v10232_v5 = vor.u32 %v6561_v56, %v5939_v27  ;;  %v6535_v45 = vld [vmem:[#allocation2 + $0x4] sm:$0xf]  ;;  %5154 = vmatpush.bf16.msra.mxu3 %v6688_v47 }
 0x2a4   : > { %4024 = vmatmul.bf16.gmra.mxu2 %v10215_v54  ;;  %3378 = vst [vmem:[#allocation2 + $0x17c] sm:$0xf] %v3296_v0  ;;  %v5932_v59 = vor.u32 %v6560_v9, %v5931_v39  ;;  %v6137_v41 = vld [vmem:[#allocation2 + $0xc] sm:$0xf0]  ;;  %v6538_v33 = vld [vmem:[#allocation2 + $0x1c] sm:$0xf]  ;;  %5332 = vmatpush.bf16.msra.mxu1 %v6704_v6 }
 0x2a5   : > { %v3315_v31 = vrot.slane %v3313_v34, 5  ;;  %v10228_v50 = vpop.f32.mrf.mxu0  ;;  %v6140_v15 = vor.u32 %v6535_v45, %v6137_v41  ;;  %v5849_v37 = vld [vmem:[#allocation2 + $0x24] sm:$0xf0]  ;;  %v5951_v1 = vld [vmem:[#allocation2 + $0xe0] sm:$0xf]  ;;  %4552 = vmatpush.bf16.msra.mxu2 %v6605_v58  ;;  %v6687_v9 = vld [vmem:[#allocation3 + $0x1a8] sm:$0xff] }
 0x2a6   : > { %v5852_v30 = vor.u32 %v6538_v33, %v5849_v37  ;;  %v6564_v42 = vld [vmem:[#allocation2 + $0xe8] sm:$0xf0]  ;;  %v6696_v38 = vld [vmem:[#allocation3 + $0x1f0] sm:$0xff]  ;;  %v6541_v25 = vld [vmem:[#allocation2 + $0x34] sm:$0xf] }
 0x2a7   : > { %v3316_v23 = vsel %vm12400_vm6, %v3311_v19, %v3315_v31  ;;  %v10244_v49 = vor.u32 %v6564_v42, %v5951_v1  ;;  %5243 = vmatpush.bf16.msra.mxu0 %v6696_v38  ;;  %v5861_v17 = vld [vmem:[#allocation2 + $0x3c] sm:$0xf0]  ;;  %v5963_v29 = vld [vmem:[#allocation2 + $0xf8] sm:$0xf]  ;;  %v6567_v44 = vld [vmem:[#allocation2 + $0x100] sm:$0xf0]  ;;  %5155 = vmatpush.bf16.msra.mxu3 %v6687_v9 }
 0x2a8   : > { %3380 = vst [vmem:[#allocation2 + $0x194] sm:$0xf] %v3316_v23  ;;  %v5864_v14 = vor.u32 %v6541_v25, %v5861_v17  ;;  %v10264_v34 = vor.u32 %v6567_v44, %v5963_v29  ;;  %v6544_v28 = vld [vmem:[#allocation2 + $0x4c] sm:$0xf]  ;;  %v5873_v19 = vld [vmem:[#allocation2 + $0x54] sm:$0xf0] }
 0x2a9   : > { %v5876_v23 = vor.u32 %v6544_v28, %v5873_v19  ;;  %v5975_v62 = vld [vmem:[#allocation2 + $0x110] sm:$0xf]  ;;  %v6570_v39 = vld [vmem:[#allocation2 + $0x118] sm:$0xf0]  ;;  %v6547_v33 = vld [vmem:[#allocation2 + $0x64] sm:$0xf] }
 0x2aa   : > { %4162 = vmatmul.bf16.gmra.mxu3 %v10223_v46  ;;  %v6604_v16 = vld [vmem:[#allocation3 + $0xa8] sm:$0xff]  ;;  %v5885_v37 = vld [vmem:[#allocation2 + $0x6c] sm:$0xf0]  ;;  %v5987_v47 = vld [vmem:[#allocation2 + $0x128] sm:$0xf] }
 0x2ab   : > { %4553 = vmatpush.bf16.msra.mxu2 %v6604_v16  ;;  %v6703_v45 = vld [vmem:[#allocation3 + $0x228] sm:$0xff]  ;;  %v5888_v1 = vor.u32 %v6547_v33, %v5885_v37  ;;  %v6573_v58 = vld [vmem:[#allocation2 + $0x130] sm:$0xf0]  ;;  %v5897_v28 = vld [vmem:[#allocation2 + $0x84] sm:$0xf0] }
 0x2ac   : > { %5333 = vmatpush.bf16.msra.mxu1 %v6703_v45  ;;  %v10304_v25 = vor.u32 %v6573_v58, %v5987_v47  ;;  %v6550_v44 = vld [vmem:[#allocation2 + $0x7c] sm:$0xf]  ;;  %v6694_v16 = vld [vmem:[#allocation3 + $0x1e0] sm:$0xff]  ;;  %v6693_v47 = vld [vmem:[#allocation3 + $0x1d8] sm:$0xff] }
 0x2ad   : > { %v10230_v57 = vpop.f32.mrf.mxu0  ;;  %v6603_v45 = vld [vmem:[#allocation3 + $0xa0] sm:$0xff] }
 0x2ae   : > { %12511 = vst [vmem:[#allocation19_spill] sm:$0xff] %v10304_v25 }
 0x2af   : > { %4554 = vmatpush.bf16.msra.mxu2 %v6603_v45 }
 0x2b2   : > { %3989 = vmatmul.bf16.gmra.mxu1 %v5932_v59  ;;  %4421 = vmatmul.bf16.gmra.mxu0 %v5932_v59 }
 0x2b4   : > { %4029 = vmatmul.bf16.gmra.mxu2 %v6028_v8  ;;  %v10284_v8 = vor.u32 %v6570_v39, %v5975_v62  ;;  %v5999_v62 = vld [vmem:[#allocation2 + $0x140] sm:$0xf]  ;;  %v6576_v39 = vld [vmem:[#allocation2 + $0x148] sm:$0xf0] }
 0x2b5   : > { %v10324_v58 = vor.u32 %v6576_v39, %v5999_v62  ;;  %v6691_v62 = vld [vmem:[#allocation3 + $0x1c8] sm:$0xff] }
 0x2b6   : > { %12505 = vst [vmem:[#allocation34_spill] sm:$0xff] %v10284_v8 }
 0x2b7   : > { %12519 = vst [vmem:[#allocation12_spill] sm:$0xff] %v10324_v58 }
 0x2b9   : > { %v10235_v10 = vpop.f32.mrf.mxu1  ;;  %v10237_v12 = vpop.f32.mrf.mxu0 }
 0x2ba   : > { %4167 = vmatmul.bf16.gmra.mxu3 %v10232_v5 }
 0x2c1   : > { %v10240_v13 = vpop.f32.mrf.mxu2  ;;  %v10242_v60 = vpop.f32.mrf.mxu1 }
 0x2c2   : > { %4426 = vmatmul.bf16.gmra.mxu0 %v9752_v40  ;;  %4470 = vmatmul.bf16.vlgmr.msrb.gmra.mxu1 %v6140_v15  ;;  %12499 = vst [vmem:[#allocation45_spill] sm:$0xff] %v10240_v13  ;;  %v10246_v21 = vpop.f32.mrf.mxu0  ;;  %v6582_v13 = vld [vmem:[#allocation2 + $0x178] sm:$0xf0] }
 0x2c4   : > { %4043 = vmatmul.bf16.vlgmr.msrb.gmra.mxu2 %v5852_v30 }
 0x2c5   : > { %v10249_v40 = vpop.f32.mrf.mxu3 }
 0x2c9   : > { %v10251_v55 = vpop.f32.mrf.mxu2  ;;  %v10253_v4 = vpop.f32.mrf.mxu1 }
 0x2ca   : > { %4172 = vmatmul.bf16.gmra.mxu3 %v10244_v49  ;;  %12500 = vst [vmem:[#allocation80_spill] sm:$0xff] %v10251_v55  ;;  %v10255_v32 = vpop.f32.mrf.mxu0 }
 0x2cd   : > { %v10258_v63 = vpop.f32.mrf.mxu3 }
 0x2d1   : > { %v10260_v51 = vpop.f32.mrf.mxu2  ;;  %v10262_v48 = vpop.f32.mrf.mxu1 }
 0x2d2   : > { %4431 = vmatmul.bf16.gmra.mxu0 %v9799_v7  ;;  %4475 = vmatmul.bf16.gmra.mxu1 %v5852_v30  ;;  %12501 = vst [vmem:[#allocation69_spill] sm:$0xff] %v10260_v51  ;;  %v10266_v52 = vpop.f32.mrf.mxu0  ;;  %v6556_v51 = vld [vmem:[#allocation2 + $0xac] sm:$0xf] }
 0x2d4   : > { %4048 = vmatmul.bf16.gmra.mxu2 %v5864_v14 }
 0x2d9   : > { %v10269_v0 = vpop.f32.mrf.mxu3  ;;  %v10271_v18 = vpop.f32.mrf.mxu2 }
 0x2da   : > { %4177 = vmatmul.bf16.gmra.mxu3 %v10264_v34  ;;  %12502 = vst [vmem:[#allocation62_spill] sm:$0xff] %v10271_v18  ;;  %v10273_v7 = vpop.f32.mrf.mxu1  ;;  %v10275_v31 = vpop.f32.mrf.mxu0 }
 0x2db   : > { %12503 = vst [vmem:[#allocation46_spill] sm:$0xff] %v10275_v31 }
 0x2e1   : > { %v10278_v43 = vpop.f32.mrf.mxu3  ;;  %v10280_v3 = vpop.f32.mrf.mxu2 }
 0x2e2   : > { %4436 = vmatmul.bf16.gmra.mxu0 %v9865_v11  ;;  %4480 = vmatmul.bf16.gmra.mxu1 %v5864_v14  ;;  %12504 = vst [vmem:[#allocation37_spill] sm:$0xff] %v10280_v3  ;;  %v10282_v59 = vpop.f32.mrf.mxu1  ;;  %v10286_v27 = vpop.f32.mrf.mxu0  ;;  %v6695_v11 = vld [vmem:[#allocation3 + $0x1e8] sm:$0xff] }
 0x2e3   : > { %12506 = vst [vmem:[#allocation86_spill] sm:$0xff] %v10286_v27  ;;  %5244 = vmatpush.bf16.msra.mxu0 %v6695_v11  ;;  %v6686_v11 = vld [vmem:[#allocation3 + $0x1a0] sm:$0xff] }
 0x2e4   : > { %4053 = vmatmul.bf16.gmra.mxu2 %v5876_v23  ;;  %5156 = vmatpush.bf16.msra.mxu3 %v6686_v11 }
 0x2e7   : > { %5245 = vmatpush.bf16.msra.mxu0 %v6694_v16  ;;  %v5909_v16 = vld [vmem:[#allocation2 + $0x9c] sm:$0xf0] }
 0x2e9   : > { %v10289_v56 = vpop.f32.mrf.mxu3  ;;  %v10291_v41 = vpop.f32.mrf.mxu2 }
 0x2ea   : > { %4182 = vmatmul.bf16.gmra.mxu3 %v10284_v8  ;;  %12507 = vst [vmem:[#allocation63_spill] sm:$0xff] %v10291_v41  ;;  %v10293_v15 = vpop.f32.mrf.mxu1  ;;  %v10295_v30 = vpop.f32.mrf.mxu0  ;;  %v6579_v41 = vld [vmem:[#allocation2 + $0x160] sm:$0xf0]  ;;  %v6251_v8 = vld [vmem:[#allocation2 + $0x38] sm:$0xf] }
 0x2eb   : > { %12508 = vst [vmem:[#allocation58_spill] sm:$0xff] %v10295_v30  ;;  %5246 = vmatpush.bf16.msra.mxu0 %v6693_v47  ;;  %v6011_v47 = vld [vmem:[#allocation2 + $0x158] sm:$0xf] }
 0x2f1   : > { %v10298_v42 = vpop.f32.mrf.mxu3  ;;  %v10300_v38 = vpop.f32.mrf.mxu2 }
 0x2f2   : > { %4441 = vmatmul.bf16.gmra.mxu0 %v9960_v53  ;;  %4485 = vmatmul.bf16.gmra.mxu1 %v5876_v23  ;;  %12509 = vst [vmem:[#allocation49_spill] sm:$0xff] %v10300_v38  ;;  %v10302_v6 = vpop.f32.mrf.mxu1  ;;  %v10306_v17 = vpop.f32.mrf.mxu0  ;;  %v5900_v23 = vor.u32 %v6550_v44, %v5897_v28  ;;  %v6702_v28 = vld [vmem:[#allocation3 + $0x220] sm:$0xff] }
 0x2f3   : > { %12510 = vst [vmem:[#allocation42_spill] sm:$0xff] %v10302_v6  ;;  %v6553_v38 = vld [vmem:[#allocation2 + $0x94] sm:$0xf]  ;;  %5334 = vmatpush.bf16.msra.mxu1 %v6702_v28 }
 0x2f4   : > { %4058 = vmatmul.bf16.gmra.mxu2 %v5888_v1  ;;  %12512 = vst [vmem:[#allocation29_spill] sm:$0xff] %v10306_v17  ;;  %v5912_v11 = vor.u32 %v6553_v38, %v5909_v16 }
 0x2f9   : > { %v10309_v14 = vpop.f32.mrf.mxu3  ;;  %v10311_v29 = vpop.f32.mrf.mxu2 }
 0x2fa   : > { %4187 = vmatmul.bf16.gmra.mxu3 %v10304_v25  ;;  %12513 = vst [vmem:[#allocation21_spill] sm:$0xff] %v10311_v29 }
 0x2fe   : > { %v10313_v53 = vpop.f32.mrf.mxu1  ;;  %v10315_v19 = vpop.f32.mrf.mxu0 }
 0x2ff   : > { %12514 = vst [vmem:[#allocation23_spill] sm:$0xff] %v10313_v53 }
 0x300   : > { %12515 = vst [vmem:[#allocation56_spill] sm:$0xff] %v10315_v19 }
 0x301   : > { %v10318_v9 = vpop.f32.mrf.mxu3 }
 0x302   : > { %4446 = vmatmul.bf16.gmra.mxu0 %v10080_v2  ;;  %4490 = vmatmul.bf16.gmra.mxu1 %v5888_v1  ;;  %12516 = vst [vmem:[#allocation66_spill] sm:$0xff] %v10318_v9  ;;  %v6692_v1 = vld [vmem:[#allocation3 + $0x1d0] sm:$0xff] }
 0x303   : > { %5247 = vmatpush.bf16.msra.mxu0 %v6692_v1  ;;  %v10344_v1 = vor.u32 %v6579_v41, %v6011_v47  ;;  %v6683_v41 = vld [vmem:[#allocation3 + $0x188] sm:$0xff]  ;;  %v6023_v47 = vld [vmem:[#allocation2 + $0x170] sm:$0xf] }
 0x304   : > { %4063 = vmatmul.bf16.gmra.mxu2 %v5900_v23 }
 0x305   : > { %v10320_v33 = vpop.f32.mrf.mxu2  ;;  %12528 = vst [vmem:[#allocation70_spill] sm:$0xff] %v10344_v1 }
 0x306   : > { %12517 = vst [vmem:[#allocation16_spill] sm:$0xff] %v10320_v33  ;;  %v10322_v37 = vpop.f32.mrf.mxu1  ;;  %v10326_v44 = vpop.f32.mrf.mxu0 }
 0x307   : > { %12518 = vst [vmem:[#allocation10_spill] sm:$0xff] %v10322_v37  ;;  %5248 = vmatpush.bf16.msra.mxu0 %v6691_v62 }
 0x308   : > { %12520 = vst [vmem:[#allocation24_spill] sm:$0xff] %v10326_v44 }
 0x30a   : > { %4192 = vmatmul.bf16.gmra.mxu3 %v10324_v58 }
 0x30d   : > { %v10329_v2 = vpop.f32.mrf.mxu3  ;;  %v10331_v29 = vpop.f32.mrf.mxu2 }
 0x30e   : > { %12521 = vst [vmem:[#allocation13_spill] sm:$0xff] %v10329_v2 }
 0x30f   : > { %12522 = vst [vmem:[#allocation27_spill] sm:$0xff] %v10331_v29  ;;  %v10333_v33 = vpop.f32.mrf.mxu1  ;;  %v10335_v39 = vpop.f32.mrf.mxu0  ;;  %v6690_v29 = vld [vmem:[#allocation3 + $0x1c0] sm:$0xff] }
 0x310   : > { %12523 = vst [vmem:[#allocation65_spill] sm:$0xff] %v10333_v33  ;;  %5249 = vmatpush.bf16.msra.mxu0 %v6690_v29 }
 0x311   : > { %12524 = vst [vmem:[#allocation55_spill] sm:$0xff] %v10335_v39 }
 0x312   : > { %4451 = vmatmul.bf16.gmra.mxu0 %v10159_v24  ;;  %4495 = vmatmul.bf16.gmra.mxu1 %v5900_v23  ;;  %v6685_v24 = vld [vmem:[#allocation3 + $0x198] sm:$0xff]  ;;  %v6684_v23 = vld [vmem:[#allocation3 + $0x190] sm:$0xff] }
 0x313   : > { %5157 = vmatpush.bf16.msra.mxu3 %v6685_v24 }
 0x314   : > { %4068 = vmatmul.bf16.gmra.mxu2 %v5912_v11 }
 0x315   : > { %v10338_v45 = vpop.f32.mrf.mxu3 }
 0x316   : > { %12525 = vst [vmem:[#allocation18_spill] sm:$0xff] %v10338_v45 }
 0x317   : > { %v10340_v3 = vpop.f32.mrf.mxu2  ;;  %v10342_v18 = vpop.f32.mrf.mxu1  ;;  %5158 = vmatpush.bf16.msra.mxu3 %v6684_v23 }
 0x318   : > { %12526 = vst [vmem:[#allocation28_spill] sm:$0xff] %v10340_v3  ;;  %v10346_v28 = vpop.f32.mrf.mxu0  ;;  %v5921_v3 = vld [vmem:[#allocation2 + $0xb4] sm:$0xf0] }
 0x319   : > { %12527 = vst [vmem:[#allocation40_spill] sm:$0xff] %v10342_v18  ;;  %v5924_v29 = vor.u32 %v6556_v51, %v5921_v3  ;;  %v6634_v51 = vld [vmem:[#allocation2 + $0x34] sm:$0xf]  ;;  %v6245_v3 = vld [vmem:[#allocation2 + $0x3c] sm:$0xf0] }
 0x31a   : > { %12529 = vst [vmem:[#allocation61_spill] sm:$0xff] %v10346_v28  ;;  %4197 = vmatmul.bf16.gmra.mxu3 %v10344_v1  ;;  %v6682_v28 = vld [vmem:[#allocation3 + $0x180] sm:$0xff] }
 0x31b   : > { %5159 = vmatpush.bf16.msra.mxu3 %v6683_v41 }
 0x31d   : > { %v10349_v38 = vpop.f32.mrf.mxu3 }
 0x31e   : > { %12530 = vst [vmem:[#allocation15_spill] sm:$0xff] %v10349_v38 }
 0x31f   : > { %v10351_v16 = vpop.f32.mrf.mxu2  ;;  %v10353_v62 = vpop.f32.mrf.mxu1  ;;  %5160 = vmatpush.bf16.msra.mxu3 %v6682_v28 }
 0x320   : > { %12531 = vst [vmem:[#allocation82_spill] sm:$0xff] %v10351_v16  ;;  %v10355_v55 = vpop.f32.mrf.mxu0  ;;  %v6602_v16 = vld [vmem:[#allocation3 + $0x98] sm:$0xff] }
 0x321   : > { %12532 = vst [vmem:[#allocation30_spill] sm:$0xff] %v10353_v62  ;;  %4555 = vmatpush.bf16.msra.mxu2 %v6602_v16  ;;  %v5933_v62 = vld [vmem:[#allocation2 + $0xcc] sm:$0xf0] }
 0x322   : > { %12533 = vst [vmem:[#allocation36_spill] sm:$0xff] %v10355_v55  ;;  %4456 = vmatmul.bf16.gmra.mxu0 %v10215_v54  ;;  %4500 = vmatmul.bf16.gmra.mxu1 %v5912_v11  ;;  %v10364_v55 = vor.u32 %v6582_v13, %v6023_v47  ;;  %v6701_v11 = vld [vmem:[#allocation3 + $0x218] sm:$0xff]  ;;  %v6248_v13 = vor.u32 %v6634_v51, %v6245_v3  ;;  %v6257_v51 = vld [vmem:[#allocation2 + $0x54] sm:$0xf0] }
 0x323   : > { %5335 = vmatpush.bf16.msra.mxu1 %v6701_v11  ;;  %v5945_v3 = vld [vmem:[#allocation2 + $0xe4] sm:$0xf0] }
 0x324   : > { %4073 = vmatmul.bf16.gmra.mxu2 %v5924_v29  ;;  %12537 = vst [vmem:[#allocation72_spill] sm:$0xff] %v10364_v55 }
 0x325   : > { %v10358_v24 = vpop.f32.mrf.mxu3 }
 0x326   : > { %12534 = vst [vmem:[#allocation41_spill] sm:$0xff] %v10358_v24 }
 0x327   : > { %v10360_v1 = vpop.f32.mrf.mxu2  ;;  %v10362_v39 = vpop.f32.mrf.mxu1 }
 0x328   : > { %12535 = vst [vmem:[#allocation77_spill] sm:$0xff] %v10360_v1  ;;  %v10366_v23 = vpop.f32.mrf.mxu0  ;;  %v6559_v1 = vld [vmem:[#allocation2 + $0xc4] sm:$0xf] }
 0x329   : > { %12536 = vst [vmem:[#allocation48_spill] sm:$0xff] %v10362_v39  ;;  %v5936_v47 = vor.u32 %v6559_v1, %v5933_v62 }
 0x32a   : > { %12538 = vst [vmem:[#allocation73_spill] sm:$0xff] %v10366_v23  ;;  %4202 = vmatmul.bf16.gmra.mxu3 %v10364_v55  ;;  %v6035_v23 = vld [vmem:[#allocation2 + $0x188] sm:$0xf]  ;;  %v6609_v55 = vld [vmem:[#allocation2 + $0x190] sm:$0xf0] }
 0x32d   : > { %v10369_v54 = vpop.f32.mrf.mxu3 }
 0x32e   : > { %12539 = vst [vmem:[#allocation71_spill] sm:$0xff] %v10369_v54 }
 0x32f   : > { %v10371_v41 = vpop.f32.mrf.mxu2  ;;  %v10373_v44 = vpop.f32.mrf.mxu1 }
 0x330   : > { %12540 = vst [vmem:[#allocation83_spill] sm:$0xff] %v10371_v41  ;;  %v10375_v16 = vpop.f32.mrf.mxu0  ;;  %v6036_v41 = vor.u32 %v6609_v55, %v6035_v23  ;;  %v6243_v23 = vld [vmem:[#allocation2 + $0x30] sm:$0xf] }
 0x331   : > { %12541 = vst [vmem:[#allocation43_spill] sm:$0xff] %v10373_v44 }
 0x332   : > { %12542 = vst [vmem:[#allocation50_spill] sm:$0xff] %v10375_v16  ;;  %4505 = vmatmul.bf16.gmra.mxu1 %v5924_v29  ;;  %5250 = vmatmul.bf16.vlgmr.msra.gmra.mxu0 %v6248_v13  ;;  %v6637_v16 = vld [vmem:[#allocation2 + $0x4c] sm:$0xf]  ;;  %v6562_v29 = vld [vmem:[#allocation2 + $0xdc] sm:$0xf] }
 0x334   : > { %4078 = vmatmul.bf16.gmra.mxu2 %v5936_v47 }
 0x335   : > { %v10377_v28 = vpop.f32.mrf.mxu3 }
 0x336   : > { %12543 = vst [vmem:[#allocation53_spill] sm:$0xff] %v10377_v28  ;;  %v6260_v28 = vor.u32 %v6637_v16, %v6257_v51  ;;  %v6640_v16 = vld [vmem:[#allocation2 + $0x64] sm:$0xf] }
 0x337   : > { %v10379_v39 = vpop.f32.mrf.mxu2  ;;  %v10381_v54 = vpop.f32.mrf.mxu1 }
 0x338   : > { %12544 = vst [vmem:[#allocation59_spill] sm:$0xff] %v10379_v39  ;;  %v10383_v44 = vpop.f32.mrf.mxu0  ;;  %v5948_v39 = vor.u32 %v6562_v29, %v5945_v3  ;;  %v6565_v3 = vld [vmem:[#allocation2 + $0xf4] sm:$0xf] }
 0x339   : > { %12545 = vst [vmem:[#allocation26_spill] sm:$0xff] %v10381_v54 }
 0x33a   : > { %12546 = vst [vmem:[#allocation75_spill] sm:$0xff] %v10383_v44  ;;  %4207 = vmatmul.bf16.gmra.mxu3 %v6036_v41  ;;  %v6635_v41 = vld [vmem:[#allocation2 + $0x38] sm:$0xf0]  ;;  %v6601_v44 = vld [vmem:[#allocation3 + $0x90] sm:$0xff] }
 0x33b   : > { %4556 = vmatpush.bf16.msra.mxu2 %v6601_v44 }
 0x33d   : > { %v10385_v11 = vpop.f32.mrf.mxu3 }
 0x33e   : > { %12547 = vst [vmem:[#allocation11_spill] sm:$0xff] %v10385_v11 }
 0x33f   : > { %v10387_v1 = vpop.f32.mrf.mxu2  ;;  %v10389_v62 = vpop.f32.mrf.mxu1 }
 0x340   : > { %12548 = vst [vmem:[#allocation84_spill] sm:$0xff] %v10387_v1  ;;  %v10391_v13 = vpop.f32.mrf.mxu0  ;;  %v6244_v1 = vor.u32 %v6635_v41, %v6243_v23  ;;  %v6255_v23 = vld [vmem:[#allocation2 + $0x48] sm:$0xf]  ;;  %v6638_v41 = vld [vmem:[#allocation2 + $0x50] sm:$0xf0] }
 0x341   : > { %12549 = vst [vmem:[#allocation64_spill] sm:$0xff] %v10391_v13  ;;  %v6256_v18 = vor.u32 %v6638_v41, %v6255_v23  ;;  %v6641_v41 = vld [vmem:[#allocation2 + $0x68] sm:$0xf0] }
 0x342   : > { %4510 = vmatmul.bf16.gmra.mxu1 %v5936_v47  ;;  %5255 = vmatmul.bf16.gmra.mxu0 %v6260_v28  ;;  %v6269_v47 = vld [vmem:[#allocation2 + $0x6c] sm:$0xf0]  ;;  %v6700_v28 = vld [vmem:[#allocation3 + $0x210] sm:$0xff] }
 0x343   : > { %5336 = vmatpush.bf16.msra.mxu1 %v6700_v28  ;;  %v6272_v19 = vor.u32 %v6640_v16, %v6269_v47  ;;  %v6281_v16 = vld [vmem:[#allocation2 + $0x84] sm:$0xf0]  ;;  %v5969_v47 = vld [vmem:[#allocation2 + $0x114] sm:$0xf0] }
 0x344   : > { %4083 = vmatmul.bf16.gmra.mxu2 %v5948_v39 }
 0x345   : > { %v10393_v55 = vpop.f32.mrf.mxu3 }
 0x346   : > { %12550 = vst [vmem:[#allocation74_spill] sm:$0xff] %v10393_v55  ;;  %v5957_v55 = vld [vmem:[#allocation2 + $0xfc] sm:$0xf0] }
 0x347   : > { %v10395_v54 = vpop.f32.mrf.mxu2  ;;  %v10397_v11 = vpop.f32.mrf.mxu1  ;;  %v5960_v44 = vor.u32 %v6565_v3, %v5957_v55 }
 0x348   : > { %v10399_v24 = vpop.f32.mrf.mxu0 }
 0x349   : > { %12551 = vst [vmem:[#allocation78_spill] sm:$0xff] %v10399_v24 }
 0x34a   : > { %5161 = vmatmul.bf16.vlgmr.msra.gmra.mxu3 %v6244_v1 }
 0x34d   : > { %v10401_v13 = vpop.f32.mrf.mxu3 }
 0x34e   : > { %12552 = vst [vmem:[#allocation31_spill] sm:$0xff] %v10401_v13 }
 0x34f   : > { %v10403_v51 = vpop.f32.mrf.mxu2  ;;  %v10405_v29 = vpop.f32.mrf.mxu1 }
 0x350   : > { %v10407_v58 = vpop.f32.mrf.mxu0 }
 0x351   : > { %12553 = vst [vmem:[#allocation22_spill] sm:$0xff] %v10407_v58  ;;  %v6643_v58 = vld [vmem:[#allocation2 + $0x7c] sm:$0xf] }
 0x352   : > { %4515 = vmatmul.bf16.gmra.mxu1 %v5948_v39  ;;  %5260 = vmatmul.bf16.gmra.mxu0 %v6272_v19  ;;  %v6568_v39 = vld [vmem:[#allocation2 + $0x10c] sm:$0xf] }
 0x353   : > { %v5972_v17 = vor.u32 %v6568_v39, %v5969_v47  ;;  %v6571_v47 = vld [vmem:[#allocation2 + $0x124] sm:$0xf] }
 0x354   : > { %4088 = vmatmul.bf16.gmra.mxu2 %v5960_v44 }
 0x355   : > { %v10409_v1 = vpop.f32.mrf.mxu3 }
 0x356   : > { %12554 = vst [vmem:[#allocation39_spill] sm:$0xff] %v10409_v1  ;;  %v6284_v1 = vor.u32 %v6643_v58, %v6281_v16  ;;  %v6646_v58 = vld [vmem:[#allocation2 + $0x94] sm:$0xf] }
 0x357   : > { %v10411_v24 = vpop.f32.mrf.mxu2  ;;  %v10413_v13 = vpop.f32.mrf.mxu1 }
 0x358   : > { %v10415_v38 = vpop.f32.mrf.mxu0 }
 0x359   : > { %12555 = vst [vmem:[#allocation68_spill] sm:$0xff] %v10415_v38  ;;  %v6600_v38 = vld [vmem:[#allocation3 + $0x88] sm:$0xff] }
 0x35a   : > { %5166 = vmatmul.bf16.gmra.mxu3 %v6256_v18  ;;  %v6267_v18 = vld [vmem:[#allocation2 + $0x60] sm:$0xf]  ;;  %4557 = vmatpush.bf16.msra.mxu2 %v6600_v38 }
 0x35b   : > { %v6268_v45 = vor.u32 %v6641_v41, %v6267_v18  ;;  %v6279_v18 = vld [vmem:[#allocation2 + $0x78] sm:$0xf]  ;;  %v6644_v41 = vld [vmem:[#allocation2 + $0x80] sm:$0xf0] }
 0x35c   : > { %v6280_v2 = vor.u32 %v6644_v41, %v6279_v18  ;;  %v6647_v41 = vld [vmem:[#allocation2 + $0x98] sm:$0xf0] }
 0x35d   : > { %v10417_v28 = vpop.f32.mrf.mxu3 }
 0x35e   : > { %12556 = vst [vmem:[#allocation14_spill] sm:$0xff] %v10417_v28 }
 0x35f   : > { %v10419_v55 = vpop.f32.mrf.mxu2  ;;  %v10421_v19 = vpop.f32.mrf.mxu1 }
 0x360   : > { %v10423_v3 = vpop.f32.mrf.mxu0 }
 0x361   : > { %12557 = vst [vmem:[#allocation33_spill] sm:$0xff] %v10423_v3 }
 0x362   : > { %4520 = vmatmul.bf16.gmra.mxu1 %v5960_v44  ;;  %5265 = vmatmul.bf16.gmra.mxu0 %v6284_v1  ;;  %v6293_v44 = vld [vmem:[#allocation2 + $0x9c] sm:$0xf0]  ;;  %v6699_v1 = vld [vmem:[#allocation3 + $0x208] sm:$0xff] }
 0x363   : > { %5337 = vmatpush.bf16.msra.mxu1 %v6699_v1  ;;  %v6296_v37 = vor.u32 %v6646_v58, %v6293_v44  ;;  %v6305_v58 = vld [vmem:[#allocation2 + $0xb4] sm:$0xf0]  ;;  %v5993_v44 = vld [vmem:[#allocation2 + $0x144] sm:$0xf0] }
 0x364   : > { %4093 = vmatmul.bf16.gmra.mxu2 %v5972_v17 }
 0x365   : > { %v10425_v23 = vpop.f32.mrf.mxu3 }
 0x366   : > { %12558 = vst [vmem:[#allocation47_spill] sm:$0xff] %v10425_v23  ;;  %v5981_v23 = vld [vmem:[#allocation2 + $0x12c] sm:$0xf0] }
 0x367   : > { %v10427_v28 = vpop.f32.mrf.mxu2  ;;  %v10429_v33 = vpop.f32.mrf.mxu1  ;;  %v5984_v38 = vor.u32 %v6571_v47, %v5981_v23 }
 0x368   : > { %12559 = vst [vmem:[#allocation20_spill] sm:$0xff] %v10429_v33  ;;  %v10431_v25 = vpop.f32.mrf.mxu0  ;;  %v6365_v33 = vld [vmem:[#allocation2 + $0x12c] sm:$0xf0] }
 0x369   : > { %12560 = vst [vmem:[#allocation17_spill] sm:$0xff] %v10431_v25 }
 0x36a   : > { %5171 = vmatmul.bf16.gmra.mxu3 %v6268_v45 }
 0x36d   : > { %v10433_v3 = vpop.f32.mrf.mxu3 }
 0x36e   : > { %12561 = vst [vmem:[#allocation79_spill] sm:$0xff] %v10433_v3 }
 0x36f   : > { %v10435_v16 = vpop.f32.mrf.mxu2  ;;  %v10437_v39 = vpop.f32.mrf.mxu1 }
 0x370   : > { %12562 = vst [vmem:[#allocation25_spill] sm:$0xff] %v10437_v39  ;;  %v10439_v30 = vpop.f32.mrf.mxu0 }
 0x371   : > { %12563 = vst [vmem:[#allocation9_spill] sm:$0xff] %v10439_v30  ;;  %v6649_v30 = vld [vmem:[#allocation2 + $0xac] sm:$0xf] }
 0x372   : > { %4525 = vmatmul.bf16.gmra.mxu1 %v5972_v17  ;;  %5270 = vmatmul.bf16.gmra.mxu0 %v6296_v37  ;;  %v6574_v37 = vld [vmem:[#allocation2 + $0x13c] sm:$0xf] }
 0x373   : > { %v5996_v53 = vor.u32 %v6574_v37, %v5993_v44  ;;  %v6577_v44 = vld [vmem:[#allocation2 + $0x154] sm:$0xf] }
 0x374   : > { %4098 = vmatmul.bf16.gmra.mxu2 %v5984_v38 }
 0x375   : > { %v10441_v45 = vpop.f32.mrf.mxu3 }
 0x376   : > { %12564 = vst [vmem:[#allocation67_spill] sm:$0xff] %v10441_v45  ;;  %v6308_v45 = vor.u32 %v6649_v30, %v6305_v58  ;;  %v6652_v30 = vld [vmem:[#allocation2 + $0xc4] sm:$0xf] }
 0x377   : > { %v10443_v25 = vpop.f32.mrf.mxu2  ;;  %v10445_v3 = vpop.f32.mrf.mxu1 }
 0x378   : > { %12565 = vst [vmem:[#allocation87_spill] sm:$0xff] %v10445_v3  ;;  %v10447_v27 = vpop.f32.mrf.mxu0 }
 0x379   : > { %12566 = vst [vmem:[#allocation35_spill] sm:$0xff] %v10447_v27  ;;  %v6599_v27 = vld [vmem:[#allocation3 + $0x80] sm:$0xff] }
 0x37a   : > { %5176 = vmatmul.bf16.gmra.mxu3 %v6280_v2  ;;  %v6291_v2 = vld [vmem:[#allocation2 + $0x90] sm:$0xf]  ;;  %4558 = vmatpush.bf16.msra.mxu2 %v6599_v27 }
 0x37d   : > { %v10449_v1 = vpop.f32.mrf.mxu3 }
 0x37e   : > { %12567 = vst [vmem:[#allocation81_spill] sm:$0xff] %v10449_v1 }
 0x37f   : > { %v10451_v23 = vpop.f32.mrf.mxu2  ;;  %v10453_v17 = vpop.f32.mrf.mxu1 }
 0x380   : > { %12568 = vst [vmem:[#allocation44_spill] sm:$0xff] %v10451_v23  ;;  %v10455_v47 = vpop.f32.mrf.mxu0 }
 0x381   : > { %12569 = vst [vmem:[#allocation85_spill] sm:$0xff] %v10453_v17  ;;  %v6292_v17 = vor.u32 %v6647_v41, %v6291_v2  ;;  %v6303_v2 = vld [vmem:[#allocation2 + $0xa8] sm:$0xf]  ;;  %v6650_v41 = vld [vmem:[#allocation2 + $0xb0] sm:$0xf0] }
 0x382   : > { %12570 = vst [vmem:[#allocation57_spill] sm:$0xff] %v10455_v47  ;;  %4530 = vmatmul.bf16.gmra.mxu1 %v5984_v38  ;;  %5275 = vmatmul.bf16.gmra.mxu0 %v6308_v45  ;;  %v6317_v38 = vld [vmem:[#allocation2 + $0xcc] sm:$0xf0] }
 0x383   : > { %v6698_v45 = vld [vmem:[#allocation3 + $0x200] sm:$0xff] }
 0x384   : > { %4103 = vmatmul.bf16.gmra.mxu2 %v5996_v53  ;;  %5338 = vmatpush.bf16.msra.mxu1 %v6698_v45 }
 0x385   : > { %v10457_v18 = vpop.f32.mrf.mxu3 }
 0x386   : > { %12571 = vst [vmem:[#allocation38_spill] sm:$0xff] %v10457_v18  ;;  %v6005_v18 = vld [vmem:[#allocation2 + $0x15c] sm:$0xf0] }
 0x387   : > { %v10459_v1 = vpop.f32.mrf.mxu2  ;;  %v10461_v3 = vpop.f32.mrf.mxu1  ;;  %v6008_v27 = vor.u32 %v6577_v44, %v6005_v18 }
 0x388   : > { %12572 = vst [vmem:[#allocation51_spill] sm:$0xff] %v10459_v1  ;;  %v10463_v39 = vpop.f32.mrf.mxu0 }
 0x389   : > { %12573 = vst [vmem:[#allocation52_spill] sm:$0xff] %v10461_v3  ;;  %v6320_v3 = vor.u32 %v6652_v30, %v6317_v38  ;;  %v6329_v30 = vld [vmem:[#allocation2 + $0xe4] sm:$0xf0]  ;;  %v6017_v38 = vld [vmem:[#allocation2 + $0x174] sm:$0xf0] }
 0x38a   : > { %12574 = vst [vmem:[#allocation32_spill] sm:$0xff] %v10463_v39  ;;  %5181 = vmatmul.bf16.gmra.mxu3 %v6292_v17 }
 0x38d   : > { %v10465_v47 = vpop.f32.mrf.mxu3 }
 0x38e   : > { %12575 = vst [vmem:[#allocation54_spill] sm:$0xff] %v10465_v47 }
 0x38f   : > { %v10467_v58 = vpop.f32.mrf.mxu2  ;;  %v10469_v37 = vpop.f32.mrf.mxu1 }
 0x390   : > { %12576 = vst [vmem:[#allocation76_spill] sm:$0xff] %v10467_v58  ;;  %v10471_v1 = vpop.f32.mrf.mxu0  ;;  %v6304_v58 = vor.u32 %v6650_v41, %v6303_v2  ;;  %v6653_v41 = vld [vmem:[#allocation2 + $0xc8] sm:$0xf0] }
 0x391   : > { %12577 = vst [vmem:[#allocation88_spill] sm:$0xff] %v10469_v37 }
 0x392   : > { %12578 = vst [vmem:[#allocation89_spill] sm:$0xff] %v10471_v1  ;;  %4535 = vmatmul.bf16.gmra.mxu1 %v5996_v53  ;;  %5280 = vmatmul.bf16.gmra.mxu0 %v6320_v3  ;;  %v6655_v1 = vld [vmem:[#allocation2 + $0xdc] sm:$0xf]  ;;  %v6580_v3 = vld [vmem:[#allocation2 + $0x16c] sm:$0xf] }
 0x394   : > { %4108 = vmatmul.bf16.gmra.mxu2 %v6008_v27 }
 0x395   : > { %v10473_v17 = vpop.f32.mrf.mxu3 }
 0x396   : > { %12579 = vst [vmem:[#allocation90_spill] sm:$0xff] %v10473_v17  ;;  %v6332_v17 = vor.u32 %v6655_v1, %v6329_v30  ;;  %v6341_v1 = vld [vmem:[#allocation2 + $0xfc] sm:$0xf0] }
 0x397   : > { %v10475_v39 = vpop.f32.mrf.mxu2  ;;  %v10477_v47 = vpop.f32.mrf.mxu1 }
 0x398   : > { %12580 = vst [vmem:[#allocation91_spill] sm:$0xff] %v10475_v39  ;;  %v10479_v37 = vpop.f32.mrf.mxu0  ;;  %v6020_v39 = vor.u32 %v6580_v3, %v6017_v38  ;;  %v6029_v3 = vld [vmem:[#allocation2 + $0x18c] sm:$0xf0] }
 0x399   : > { %12581 = vst [vmem:[#allocation92_spill] sm:$0xff] %v10477_v47 }
 0x39a   : > { %12582 = vst [vmem:[#allocation93_spill] sm:$0xff] %v10479_v37  ;;  %5186 = vmatmul.bf16.gmra.mxu3 %v6304_v58  ;;  %v6315_v58 = vld [vmem:[#allocation2 + $0xc0] sm:$0xf] }
 0x39b   : > { %v6316_v47 = vor.u32 %v6653_v41, %v6315_v58  ;;  %v6327_v41 = vld [vmem:[#allocation2 + $0xd8] sm:$0xf] }
 0x39d   : > { %v10481_v45 = vpop.f32.mrf.mxu3 }
 0x39e   : > { %12583 = vst [vmem:[#allocation94_spill] sm:$0xff] %v10481_v45 }
 0x39f   : > { %v10483_v18 = vpop.f32.mrf.mxu2  ;;  %v10485_v53 = vpop.f32.mrf.mxu1 }
 0x3a0   : > { %12584 = vst [vmem:[#allocation95_spill] sm:$0xff] %v10483_v18  ;;  %v10487_v44 = vpop.f32.mrf.mxu0 }
 0x3a1   : > { %12585 = vst [vmem:[#allocation96_spill] sm:$0xff] %v10485_v53 }
 0x3a2   : > { %12586 = vst [vmem:[#allocation97_spill] sm:$0xff] %v10487_v44  ;;  %4540 = vmatmul.bf16.gmra.mxu1 %v6008_v27  ;;  %5285 = vmatmul.bf16.gmra.mxu0 %v6332_v17  ;;  %v6658_v44 = vld [vmem:[#allocation2 + $0xf4] sm:$0xf]  ;;  %v6607_v17 = vld [vmem:[#allocation2 + $0x184] sm:$0xf] }
 0x3a3   : > { %v6032_v9 = vor.u32 %v6607_v17, %v6029_v3 }
 0x3a4   : > { %4113 = vmatmul.bf16.gmra.mxu2 %v6020_v39 }
 0x3a5   : > { %v10489_v2 = vpop.f32.mrf.mxu3 }
 0x3a6   : > { %12587 = vst [vmem:[#allocation98_spill] sm:$0xff] %v10489_v2  ;;  %v6344_v2 = vor.u32 %v6658_v44, %v6341_v1  ;;  %v6143_v44 = vld [vmem:[#allocation2 + $0x8] sm:$0xf] }
 0x3a7   : > { %v10491_v37 = vpop.f32.mrf.mxu2  ;;  %v10493_v45 = vpop.f32.mrf.mxu1 }
 0x3a8   : > { %12588 = vst [vmem:[#allocation99_spill] sm:$0xff] %v10491_v37  ;;  %v10495_v18 = vpop.f32.mrf.mxu0  ;;  %v6353_v37 = vld [vmem:[#allocation2 + $0x114] sm:$0xf0] }
 0x3a9   : > { %12589 = vst [vmem:[#allocation100_spill] sm:$0xff] %v10493_v45 }
 0x3aa   : > { %12590 = vst [vmem:[#allocation101_spill] sm:$0xff] %v10495_v18  ;;  %5191 = vmatmul.bf16.gmra.mxu3 %v6316_v47  ;;  %v6656_v47 = vld [vmem:[#allocation2 + $0xe0] sm:$0xf0] }
 0x3ab   : > { %v6328_v45 = vor.u32 %v6656_v47, %v6327_v41  ;;  %v6339_v41 = vld [vmem:[#allocation2 + $0xf0] sm:$0xf]  ;;  %v6659_v47 = vld [vmem:[#allocation2 + $0xf8] sm:$0xf0] }
 0x3ac   : > { %v6340_v23 = vor.u32 %v6659_v47, %v6339_v41  ;;  %v6662_v41 = vld [vmem:[#allocation2 + $0x110] sm:$0xf0] }
 0x3ad   : > { %v10497_v53 = vpop.f32.mrf.mxu3 }
 0x3ae   : > { %12591 = vst [vmem:[#allocation102_spill] sm:$0xff] %v10497_v53 }
 0x3af   : > { %v10499_v30 = vpop.f32.mrf.mxu2  ;;  %v10501_v27 = vpop.f32.mrf.mxu1 }
 0x3b0   : > { %12592 = vst [vmem:[#allocation103_spill] sm:$0xff] %v10499_v30  ;;  %v5251_v38 = vpop.f32.mrf.mxu0 }
 0x3b1   : > { %12593 = vst [vmem:[#allocation104_spill] sm:$0xff] %v10501_v27  ;;  %v6661_v27 = vld [vmem:[#allocation2 + $0x10c] sm:$0xf] }
 0x3b2   : > { %4545 = vmatmul.bf16.gmra.mxu1 %v6020_v39  ;;  %5290 = vmatmul.bf16.gmra.mxu0 %v6344_v2  ;;  %v6537_v39 = vld [vmem:[#allocation2 + $0x10] sm:$0xf0]  ;;  %v6636_v2 = vld [vmem:[#allocation2 + $0x40] sm:$0xf0] }
 0x3b3   : > { %v6144_v3 = vor.u32 %v6537_v39, %v6143_v44  ;;  %v6263_v44 = vld [vmem:[#allocation2 + $0x50] sm:$0xf] }
 0x3b4   : > { %4118 = vmatmul.bf16.gmra.mxu2 %v6032_v9 }
 0x3b5   : > { %v10503_v58 = vpop.f32.mrf.mxu3 }
 0x3b6   : > { %12594 = vst [vmem:[#allocation105_spill] sm:$0xff] %v10503_v58  ;;  %v6356_v58 = vor.u32 %v6661_v27, %v6353_v37  ;;  %v6639_v37 = vld [vmem:[#allocation2 + $0x58] sm:$0xf0] }
 0x3b7   : > { %v10505_v18 = vpop.f32.mrf.mxu2  ;;  %v10507_v53 = vpop.f32.mrf.mxu1 }
 0x3b8   : > { %12595 = vst [vmem:[#allocation106_spill] sm:$0xff] %v10505_v18  ;;  %v5253_v30 = vpop.f32.mrf.mxu0  ;;  %v6252_v18 = vor.u32 %v6636_v2, %v6251_v8  ;;  %v6264_v2 = vor.u32 %v6639_v37, %v6263_v44  ;;  %v6642_v44 = vld [vmem:[#allocation2 + $0x70] sm:$0xf0] }
 0x3b9   : > { %12596 = vst [vmem:[#allocation107_spill] sm:$0xff] %v10507_v53 }
 0x3ba   : > { %5196 = vmatmul.bf16.gmra.mxu3 %v6328_v45 }
 0x3bd   : > { %v10509_v31 = vpop.f32.mrf.mxu3 }
 0x3be   : > { %12597 = vst [vmem:[#allocation108_spill] sm:$0xff] %v10509_v31 }
 0x3bf   : > { %v10511_v9 = vpop.f32.mrf.mxu2  ;;  %v10513_v1 = vpop.f32.mrf.mxu1 }
 0x3c0   : > { %12598 = vst [vmem:[#allocation109_spill] sm:$0xff] %v10511_v9  ;;  %v5256_v17 = vpop.f32.mrf.mxu0  ;;  %v6664_v9 = vld [vmem:[#allocation2 + $0x124] sm:$0xf] }
 0x3c1   : > { %12599 = vst [vmem:[#allocation110_spill] sm:$0xff] %v10513_v1  ;;  %v6368_v39 = vor.u32 %v6664_v9, %v6365_v33  ;;  %v6377_v33 = vld [vmem:[#allocation2 + $0x144] sm:$0xf0] }
 0x3c2   : > { %5295 = vmatmul.bf16.gmra.mxu0 %v6356_v58  ;;  %5339 = vmatmul.bf16.vlgmr.msra.gmra.mxu1 %v6252_v18  ;;  %v6275_v9 = vld [vmem:[#allocation2 + $0x68] sm:$0xf] }
 0x3c4   : > { %4559 = vmatmul.bf16.vlgmr.msra.gmra.mxu2 %v6144_v3 }
 0x3c5   : > { %v10515_v45 = vpop.f32.mrf.mxu3 }
 0x3c6   : > { %12600 = vst [vmem:[#allocation111_spill] sm:$0xff] %v10515_v45 }
 0x3c7   : > { %v10517_v53 = vpop.f32.mrf.mxu2  ;;  %v10519_v31 = vpop.f32.mrf.mxu1 }
 0x3c8   : > { %12601 = vst [vmem:[#allocation112_spill] sm:$0xff] %v10517_v53  ;;  %v5258_v6 = vpop.f32.mrf.mxu0 }
 0x3c9   : > { %12602 = vst [vmem:[#allocation113_spill] sm:$0xff] %v10519_v31 }
 0x3ca   : > { %5201 = vmatmul.bf16.gmra.mxu3 %v6340_v23  ;;  %v6351_v23 = vld [vmem:[#allocation2 + $0x108] sm:$0xf] }
 0x3cd   : > { %v5162_v1 = vpop.f32.mrf.mxu3 }
 0x3ce   : > { %v10521_v8 = vadd.f32 %v5251_v38, %v5162_v1  ;;  %v6352_v1 = vor.u32 %v6662_v41, %v6351_v23  ;;  %v6363_v41 = vld [vmem:[#allocation2 + $0x120] sm:$0xf] }
 0x3cf   : > { %v10523_v18 = vpop.f32.mrf.mxu2  ;;  %v10525_v27 = vpop.f32.mrf.mxu1 }
 0x3d0   : > { %12603 = vst [vmem:[#allocation114_spill] sm:$0xff] %v10523_v18  ;;  %v5261_v58 = vpop.f32.mrf.mxu0 }
 0x3d1   : > { %12604 = vst [vmem:[#allocation115_spill] sm:$0xff] %v10525_v27  ;;  %v6667_v27 = vld [vmem:[#allocation2 + $0x13c] sm:$0xf] }
 0x3d2   : > { %5300 = vmatmul.bf16.gmra.mxu0 %v6368_v39  ;;  %5344 = vmatmul.bf16.gmra.mxu1 %v6264_v2  ;;  %v6380_v2 = vor.u32 %v6667_v27, %v6377_v33  ;;  %v6389_v33 = vld [vmem:[#allocation2 + $0x15c] sm:$0xf0] }
 0x3d4   : > { %4564 = vmatmul.bf16.gmra.mxu2 %v9774_v61 }
 0x3d5   : > { %v5164_v3 = vpop.f32.mrf.mxu3 }
 0x3d6   : > { %v10528_v47 = vadd.f32 %v5253_v30, %v5164_v3  ;;  %v6276_v3 = vor.u32 %v6642_v44, %v6275_v9  ;;  %v6287_v9 = vld [vmem:[#allocation2 + $0x80] sm:$0xf]  ;;  %v6645_v44 = vld [vmem:[#allocation2 + $0x88] sm:$0xf0] }
 0x3d7   : > { %v10530_v45 = vpop.f32.mrf.mxu2  ;;  %v10532_v38 = vpop.f32.mrf.mxu1 }
 0x3d8   : > { %12605 = vst [vmem:[#allocation116_spill] sm:$0xff] %v10530_v45  ;;  %v5263_v31 = vpop.f32.mrf.mxu0 }
 0x3d9   : > { %12606 = vst [vmem:[#allocation117_spill] sm:$0xff] %v10532_v38 }
 0x3da   : > { %5206 = vmatmul.bf16.gmra.mxu3 %v6352_v1  ;;  %v6665_v1 = vld [vmem:[#allocation2 + $0x128] sm:$0xf0] }
 0x3dd   : > { %v5167_v18 = vpop.f32.mrf.mxu3 }
 0x3de   : > { %v10534_v37 = vadd.f32 %v5256_v17, %v5167_v18  ;;  %v6364_v18 = vor.u32 %v6665_v1, %v6363_v41  ;;  %v6375_v1 = vld [vmem:[#allocation2 + $0x138] sm:$0xf] }
 0x3df   : > { %v10536_v61 = vpop.f32.mrf.mxu2  ;;  %v10538_v39 = vpop.f32.mrf.mxu1 }
 0x3e0   : > { %12607 = vst [vmem:[#allocation118_spill] sm:$0xff] %v10536_v61  ;;  %v5266_v30 = vpop.f32.mrf.mxu0 }
 0x3e1   : > { %12608 = vst [vmem:[#allocation119_spill] sm:$0xff] %v10538_v39  ;;  %v6670_v39 = vld [vmem:[#allocation2 + $0x154] sm:$0xf] }
 0x3e2   : > { %5305 = vmatmul.bf16.gmra.mxu0 %v6380_v2  ;;  %5349 = vmatmul.bf16.gmra.mxu1 %v6276_v3 }
 0x3e4   : > { %4569 = vmatmul.bf16.gmra.mxu2 %v9856_v36 }
 0x3e5   : > { %v5169_v23 = vpop.f32.mrf.mxu3 }
 0x3e6   : > { %v10541_v38 = vadd.f32 %v5258_v6, %v5169_v23  ;;  %v6392_v6 = vor.u32 %v6670_v39, %v6389_v33  ;;  %v6288_v23 = vor.u32 %v6645_v44, %v6287_v9  ;;  %v6401_v39 = vld [vmem:[#allocation2 + $0x174] sm:$0xf0]  ;;  %v6648_v9 = vld [vmem:[#allocation2 + $0xa0] sm:$0xf0] }
 0x3e7   : > { %v10543_v45 = vpop.f32.mrf.mxu2  ;;  %v10545_v17 = vpop.f32.mrf.mxu1  ;;  %v6299_v33 = vld [vmem:[#allocation2 + $0x98] sm:$0xf] }
 0x3e8   : > { %12609 = vst [vmem:[#allocation120_spill] sm:$0xff] %v10543_v45  ;;  %v10547_v61 = vpop.f32.mrf.mxu0 }
 0x3e9   : > { %12610 = vst [vmem:[#allocation121_spill] sm:$0xff] %v10545_v17 }
 0x3ea   : > { %5211 = vmatmul.bf16.gmra.mxu3 %v6364_v18  ;;  %12611 = vst [vmem:[#allocation122_spill] sm:$0xff] %v10547_v61  ;;  %v6668_v18 = vld [vmem:[#allocation2 + $0x140] sm:$0xf0] }
 0x3ed   : > { %v5172_v27 = vpop.f32.mrf.mxu3 }
 0x3ee   : > { %v10549_v2 = vadd.f32 %v5261_v58, %v5172_v27  ;;  %v6376_v27 = vor.u32 %v6668_v18, %v6375_v1  ;;  %v6387_v18 = vld [vmem:[#allocation2 + $0x150] sm:$0xf] }
 0x3ef   : > { %v10551_v36 = vpop.f32.mrf.mxu2  ;;  %v10553_v3 = vpop.f32.mrf.mxu1 }
 0x3f0   : > { %12612 = vst [vmem:[#allocation123_spill] sm:$0xff] %v10551_v36  ;;  %v5271_v17 = vpop.f32.mrf.mxu0  ;;  %v6673_v36 = vld [vmem:[#allocation2 + $0x16c] sm:$0xf] }
 0x3f1   : > { %12613 = vst [vmem:[#allocation124_spill] sm:$0xff] %v10553_v3 }
 0x3f2   : > { %5310 = vmatmul.bf16.gmra.mxu0 %v6392_v6  ;;  %5354 = vmatmul.bf16.gmra.mxu1 %v6288_v23 }
 0x3f4   : > { %4574 = vmatmul.bf16.gmra.mxu2 %v9942_v22 }
 0x3f5   : > { %v5174_v41 = vpop.f32.mrf.mxu3 }
 0x3f6   : > { %v10556_v45 = vadd.f32 %v5263_v31, %v5174_v41  ;;  %v6404_v31 = vor.u32 %v6673_v36, %v6401_v39  ;;  %v6300_v41 = vor.u32 %v6648_v9, %v6299_v33  ;;  %v6311_v36 = vld [vmem:[#allocation2 + $0xb0] sm:$0xf]  ;;  %v6651_v39 = vld [vmem:[#allocation2 + $0xb8] sm:$0xf0] }
 0x3f7   : > { %v10558_v53 = vpop.f32.mrf.mxu2  ;;  %v10560_v58 = vpop.f32.mrf.mxu1 }
 0x3f8   : > { %12614 = vst [vmem:[#allocation125_spill] sm:$0xff] %v10558_v53  ;;  %v5273_v6 = vpop.f32.mrf.mxu0 }
 0x3f9   : > { %12615 = vst [vmem:[#allocation126_spill] sm:$0xff] %v10560_v58 }
 0x3fa   : > { %5216 = vmatmul.bf16.gmra.mxu3 %v6376_v27  ;;  %v6671_v27 = vld [vmem:[#allocation2 + $0x158] sm:$0xf0] }
 0x3fd   : > { %v5177_v3 = vpop.f32.mrf.mxu3 }
 0x3fe   : > { %v10562_v44 = vadd.f32 %v5266_v30, %v5177_v3  ;;  %v6388_v3 = vor.u32 %v6671_v27, %v6387_v18  ;;  %v6399_v27 = vld [vmem:[#allocation2 + $0x168] sm:$0xf] }
 0x3ff   : > { %v10564_v22 = vpop.f32.mrf.mxu2  ;;  %v10566_v23 = vpop.f32.mrf.mxu1 }
 0x400   : > { %12616 = vst [vmem:[#allocation127_spill] sm:$0xff] %v10564_v22  ;;  %v5276_v30 = vpop.f32.mrf.mxu0  ;;  %v6676_v22 = vld [vmem:[#allocation2 + $0x184] sm:$0xf] }
 0x401   : > { %12617 = vst [vmem:[#allocation128_spill] sm:$0xff] %v10566_v23  ;;  %v6413_v23 = vld [vmem:[#allocation2 + $0x18c] sm:$0xf0] }
 0x402   : > { %5315 = vmatmul.bf16.gmra.mxu0 %v6404_v31  ;;  %5359 = vmatmul.bf16.gmra.mxu1 %v6300_v41  ;;  %v6416_v31 = vor.u32 %v6676_v22, %v6413_v23  ;;  %v6312_v41 = vor.u32 %v6651_v39, %v6311_v36  ;;  %v6323_v22 = vld [vmem:[#allocation2 + $0xc8] sm:$0xf]  ;;  %v6654_v23 = vld [vmem:[#allocation2 + $0xd0] sm:$0xf0] }
 0x404   : > { %4579 = vmatmul.bf16.gmra.mxu2 %v10026_v35 }
 0x405   : > { %v10569_v1 = vpop.f32.mrf.mxu3 }
 0x406   : > { %12618 = vst [vmem:[#allocation129_spill] sm:$0xff] %v10569_v1 }
 0x407   : > { %v10571_v58 = vpop.f32.mrf.mxu2  ;;  %v10573_v53 = vpop.f32.mrf.mxu1 }
 0x408   : > { %12619 = vst [vmem:[#allocation130_spill] sm:$0xff] %v10571_v58  ;;  %v5278_v1 = vpop.f32.mrf.mxu0 }
 0x409   : > { %12620 = vst [vmem:[#allocation131_spill] sm:$0xff] %v10573_v53 }
 0x40a   : > { %5221 = vmatmul.bf16.gmra.mxu3 %v6388_v3  ;;  %v6674_v3 = vld [vmem:[#allocation2 + $0x170] sm:$0xf0] }
 0x40d   : > { %v5182_v61 = vpop.f32.mrf.mxu3 }
 0x40e   : > { %v10575_v33 = vadd.f32 %v5271_v17, %v5182_v61  ;;  %v6400_v17 = vor.u32 %v6674_v3, %v6399_v27 }
 0x40f   : > { %v10577_v9 = vpop.f32.mrf.mxu2  ;;  %v10579_v35 = vpop.f32.mrf.mxu1 }
 0x410   : > { %12621 = vst [vmem:[#allocation132_spill] sm:$0xff] %v10577_v9  ;;  %v5281_v9 = vpop.f32.mrf.mxu0 }
 0x411   : > { %12622 = vst [vmem:[#allocation133_spill] sm:$0xff] %v10579_v35 }
 0x412   : > { %5320 = vmatmul.bf16.gmra.mxu0 %v6416_v31  ;;  %5364 = vmatmul.bf16.gmra.mxu1 %v6312_v41  ;;  %v6324_v31 = vor.u32 %v6654_v23, %v6323_v22  ;;  %v6411_v41 = vld [vmem:[#allocation2 + $0x180] sm:$0xf] }
 0x414   : > { %4584 = vmatmul.bf16.gmra.mxu2 %v10114_v26 }
 0x415   : > { %v5184_v18 = vpop.f32.mrf.mxu3 }
 0x416   : > { %v10582_v53 = vadd.f32 %v5273_v6, %v5184_v18  ;;  %v6677_v18 = vld [vmem:[#allocation2 + $0x188] sm:$0xf0] }
 0x417   : > { %v10584_v58 = vpop.f32.mrf.mxu2  ;;  %v10586_v61 = vpop.f32.mrf.mxu1 }
 0x418   : > { %12623 = vst [vmem:[#allocation134_spill] sm:$0xff] %v10584_v58  ;;  %v6657_v58 = vld [vmem:[#allocation2 + $0xe8] sm:$0xf0] }
 0x419   : > { %12624 = vst [vmem:[#allocation135_spill] sm:$0xff] %v10586_v61  ;;  %v5283_v61 = vpop.f32.mrf.mxu0 }
 0x41a   : > { %5226 = vmatmul.bf16.gmra.mxu3 %v6400_v17 }
 0x41d   : > { %v5187_v35 = vpop.f32.mrf.mxu3 }
 0x41e   : > { %v10588_v36 = vadd.f32 %v5276_v30, %v5187_v35  ;;  %v6412_v30 = vor.u32 %v6677_v18, %v6411_v41 }
 0x41f   : > { %v10590_v39 = vpop.f32.mrf.mxu2  ;;  %v10592_v26 = vpop.f32.mrf.mxu1 }
 0x420   : > { %12625 = vst [vmem:[#allocation136_spill] sm:$0xff] %v10590_v39  ;;  %v6335_v39 = vld [vmem:[#allocation2 + $0xe0] sm:$0xf] }
 0x421   : > { %12626 = vst [vmem:[#allocation137_spill] sm:$0xff] %v10592_v26  ;;  %v5286_v23 = vpop.f32.mrf.mxu0 }
 0x422   : > { %5369 = vmatmul.bf16.gmra.mxu1 %v6324_v31  ;;  %v6336_v31 = vor.u32 %v6657_v58, %v6335_v39 }
 0x424   : > { %4589 = vmatmul.bf16.gmra.mxu2 %v10178_v20 }
 0x425   : > { %v5189_v6 = vpop.f32.mrf.mxu3 }
 0x426   : > { %v10595_v27 = vadd.f32 %v5278_v1, %v5189_v6 }
 0x427   : > { %v10597_v3 = vpop.f32.mrf.mxu2  ;;  %v10599_v17 = vpop.f32.mrf.mxu1 }
 0x428   : > { %12627 = vst [vmem:[#allocation138_spill] sm:$0xff] %v10599_v17 }
 0x429   : > { %v5288_v18 = vpop.f32.mrf.mxu0 }
 0x42a   : > { %5231 = vmatmul.bf16.gmra.mxu3 %v6412_v30 }
 0x42d   : > { %v5192_v35 = vpop.f32.mrf.mxu3 }
 0x42e   : > { %v10601_v26 = vadd.f32 %v5281_v9, %v5192_v35  ;;  %v4045_v9 = vadd.f32 %v10395_v54, %v10235_v10  ;;  %v6347_v35 = vld [vmem:[#allocation2 + $0xf8] sm:$0xf] }
 0x42f   : > { %v10603_v22 = vpop.f32.mrf.mxu2  ;;  %v10605_v20 = vpop.f32.mrf.mxu1 }
 0x430   : > { %12628 = vst [vmem:[#allocation139_spill] sm:$0xff] %v10603_v22  ;;  %v6660_v22 = vld [vmem:[#allocation2 + $0x100] sm:$0xf0] }
 0x431   : > { %12629 = vst [vmem:[#allocation140_spill] sm:$0xff] %v10605_v20  ;;  %v4134_v20 = vadd.f32 %v10249_v40, %v4045_v9  ;;  %v5291_v54 = vpop.f32.mrf.mxu0 }
 0x432   : > { %5374 = vmatmul.bf16.gmra.mxu1 %v6336_v31  ;;  %v6348_v31 = vor.u32 %v6660_v22, %v6347_v35  ;;  %v6663_v35 = vld [vmem:[#allocation2 + $0x118] sm:$0xf0] }
 0x433   : > { %v4383_v10 = vadd.f32 %v10228_v50, %v4134_v20  ;;  %v6359_v20 = vld [vmem:[#allocation2 + $0x110] sm:$0xf] }
 0x434   : > { %4594 = vmatmul.bf16.gmra.mxu2 %v10223_v46 }
 0x435   : > { %v5194_v1 = vpop.f32.mrf.mxu3  ;;  %v4472_v9 = vadd.f32 %v10389_v62, %v4383_v10 }
 0x436   : > { %v10608_v6 = vadd.f32 %v5283_v61, %v5194_v1  ;;  %v4047_v1 = vadd.f32 %v10403_v51, %v10242_v60  ;;  %v4050_v60 = vadd.f32 %v10411_v24, %v10253_v4  ;;  %v6360_v4 = vor.u32 %v6663_v35, %v6359_v20 }
 0x437   : > { %v10610_v17 = vpop.f32.mrf.mxu2  ;;  %v10612_v41 = vpop.f32.mrf.mxu1  ;;  %v4052_v24 = vadd.f32 %v10419_v55, %v10262_v48  ;;  %v4055_v55 = vadd.f32 %v10427_v28, %v10273_v7  ;;  %v4057_v7 = vadd.f32 %v10435_v16, %v10282_v59  ;;  %v4060_v16 = vadd.f32 %v10443_v25, %v10293_v15  ;;  %v12638_v25 = vld [vmem:[#allocation42_spill] sm:$0xff] }
 0x438   : > { %12630 = vst [vmem:[#allocation141_spill] sm:$0xff] %v10612_v41  ;;  %v4136_v40 = vadd.f32 %v10258_v63, %v4047_v1  ;;  %v4139_v63 = vadd.f32 %v10269_v0, %v4050_v60 }
 0x439   : > { %v4141_v1 = vadd.f32 %v10278_v43, %v4052_v24  ;;  %v6666_v43 = vld [vmem:[#allocation2 + $0x130] sm:$0xf0]  ;;  %v4149_v24 = vadd.f32 %v10309_v14, %v4060_v16  ;;  %v12643_v14 = vld [vmem:[#allocation66_spill] sm:$0xff] }
 0x43a   : > { %v4385_v50 = vadd.f32 %v10230_v57, %v4136_v40 }
 0x43c   : > { %v4474_v62 = vadd.f32 %v10397_v11, %v4385_v50 }
 0x43d   : > { %v5197_v30 = vpop.f32.mrf.mxu3 }
 0x43e   : > { %v10617_v58 = vadd.f32 %v5286_v23, %v5197_v30 }
 0x43f   : > { %v10619_v39 = vpop.f32.mrf.mxu2  ;;  %v5340_v46 = vpop.f32.mrf.mxu1 }
 0x440   : > { %12631 = vst [vmem:[#allocation142_spill] sm:$0xff] %v10619_v39  ;;  %v5341_v61 = vadd.f32 %v5340_v46, %v10521_v8 }
 0x442   : > { %5379 = vmatmul.bf16.gmra.mxu1 %v6348_v31 }
 0x444   : > { %4599 = vmatmul.bf16.gmra.mxu2 %v10232_v5 }
 0x445   : > { %v5199_v41 = vpop.f32.mrf.mxu3 }
 0x446   : > { %v10627_v23 = vadd.f32 %v5288_v18, %v5199_v41  ;;  %v5293_v41 = vpop.f32.mrf.mxu0 }
 0x447   : > { %v4560_v30 = vpop.f32.mrf.mxu2  ;;  %v5342_v39 = vpop.f32.mrf.mxu1 }
 0x448   : > { %v4561_v8 = vadd.f32 %v4560_v30, %v4472_v9  ;;  %v5343_v22 = vadd.f32 %v5342_v39, %v10528_v47 }
 0x44a   : > { %v10633_v51 = vadd.f32 %v5341_v61, %v4561_v8  ;;  %v4388_v61 = vadd.f32 %v10237_v12, %v4139_v63  ;;  %v4390_v12 = vadd.f32 %v10246_v21, %v4141_v1  ;;  %v6371_v8 = vld [vmem:[#allocation2 + $0x128] sm:$0xf] }
 0x44b   : > { %v6372_v35 = vor.u32 %v6666_v43, %v6371_v8 }
 0x44c   : > { %12632 = vst [vmem:[#allocation143_spill] sm:$0xff] %v10633_v51  ;;  %v4477_v10 = vadd.f32 %v10405_v29, %v4388_v61  ;;  %v4479_v29 = vadd.f32 %v10413_v13, %v4390_v12  ;;  %v4146_v13 = vadd.f32 %v10298_v42, %v4057_v7  ;;  %v6669_v42 = vld [vmem:[#allocation2 + $0x148] sm:$0xf0]  ;;  %v6395_v7 = vld [vmem:[#allocation2 + $0x158] sm:$0xf] }
 0x44d   : > { %v5202_v5 = vpop.f32.mrf.mxu3 }
 0x44e   : > { %v10637_v18 = vadd.f32 %v5291_v54, %v5202_v5  ;;  %v5296_v48 = vpop.f32.mrf.mxu0 }
 0x44f   : > { %v4562_v46 = vpop.f32.mrf.mxu2  ;;  %v5345_v31 = vpop.f32.mrf.mxu1 }
 0x450   : > { %v4563_v47 = vadd.f32 %v4562_v46, %v4474_v62  ;;  %v5346_v39 = vadd.f32 %v5345_v31, %v10534_v37 }
 0x452   : > { %v10643_v57 = vadd.f32 %v5343_v22, %v4563_v47  ;;  %5384 = vmatmul.bf16.gmra.mxu1 %v6360_v4  ;;  %v4144_v22 = vadd.f32 %v10289_v56, %v4055_v55  ;;  %v6383_v4 = vld [vmem:[#allocation2 + $0x140] sm:$0xf]  ;;  %v12642_v55 = vld [vmem:[#allocation34_spill] sm:$0xff] }
 0x453   : > { %v6384_v15 = vor.u32 %v6669_v42, %v6383_v4  ;;  %v12653_v42 = vld [vmem:[#allocation10_spill] sm:$0xff] }
 0x454   : > { %12633 = vst [vmem:[#allocation144_spill] sm:$0xff] %v10643_v57  ;;  %4604 = vmatmul.bf16.gmra.mxu2 %v10244_v49  ;;  %v4393_v21 = vadd.f32 %v10255_v32, %v4144_v22  ;;  %v4395_v32 = vadd.f32 %v10266_v52, %v4146_v13  ;;  %v12650_v13 = vld [vmem:[#allocation129_spill] sm:$0xff] }
 0x455   : > { %v5204_v0 = vpop.f32.mrf.mxu3 }
 0x456   : > { %v10648_v11 = vadd.f32 %v5293_v41, %v5204_v0  ;;  %v5298_v63 = vpop.f32.mrf.mxu0  ;;  %v4482_v62 = vadd.f32 %v10421_v19, %v4393_v21  ;;  %v12637_v19 = vld [vmem:[#allocation20_spill] sm:$0xff]  ;;  %v6672_v21 = vld [vmem:[#allocation2 + $0x160] sm:$0xf0] }
 0x457   : > { %v4565_v54 = vpop.f32.mrf.mxu2  ;;  %v5347_v37 = vpop.f32.mrf.mxu1  ;;  %v4484_v0 = vadd.f32 %v12637_v19, %v4395_v32  ;;  %v6396_v4 = vor.u32 %v6672_v21, %v6395_v7  ;;  %v6680_v7 = vld [vmem:[#allocation2 + $0x1a0] sm:$0xf0] }
 0x458   : > { %v4566_v40 = vadd.f32 %v4565_v54, %v4477_v10  ;;  %v5348_v9 = vadd.f32 %v5347_v37, %v10541_v38  ;;  %v12639_v37 = vld [vmem:[#allocation44_spill] sm:$0xff] }
 0x45a   : > { %v10654_v30 = vadd.f32 %v5346_v39, %v4566_v40  ;;  %v4062_v40 = vadd.f32 %v12639_v37, %v12638_v25  ;;  %v12659_v25 = vld [vmem:[#allocation85_spill] sm:$0xff] }
 0x45c   : > { %12634 = vst [vmem:[#allocation145_spill] sm:$0xff] %v10654_v30  ;;  %v4151_v12 = vadd.f32 %v12643_v14, %v4062_v40  ;;  %v12661_v14 = vld [vmem:[#allocation91_spill] sm:$0xff] }
 0x45d   : > { %v5207_v49 = vpop.f32.mrf.mxu3 }
 0x45e   : > { %v10658_v60 = vadd.f32 %v5296_v48, %v5207_v49  ;;  %v12644_v49 = vld [vmem:[#allocation25_spill] sm:$0xff] }
 0x45f   : > { %v4567_v50 = vpop.f32.mrf.mxu2  ;;  %v5350_v5 = vpop.f32.mrf.mxu1 }
 0x460   : > { %v4568_v38 = vadd.f32 %v4567_v50, %v4479_v29  ;;  %v5351_v20 = vadd.f32 %v5350_v5, %v10549_v2  ;;  %v12645_v50 = vld [vmem:[#allocation23_spill] sm:$0xff] }
 0x462   : > { %v10664_v28 = vadd.f32 %v5348_v9, %v4568_v38  ;;  %5389 = vmatmul.bf16.gmra.mxu1 %v6372_v35  ;;  %v12641_v9 = vld [vmem:[#allocation46_spill] sm:$0xff] }
 0x463   : > { %v4398_v48 = vadd.f32 %v12641_v9, %v4149_v24  ;;  %v12654_v24 = vld [vmem:[#allocation76_spill] sm:$0xff] }
 0x464   : > { %12635 = vst [vmem:[#allocation146_spill] sm:$0xff] %v10664_v28  ;;  %4609 = vmatmul.bf16.gmra.mxu2 %v10264_v34  ;;  %v5301_v34 = vpop.f32.mrf.mxu0  ;;  %v4067_v19 = vadd.f32 %v12654_v24, %v12653_v42  ;;  %v12672_v42 = vld [vmem:[#allocation88_spill] sm:$0xff] }
 0x465   : > { %v5209_v56 = vpop.f32.mrf.mxu3  ;;  %v4487_v8 = vadd.f32 %v12644_v49, %v4398_v48 }
 0x466   : > { %v10669_v41 = vadd.f32 %v5298_v63, %v5209_v56  ;;  %v12649_v63 = vld [vmem:[#allocation13_spill] sm:$0xff] }
 0x467   : > { %v4570_v2 = vpop.f32.mrf.mxu2  ;;  %v5352_v46 = vpop.f32.mrf.mxu1 }
 0x468   : > { %v4571_v31 = vadd.f32 %v4570_v2, %v4482_v62  ;;  %v5353_v59 = vadd.f32 %v5352_v46, %v10556_v45  ;;  %v12651_v62 = vld [vmem:[#allocation122_spill] sm:$0xff]  ;;  %v12652_v46 = vld [vmem:[#allocation87_spill] sm:$0xff] }
 0x469   : > { %v5269_v2 = vadd.f32 %v12651_v62, %v12650_v13 }
 0x46a   : > { %v10675_v47 = vadd.f32 %v5351_v20, %v4571_v31  ;;  %v12648_v20 = vld [vmem:[#allocation86_spill] sm:$0xff] }
 0x46b   : > { %v4400_v35 = vadd.f32 %v12648_v20, %v4151_v12 }
 0x46c   : > { %12636 = vst [vmem:[#allocation147_spill] sm:$0xff] %v10675_v47 }
 0x46d   : > { %v5212_v39 = vpop.f32.mrf.mxu3  ;;  %v4489_v31 = vadd.f32 %v12652_v46, %v4400_v35  ;;  %v6423_v35 = vld [vmem:[#allocation2 + $0x198] sm:$0xf]  ;;  %v12667_v46 = vld [vmem:[#allocation95_spill] sm:$0xff] }
 0x46e   : > { %v10679_v61 = vadd.f32 %v5301_v34, %v5212_v39 }
 0x46f   : > { %v4572_v1 = vpop.f32.mrf.mxu2  ;;  %v5355_v10 = vpop.f32.mrf.mxu1 }
 0x470   : > { %v4573_v45 = vadd.f32 %v4572_v1, %v4484_v0  ;;  %v5356_v54 = vadd.f32 %v5355_v10, %v10562_v44  ;;  %v12646_v44 = vld [vmem:[#allocation51_spill] sm:$0xff]  ;;  %v12656_v1 = vld [vmem:[#allocation58_spill] sm:$0xff] }
 0x471   : > { %v4065_v5 = vadd.f32 %v12646_v44, %v12645_v50  ;;  %v12664_v50 = vld [vmem:[#allocation15_spill] sm:$0xff] }
 0x472   : > { %v10685_v52 = vadd.f32 %v5353_v59, %v4573_v45  ;;  %5394 = vmatmul.bf16.gmra.mxu1 %v6384_v15  ;;  %v12657_v45 = vld [vmem:[#allocation19_spill] sm:$0xff] }
 0x473   : > { %v4154_v56 = vadd.f32 %v12649_v63, %v4065_v5  ;;  %v12665_v5 = vld [vmem:[#allocation52_spill] sm:$0xff] }
 0x474   : > { %12640 = vst [vmem:[#allocation20_spill] sm:$0xff] %v10685_v52  ;;  %4614 = vmatmul.bf16.gmra.mxu2 %v12642_v55  ;;  %v12660_v55 = vld [vmem:[#allocation65_spill] sm:$0xff] }
 0x475   : > { %v4403_v10 = vadd.f32 %v12656_v1, %v4154_v56  ;;  %v4070_v12 = vadd.f32 %v12661_v14, %v12660_v55  ;;  %v6424_v56 = vor.u32 %v6680_v7, %v6423_v35  ;;  %v6425_v1 = vld [vmem:[#allocation2 + $0x1a4] sm:$0xf0]  ;;  %v6678_v14 = vld [vmem:[#allocation2 + $0x190] sm:$0xf0]  ;;  %v12680_v35 = vld [vmem:[#allocation103_spill] sm:$0xff] }
 0x476   : > { %v6419_v55 = vld [vmem:[#allocation2 + $0x188] sm:$0xf] }
 0x477   : > { %v4575_v43 = vpop.f32.mrf.mxu2  ;;  %v5357_v22 = vpop.f32.mrf.mxu1  ;;  %v4492_v37 = vadd.f32 %v12659_v25, %v4403_v10  ;;  %v4159_v44 = vadd.f32 %v12664_v50, %v4070_v12  ;;  %5236 = vmatmul.bf16.gmra.mxu3 %v6424_v56  ;;  %v12673_v25 = vld [vmem:[#allocation30_spill] sm:$0xff]  ;;  %v12677_v12 = vld [vmem:[#allocation71_spill] sm:$0xff] }
 0x478   : > { %v4576_v29 = vadd.f32 %v4575_v43, %v4487_v8  ;;  %v5358_v32 = vadd.f32 %v5357_v22, %v5269_v2  ;;  %v12663_v8 = vld [vmem:[#allocation29_spill] sm:$0xff]  ;;  %v12666_v2 = vld [vmem:[#allocation40_spill] sm:$0xff] }
 0x479   : > { %v6407_v22 = vld [vmem:[#allocation2 + $0x170] sm:$0xf] }
 0x47a   : > { %v10693_v38 = vadd.f32 %v5356_v54, %v4576_v29  ;;  %v12658_v54 = vld [vmem:[#allocation18_spill] sm:$0xff] }
 0x47b   : > { %v4156_v15 = vadd.f32 %v12658_v54, %v4067_v19  ;;  %v6675_v29 = vld [vmem:[#allocation2 + $0x178] sm:$0xf0] }
 0x47c   : > { %12647 = vst [vmem:[#allocation42_spill] sm:$0xff] %v10693_v38  ;;  %v6408_v62 = vor.u32 %v6675_v29, %v6407_v22  ;;  %v6679_v19 = vld [vmem:[#allocation2 + $0x19c] sm:$0xf] }
 0x47d   : > { %v4405_v43 = vadd.f32 %v12663_v8, %v4156_v15 }
 0x47f   : > { %v4577_v59 = vpop.f32.mrf.mxu2  ;;  %v5360_v16 = vpop.f32.mrf.mxu1  ;;  %v4494_v20 = vadd.f32 %v12665_v5, %v4405_v43  ;;  %v12678_v43 = vld [vmem:[#allocation92_spill] sm:$0xff] }
 0x480   : > { %v4578_v34 = vadd.f32 %v4577_v59, %v4489_v31  ;;  %v5361_v39 = vadd.f32 %v5360_v16, %v10575_v33  ;;  %v4072_v31 = vadd.f32 %v12667_v46, %v12666_v2  ;;  %v12669_v16 = vld [vmem:[#allocation56_spill] sm:$0xff] }
 0x481   : > { %v12685_v2 = vld [vmem:[#allocation96_spill] sm:$0xff] }
 0x482   : > { %v10703_v0 = vadd.f32 %v5358_v32, %v4578_v34  ;;  %5399 = vmatmul.bf16.gmra.mxu1 %v6396_v4  ;;  %v4408_v32 = vadd.f32 %v12669_v16, %v4159_v44  ;;  %v12670_v34 = vld [vmem:[#allocation12_spill] sm:$0xff] }
 0x484   : > { %12655 = vst [vmem:[#allocation44_spill] sm:$0xff] %v10703_v0  ;;  %4619 = vmatmul.bf16.gmra.mxu2 %v12657_v45  ;;  %v4497_v24 = vadd.f32 %v12672_v42, %v4408_v32  ;;  %v6428_v45 = vor.u32 %v6679_v19, %v6425_v1  ;;  %v6431_v1 = vld [vmem:[#allocation2 + $0x1a0] sm:$0xf] }
 0x486   : > { %5325 = vmatmul.bf16.gmra.mxu0 %v6428_v45 }
 0x487   : > { %v4580_v40 = vpop.f32.mrf.mxu2  ;;  %v5362_v9 = vpop.f32.mrf.mxu1 }
 0x488   : > { %v4581_v48 = vadd.f32 %v4580_v40, %v4492_v37  ;;  %v5363_v33 = vadd.f32 %v5362_v9, %v10582_v53  ;;  %v12674_v37 = vld [vmem:[#allocation99_spill] sm:$0xff] }
 0x489   : > { %v4075_v40 = vadd.f32 %v12674_v37, %v12673_v25 }
 0x48a   : > { %v10712_v49 = vadd.f32 %v5361_v39, %v4581_v48  ;;  %v12671_v39 = vld [vmem:[#allocation41_spill] sm:$0xff]  ;;  %v12676_v48 = vld [vmem:[#allocation24_spill] sm:$0xff] }
 0x48b   : > { %v4161_v4 = vadd.f32 %v12671_v39, %v4072_v31  ;;  %v4164_v8 = vadd.f32 %v12677_v12, %v4075_v40  ;;  %v12687_v39 = vld [vmem:[#allocation106_spill] sm:$0xff] }
 0x48c   : > { %12662 = vst [vmem:[#allocation46_spill] sm:$0xff] %v10712_v49 }
 0x48f   : > { %v4582_v21 = vpop.f32.mrf.mxu2  ;;  %v5365_v63 = vpop.f32.mrf.mxu1 }
 0x490   : > { %v4583_v13 = vadd.f32 %v4582_v21, %v4494_v20  ;;  %v5366_v53 = vadd.f32 %v5365_v63, %v10588_v36  ;;  %v12679_v20 = vld [vmem:[#allocation48_spill] sm:$0xff]  ;;  %v12682_v63 = vld [vmem:[#allocation55_spill] sm:$0xff] }
 0x491   : > { %v4077_v7 = vadd.f32 %v12680_v35, %v12679_v20  ;;  %v4413_v56 = vadd.f32 %v12682_v63, %v4164_v8  ;;  %v12695_v8 = vld [vmem:[#allocation36_spill] sm:$0xff] }
 0x492   : > { %v10720_v59 = vadd.f32 %v5363_v33, %v4583_v13  ;;  %5404 = vmatmul.bf16.gmra.mxu1 %v6408_v62  ;;  %v4410_v33 = vadd.f32 %v12676_v48, %v4161_v4  ;;  %v12683_v13 = vld [vmem:[#allocation70_spill] sm:$0xff]  ;;  %v12700_v63 = vld [vmem:[#allocation112_spill] sm:$0xff] }
 0x493   : > { %v4502_v46 = vadd.f32 %v12685_v2, %v4413_v56  ;;  %v12702_v2 = vld [vmem:[#allocation31_spill] sm:$0xff] }
 0x494   : > { %12668 = vst [vmem:[#allocation34_spill] sm:$0xff] %v10720_v59  ;;  %4624 = vmatmul.bf16.gmra.mxu2 %v12670_v34  ;;  %v4499_v22 = vadd.f32 %v12678_v43, %v4410_v33  ;;  %v12686_v34 = vld [vmem:[#allocation43_spill] sm:$0xff] }
 0x495   : > { %v4080_v4 = vadd.f32 %v12687_v39, %v12686_v34 }
 0x497   : > { %v4585_v10 = vpop.f32.mrf.mxu2  ;;  %v5367_v36 = vpop.f32.mrf.mxu1 }
 0x498   : > { %v4586_v54 = vadd.f32 %v4585_v10, %v4497_v24  ;;  %v5368_v15 = vadd.f32 %v5367_v36, %v10595_v27  ;;  %v6420_v27 = vor.u32 %v6678_v14, %v6419_v55  ;;  %v12689_v24 = vld [vmem:[#allocation61_spill] sm:$0xff]  ;;  %v6681_v10 = vld [vmem:[#allocation2 + $0x1a8] sm:$0xf0]  ;;  %v12690_v36 = vld [vmem:[#allocation11_spill] sm:$0xff] }
 0x499   : > { %v4169_v45 = vadd.f32 %v12690_v36, %v4080_v4  ;;  %v6432_v25 = vor.u32 %v6681_v10, %v6431_v1  ;;  %v12693_v55 = vld [vmem:[#allocation109_spill] sm:$0xff]  ;;  %v12704_v4 = vld [vmem:[#allocation80_spill] sm:$0xff]  ;;  %v12706_v1 = vld [vmem:[#allocation50_spill] sm:$0xff] }
 0x49a   : > { %v10729_v9 = vadd.f32 %v5366_v53, %v4586_v54  ;;  %v12684_v53 = vld [vmem:[#allocation53_spill] sm:$0xff]  ;;  %v12691_v54 = vld [vmem:[#allocation100_spill] sm:$0xff]  ;;  %v12707_v36 = vld [vmem:[#allocation39_spill] sm:$0xff] }
 0x49b   : > { %v4166_v62 = vadd.f32 %v12684_v53, %v4077_v7  ;;  %v4418_v43 = vadd.f32 %v12695_v8, %v4169_v45  ;;  %v12701_v53 = vld [vmem:[#allocation73_spill] sm:$0xff] }
 0x49c   : > { %12675 = vst [vmem:[#allocation66_spill] sm:$0xff] %v10729_v9 }
 0x49d   : > { %v4415_v19 = vadd.f32 %v12689_v24, %v4166_v62  ;;  %v12705_v24 = vld [vmem:[#allocation114_spill] sm:$0xff] }
 0x49f   : > { %v4587_v29 = vpop.f32.mrf.mxu2  ;;  %v5370_v50 = vpop.f32.mrf.mxu1 }
 0x4a0   : > { %v4588_v44 = vadd.f32 %v4587_v29, %v4499_v22  ;;  %v5371_v5 = vadd.f32 %v5370_v50, %v10601_v26  ;;  %v12696_v22 = vld [vmem:[#allocation72_spill] sm:$0xff]  ;;  %v12697_v29 = vld [vmem:[#allocation74_spill] sm:$0xff] }
 0x4a2   : > { %v10737_v21 = vadd.f32 %v5368_v15, %v4588_v44  ;;  %5409 = vmatmul.bf16.gmra.mxu1 %v6420_v27  ;;  %v4504_v15 = vadd.f32 %v12691_v54, %v4415_v19  ;;  %v12698_v44 = vld [vmem:[#allocation104_spill] sm:$0xff]  ;;  %v4087_v19 = vadd.f32 %v12705_v24, %v12704_v4  ;;  %v12708_v54 = vld [vmem:[#allocation110_spill] sm:$0xff] }
 0x4a3   : > { %v12720_v4 = vld [vmem:[#allocation120_spill] sm:$0xff] }
 0x4a4   : > { %12681 = vst [vmem:[#allocation25_spill] sm:$0xff] %v10737_v21  ;;  %4629 = vmatmul.bf16.gmra.mxu2 %v12683_v13  ;;  %v4176_v45 = vadd.f32 %v12707_v36, %v4087_v19  ;;  %v12722_v36 = vld [vmem:[#allocation79_spill] sm:$0xff] }
 0x4a7   : > { %v4590_v31 = vpop.f32.mrf.mxu2  ;;  %v5372_v16 = vpop.f32.mrf.mxu1 }
 0x4a8   : > { %v4591_v32 = vadd.f32 %v4590_v31, %v4502_v46  ;;  %v5373_v26 = vadd.f32 %v5372_v16, %v10608_v6  ;;  %v12692_v6 = vld [vmem:[#allocation26_spill] sm:$0xff]  ;;  %v12703_v31 = vld [vmem:[#allocation107_spill] sm:$0xff] }
 0x4a9   : > { %v4082_v14 = vadd.f32 %v12693_v55, %v12692_v6  ;;  %v12710_v6 = vld [vmem:[#allocation116_spill] sm:$0xff] }
 0x4aa   : > { %v10746_v42 = vadd.f32 %v5371_v5, %v4591_v32  ;;  %v4507_v5 = vadd.f32 %v12698_v44, %v4418_v43  ;;  %v12712_v43 = vld [vmem:[#allocation14_spill] sm:$0xff] }
 0x4ab   : > { %v4171_v50 = vadd.f32 %v12697_v29, %v4082_v14  ;;  %v12711_v14 = vld [vmem:[#allocation75_spill] sm:$0xff]  ;;  %v12713_v29 = vld [vmem:[#allocation113_spill] sm:$0xff] }
 0x4ac   : > { %12688 = vst [vmem:[#allocation23_spill] sm:$0xff] %v10746_v42  ;;  %v4425_v8 = vadd.f32 %v12711_v14, %v4176_v45 }
 0x4ad   : > { %v4420_v62 = vadd.f32 %v12701_v53, %v4171_v50  ;;  %v12717_v53 = vld [vmem:[#allocation47_spill] sm:$0xff] }
 0x4ae   : > { %v4514_v50 = vadd.f32 %v12713_v29, %v4425_v8  ;;  %v12725_v8 = vld [vmem:[#allocation119_spill] sm:$0xff] }
 0x4af   : > { %v4592_v37 = vpop.f32.mrf.mxu2  ;;  %v5375_v40 = vpop.f32.mrf.mxu1  ;;  %v4509_v16 = vadd.f32 %v12703_v31, %v4420_v62 }
 0x4b0   : > { %v4593_v48 = vadd.f32 %v4592_v37, %v4504_v15  ;;  %v5376_v33 = vadd.f32 %v5375_v40, %v10617_v58  ;;  %v12699_v58 = vld [vmem:[#allocation45_spill] sm:$0xff] }
 0x4b1   : > { %v4085_v56 = vadd.f32 %v12700_v63, %v12699_v58  ;;  %v12716_v63 = vld [vmem:[#allocation64_spill] sm:$0xff] }
 0x4b2   : > { %v10754_v12 = vadd.f32 %v5373_v26, %v4593_v48  ;;  %5414 = vmatmul.bf16.gmra.mxu1 %v6432_v25 }
 0x4b3   : > { %v4174_v46 = vadd.f32 %v12702_v2, %v4085_v56  ;;  %v12718_v2 = vld [vmem:[#allocation115_spill] sm:$0xff] }
 0x4b4   : > { %12694 = vst [vmem:[#allocation51_spill] sm:$0xff] %v10754_v12  ;;  %4634 = vmatmul.bf16.gmra.mxu2 %v12696_v22 }
 0x4b5   : > { %v4423_v10 = vadd.f32 %v12706_v1, %v4174_v46  ;;  %v12721_v1 = vld [vmem:[#allocation78_spill] sm:$0xff] }
 0x4b7   : > { %v4595_v27 = vpop.f32.mrf.mxu2  ;;  %v5377_v20 = vpop.f32.mrf.mxu1  ;;  %v4512_v15 = vadd.f32 %v12708_v54, %v4423_v10  ;;  %v12723_v54 = vld [vmem:[#allocation117_spill] sm:$0xff] }
 0x4b8   : > { %v4596_v35 = vadd.f32 %v4595_v27, %v4507_v5  ;;  %v5378_v7 = vadd.f32 %v5377_v20, %v10627_v23 }
 0x4ba   : > { %v10763_v13 = vadd.f32 %v5376_v33, %v4596_v35  ;;  %v12709_v33 = vld [vmem:[#allocation69_spill] sm:$0xff]  ;;  %v12714_v35 = vld [vmem:[#allocation62_spill] sm:$0xff] }
 0x4bb   : > { %v4090_v55 = vadd.f32 %v12710_v6, %v12709_v33 }
 0x4bd   : > { %v4179_v22 = vadd.f32 %v12712_v43, %v4090_v55  ;;  %v12724_v55 = vld [vmem:[#allocation22_spill] sm:$0xff] }
 0x4bf   : > { %v4597_v32 = vpop.f32.mrf.mxu2  ;;  %v5380_v26 = vpop.f32.mrf.mxu1  ;;  %v4428_v56 = vadd.f32 %v12716_v63, %v4179_v22 }
 0x4c0   : > { %v4598_v34 = vadd.f32 %v4597_v32, %v4509_v16  ;;  %v5381_v39 = vadd.f32 %v5380_v26, %v10637_v18  ;;  %v10792_v32 = vpop.f32.mrf.mxu0  ;;  %v10794_v26 = vpop.f32.mrf.mxu3 }
 0x4c1   : > { %v4517_v46 = vadd.f32 %v12718_v2, %v4428_v56 }
 0x4c2   : > { %v10771_v23 = vadd.f32 %v5378_v7, %v4598_v34  ;;  %v12715_v7 = vld [vmem:[#allocation118_spill] sm:$0xff] }
 0x4c3   : > { %v4092_v58 = vadd.f32 %v12715_v7, %v12714_v35 }
 0x4c5   : > { %v4181_v62 = vadd.f32 %v12717_v53, %v4092_v58 }
 0x4c7   : > { %v4600_v25 = vpop.f32.mrf.mxu2  ;;  %v5382_v37 = vpop.f32.mrf.mxu1  ;;  %v4430_v10 = vadd.f32 %v12721_v1, %v4181_v62 }
 0x4c8   : > { %v4601_v40 = vadd.f32 %v4600_v25, %v4512_v15  ;;  %v5383_v48 = vadd.f32 %v5382_v37, %v10648_v11  ;;  %v10805_v33 = vpop.f32.mrf.mxu0  ;;  %v10807_v6 = vpop.f32.mrf.mxu3 }
 0x4c9   : > { %v4519_v15 = vadd.f32 %v12723_v54, %v4430_v10 }
 0x4ca   : > { %v10779_v18 = vadd.f32 %v5381_v39, %v4601_v40  ;;  %v12719_v39 = vld [vmem:[#allocation37_spill] sm:$0xff] }
 0x4cb   : > { %v4095_v24 = vadd.f32 %v12720_v4, %v12719_v39 }
 0x4cd   : > { %v4184_v45 = vadd.f32 %v12722_v36, %v4095_v24  ;;  %v5493_v24 = vmul.f32 %v10664_v28, %v10664_v28  ;;  %v5494_v36 = vmul.f32 %v10675_v47, %v10675_v47 }
 0x4cf   : > { %v4602_v44 = vpop.f32.mrf.mxu2  ;;  %v5385_v5 = vpop.f32.mrf.mxu1  ;;  %v4433_v14 = vadd.f32 %v12724_v55, %v4184_v45  ;;  %v5496_v55 = vmul.f32 %v10693_v38, %v10693_v38 }
 0x4d0   : > { %v4603_v27 = vadd.f32 %v4602_v44, %v4514_v50  ;;  %v5386_v20 = vadd.f32 %v5385_v5, %v10658_v60  ;;  %v10817_v5 = vpop.f32.mrf.mxu0 }
 0x4d1   : > { %v4522_v43 = vadd.f32 %v12725_v8, %v4433_v14 }
 0x4d2   : > { %v10787_v11 = vadd.f32 %v5383_v48, %v4603_v27  ;;  %v10819_v27 = vpop.f32.mrf.mxu3 }
 0x4d7   : > { %v4605_v31 = vpop.f32.mrf.mxu2  ;;  %v5387_v16 = vpop.f32.mrf.mxu1 }
 0x4d8   : > { %v4606_v34 = vadd.f32 %v4605_v31, %v4517_v46  ;;  %v5388_v60 = vadd.f32 %v5387_v16, %v10669_v41  ;;  %v10825_v35 = vpop.f32.mrf.mxu0  ;;  %v5491_v46 = vmul.f32 %v10643_v57, %v10643_v57  ;;  %v5490_v31 = vmul.f32 %v10633_v51, %v10633_v51 }
 0x4d9   : > { %v5492_v16 = vmul.f32 %v10654_v30, %v10654_v30 }
 0x4da   : > { %v10799_v19 = vadd.f32 %v5386_v20, %v4606_v34  ;;  %v10827_v7 = vpop.f32.mrf.mxu3  ;;  %v5452_v34 = vadd.f32 %v10643_v57, %v10633_v51  ;;  %v5522_v4 = vadd.f32 %v5491_v46, %v5490_v31  ;;  %v12739_v51 = vld [vmem:[#allocation28_spill] sm:$0xff] }
 0x4dc   : > { %v5453_v1 = vadd.f32 %v5452_v34, %v10654_v30  ;;  %v5523_v10 = vadd.f32 %v5522_v4, %v5492_v16  ;;  %v5498_v16 = vmul.f32 %v10712_v49, %v10712_v49 }
 0x4df   : > { %v4607_v25 = vpop.f32.mrf.mxu2  ;;  %v5390_v37 = vpop.f32.mrf.mxu1 }
 0x4e0   : > { %v4608_v40 = vadd.f32 %v4607_v25, %v4519_v15  ;;  %v5391_v48 = vadd.f32 %v5390_v37, %v10679_v61  ;;  %v10837_v62 = vpop.f32.mrf.mxu0  ;;  %v5454_v15 = vadd.f32 %v5453_v1, %v10664_v28  ;;  %v5524_v25 = vadd.f32 %v5523_v10, %v5493_v24 }
 0x4e1   : > { %v5495_v37 = vmul.f32 %v10685_v52, %v10685_v52  ;;  %v5499_v1 = vmul.f32 %v10720_v59, %v10720_v59 }
 0x4e2   : > { %v10809_v41 = vadd.f32 %v5388_v60, %v4608_v40  ;;  %v10839_v2 = vpop.f32.mrf.mxu3  ;;  %v5455_v40 = vadd.f32 %v5454_v15, %v10675_v47  ;;  %v12726_v15 = vld [vmem:[#allocation63_spill] sm:$0xff]  ;;  %v12736_v47 = vld [vmem:[#allocation130_spill] sm:$0xff] }
 0x4e4   : > { %v5456_v14 = vadd.f32 %v5455_v40, %v10685_v52 }
 0x4e6   : > { %v5457_v46 = vadd.f32 %v5456_v14, %v10693_v38  ;;  %v12729_v14 = vld [vmem:[#allocation125_spill] sm:$0xff]  ;;  %v12732_v38 = vld [vmem:[#allocation127_spill] sm:$0xff] }
 0x4e7   : > { %v4610_v22 = vpop.f32.mrf.mxu2  ;;  %v10813_v29 = vpop.f32.mrf.mxu1 }
 0x4e8   : > { %v4611_v50 = vadd.f32 %v4610_v22, %v4522_v43  ;;  %v10858_v45 = vpop.f32.mrf.mxu0  ;;  %v5458_v34 = vadd.f32 %v5457_v46, %v10703_v0 }
 0x4ea   : > { %v10815_v44 = vadd.f32 %v5391_v48, %v4611_v50  ;;  %v10860_v54 = vpop.f32.mrf.mxu3  ;;  %v5525_v48 = vadd.f32 %v5524_v25, %v5494_v36  ;;  %v5497_v50 = vmul.f32 %v10703_v0, %v10703_v0  ;;  %v5459_v36 = vadd.f32 %v5458_v34, %v10712_v49  ;;  %v12727_v25 = vld [vmem:[#allocation123_spill] sm:$0xff]  ;;  %v12731_v49 = vld [vmem:[#allocation21_spill] sm:$0xff] }
 0x4eb   : > { %v5501_v34 = vmul.f32 %v10737_v21, %v10737_v21 }
 0x4ec   : > { %v5526_v22 = vadd.f32 %v5525_v48, %v5495_v37  ;;  %v4097_v37 = vadd.f32 %v12727_v25, %v12726_v15  ;;  %v5500_v48 = vmul.f32 %v10729_v9, %v10729_v9  ;;  %v4102_v15 = vadd.f32 %v12732_v38, %v12731_v49  ;;  %v12740_v38 = vld [vmem:[#allocation134_spill] sm:$0xff] }
 0x4ed   : > { %v4110_v49 = vadd.f32 %v12740_v38, %v12739_v51 }
 0x4ee   : > { %v5527_v31 = vadd.f32 %v5526_v22, %v5496_v55  ;;  %v12728_v55 = vld [vmem:[#allocation49_spill] sm:$0xff] }
 0x4ef   : > { %v10821_v61 = vpop.f32.mrf.mxu2  ;;  %v10823_v20 = vpop.f32.mrf.mxu1  ;;  %v4100_v22 = vadd.f32 %v12729_v14, %v12728_v55  ;;  %v5502_v55 = vmul.f32 %v10746_v42, %v10746_v42 }
 0x4f0   : > { %v5528_v4 = vadd.f32 %v5527_v31, %v5497_v50  ;;  %v10879_v24 = vpop.f32.mrf.mxu0  ;;  %v5460_v50 = vadd.f32 %v5459_v36, %v10720_v59  ;;  %v12734_v36 = vld [vmem:[#allocation81_spill] sm:$0xff]  ;;  %v12735_v59 = vld [vmem:[#allocation16_spill] sm:$0xff] }
 0x4f1   : > { %v4189_v14 = vadd.f32 %v12734_v36, %v4100_v22  ;;  %v4105_v28 = vadd.f32 %v12736_v47, %v12735_v59  ;;  %v12744_v36 = vld [vmem:[#allocation77_spill] sm:$0xff]  ;;  %v12745_v59 = vld [vmem:[#allocation83_spill] sm:$0xff] }
 0x4f2   : > { %v10883_v10 = vpop.f32.mrf.mxu3  ;;  %v5529_v40 = vadd.f32 %v5528_v4, %v5498_v16  ;;  %v5461_v16 = vadd.f32 %v5460_v50, %v10729_v9  ;;  %v12733_v4 = vld [vmem:[#allocation67_spill] sm:$0xff]  ;;  %v12741_v50 = vld [vmem:[#allocation82_spill] sm:$0xff]  ;;  %v12742_v9 = vld [vmem:[#allocation136_spill] sm:$0xff]  ;;  %v4115_v47 = vadd.f32 %v10597_v3, %v12744_v36 }
 0x4f3   : > { %v4186_v25 = vadd.f32 %v12733_v4, %v4097_v37  ;;  %v4112_v37 = vadd.f32 %v12742_v9, %v12741_v50  ;;  %v12743_v4 = vld [vmem:[#allocation38_spill] sm:$0xff] }
 0x4f4   : > { %v5530_v0 = vadd.f32 %v5529_v40, %v5499_v1  ;;  %v12737_v1 = vld [vmem:[#allocation27_spill] sm:$0xff]  ;;  %v12738_v40 = vld [vmem:[#allocation132_spill] sm:$0xff]  ;;  %v5462_v57 = vadd.f32 %v5461_v16, %v10737_v21  ;;  %v4191_v22 = vadd.f32 %v12743_v4, %v4102_v15  ;;  %v12751_v4 = vld [vmem:[#allocation54_spill] sm:$0xff] }
 0x4f5   : > { %v4107_v30 = vadd.f32 %v12738_v40, %v12737_v1  ;;  %v12747_v40 = vld [vmem:[#allocation59_spill] sm:$0xff]  ;;  %v12750_v15 = vld [vmem:[#allocation68_spill] sm:$0xff]  ;;  %v4194_v3 = vadd.f32 %v12751_v4, %v4105_v28  ;;  %v12752_v36 = vld [vmem:[#allocation90_spill] sm:$0xff] }
 0x4f6   : > { %v5531_v52 = vadd.f32 %v5530_v0, %v5500_v48  ;;  %v5503_v48 = vmul.f32 %v10754_v12, %v10754_v12  ;;  %v5463_v16 = vadd.f32 %v5462_v57, %v10746_v42  ;;  %v4120_v51 = vadd.f32 %v10610_v17, %v12747_v40  ;;  %v12753_v57 = vld [vmem:[#allocation33_spill] sm:$0xff]  ;;  %v12756_v40 = vld [vmem:[#allocation98_spill] sm:$0xff] }
 0x4f7   : > { %v10829_v58 = vpop.f32.mrf.mxu2  ;;  %v10831_v63 = vpop.f32.mrf.mxu1  ;;  %v4435_v50 = vadd.f32 %v12750_v15, %v4186_v25  ;;  %v4196_v21 = vadd.f32 %v12752_v36, %v4107_v30  ;;  %v5505_v25 = vmul.f32 %v10771_v23, %v10771_v23  ;;  %v12757_v15 = vld [vmem:[#allocation102_spill] sm:$0xff]  ;;  %v12758_v4 = vld [vmem:[#allocation105_spill] sm:$0xff] }
 0x4f8   : > { %v5532_v0 = vadd.f32 %v5531_v52, %v5501_v34  ;;  %v10925_v38 = vpop.f32.mrf.mxu0  ;;  %v5504_v34 = vmul.f32 %v10763_v13, %v10763_v13  ;;  %v4204_v28 = vadd.f32 %v12757_v15, %v4115_v47 }
 0x4f9   : > { %12748 = vst [vmem:[#allocation13_spill] sm:$0xff] %v10925_v38  ;;  %v4201_v38 = vadd.f32 %v12756_v40, %v4112_v37  ;;  %v12761_v37 = vld [vmem:[#allocation121_spill] sm:$0xff] }
 0x4fa   : > { %v5533_v9 = vadd.f32 %v5532_v0, %v5502_v55  ;;  %v10927_v52 = vpop.f32.mrf.mxu3  ;;  %v12755_v55 = vld [vmem:[#allocation94_spill] sm:$0xff] }
 0x4fb   : > { %12749 = vst [vmem:[#allocation129_spill] sm:$0xff] %v10927_v52  ;;  %v4199_v0 = vadd.f32 %v12755_v55, %v4110_v49  ;;  %v5506_v49 = vmul.f32 %v10779_v18, %v10779_v18  ;;  %v12763_v55 = vld [vmem:[#allocation142_spill] sm:$0xff] }
 0x4fc   : > { %v5534_v52 = vadd.f32 %v5533_v9, %v5503_v48  ;;  %v4524_v48 = vadd.f32 %v12761_v37, %v4435_v50  ;;  %v12762_v9 = vld [vmem:[#allocation84_spill] sm:$0xff]  ;;  %v5307_v50 = vadd.f32 %v10805_v33, %v10807_v6  ;;  %v12767_v37 = vld [vmem:[#allocation35_spill] sm:$0xff] }
 0x4fd   : > { %v10958_v40 = vadd.f32 %v12763_v55, %v12762_v9  ;;  %v12770_v6 = vld [vmem:[#allocation32_spill] sm:$0xff] }
 0x4fe   : > { %v4450_v55 = vadd.f32 %v12770_v6, %v4201_v38  ;;  %v12772_v38 = vld [vmem:[#allocation89_spill] sm:$0xff] }
 0x4ff   : > { %v10833_v56 = vpop.f32.mrf.mxu2  ;;  %v10835_v53 = vpop.f32.mrf.mxu1 }
 0x507   : > { %v10849_v60 = vpop.f32.mrf.mxu2  ;;  %v10851_v39 = vpop.f32.mrf.mxu1 }
 0x50f   : > { %v10869_v8 = vpop.f32.mrf.mxu2  ;;  %v10871_v43 = vpop.f32.mrf.mxu1 }
 0x517   : > { %v10893_v46 = vpop.f32.mrf.mxu2  ;;  %v10895_v31 = vpop.f32.mrf.mxu1 }
 0x518   : > { %12730 = vst [vmem:[#allocation86_spill] sm:$0xff] %v10895_v31  ;;  %v12746_v31 = vld [vmem:[#allocation139_spill] sm:$0xff] }
 0x519   : > { %v4117_v1 = vadd.f32 %v12746_v31, %v12745_v59  ;;  %v5464_v31 = vadd.f32 %v5463_v16, %v10754_v12  ;;  %v4438_v59 = vadd.f32 %v12753_v57, %v4189_v14  ;;  %v12759_v14 = vld [vmem:[#allocation17_spill] sm:$0xff]  ;;  %v12760_v57 = vld [vmem:[#allocation108_spill] sm:$0xff] }
 0x51a   : > { %v4440_v36 = vadd.f32 %v12759_v14, %v4191_v22  ;;  %v10951_v12 = vadd.f32 %v12760_v57, %v4120_v51  ;;  %v5304_v22 = vadd.f32 %v10792_v32, %v10794_v26  ;;  %v12766_v57 = vld [vmem:[#allocation126_spill] sm:$0xff] }
 0x51b   : > { %v10946_v30 = vadd.f32 %v12758_v4, %v4117_v1  ;;  %v5465_v16 = vadd.f32 %v5464_v31, %v10763_v13  ;;  %v12764_v1 = vld [vmem:[#allocation124_spill] sm:$0xff]  ;;  %v12765_v31 = vld [vmem:[#allocation9_spill] sm:$0xff] }
 0x51c   : > { %v4527_v15 = vadd.f32 %v12764_v1, %v4438_v59  ;;  %v4443_v4 = vadd.f32 %v12765_v31, %v4194_v3  ;;  %v4445_v59 = vadd.f32 %v12767_v37, %v4196_v21  ;;  %v5508_v3 = vmul.f32 %v10799_v19, %v10799_v19 }
 0x51d   : > { %v5466_v47 = vadd.f32 %v5465_v16, %v10771_v23  ;;  %v4529_v16 = vadd.f32 %v12766_v57, %v4440_v36  ;;  %v5393_v32 = vadd.f32 %v10813_v29, %v5304_v22  ;;  %v10981_v36 = vpop.f32.mrf.mxu0  ;;  %v5396_v29 = vadd.f32 %v10823_v20, %v5307_v50 }
 0x51e   : > { %v4616_v26 = vadd.f32 %v10829_v58, %v4527_v15  ;;  %v5309_v58 = vadd.f32 %v10817_v5, %v10819_v27  ;;  %v5234_v15 = vpop.f32.mrf.mxu3  ;;  %v4453_v22 = vadd.f32 %v12772_v38, %v4204_v28  ;;  %v5312_v20 = vadd.f32 %v10825_v35, %v10827_v7 }
 0x51f   : > { %v10936_v42 = vpop.f32.mrf.mxu2  ;;  %v10938_v17 = vpop.f32.mrf.mxu1  ;;  %v5467_v14 = vadd.f32 %v5466_v47, %v10779_v18  ;;  %v4618_v31 = vadd.f32 %v10833_v56, %v4529_v16  ;;  %v12773_v56 = vld [vmem:[#allocation133_spill] sm:$0xff] }
 0x520   : > { %12754 = vst [vmem:[#allocation122_spill] sm:$0xff] %v10938_v17  ;;  %v5535_v17 = vadd.f32 %v5534_v52, %v5504_v34  ;;  %v5507_v52 = vmul.f32 %v10787_v11, %v10787_v11  ;;  %v4613_v34 = vadd.f32 %v10821_v61, %v4524_v48  ;;  %v12768_v61 = vld [vmem:[#allocation128_spill] sm:$0xff]  ;;  %v12769_v48 = vld [vmem:[#allocation57_spill] sm:$0xff]  ;;  %v10996_v57 = vadd.f32 %v5396_v29, %v4616_v26 }
 0x521   : > { %v4448_v33 = vadd.f32 %v12769_v48, %v4199_v0  ;;  %v12771_v0 = vld [vmem:[#allocation131_spill] sm:$0xff]  ;;  %v5398_v5 = vadd.f32 %v10831_v63, %v5309_v58  ;;  %v5401_v35 = vadd.f32 %v10835_v53, %v5312_v20  ;;  %v12777_v58 = vld [vmem:[#allocation129_spill] sm:$0xff] }
 0x522   : > { %v5536_v51 = vadd.f32 %v5535_v17, %v5505_v25  ;;  %v5468_v17 = vadd.f32 %v5467_v14, %v10787_v11  ;;  %v4532_v25 = vadd.f32 %v12768_v61, %v4443_v4  ;;  %v10985_v1 = vadd.f32 %v5393_v32, %v4613_v34 }
 0x523   : > { %v4534_v4 = vadd.f32 %v12771_v0, %v4445_v59  ;;  %v5510_v34 = vmul.f32 %v10815_v44, %v10815_v44  ;;  %v4537_v50 = vadd.f32 %v12773_v56, %v4448_v33  ;;  %v12774_v59 = vld [vmem:[#allocation135_spill] sm:$0xff]  ;;  %v11009_v32 = vadd.f32 %v5398_v5, %v4618_v31  ;;  %v12778_v31 = vld [vmem:[#allocation13_spill] sm:$0xff]  ;;  %v12782_v56 = vld [vmem:[#allocation138_spill] sm:$0xff] }
 0x524   : > { %v5537_v9 = vadd.f32 %v5536_v51, %v5506_v49  ;;  %v5509_v49 = vmul.f32 %v10809_v41, %v10809_v41  ;;  %v4621_v27 = vadd.f32 %v10849_v60, %v4532_v25  ;;  %v5511_v37 = vmul.f32 %v10985_v1, %v10985_v1 }
 0x525   : > { %v4623_v7 = vadd.f32 %v10869_v8, %v4534_v4  ;;  %v5512_v26 = vmul.f32 %v10996_v57, %v10996_v57  ;;  %v5317_v25 = vadd.f32 %v10858_v45, %v10860_v54  ;;  %v5319_v8 = vadd.f32 %v10879_v24, %v10883_v10  ;;  %v5326_v29 = vpop.f32.mrf.mxu0  ;;  %v12779_v4 = vld [vmem:[#allocation97_spill] sm:$0xff] }
 0x526   : > { %v5538_v21 = vadd.f32 %v5537_v9, %v5507_v52  ;;  %v5469_v52 = vadd.f32 %v5468_v17, %v10799_v19  ;;  %v4539_v9 = vadd.f32 %v12774_v59, %v4450_v55  ;;  %v12775_v17 = vld [vmem:[#allocation137_spill] sm:$0xff]  ;;  %v11019_v48 = vadd.f32 %v5401_v35, %v4621_v27  ;;  %v12784_v35 = vld [vmem:[#allocation140_spill] sm:$0xff] }
 0x527   : > { %v4630_v47 = vpop.f32.mrf.mxu2  ;;  %v5412_v51 = vpop.f32.mrf.mxu1  ;;  %v4542_v61 = vadd.f32 %v12775_v17, %v4453_v22  ;;  %v12776_v55 = vld [vmem:[#allocation93_spill] sm:$0xff]  ;;  %v5406_v54 = vadd.f32 %v10871_v43, %v5317_v25  ;;  %v5322_v24 = vadd.f32 %v12778_v31, %v12777_v58 }
 0x528   : > { %v5539_v14 = vadd.f32 %v5538_v21, %v5508_v3  ;;  %v5470_v28 = vadd.f32 %v5469_v52, %v10809_v41  ;;  %v5314_v3 = vadd.f32 %v10837_v62, %v10839_v2  ;;  %v4626_v2 = vadd.f32 %v10893_v46, %v4537_v50  ;;  %v5237_v46 = vpop.f32.mrf.mxu3  ;;  %v12780_v52 = vld [vmem:[#allocation86_spill] sm:$0xff] }
 0x529   : > { %v4455_v21 = vadd.f32 %v12776_v55, %v10946_v30  ;;  %v4458_v30 = vadd.f32 %v12779_v4, %v10951_v12  ;;  %v5514_v38 = vmul.f32 %v11019_v48, %v11019_v48  ;;  %v5408_v43 = vadd.f32 %v12780_v52, %v5319_v8  ;;  %v12785_v8 = vld [vmem:[#allocation101_spill] sm:$0xff] }
 0x52a   : > { %v5540_v16 = vadd.f32 %v5539_v14, %v5509_v49  ;;  %v5471_v63 = vadd.f32 %v5470_v28, %v10815_v44  ;;  %v5403_v62 = vadd.f32 %v10851_v39, %v5314_v3  ;;  %v5513_v49 = vmul.f32 %v11009_v32, %v11009_v32 }
 0x52b   : > { %v4628_v39 = vadd.f32 %v10936_v42, %v4539_v9  ;;  %v11041_v22 = vadd.f32 %v5406_v54, %v4626_v2  ;;  %v4631_v14 = vadd.f32 %v4630_v47, %v4542_v61  ;;  %v5327_v27 = vadd.f32 %v5326_v29, %v5237_v46 }
 0x52c   : > { %v5541_v60 = vadd.f32 %v5540_v16, %v5510_v34  ;;  %v5472_v33 = vadd.f32 %v5471_v63, %v10985_v1  ;;  %v11030_v45 = vadd.f32 %v5403_v62, %v4623_v7  ;;  %v12781_v34 = vld [vmem:[#allocation111_spill] sm:$0xff]  ;;  %v4544_v50 = vadd.f32 %v12782_v56, %v4455_v21 }
 0x52d   : > { %v4211_v20 = vadd.f32 %v12781_v34, %v10958_v40  ;;  %v11050_v16 = vadd.f32 %v5408_v43, %v4628_v39  ;;  %v5324_v9 = vadd.f32 %v10981_v36, %v5234_v15  ;;  %v4547_v40 = vadd.f32 %v12784_v35, %v4458_v30 }
 0x52e   : > { %v5542_v6 = vadd.f32 %v5541_v60, %v5511_v37  ;;  %v5473_v10 = vadd.f32 %v5472_v33, %v10996_v57  ;;  %v5515_v12 = vmul.f32 %v11030_v45, %v11030_v45  ;;  %v12783_v37 = vld [vmem:[#allocation122_spill] sm:$0xff]  ;;  %v5516_v63 = vmul.f32 %v11041_v22, %v11041_v22 }
 0x52f   : > { %v4632_v53 = vpop.f32.mrf.mxu2  ;;  %v5415_v42 = vpop.f32.mrf.mxu1  ;;  %v5411_v59 = vadd.f32 %v12783_v37, %v5322_v24  ;;  %v5413_v61 = vadd.f32 %v5412_v51, %v5324_v9  ;;  %v5517_v36 = vmul.f32 %v11050_v16, %v11050_v16  ;;  %v4460_v33 = vadd.f32 %v12785_v8, %v4211_v20  ;;  %v12786_v24 = vld [vmem:[#allocation141_spill] sm:$0xff] }
 0x530   : > { %v5543_v0 = vadd.f32 %v5542_v6, %v5512_v26  ;;  %v5474_v5 = vadd.f32 %v5473_v10, %v11009_v32  ;;  %v4633_v3 = vadd.f32 %v4632_v53, %v4544_v50  ;;  %v5416_v25 = vadd.f32 %v5415_v42, %v5327_v27  ;;  %v5239_v21 = vpop.f32.mrf.mxu3 }
 0x531   : > { %v11058_v60 = vadd.f32 %v5411_v59, %v4631_v14  ;;  %v4549_v10 = vadd.f32 %v12786_v24, %v4460_v33 }
 0x532   : > { %v5544_v28 = vadd.f32 %v5543_v0, %v5513_v49  ;;  %v5475_v47 = vadd.f32 %v5474_v5, %v11019_v48  ;;  %v11064_v53 = vadd.f32 %v5413_v61, %v4633_v3  ;;  %v5328_v49 = vpop.f32.mrf.mxu0 }
 0x533   : > { %v5518_v55 = vmul.f32 %v11058_v60, %v11058_v60  ;;  %v5329_v31 = vadd.f32 %v5328_v49, %v5239_v21  ;;  %v5574_v49 = vld [vmem:[%s11208_s5] sm:$0x1] }
 0x534   : > { %v5545_v7 = vadd.f32 %v5544_v28, %v5514_v38  ;;  %v5476_v17 = vadd.f32 %v5475_v47, %v11030_v45  ;;  %v5519_v58 = vmul.f32 %v11064_v53, %v11064_v53 }
 0x536   : > { %v5546_v2 = vadd.f32 %v5545_v7, %v5515_v12  ;;  %v5477_v15 = vadd.f32 %v5476_v17, %v11041_v22 }
 0x537   : > { %v4635_v26 = vpop.f32.mrf.mxu2  ;;  %v5417_v46 = vpop.f32.mrf.mxu1 }
 0x538   : > { %v4636_v62 = vadd.f32 %v4635_v26, %v4547_v40  ;;  %v5547_v6 = vadd.f32 %v5546_v2, %v5516_v63  ;;  %v5478_v51 = vadd.f32 %v5477_v15, %v11050_v16  ;;  %v5418_v52 = vadd.f32 %v5417_v46, %v5329_v31  ;;  %v12787_v63 = vld [vmem:[#allocation60_spill] sm:$0xff]  ;;  %v5576_v46 = vld [vmem:[%s11209_s6] sm:$0x1] }
 0x53a   : > { %v11070_v54 = vadd.f32 %v5416_v25, %v4636_v62  ;;  %v5548_v39 = vadd.f32 %v5547_v6, %v5517_v36  ;;  %v5479_v29 = vadd.f32 %v5478_v51, %v11058_v60 }
 0x53c   : > { %v5549_v0 = vadd.f32 %v5548_v39, %v5518_v55  ;;  %v5480_v30 = vadd.f32 %v5479_v29, %v11064_v53  ;;  %v5520_v38 = vmul.f32 %v11070_v54, %v11070_v54 }
 0x53e   : > { %v5550_v14 = vadd.f32 %v5549_v0, %v5519_v58  ;;  %v5481_v42 = vadd.f32 %v5480_v30, %v11070_v54 }
 0x53f   : > { %v4637_v4 = vpop.f32.mrf.mxu2 }
 0x540   : > { %v4638_v43 = vadd.f32 %v4637_v4, %v4549_v10  ;;  %v5551_v20 = vadd.f32 %v5550_v14, %v5520_v38  ;;  %v12788_v10 = vld [vmem:[#allocation143_spill] sm:$0xff]  ;;  %v12789_v4 = vld [vmem:[#allocation144_spill] sm:$0xff]  ;;  %v12790_v38 = vld [vmem:[#allocation145_spill] sm:$0xff] }
 0x542   : > { %v5451_v34 = vadd.f32 %v5418_v52, %v4638_v43  ;;  %v12791_v43 = vld [vmem:[#allocation146_spill] sm:$0xff] }
 0x544   : > { %v5482_v5 = vadd.f32 %v5481_v42, %v5451_v34  ;;  %v5521_v27 = vmul.f32 %v5451_v34, %v5451_v34  ;;  %v12792_v42 = vld [vmem:[#allocation147_spill] sm:$0xff] }
 0x546   : > { %v5483_v56 = vrot.slane %v5482_v5, 4  ;;  %v5552_v50 = vadd.f32 %v5551_v20, %v5521_v27 }
 0x548   : > { %v5484_v28 = vadd.f32 %v5483_v56, %v5482_v5  ;;  %v5553_v12 = vrot.slane %v5552_v50, 4  ;;  %v12793_v5 = vld [vmem:[#allocation20_spill] sm:$0xff] }
 0x54a   : > { %v5485_v37 = vrot.slane %v5484_v28, 2  ;;  %v5554_v59 = vadd.f32 %v5553_v12, %v5552_v50  ;;  %v12794_v50 = vld [vmem:[#allocation42_spill] sm:$0xff]  ;;  %v12795_v12 = vld [vmem:[#allocation44_spill] sm:$0xff] }
 0x54c   : > { %v5486_v9 = vadd.f32 %v5485_v37, %v5484_v28  ;;  %v5555_v47 = vrot.slane %v5554_v59, 2 }
 0x54e   : > { %v5487_v3 = vrot.slane %v5486_v9, 1  ;;  %v5556_v35 = vadd.f32 %v5555_v47, %v5554_v59  ;;  %v12796_v59 = vld [vmem:[#allocation46_spill] sm:$0xff] }
 0x550   : > { %v5488_v40 = vadd.f32 %v5487_v3, %v5486_v9  ;;  %v5557_v7 = vrot.slane %v5556_v35, 1  ;;  %v12798_v3 = vld [vmem:[#allocation66_spill] sm:$0xff] }
 0x552   : > { %v5489_v26 = vmul.f32 %v5488_v40, %v12787_v63  ;;  %v5558_v17 = vadd.f32 %v5557_v7, %v5556_v35  ;;  %v12799_v40 = vld [vmem:[#allocation25_spill] sm:$0xff] }
 0x554   : > { %v5559_v61 = vmul.f32 %v5558_v17, %v12787_v63  ;;  %v5560_v25 = vmul.f32 %v5489_v26, %v5489_v26  ;;  %v12800_v63 = vld [vmem:[#allocation23_spill] sm:$0xff] }
 0x556   : > { %v5561_v62 = vsub.f32 %v5559_v61, %v5560_v25  ;;  %v12801_v61 = vld [vmem:[#allocation51_spill] sm:$0xff] }
 0x558   : > { %v5562_v2 = vmax.f32 %v5561_v62, 0.0 }
 0x55a   : > { %v5563_v36 = vadd.f32 1e-05, %v5562_v2 }
 0x55c   : > { %6778 = vrsqrt.f32 %v5563_v36  ;;  %vm5570_vm13 = vweird.f32 %v5563_v36 }
 0x562   : > { %v6779_v15 = vpop.eup %6778 }
 0x563   : > { %v5565_v8 = vmul.f32 %v6779_v15, %v5563_v36  ;;  %vm5571_vm6 = vweird.f32 %v6779_v15 }
 0x564   : > { %vm5572_vm3 = vmor %vm5570_vm13, %vm5571_vm6 }
 0x565   : > { %v5566_v33 = vmul.f32 %v6779_v15, %v5565_v8 }
 0x567   : > { %v5567_v6 = vmul.f32 0.5, %v5566_v33 }
 0x569   : > { %v5568_v55 = vsub.f32 1.5, %v5567_v6 }
 0x56b   : > { %v5569_v21 = vmul.f32 %v6779_v15, %v5568_v55 }
 0x56d   : > { %v5573_v51 = vsel %vm5572_vm3, %v6779_v15, %v5569_v21 }
 0x56e   : > { %v5575_v39 = vmul.f32 %v5574_v49, %v5573_v51 }
 0x570   : > { %v5577_v29 = vmul.f32 %v5575_v39, %v5489_v26  ;;  %v5579_v58 = vperm.slane %v5575_v39, 0 }
 0x572   : > { %v5578_v31 = vsub.f32 %v5576_v46, %v5577_v29  ;;  %v5611_v24 = vmul.f32 %v5579_v58, %v5451_v34  ;;  %v5580_v0 = vmul.f32 %v5579_v58, %v12788_v10  ;;  %v5581_v30 = vmul.f32 %v5579_v58, %v12789_v4  ;;  %v12797_v34 = vld [vmem:[#allocation34_spill] sm:$0xff] }
 0x573   : > { %v5582_v52 = vmul.f32 %v5579_v58, %v12790_v38  ;;  %v5583_v14 = vmul.f32 %v5579_v58, %v12791_v43  ;;  %v5584_v20 = vmul.f32 %v5579_v58, %v12792_v42  ;;  %v5585_v27 = vmul.f32 %v5579_v58, %v12793_v5 }
 0x574   : > { %v5613_v56 = vperm.slane %v5578_v31, 0  ;;  %v5586_v28 = vmul.f32 %v5579_v58, %v12794_v50  ;;  %v5587_v37 = vmul.f32 %v5579_v58, %v12795_v12  ;;  %v5588_v9 = vmul.f32 %v5579_v58, %v12796_v59 }
 0x575   : > { %v5589_v47 = vmul.f32 %v5579_v58, %v12797_v34  ;;  %v5590_v35 = vmul.f32 %v5579_v58, %v12798_v3  ;;  %v5591_v7 = vmul.f32 %v5579_v58, %v12799_v40  ;;  %v5592_v26 = vmul.f32 %v5579_v58, %v12800_v63 }
 0x576   : > { %v5646_v17 = vadd.f32 %v5613_v56, %v5611_v24  ;;  %v5593_v25 = vmul.f32 %v5579_v58, %v12801_v61  ;;  %v5594_v62 = vmul.f32 %v5579_v58, %v10763_v13  ;;  %v5595_v2 = vmul.f32 %v5579_v58, %v10771_v23 }
 0x577   : > { %v5596_v36 = vmul.f32 %v5579_v58, %v10779_v18  ;;  %v5597_v15 = vmul.f32 %v5579_v58, %v10787_v11  ;;  %v5598_v8 = vmul.f32 %v5579_v58, %v10799_v19  ;;  %v5599_v33 = vmul.f32 %v5579_v58, %v10809_v41 }
 0x578   : > { %v5678_v6 = vmax.f32 %v5646_v17, 0.0  ;;  %v5600_v55 = vmul.f32 %v5579_v58, %v10815_v44  ;;  %v5601_v21 = vmul.f32 %v5579_v58, %v10985_v1  ;;  %v5602_v49 = vmul.f32 %v5579_v58, %v10996_v57 }
 0x579   : > { %v5603_v51 = vmul.f32 %v5579_v58, %v11009_v32  ;;  %v5604_v13 = vmul.f32 %v5579_v58, %v11019_v48  ;;  %v5605_v23 = vmul.f32 %v5579_v58, %v11030_v45  ;;  %v5606_v18 = vmul.f32 %v5579_v58, %v11041_v22 }
 0x57a   : > { %5710 = vst [vmem:[%s7001_s13 + $0xf8] sm:$0xff] %v5678_v6  ;;  %v5607_v11 = vmul.f32 %v5579_v58, %v11050_v16  ;;  %v5608_v19 = vmul.f32 %v5579_v58, %v11058_v60  ;;  %v5609_v41 = vmul.f32 %v5579_v58, %v11064_v53  ;;  %v5610_v44 = vmul.f32 %v5579_v58, %v11070_v54 }
 0x57b   : > { %v5615_v1 = vadd.f32 %v5613_v56, %v5580_v0  ;;  %v5616_v39 = vadd.f32 %v5613_v56, %v5581_v30  ;;  %v5617_v57 = vadd.f32 %v5613_v56, %v5582_v52  ;;  %v5618_v46 = vadd.f32 %v5613_v56, %v5583_v14 }
 0x57c   : > { %v5619_v32 = vadd.f32 %v5613_v56, %v5584_v20  ;;  %v5620_v29 = vadd.f32 %v5613_v56, %v5585_v27  ;;  %v5621_v48 = vadd.f32 %v5613_v56, %v5586_v28  ;;  %v5622_v31 = vadd.f32 %v5613_v56, %v5587_v37 }
 0x57d   : > { %v5623_v45 = vadd.f32 %v5613_v56, %v5588_v9  ;;  %v5624_v24 = vadd.f32 %v5613_v56, %v5589_v47  ;;  %v5625_v22 = vadd.f32 %v5613_v56, %v5590_v35  ;;  %v5626_v10 = vadd.f32 %v5613_v56, %v5591_v7 }
 0x57e   : > { %v5627_v4 = vadd.f32 %v5613_v56, %v5592_v26  ;;  %v5628_v16 = vadd.f32 %v5613_v56, %v5593_v25  ;;  %v5629_v38 = vadd.f32 %v5613_v56, %v5594_v62  ;;  %v5630_v60 = vadd.f32 %v5613_v56, %v5595_v2 }
 0x57f   : > { %v5631_v43 = vadd.f32 %v5613_v56, %v5596_v36  ;;  %v5632_v53 = vadd.f32 %v5613_v56, %v5597_v15  ;;  %v5633_v42 = vadd.f32 %v5613_v56, %v5598_v8  ;;  %v5634_v54 = vadd.f32 %v5613_v56, %v5599_v33 }
 0x580   : > { %v5635_v58 = vadd.f32 %v5613_v56, %v5600_v55  ;;  %v5636_v0 = vadd.f32 %v5613_v56, %v5601_v21  ;;  %v5637_v30 = vadd.f32 %v5613_v56, %v5602_v49  ;;  %v5638_v52 = vadd.f32 %v5613_v56, %v5603_v51 }
 0x581   : > { %v5639_v14 = vadd.f32 %v5613_v56, %v5604_v13  ;;  %v11120_v20 = vadd.f32 %v5613_v56, %v5605_v23  ;;  %v11122_v5 = vadd.f32 %v5613_v56, %v5606_v18  ;;  %v11124_v27 = vadd.f32 %v5613_v56, %v5607_v11 }
 0x582   : > { %v11126_v50 = vadd.f32 %v5613_v56, %v5608_v19  ;;  %v11128_v28 = vadd.f32 %v5613_v56, %v5609_v41  ;;  %v11130_v12 = vadd.f32 %v5613_v56, %v5610_v44  ;;  %v5647_v37 = vmax.f32 %v5615_v1, 0.0 }
 0x583   : > { %v5648_v59 = vmax.f32 %v5616_v39, 0.0  ;;  %v5649_v9 = vmax.f32 %v5617_v57, 0.0  ;;  %v5650_v34 = vmax.f32 %v5618_v46, 0.0  ;;  %v5651_v47 = vmax.f32 %v5619_v32, 0.0 }
 0x584   : > { %5679 = vst [vmem:[%s7001_s13] sm:$0xff] %v5647_v37  ;;  %v5652_v3 = vmax.f32 %v5620_v29, 0.0  ;;  %v5653_v35 = vmax.f32 %v5621_v48, 0.0  ;;  %v5654_v40 = vmax.f32 %v5622_v31, 0.0  ;;  %v5655_v56 = vmax.f32 %v5623_v45, 0.0 }
 0x585   : > { %5680 = vst [vmem:[%s7001_s13 + $0x8] sm:$0xff] %v5648_v59  ;;  %v5656_v7 = vmax.f32 %v5624_v24, 0.0  ;;  %v5657_v63 = vmax.f32 %v5625_v22, 0.0  ;;  %v5658_v26 = vmax.f32 %v5626_v10, 0.0  ;;  %v5659_v17 = vmax.f32 %v5627_v4, 0.0 }
 0x586   : > { %5681 = vst [vmem:[%s7001_s13 + $0x10] sm:$0xff] %v5649_v9  ;;  %v5660_v61 = vmax.f32 %v5628_v16, 0.0  ;;  %v5661_v25 = vmax.f32 %v5629_v38, 0.0  ;;  %v5662_v62 = vmax.f32 %v5630_v60, 0.0  ;;  %v5663_v2 = vmax.f32 %v5631_v43, 0.0 }
 0x587   : > { %5682 = vst [vmem:[%s7001_s13 + $0x18] sm:$0xff] %v5650_v34  ;;  %v5664_v36 = vmax.f32 %v5632_v53, 0.0  ;;  %v5665_v15 = vmax.f32 %v5633_v42, 0.0  ;;  %v5666_v8 = vmax.f32 %v5634_v54, 0.0  ;;  %v5667_v33 = vmax.f32 %v5635_v58, 0.0 }
 0x588   : > { %5683 = vst [vmem:[%s7001_s13 + $0x20] sm:$0xff] %v5651_v47  ;;  %v5668_v6 = vmax.f32 %v5636_v0, 0.0  ;;  %v5669_v55 = vmax.f32 %v5637_v30, 0.0  ;;  %v5670_v21 = vmax.f32 %v5638_v52, 0.0  ;;  %v5671_v49 = vmax.f32 %v5639_v14, 0.0 }
 0x589   : > { %5684 = vst [vmem:[%s7001_s13 + $0x28] sm:$0xff] %v5652_v3  ;;  %v5672_v51 = vmax.f32 %v11120_v20, 0.0  ;;  %v5673_v13 = vmax.f32 %v11122_v5, 0.0  ;;  %v5674_v23 = vmax.f32 %v11124_v27, 0.0  ;;  %v5675_v18 = vmax.f32 %v11126_v50, 0.0 }
 0x58a   : > { %5685 = vst [vmem:[%s7001_s13 + $0x30] sm:$0xff] %v5653_v35  ;;  %v5676_v11 = vmax.f32 %v11128_v28, 0.0  ;;  %v5677_v19 = vmax.f32 %v11130_v12, 0.0 }
 0x58b   : > { %5686 = vst [vmem:[%s7001_s13 + $0x38] sm:$0xff] %v5654_v40 }
 0x58c   : > { %5687 = vst [vmem:[%s7001_s13 + $0x40] sm:$0xff] %v5655_v56 }
 0x58d   : > { %5688 = vst [vmem:[%s7001_s13 + $0x48] sm:$0xff] %v5656_v7 }
 0x58e   : > { %5689 = vst [vmem:[%s7001_s13 + $0x50] sm:$0xff] %v5657_v63 }
 0x58f   : > { %5690 = vst [vmem:[%s7001_s13 + $0x58] sm:$0xff] %v5658_v26 }
 0x590   : > { %5691 = vst [vmem:[%s7001_s13 + $0x60] sm:$0xff] %v5659_v17 }
 0x591   : > { %5692 = vst [vmem:[%s7001_s13 + $0x68] sm:$0xff] %v5660_v61 }
 0x592   : > { %5693 = vst [vmem:[%s7001_s13 + $0x70] sm:$0xff] %v5661_v25 }
 0x593   : > { %5694 = vst [vmem:[%s7001_s13 + $0x78] sm:$0xff] %v5662_v62 }
 0x594   : > { %5695 = vst [vmem:[%s7001_s13 + $0x80] sm:$0xff] %v5663_v2 }
 0x595   : > { %5696 = vst [vmem:[%s7001_s13 + $0x88] sm:$0xff] %v5664_v36 }
 0x596   : > { %5697 = vst [vmem:[%s7001_s13 + $0x90] sm:$0xff] %v5665_v15 }
 0x597   : > { %5698 = vst [vmem:[%s7001_s13 + $0x98] sm:$0xff] %v5666_v8 }
 0x598   : > { %5699 = vst [vmem:[%s7001_s13 + $0xa0] sm:$0xff] %v5667_v33 }
 0x599   : > { %5700 = vst [vmem:[%s7001_s13 + $0xa8] sm:$0xff] %v5668_v6 }
 0x59a   : > { %5701 = vst [vmem:[%s7001_s13 + $0xb0] sm:$0xff] %v5669_v55 }
 0x59b   : > { %5702 = vst [vmem:[%s7001_s13 + $0xb8] sm:$0xff] %v5670_v21 }
 0x59c   : > { %5703 = vst [vmem:[%s7001_s13 + $0xc0] sm:$0xff] %v5671_v49 }
 0x59d   : > { %5704 = vst [vmem:[%s7001_s13 + $0xc8] sm:$0xff] %v5672_v51 }
 0x59e   : > { %5705 = vst [vmem:[%s7001_s13 + $0xd0] sm:$0xff] %v5673_v13 }
 0x59f   : > { %5706 = vst [vmem:[%s7001_s13 + $0xd8] sm:$0xff] %v5674_v23 }
 0x5a0   : > { %5707 = vst [vmem:[%s7001_s13 + $0xe0] sm:$0xff] %v5675_v18 }
 0x5a1   : > { %5708 = vst [vmem:[%s7001_s13 + $0xe8] sm:$0xff] %v5676_v11 }
 0x5a2   : > { %5709 = vst [vmem:[%s7001_s13 + $0xf0] sm:$0xff] %v5677_v19 }
 0x5a3   : > { %6842 = shalt.err (!%p6839_p9)
}
 0x5a4   : > { %s6890_s20 = smov 128   ;;  %s6891_s13 = smov 8  }
 0x5a5   : > { %6720 = dma.vmem_to_hbm [thread:$0]  (%p6970_p5), %s5725_s28, 4096, %s5727_s16, %s5712_s17, %s6890_s20, %s6890_s20, %s6891_s13  }
 0x5a6 PF: > { %p6732_p10 = scmp.ge.s32.totalorder %s6881_s27, 2  ;;  %s5741_s9 = sand.u32 1, %s6869_s24  }
 0x5a7   : > { %s5742_s14 = scalar_lea.sflag [#allocation5], %s5741_s9 }
 0x5a8   : > { %p6727_p11 = pnand %p6732_p10, %p6974_p6 }
 0x5aa   : > { %p6728_p12 = pneg %p6727_p11 }
 0x5ac   : > { %6864 = dma.done.wait (%p6728_p12), %s5742_s14, 4096  }
 0x5ad   : > { %6866 = vsyncadd (%p6728_p12), %s5742_s14, 4294963200  ;;  %p18_p13 = scmp.ge.s32.totalorder %s6957_s30, 4   ;;  %s12802_s24 = smov %s6873_s25 }
 0x5ae   : > { %s12803_s25 = smov %s6877_s26  ;;  %s12804_s26 = smov %s6968_s10 }
 0x5af   : > { %s12805_s27 = smov %s6957_s30  ;;  %20 = sbr.rel (!%p18_p13) target bundleno = 4 (0x4), region = 94 }
 0x5b4   :  { %5748 = vsyncpa [#allocation4], 1 }
 0x5b5   :  { %5750 = vsyncpa [#allocation4 + $0x1], 1 }
 0x5b6   :  { %5751 = vsyncpa [#allocation5], 1 }
 0x5b7   :  { %5753 = vsyncpa [#allocation5 + $0x1], 1 }

</bundles_post_ra>
